<compile_context>
chip_gen: v7x
topology: tpu7x:2x2x1
jax: 0.10.0
libtpu: 0.0.40
codegen_flags: <defaults>
</compile_context>

<pallas_src>
import jax
import jax.numpy as jnp
from jax.experimental import pallas as pl
from jax.experimental.pallas import tpu as pltpu

N_BATCH = 2
C_IN, C_OUT = 3, 64
KSIZE = 5
H = W = 24                    # conv(k=5, pad=2) keeps 24; pool(3,2,1): 24 -> 12
HP = WP = 12
K_FEAT = KSIZE * KSIZE * C_IN  # 75
FC_HID = 128
FC_IN = C_OUT * HP * WP        # 9216
BLK = HP * C_OUT               # 768 = features (hp, c) per pooled-W column


def net24_kernel(patches_ref, wc_ref, bc_ref, wfc_ref, bfc_ref,
                 wout_ref, bout_ref, out_ref, act_scr, hpool_scr):
    n = out_ref.shape[0]
    nw = n * W                                   # rows per conv-output H line

    # ---- 1) conv as one im2col matmul, + bias, ReLU (hoisted, applied once) ----
    conv = jnp.dot(patches_ref[...], wc_ref[...],
                   preferred_element_type=jnp.float32)          # (H*n*W, 64)
    act_scr[...] = jnp.maximum(conv + bc_ref[...], 0.0)          # rows = (h, n, w)

    # ---- 2) H-direction of maxpool(3,2,1), vectorized over (n, w, c) ----------
    # Window for output row hp is input rows {2hp-1, 2hp, 2hp+1}; the 2hp-1 term
    # is the previous window's odd row (prev).  Each hp result (48, 64) is
    # scattered into the lane dim of hpool_scr so lanes become (hp*64 + c).
    prev = None
    for hp in range(HP):
        a = act_scr[(2 * hp) * nw:(2 * hp + 1) * nw, :]          # h = 2*hp
        b = act_scr[(2 * hp + 1) * nw:(2 * hp + 2) * nw, :]      # h = 2*hp + 1
        m = jnp.maximum(a, b)
        if hp > 0:
            m = jnp.maximum(m, prev)                             # h = 2*hp - 1
        prev = b
        hpool_scr[:, :, hp * C_OUT:(hp + 1) * C_OUT] = m.reshape(n, W, C_OUT)

    # ---- 3) W-direction of the pool fused with fc: 12 accumulated matmuls -----
    acc = jnp.zeros((n, FC_HID), jnp.float32)
    prevw = None
    for wp in range(WP):
        a = hpool_scr[:, 2 * wp, :]                              # (n, 768)
        b = hpool_scr[:, 2 * wp + 1, :]
        m = jnp.maximum(a, b)
        if wp > 0:
            m = jnp.maximum(m, prevw)                            # w = 2*wp - 1
        prevw = b
        acc = acc + jnp.dot(m, wfc_ref[wp],
                            preferred_element_type=jnp.float32)  # K = 768

    hid = jnp.maximum(acc + bfc_ref[...], 0.0)                   # (n, 128)
    logit = jnp.sum(hid * wout_ref[...], axis=-1, keepdims=True) + bout_ref[...]
    # sigmoid via EUP exp + approximate reciprocal (avoids a VPU divide)
    out_ref[...] = pl.reciprocal(1.0 + jnp.exp(-logit), approx=True)


def net24_forward(x_nchw, params):
    conv_w, conv_b, fc_w, fc_b, out_w, out_b = params
    n = x_nchw.shape[0]

    # ---- glue: NCHW -> NHWC, pad by 2, im2col 5x5 patches (reshapes only) ----
    x_nhwc = jnp.transpose(x_nchw, (0, 2, 3, 1)).astype(jnp.float32)
    xpad = jnp.pad(x_nhwc, ((0, 0), (2, 2), (2, 2), (0, 0)))
    cols = [xpad[:, kh:kh + H, kw:kw + W, :]
            for kh in range(KSIZE) for kw in range(KSIZE)]
    patches = jnp.concatenate(cols, axis=-1)                     # (n, H, W, 75)
    # rows ordered (h, n, w) so one contiguous slab covers a full H line
    patches = jnp.transpose(patches, (1, 0, 2, 3)).reshape(H * n * W, K_FEAT)

    # ---- glue: re-layout PyTorch-convention weights for the kernel ----------
    # conv weight (Cout, Cin, KH, KW) -> (KH, KW, Cin, Cout) -> (75, 64)
    wc = jnp.transpose(conv_w, (2, 3, 1, 0)).reshape(K_FEAT, C_OUT)
    bc = conv_b.reshape(1, C_OUT)
    # fc weight (128, 9216) with input index c*144 + hp*12 + wp  ->
    # (wp, hp*64 + c, f) to match the kernel's per-W-column matmuls.
    wfc = jnp.transpose(fc_w.reshape(FC_HID, C_OUT, HP, WP),
                        (3, 2, 1, 0)).reshape(WP, BLK, FC_HID)
    bfc = fc_b.reshape(1, FC_HID)
    wout = out_w.reshape(1, FC_HID)
    bout = out_b.reshape(1, 1)

    vmem = pl.BlockSpec(memory_space=pltpu.MemorySpace.VMEM)
    return pl.pallas_call(
        net24_kernel,
        out_shape=jax.ShapeDtypeStruct((n, 1), jnp.float32),
        in_specs=[vmem] * 7,
        out_specs=vmem,
        scratch_shapes=[
            pltpu.VMEM((H * n * W, C_OUT), jnp.float32),   # ReLU(conv), rows (h,n,w)
            pltpu.VMEM((n, W, BLK), jnp.float32),          # H-pooled, lanes (hp,c)
        ],
        compiler_params=pltpu.CompilerParams(
            vmem_limit_bytes=64 * 1024 * 1024),
    )(patches, wc, bc, wfc, bfc, wout, bout)


def net24_reference(x, params):
    # Pure-JAX reference with PyTorch NCHW semantics, for verification.
    conv_w, conv_b, fc_w, fc_b, out_w, out_b = params
    hi = jax.lax.Precision.HIGHEST
    h = jax.lax.conv_general_dilated(
        x, conv_w, (1, 1), [(2, 2), (2, 2)],
        dimension_numbers=('NCHW', 'OIHW', 'NCHW'),
        precision=hi) + conv_b.reshape(1, -1, 1, 1)
    h = jax.lax.reduce_window(h, -jnp.inf, jax.lax.max,
                              (1, 1, 3, 3), (1, 1, 2, 2),
                              [(0, 0), (0, 0), (1, 1), (1, 1)])
    h = jnp.maximum(h, 0.0)
    h = h.reshape(-1, FC_IN)
    h = jnp.maximum(jnp.dot(h, fc_w.T, precision=hi) + fc_b, 0.0)
    return jax.nn.sigmoid(jnp.dot(h, out_w.T, precision=hi) + out_b)


if __name__ == "__main__":
    key = jax.random.PRNGKey(0)
    kx, k1, k2, k3, k4, k5, k6 = jax.random.split(key, 7)

    x = jax.random.normal(kx, (N_BATCH, C_IN, H, W), jnp.float32)

    conv_w = 0.05 * jax.random.normal(k1, (C_OUT, C_IN, KSIZE, KSIZE), jnp.float32)
    conv_b = 0.1 * jax.random.normal(k2, (C_OUT,), jnp.float32)
    fc_w = 0.02 * jax.random.normal(k3, (FC_HID, FC_IN), jnp.float32)
    fc_b = 0.1 * jax.random.normal(k4, (FC_HID,), jnp.float32)
    out_w = 0.1 * jax.random.normal(k5, (1, FC_HID), jnp.float32)
    out_b = 0.1 * jax.random.normal(k6, (1,), jnp.float32)
    params = (conv_w, conv_b, fc_w, fc_b, out_w, out_b)

    out = jax.block_until_ready(net24_forward(x, params))
    ref = jax.block_until_ready(net24_reference(x, params))

    assert out.shape == (N_BATCH, 1), out.shape
    # approx reciprocal in the sigmoid limits accuracy to ~1e-4 relative;
    # layout/math bugs would show up as O(0.1) errors.
    err = float(jnp.max(jnp.abs(out - ref)))
    assert err < 5e-3, (err, out, ref)
    print("KERNEL_OK")
</pallas_src>

<mosaic_0001>
module attributes {stable_mosaic.version = 11 : i64} {
  func.func @net24_kernel(%arg0: memref<1152x75xf32, #tpu.memory_space<vmem>>, %arg1: memref<75x64xf32, #tpu.memory_space<vmem>>, %arg2: memref<1x64xf32, #tpu.memory_space<vmem>>, %arg3: memref<12x768x128xf32, #tpu.memory_space<vmem>>, %arg4: memref<1x128xf32, #tpu.memory_space<vmem>>, %arg5: memref<1x128xf32, #tpu.memory_space<vmem>>, %arg6: memref<1x1xf32, #tpu.memory_space<vmem>>, %arg7: memref<2x1xf32, #tpu.memory_space<vmem>>, %arg8: memref<1152x64xf32, #tpu.memory_space<vmem>>, %arg9: memref<2x24x768xf32, #tpu.memory_space<vmem>>) attributes {dimension_semantics = [], scalar_prefetch = 0 : i64, scratch_operands = 2 : i64, tpu.core_type = #tpu.core_type<tc>} {
    %c0 = arith.constant 0 : index
    %c0_0 = arith.constant 0 : index
    %0 = vector.load %arg0[%c0, %c0_0] : memref<1152x75xf32, #tpu.memory_space<vmem>>, vector<1152x75xf32>
    %c0_1 = arith.constant 0 : index
    %c0_2 = arith.constant 0 : index
    %1 = vector.load %arg1[%c0_1, %c0_2] : memref<75x64xf32, #tpu.memory_space<vmem>>, vector<75x64xf32>
    %cst = arith.constant dense<0.000000e+00> : vector<1152x64xf32>
    %2 = tpu.matmul %0, %1, %cst {dimension_numbers = #tpu.dot_dimension_numbers<[1], [0], [0], [1], [0, 0, 1, 1], [], []>} : vector<1152x75xf32>, vector<75x64xf32>, vector<1152x64xf32> -> vector<1152x64xf32>
    %c0_3 = arith.constant 0 : index
    %c0_4 = arith.constant 0 : index
    %3 = vector.load %arg2[%c0_3, %c0_4] : memref<1x64xf32, #tpu.memory_space<vmem>>, vector<1x64xf32>
    %4 = vector.broadcast %3 : vector<1x64xf32> to vector<1152x64xf32>
    %5 = arith.addf %2, %4 : vector<1152x64xf32>
    %cst_5 = arith.constant 0.000000e+00 : f32
    %6 = vector.broadcast %cst_5 : f32 to vector<1152x64xf32>
    %7 = arith.maximumf %5, %6 : vector<1152x64xf32>
    %c0_6 = arith.constant 0 : index
    %c0_7 = arith.constant 0 : index
    %8 = vector.load %arg8[%c0_6, %c0_7] : memref<1152x64xf32, #tpu.memory_space<vmem>>, vector<1152x64xf32>
    tpu.vector_store %arg8[%c0_6, %c0_7], %7 {strides = array<i32>} : memref<1152x64xf32, #tpu.memory_space<vmem>>, vector<1152x64xf32>,
    %c0_8 = arith.constant 0 : index
    %c0_9 = arith.constant 0 : index
    %9 = vector.load %arg8[%c0_8, %c0_9] : memref<1152x64xf32, #tpu.memory_space<vmem>>, vector<48x64xf32>
    %c48 = arith.constant 48 : index
    %c0_10 = arith.constant 0 : index
    %10 = vector.load %arg8[%c48, %c0_10] : memref<1152x64xf32, #tpu.memory_space<vmem>>, vector<48x64xf32>
    %11 = arith.maximumf %9, %10 : vector<48x64xf32>
    %12 = vector.shape_cast %11 : vector<48x64xf32> to vector<2x24x64xf32>
    %c0_11 = arith.constant 0 : index
    %c0_12 = arith.constant 0 : index
    %c0_13 = arith.constant 0 : index
    %13 = vector.load %arg9[%c0_11, %c0_12, %c0_13] : memref<2x24x768xf32, #tpu.memory_space<vmem>>, vector<2x24x64xf32>
    tpu.vector_store %arg9[%c0_11, %c0_12, %c0_13], %12 {strides = array<i32>} : memref<2x24x768xf32, #tpu.memory_space<vmem>>, vector<2x24x64xf32>,
    %c96 = arith.constant 96 : index
    %c0_14 = arith.constant 0 : index
    %14 = vector.load %arg8[%c96, %c0_14] : memref<1152x64xf32, #tpu.memory_space<vmem>>, vector<48x64xf32>
    %c144 = arith.constant 144 : index
    %c0_15 = arith.constant 0 : index
    %15 = vector.load %arg8[%c144, %c0_15] : memref<1152x64xf32, #tpu.memory_space<vmem>>, vector<48x64xf32>
    %16 = arith.maximumf %14, %15 : vector<48x64xf32>
    %17 = arith.maximumf %16, %10 : vector<48x64xf32>
    %18 = vector.shape_cast %17 : vector<48x64xf32> to vector<2x24x64xf32>
    %c0_16 = arith.constant 0 : index
    %c0_17 = arith.constant 0 : index
    %c64 = arith.constant 64 : index
    %19 = vector.load %arg9[%c0_16, %c0_17, %c64] : memref<2x24x768xf32, #tpu.memory_space<vmem>>, vector<2x24x64xf32>
    tpu.vector_store %arg9[%c0_16, %c0_17, %c64], %18 {strides = array<i32>} : memref<2x24x768xf32, #tpu.memory_space<vmem>>, vector<2x24x64xf32>,
    %c192 = arith.constant 192 : index
    %c0_18 = arith.constant 0 : index
    %20 = vector.load %arg8[%c192, %c0_18] : memref<1152x64xf32, #tpu.memory_space<vmem>>, vector<48x64xf32>
    %c240 = arith.constant 240 : index
    %c0_19 = arith.constant 0 : index
    %21 = vector.load %arg8[%c240, %c0_19] : memref<1152x64xf32, #tpu.memory_space<vmem>>, vector<48x64xf32>
    %22 = arith.maximumf %20, %21 : vector<48x64xf32>
    %23 = arith.maximumf %22, %15 : vector<48x64xf32>
    %24 = vector.shape_cast %23 : vector<48x64xf32> to vector<2x24x64xf32>
    %c0_20 = arith.constant 0 : index
    %c0_21 = arith.constant 0 : index
    %c128 = arith.constant 128 : index
    %25 = vector.load %arg9[%c0_20, %c0_21, %c128] : memref<2x24x768xf32, #tpu.memory_space<vmem>>, vector<2x24x64xf32>
    tpu.vector_store %arg9[%c0_20, %c0_21, %c128], %24 {strides = array<i32>} : memref<2x24x768xf32, #tpu.memory_space<vmem>>, vector<2x24x64xf32>,
    %c288 = arith.constant 288 : index
    %c0_22 = arith.constant 0 : index
    %26 = vector.load %arg8[%c288, %c0_22] : memref<1152x64xf32, #tpu.memory_space<vmem>>, vector<48x64xf32>
    %c336 = arith.constant 336 : index
    %c0_23 = arith.constant 0 : index
    %27 = vector.load %arg8[%c336, %c0_23] : memref<1152x64xf32, #tpu.memory_space<vmem>>, vector<48x64xf32>
    %28 = arith.maximumf %26, %27 : vector<48x64xf32>
    %29 = arith.maximumf %28, %21 : vector<48x64xf32>
    %30 = vector.shape_cast %29 : vector<48x64xf32> to vector<2x24x64xf32>
    %c0_24 = arith.constant 0 : index
    %c0_25 = arith.constant 0 : index
    %c192_26 = arith.constant 192 : index
    %31 = vector.load %arg9[%c0_24, %c0_25, %c192_26] : memref<2x24x768xf32, #tpu.memory_space<vmem>>, vector<2x24x64xf32>
    tpu.vector_store %arg9[%c0_24, %c0_25, %c192_26], %30 {strides = array<i32>} : memref<2x24x768xf32, #tpu.memory_space<vmem>>, vector<2x24x64xf32>,
    %c384 = arith.constant 384 : index
    %c0_27 = arith.constant 0 : index
    %32 = vector.load %arg8[%c384, %c0_27] : memref<1152x64xf32, #tpu.memory_space<vmem>>, vector<48x64xf32>
    %c432 = arith.constant 432 : index
    %c0_28 = arith.constant 0 : index
    %33 = vector.load %arg8[%c432, %c0_28] : memref<1152x64xf32, #tpu.memory_space<vmem>>, vector<48x64xf32>
    %34 = arith.maximumf %32, %33 : vector<48x64xf32>
    %35 = arith.maximumf %34, %27 : vector<48x64xf32>
    %36 = vector.shape_cast %35 : vector<48x64xf32> to vector<2x24x64xf32>
    %c0_29 = arith.constant 0 : index
    %c0_30 = arith.constant 0 : index
    %c256 = arith.constant 256 : index
    %37 = vector.load %arg9[%c0_29, %c0_30, %c256] : memref<2x24x768xf32, #tpu.memory_space<vmem>>, vector<2x24x64xf32>
    tpu.vector_store %arg9[%c0_29, %c0_30, %c256], %36 {strides = array<i32>} : memref<2x24x768xf32, #tpu.memory_space<vmem>>, vector<2x24x64xf32>,
    %c480 = arith.constant 480 : index
    %c0_31 = arith.constant 0 : index
    %38 = vector.load %arg8[%c480, %c0_31] : memref<1152x64xf32, #tpu.memory_space<vmem>>, vector<48x64xf32>
    %c528 = arith.constant 528 : index
    %c0_32 = arith.constant 0 : index
    %39 = vector.load %arg8[%c528, %c0_32] : memref<1152x64xf32, #tpu.memory_space<vmem>>, vector<48x64xf32>
    %40 = arith.maximumf %38, %39 : vector<48x64xf32>
    %41 = arith.maximumf %40, %33 : vector<48x64xf32>
    %42 = vector.shape_cast %41 : vector<48x64xf32> to vector<2x24x64xf32>
    %c0_33 = arith.constant 0 : index
    %c0_34 = arith.constant 0 : index
    %c320 = arith.constant 320 : index
    %43 = vector.load %arg9[%c0_33, %c0_34, %c320] : memref<2x24x768xf32, #tpu.memory_space<vmem>>, vector<2x24x64xf32>
    tpu.vector_store %arg9[%c0_33, %c0_34, %c320], %42 {strides = array<i32>} : memref<2x24x768xf32, #tpu.memory_space<vmem>>, vector<2x24x64xf32>,
    %c576 = arith.constant 576 : index
    %c0_35 = arith.constant 0 : index
    %44 = vector.load %arg8[%c576, %c0_35] : memref<1152x64xf32, #tpu.memory_space<vmem>>, vector<48x64xf32>
    %c624 = arith.constant 624 : index
    %c0_36 = arith.constant 0 : index
    %45 = vector.load %arg8[%c624, %c0_36] : memref<1152x64xf32, #tpu.memory_space<vmem>>, vector<48x64xf32>
    %46 = arith.maximumf %44, %45 : vector<48x64xf32>
    %47 = arith.maximumf %46, %39 : vector<48x64xf32>
    %48 = vector.shape_cast %47 : vector<48x64xf32> to vector<2x24x64xf32>
    %c0_37 = arith.constant 0 : index
    %c0_38 = arith.constant 0 : index
    %c384_39 = arith.constant 384 : index
    %49 = vector.load %arg9[%c0_37, %c0_38, %c384_39] : memref<2x24x768xf32, #tpu.memory_space<vmem>>, vector<2x24x64xf32>
    tpu.vector_store %arg9[%c0_37, %c0_38, %c384_39], %48 {strides = array<i32>} : memref<2x24x768xf32, #tpu.memory_space<vmem>>, vector<2x24x64xf32>,
    %c672 = arith.constant 672 : index
    %c0_40 = arith.constant 0 : index
    %50 = vector.load %arg8[%c672, %c0_40] : memref<1152x64xf32, #tpu.memory_space<vmem>>, vector<48x64xf32>
    %c720 = arith.constant 720 : index
    %c0_41 = arith.constant 0 : index
    %51 = vector.load %arg8[%c720, %c0_41] : memref<1152x64xf32, #tpu.memory_space<vmem>>, vector<48x64xf32>
    %52 = arith.maximumf %50, %51 : vector<48x64xf32>
    %53 = arith.maximumf %52, %45 : vector<48x64xf32>
    %54 = vector.shape_cast %53 : vector<48x64xf32> to vector<2x24x64xf32>
    %c0_42 = arith.constant 0 : index
    %c0_43 = arith.constant 0 : index
    %c448 = arith.constant 448 : index
    %55 = vector.load %arg9[%c0_42, %c0_43, %c448] : memref<2x24x768xf32, #tpu.memory_space<vmem>>, vector<2x24x64xf32>
    tpu.vector_store %arg9[%c0_42, %c0_43, %c448], %54 {strides = array<i32>} : memref<2x24x768xf32, #tpu.memory_space<vmem>>, vector<2x24x64xf32>,
    %c768 = arith.constant 768 : index
    %c0_44 = arith.constant 0 : index
    %56 = vector.load %arg8[%c768, %c0_44] : memref<1152x64xf32, #tpu.memory_space<vmem>>, vector<48x64xf32>
    %c816 = arith.constant 816 : index
    %c0_45 = arith.constant 0 : index
    %57 = vector.load %arg8[%c816, %c0_45] : memref<1152x64xf32, #tpu.memory_space<vmem>>, vector<48x64xf32>
    %58 = arith.maximumf %56, %57 : vector<48x64xf32>
    %59 = arith.maximumf %58, %51 : vector<48x64xf32>
    %60 = vector.shape_cast %59 : vector<48x64xf32> to vector<2x24x64xf32>
    %c0_46 = arith.constant 0 : index
    %c0_47 = arith.constant 0 : index
    %c512 = arith.constant 512 : index
    %61 = vector.load %arg9[%c0_46, %c0_47, %c512] : memref<2x24x768xf32, #tpu.memory_space<vmem>>, vector<2x24x64xf32>
    tpu.vector_store %arg9[%c0_46, %c0_47, %c512], %60 {strides = array<i32>} : memref<2x24x768xf32, #tpu.memory_space<vmem>>, vector<2x24x64xf32>,
    %c864 = arith.constant 864 : index
    %c0_48 = arith.constant 0 : index
    %62 = vector.load %arg8[%c864, %c0_48] : memref<1152x64xf32, #tpu.memory_space<vmem>>, vector<48x64xf32>
    %c912 = arith.constant 912 : index
    %c0_49 = arith.constant 0 : index
    %63 = vector.load %arg8[%c912, %c0_49] : memref<1152x64xf32, #tpu.memory_space<vmem>>, vector<48x64xf32>
    %64 = arith.maximumf %62, %63 : vector<48x64xf32>
    %65 = arith.maximumf %64, %57 : vector<48x64xf32>
    %66 = vector.shape_cast %65 : vector<48x64xf32> to vector<2x24x64xf32>
    %c0_50 = arith.constant 0 : index
    %c0_51 = arith.constant 0 : index
    %c576_52 = arith.constant 576 : index
    %67 = vector.load %arg9[%c0_50, %c0_51, %c576_52] : memref<2x24x768xf32, #tpu.memory_space<vmem>>, vector<2x24x64xf32>
    tpu.vector_store %arg9[%c0_50, %c0_51, %c576_52], %66 {strides = array<i32>} : memref<2x24x768xf32, #tpu.memory_space<vmem>>, vector<2x24x64xf32>,
    %c960 = arith.constant 960 : index
    %c0_53 = arith.constant 0 : index
    %68 = vector.load %arg8[%c960, %c0_53] : memref<1152x64xf32, #tpu.memory_space<vmem>>, vector<48x64xf32>
    %c1008 = arith.constant 1008 : index
    %c0_54 = arith.constant 0 : index
    %69 = vector.load %arg8[%c1008, %c0_54] : memref<1152x64xf32, #tpu.memory_space<vmem>>, vector<48x64xf32>
    %70 = arith.maximumf %68, %69 : vector<48x64xf32>
    %71 = arith.maximumf %70, %63 : vector<48x64xf32>
    %72 = vector.shape_cast %71 : vector<48x64xf32> to vector<2x24x64xf32>
    %c0_55 = arith.constant 0 : index
    %c0_56 = arith.constant 0 : index
    %c640 = arith.constant 640 : index
    %73 = vector.load %arg9[%c0_55, %c0_56, %c640] : memref<2x24x768xf32, #tpu.memory_space<vmem>>, vector<2x24x64xf32>
    tpu.vector_store %arg9[%c0_55, %c0_56, %c640], %72 {strides = array<i32>} : memref<2x24x768xf32, #tpu.memory_space<vmem>>, vector<2x24x64xf32>,
    %c1056 = arith.constant 1056 : index
    %c0_57 = arith.constant 0 : index
    %74 = vector.load %arg8[%c1056, %c0_57] : memref<1152x64xf32, #tpu.memory_space<vmem>>, vector<48x64xf32>
    %c1104 = arith.constant 1104 : index
    %c0_58 = arith.constant 0 : index
    %75 = vector.load %arg8[%c1104, %c0_58] : memref<1152x64xf32, #tpu.memory_space<vmem>>, vector<48x64xf32>
    %76 = arith.maximumf %74, %75 : vector<48x64xf32>
    %77 = arith.maximumf %76, %69 : vector<48x64xf32>
    %78 = vector.shape_cast %77 : vector<48x64xf32> to vector<2x24x64xf32>
    %c0_59 = arith.constant 0 : index
    %c0_60 = arith.constant 0 : index
    %c704 = arith.constant 704 : index
    %79 = vector.load %arg9[%c0_59, %c0_60, %c704] : memref<2x24x768xf32, #tpu.memory_space<vmem>>, vector<2x24x64xf32>
    tpu.vector_store %arg9[%c0_59, %c0_60, %c704], %78 {strides = array<i32>} : memref<2x24x768xf32, #tpu.memory_space<vmem>>, vector<2x24x64xf32>,
    %cst_61 = arith.constant 0.000000e+00 : f32
    %80 = vector.broadcast %cst_61 : f32 to vector<2x128xf32>
    %c0_62 = arith.constant 0 : index
    %c0_63 = arith.constant 0 : index
    %c0_64 = arith.constant 0 : index
    %81 = vector.load %arg9[%c0_62, %c0_63, %c0_64] : memref<2x24x768xf32, #tpu.memory_space<vmem>>, vector<2x1x768xf32>
    %82 = vector.shape_cast %81 : vector<2x1x768xf32> to vector<2x768xf32>
    %c0_65 = arith.constant 0 : index
    %c1 = arith.constant 1 : index
    %c0_66 = arith.constant 0 : index
    %83 = vector.load %arg9[%c0_65, %c1, %c0_66] : memref<2x24x768xf32, #tpu.memory_space<vmem>>, vector<2x1x768xf32>
    %84 = vector.shape_cast %83 : vector<2x1x768xf32> to vector<2x768xf32>
    %85 = arith.maximumf %82, %84 : vector<2x768xf32>
    %c0_67 = arith.constant 0 : index
    %c0_68 = arith.constant 0 : index
    %c0_69 = arith.constant 0 : index
    %86 = vector.load %arg3[%c0_67, %c0_68, %c0_69] : memref<12x768x128xf32, #tpu.memory_space<vmem>>, vector<1x768x128xf32>
    %87 = vector.shape_cast %86 : vector<1x768x128xf32> to vector<768x128xf32>
    %cst_70 = arith.constant dense<0.000000e+00> : vector<2x128xf32>
    %88 = tpu.matmul %85, %87, %cst_70 {dimension_numbers = #tpu.dot_dimension_numbers<[1], [0], [0], [1], [0, 0, 1, 1], [], []>} : vector<2x768xf32>, vector<768x128xf32>, vector<2x128xf32> -> vector<2x128xf32>
    %89 = arith.addf %80, %88 : vector<2x128xf32>
    %c0_71 = arith.constant 0 : index
    %c2 = arith.constant 2 : index
    %c0_72 = arith.constant 0 : index
    %90 = vector.load %arg9[%c0_71, %c2, %c0_72] : memref<2x24x768xf32, #tpu.memory_space<vmem>>, vector<2x1x768xf32>
    %91 = vector.shape_cast %90 : vector<2x1x768xf32> to vector<2x768xf32>
    %c0_73 = arith.constant 0 : index
    %c3 = arith.constant 3 : index
    %c0_74 = arith.constant 0 : index
    %92 = vector.load %arg9[%c0_73, %c3, %c0_74] : memref<2x24x768xf32, #tpu.memory_space<vmem>>, vector<2x1x768xf32>
    %93 = vector.shape_cast %92 : vector<2x1x768xf32> to vector<2x768xf32>
    %94 = arith.maximumf %91, %93 : vector<2x768xf32>
    %95 = arith.maximumf %94, %84 : vector<2x768xf32>
    %c1_75 = arith.constant 1 : index
    %c0_76 = arith.constant 0 : index
    %c0_77 = arith.constant 0 : index
    %96 = vector.load %arg3[%c1_75, %c0_76, %c0_77] : memref<12x768x128xf32, #tpu.memory_space<vmem>>, vector<1x768x128xf32>
    %97 = vector.shape_cast %96 : vector<1x768x128xf32> to vector<768x128xf32>
    %cst_78 = arith.constant dense<0.000000e+00> : vector<2x128xf32>
    %98 = tpu.matmul %95, %97, %cst_78 {dimension_numbers = #tpu.dot_dimension_numbers<[1], [0], [0], [1], [0, 0, 1, 1], [], []>} : vector<2x768xf32>, vector<768x128xf32>, vector<2x128xf32> -> vector<2x128xf32>
    %99 = arith.addf %89, %98 : vector<2x128xf32>
    %c0_79 = arith.constant 0 : index
    %c4 = arith.constant 4 : index
    %c0_80 = arith.constant 0 : index
    %100 = vector.load %arg9[%c0_79, %c4, %c0_80] : memref<2x24x768xf32, #tpu.memory_space<vmem>>, vector<2x1x768xf32>
    %101 = vector.shape_cast %100 : vector<2x1x768xf32> to vector<2x768xf32>
    %c0_81 = arith.constant 0 : index
    %c5 = arith.constant 5 : index
    %c0_82 = arith.constant 0 : index
    %102 = vector.load %arg9[%c0_81, %c5, %c0_82] : memref<2x24x768xf32, #tpu.memory_space<vmem>>, vector<2x1x768xf32>
    %103 = vector.shape_cast %102 : vector<2x1x768xf32> to vector<2x768xf32>
    %104 = arith.maximumf %101, %103 : vector<2x768xf32>
    %105 = arith.maximumf %104, %93 : vector<2x768xf32>
    %c2_83 = arith.constant 2 : index
    %c0_84 = arith.constant 0 : index
    %c0_85 = arith.constant 0 : index
    %106 = vector.load %arg3[%c2_83, %c0_84, %c0_85] : memref<12x768x128xf32, #tpu.memory_space<vmem>>, vector<1x768x128xf32>
    %107 = vector.shape_cast %106 : vector<1x768x128xf32> to vector<768x128xf32>
    %cst_86 = arith.constant dense<0.000000e+00> : vector<2x128xf32>
    %108 = tpu.matmul %105, %107, %cst_86 {dimension_numbers = #tpu.dot_dimension_numbers<[1], [0], [0], [1], [0, 0, 1, 1], [], []>} : vector<2x768xf32>, vector<768x128xf32>, vector<2x128xf32> -> vector<2x128xf32>
    %109 = arith.addf %99, %108 : vector<2x128xf32>
    %c0_87 = arith.constant 0 : index
    %c6 = arith.constant 6 : index
    %c0_88 = arith.constant 0 : index
    %110 = vector.load %arg9[%c0_87, %c6, %c0_88] : memref<2x24x768xf32, #tpu.memory_space<vmem>>, vector<2x1x768xf32>
    %111 = vector.shape_cast %110 : vector<2x1x768xf32> to vector<2x768xf32>
    %c0_89 = arith.constant 0 : index
    %c7 = arith.constant 7 : index
    %c0_90 = arith.constant 0 : index
    %112 = vector.load %arg9[%c0_89, %c7, %c0_90] : memref<2x24x768xf32, #tpu.memory_space<vmem>>, vector<2x1x768xf32>
    %113 = vector.shape_cast %112 : vector<2x1x768xf32> to vector<2x768xf32>
    %114 = arith.maximumf %111, %113 : vector<2x768xf32>
    %115 = arith.maximumf %114, %103 : vector<2x768xf32>
    %c3_91 = arith.constant 3 : index
    %c0_92 = arith.constant 0 : index
    %c0_93 = arith.constant 0 : index
    %116 = vector.load %arg3[%c3_91, %c0_92, %c0_93] : memref<12x768x128xf32, #tpu.memory_space<vmem>>, vector<1x768x128xf32>
    %117 = vector.shape_cast %116 : vector<1x768x128xf32> to vector<768x128xf32>
    %cst_94 = arith.constant dense<0.000000e+00> : vector<2x128xf32>
    %118 = tpu.matmul %115, %117, %cst_94 {dimension_numbers = #tpu.dot_dimension_numbers<[1], [0], [0], [1], [0, 0, 1, 1], [], []>} : vector<2x768xf32>, vector<768x128xf32>, vector<2x128xf32> -> vector<2x128xf32>
    %119 = arith.addf %109, %118 : vector<2x128xf32>
    %c0_95 = arith.constant 0 : index
    %c8 = arith.constant 8 : index
    %c0_96 = arith.constant 0 : index
    %120 = vector.load %arg9[%c0_95, %c8, %c0_96] : memref<2x24x768xf32, #tpu.memory_space<vmem>>, vector<2x1x768xf32>
    %121 = vector.shape_cast %120 : vector<2x1x768xf32> to vector<2x768xf32>
    %c0_97 = arith.constant 0 : index
    %c9 = arith.constant 9 : index
    %c0_98 = arith.constant 0 : index
    %122 = vector.load %arg9[%c0_97, %c9, %c0_98] : memref<2x24x768xf32, #tpu.memory_space<vmem>>, vector<2x1x768xf32>
    %123 = vector.shape_cast %122 : vector<2x1x768xf32> to vector<2x768xf32>
    %124 = arith.maximumf %121, %123 : vector<2x768xf32>
    %125 = arith.maximumf %124, %113 : vector<2x768xf32>
    %c4_99 = arith.constant 4 : index
    %c0_100 = arith.constant 0 : index
    %c0_101 = arith.constant 0 : index
    %126 = vector.load %arg3[%c4_99, %c0_100, %c0_101] : memref<12x768x128xf32, #tpu.memory_space<vmem>>, vector<1x768x128xf32>
    %127 = vector.shape_cast %126 : vector<1x768x128xf32> to vector<768x128xf32>
    %cst_102 = arith.constant dense<0.000000e+00> : vector<2x128xf32>
    %128 = tpu.matmul %125, %127, %cst_102 {dimension_numbers = #tpu.dot_dimension_numbers<[1], [0], [0], [1], [0, 0, 1, 1], [], []>} : vector<2x768xf32>, vector<768x128xf32>, vector<2x128xf32> -> vector<2x128xf32>
    %129 = arith.addf %119, %128 : vector<2x128xf32>
    %c0_103 = arith.constant 0 : index
    %c10 = arith.constant 10 : index
    %c0_104 = arith.constant 0 : index
    %130 = vector.load %arg9[%c0_103, %c10, %c0_104] : memref<2x24x768xf32, #tpu.memory_space<vmem>>, vector<2x1x768xf32>
    %131 = vector.shape_cast %130 : vector<2x1x768xf32> to vector<2x768xf32>
    %c0_105 = arith.constant 0 : index
    %c11 = arith.constant 11 : index
    %c0_106 = arith.constant 0 : index
    %132 = vector.load %arg9[%c0_105, %c11, %c0_106] : memref<2x24x768xf32, #tpu.memory_space<vmem>>, vector<2x1x768xf32>
    %133 = vector.shape_cast %132 : vector<2x1x768xf32> to vector<2x768xf32>
    %134 = arith.maximumf %131, %133 : vector<2x768xf32>
    %135 = arith.maximumf %134, %123 : vector<2x768xf32>
    %c5_107 = arith.constant 5 : index
    %c0_108 = arith.constant 0 : index
    %c0_109 = arith.constant 0 : index
    %136 = vector.load %arg3[%c5_107, %c0_108, %c0_109] : memref<12x768x128xf32, #tpu.memory_space<vmem>>, vector<1x768x128xf32>
    %137 = vector.shape_cast %136 : vector<1x768x128xf32> to vector<768x128xf32>
    %cst_110 = arith.constant dense<0.000000e+00> : vector<2x128xf32>
    %138 = tpu.matmul %135, %137, %cst_110 {dimension_numbers = #tpu.dot_dimension_numbers<[1], [0], [0], [1], [0, 0, 1, 1], [], []>} : vector<2x768xf32>, vector<768x128xf32>, vector<2x128xf32> -> vector<2x128xf32>
    %139 = arith.addf %129, %138 : vector<2x128xf32>
    %c0_111 = arith.constant 0 : index
    %c12 = arith.constant 12 : index
    %c0_112 = arith.constant 0 : index
    %140 = vector.load %arg9[%c0_111, %c12, %c0_112] : memref<2x24x768xf32, #tpu.memory_space<vmem>>, vector<2x1x768xf32>
    %141 = vector.shape_cast %140 : vector<2x1x768xf32> to vector<2x768xf32>
    %c0_113 = arith.constant 0 : index
    %c13 = arith.constant 13 : index
    %c0_114 = arith.constant 0 : index
    %142 = vector.load %arg9[%c0_113, %c13, %c0_114] : memref<2x24x768xf32, #tpu.memory_space<vmem>>, vector<2x1x768xf32>
    %143 = vector.shape_cast %142 : vector<2x1x768xf32> to vector<2x768xf32>
    %144 = arith.maximumf %141, %143 : vector<2x768xf32>
    %145 = arith.maximumf %144, %133 : vector<2x768xf32>
    %c6_115 = arith.constant 6 : index
    %c0_116 = arith.constant 0 : index
    %c0_117 = arith.constant 0 : index
    %146 = vector.load %arg3[%c6_115, %c0_116, %c0_117] : memref<12x768x128xf32, #tpu.memory_space<vmem>>, vector<1x768x128xf32>
    %147 = vector.shape_cast %146 : vector<1x768x128xf32> to vector<768x128xf32>
    %cst_118 = arith.constant dense<0.000000e+00> : vector<2x128xf32>
    %148 = tpu.matmul %145, %147, %cst_118 {dimension_numbers = #tpu.dot_dimension_numbers<[1], [0], [0], [1], [0, 0, 1, 1], [], []>} : vector<2x768xf32>, vector<768x128xf32>, vector<2x128xf32> -> vector<2x128xf32>
    %149 = arith.addf %139, %148 : vector<2x128xf32>
    %c0_119 = arith.constant 0 : index
    %c14 = arith.constant 14 : index
    %c0_120 = arith.constant 0 : index
    %150 = vector.load %arg9[%c0_119, %c14, %c0_120] : memref<2x24x768xf32, #tpu.memory_space<vmem>>, vector<2x1x768xf32>
    %151 = vector.shape_cast %150 : vector<2x1x768xf32> to vector<2x768xf32>
    %c0_121 = arith.constant 0 : index
    %c15 = arith.constant 15 : index
    %c0_122 = arith.constant 0 : index
    %152 = vector.load %arg9[%c0_121, %c15, %c0_122] : memref<2x24x768xf32, #tpu.memory_space<vmem>>, vector<2x1x768xf32>
    %153 = vector.shape_cast %152 : vector<2x1x768xf32> to vector<2x768xf32>
    %154 = arith.maximumf %151, %153 : vector<2x768xf32>
    %155 = arith.maximumf %154, %143 : vector<2x768xf32>
    %c7_123 = arith.constant 7 : index
    %c0_124 = arith.constant 0 : index
    %c0_125 = arith.constant 0 : index
    %156 = vector.load %arg3[%c7_123, %c0_124, %c0_125] : memref<12x768x128xf32, #tpu.memory_space<vmem>>, vector<1x768x128xf32>
    %157 = vector.shape_cast %156 : vector<1x768x128xf32> to vector<768x128xf32>
    %cst_126 = arith.constant dense<0.000000e+00> : vector<2x128xf32>
    %158 = tpu.matmul %155, %157, %cst_126 {dimension_numbers = #tpu.dot_dimension_numbers<[1], [0], [0], [1], [0, 0, 1, 1], [], []>} : vector<2x768xf32>, vector<768x128xf32>, vector<2x128xf32> -> vector<2x128xf32>
    %159 = arith.addf %149, %158 : vector<2x128xf32>
    %c0_127 = arith.constant 0 : index
    %c16 = arith.constant 16 : index
    %c0_128 = arith.constant 0 : index
    %160 = vector.load %arg9[%c0_127, %c16, %c0_128] : memref<2x24x768xf32, #tpu.memory_space<vmem>>, vector<2x1x768xf32>
    %161 = vector.shape_cast %160 : vector<2x1x768xf32> to vector<2x768xf32>
    %c0_129 = arith.constant 0 : index
    %c17 = arith.constant 17 : index
    %c0_130 = arith.constant 0 : index
    %162 = vector.load %arg9[%c0_129, %c17, %c0_130] : memref<2x24x768xf32, #tpu.memory_space<vmem>>, vector<2x1x768xf32>
    %163 = vector.shape_cast %162 : vector<2x1x768xf32> to vector<2x768xf32>
    %164 = arith.maximumf %161, %163 : vector<2x768xf32>
    %165 = arith.maximumf %164, %153 : vector<2x768xf32>
    %c8_131 = arith.constant 8 : index
    %c0_132 = arith.constant 0 : index
    %c0_133 = arith.constant 0 : index
    %166 = vector.load %arg3[%c8_131, %c0_132, %c0_133] : memref<12x768x128xf32, #tpu.memory_space<vmem>>, vector<1x768x128xf32>
    %167 = vector.shape_cast %166 : vector<1x768x128xf32> to vector<768x128xf32>
    %cst_134 = arith.constant dense<0.000000e+00> : vector<2x128xf32>
    %168 = tpu.matmul %165, %167, %cst_134 {dimension_numbers = #tpu.dot_dimension_numbers<[1], [0], [0], [1], [0, 0, 1, 1], [], []>} : vector<2x768xf32>, vector<768x128xf32>, vector<2x128xf32> -> vector<2x128xf32>
    %169 = arith.addf %159, %168 : vector<2x128xf32>
    %c0_135 = arith.constant 0 : index
    %c18 = arith.constant 18 : index
    %c0_136 = arith.constant 0 : index
    %170 = vector.load %arg9[%c0_135, %c18, %c0_136] : memref<2x24x768xf32, #tpu.memory_space<vmem>>, vector<2x1x768xf32>
    %171 = vector.shape_cast %170 : vector<2x1x768xf32> to vector<2x768xf32>
    %c0_137 = arith.constant 0 : index
    %c19 = arith.constant 19 : index
    %c0_138 = arith.constant 0 : index
    %172 = vector.load %arg9[%c0_137, %c19, %c0_138] : memref<2x24x768xf32, #tpu.memory_space<vmem>>, vector<2x1x768xf32>
    %173 = vector.shape_cast %172 : vector<2x1x768xf32> to vector<2x768xf32>
    %174 = arith.maximumf %171, %173 : vector<2x768xf32>
    %175 = arith.maximumf %174, %163 : vector<2x768xf32>
    %c9_139 = arith.constant 9 : index
    %c0_140 = arith.constant 0 : index
    %c0_141 = arith.constant 0 : index
    %176 = vector.load %arg3[%c9_139, %c0_140, %c0_141] : memref<12x768x128xf32, #tpu.memory_space<vmem>>, vector<1x768x128xf32>
    %177 = vector.shape_cast %176 : vector<1x768x128xf32> to vector<768x128xf32>
    %cst_142 = arith.constant dense<0.000000e+00> : vector<2x128xf32>
    %178 = tpu.matmul %175, %177, %cst_142 {dimension_numbers = #tpu.dot_dimension_numbers<[1], [0], [0], [1], [0, 0, 1, 1], [], []>} : vector<2x768xf32>, vector<768x128xf32>, vector<2x128xf32> -> vector<2x128xf32>
    %179 = arith.addf %169, %178 : vector<2x128xf32>
    %c0_143 = arith.constant 0 : index
    %c20 = arith.constant 20 : index
    %c0_144 = arith.constant 0 : index
    %180 = vector.load %arg9[%c0_143, %c20, %c0_144] : memref<2x24x768xf32, #tpu.memory_space<vmem>>, vector<2x1x768xf32>
    %181 = vector.shape_cast %180 : vector<2x1x768xf32> to vector<2x768xf32>
    %c0_145 = arith.constant 0 : index
    %c21 = arith.constant 21 : index
    %c0_146 = arith.constant 0 : index
    %182 = vector.load %arg9[%c0_145, %c21, %c0_146] : memref<2x24x768xf32, #tpu.memory_space<vmem>>, vector<2x1x768xf32>
    %183 = vector.shape_cast %182 : vector<2x1x768xf32> to vector<2x768xf32>
    %184 = arith.maximumf %181, %183 : vector<2x768xf32>
    %185 = arith.maximumf %184, %173 : vector<2x768xf32>
    %c10_147 = arith.constant 10 : index
    %c0_148 = arith.constant 0 : index
    %c0_149 = arith.constant 0 : index
    %186 = vector.load %arg3[%c10_147, %c0_148, %c0_149] : memref<12x768x128xf32, #tpu.memory_space<vmem>>, vector<1x768x128xf32>
    %187 = vector.shape_cast %186 : vector<1x768x128xf32> to vector<768x128xf32>
    %cst_150 = arith.constant dense<0.000000e+00> : vector<2x128xf32>
    %188 = tpu.matmul %185, %187, %cst_150 {dimension_numbers = #tpu.dot_dimension_numbers<[1], [0], [0], [1], [0, 0, 1, 1], [], []>} : vector<2x768xf32>, vector<768x128xf32>, vector<2x128xf32> -> vector<2x128xf32>
    %189 = arith.addf %179, %188 : vector<2x128xf32>
    %c0_151 = arith.constant 0 : index
    %c22 = arith.constant 22 : index
    %c0_152 = arith.constant 0 : index
    %190 = vector.load %arg9[%c0_151, %c22, %c0_152] : memref<2x24x768xf32, #tpu.memory_space<vmem>>, vector<2x1x768xf32>
    %191 = vector.shape_cast %190 : vector<2x1x768xf32> to vector<2x768xf32>
    %c0_153 = arith.constant 0 : index
    %c23 = arith.constant 23 : index
    %c0_154 = arith.constant 0 : index
    %192 = vector.load %arg9[%c0_153, %c23, %c0_154] : memref<2x24x768xf32, #tpu.memory_space<vmem>>, vector<2x1x768xf32>
    %193 = vector.shape_cast %192 : vector<2x1x768xf32> to vector<2x768xf32>
    %194 = arith.maximumf %191, %193 : vector<2x768xf32>
    %195 = arith.maximumf %194, %183 : vector<2x768xf32>
    %c11_155 = arith.constant 11 : index
    %c0_156 = arith.constant 0 : index
    %c0_157 = arith.constant 0 : index
    %196 = vector.load %arg3[%c11_155, %c0_156, %c0_157] : memref<12x768x128xf32, #tpu.memory_space<vmem>>, vector<1x768x128xf32>
    %197 = vector.shape_cast %196 : vector<1x768x128xf32> to vector<768x128xf32>
    %cst_158 = arith.constant dense<0.000000e+00> : vector<2x128xf32>
    %198 = tpu.matmul %195, %197, %cst_158 {dimension_numbers = #tpu.dot_dimension_numbers<[1], [0], [0], [1], [0, 0, 1, 1], [], []>} : vector<2x768xf32>, vector<768x128xf32>, vector<2x128xf32> -> vector<2x128xf32>
    %199 = arith.addf %189, %198 : vector<2x128xf32>
    %c0_159 = arith.constant 0 : index
    %c0_160 = arith.constant 0 : index
    %200 = vector.load %arg4[%c0_159, %c0_160] : memref<1x128xf32, #tpu.memory_space<vmem>>, vector<1x128xf32>
    %201 = vector.broadcast %200 : vector<1x128xf32> to vector<2x128xf32>
    %202 = arith.addf %199, %201 : vector<2x128xf32>
    %cst_161 = arith.constant 0.000000e+00 : f32
    %203 = vector.broadcast %cst_161 : f32 to vector<2x128xf32>
    %204 = arith.maximumf %202, %203 : vector<2x128xf32>
    %c0_162 = arith.constant 0 : index
    %c0_163 = arith.constant 0 : index
    %205 = vector.load %arg5[%c0_162, %c0_163] : memref<1x128xf32, #tpu.memory_space<vmem>>, vector<1x128xf32>
    %206 = vector.broadcast %205 : vector<1x128xf32> to vector<2x128xf32>
    %207 = arith.mulf %204, %206 : vector<2x128xf32>
    %cst_164 = arith.constant dense<0.000000e+00> : vector<2xf32>
    %208 = vector.multi_reduction <add>, %207, %cst_164 [1] : vector<2x128xf32> to vector<2xf32>
    %209 = vector.shape_cast %208 : vector<2xf32> to vector<2x1xf32>
    %c0_165 = arith.constant 0 : index
    %c0_166 = arith.constant 0 : index
    %210 = vector.load %arg6[%c0_165, %c0_166] : memref<1x1xf32, #tpu.memory_space<vmem>>, vector<1x1xf32>
    %211 = vector.broadcast %210 : vector<1x1xf32> to vector<2x1xf32>
    %212 = arith.addf %209, %211 : vector<2x1xf32>
    %cst_167 = arith.constant 0.000000e+00 : f32
    %213 = vector.broadcast %cst_167 : f32 to vector<2x1xf32>
    %214 = arith.subf %213, %212 : vector<2x1xf32>
    %215 = math.exp %214 : vector<2x1xf32>
    %cst_168 = arith.constant 1.000000e+00 : f32
    %216 = vector.broadcast %cst_168 : f32 to vector<2x1xf32>
    %217 = arith.addf %216, %215 : vector<2x1xf32>
    %218 = tpu.reciprocal %217 {approx = true} : vector<2x1xf32> -> vector<2x1xf32>
    %c0_169 = arith.constant 0 : index
    %c0_170 = arith.constant 0 : index
    %219 = vector.load %arg7[%c0_169, %c0_170] : memref<2x1xf32, #tpu.memory_space<vmem>>, vector<2x1xf32>
    tpu.vector_store %arg7[%c0_169, %c0_170], %218 {strides = array<i32>} : memref<2x1xf32, #tpu.memory_space<vmem>>, vector<2x1xf32>,
    return
  }
}

</mosaic_0001>

<bundles_post_ra>
// kernel: tpu_custom_call.1
= control target key start
LH: loop header
LB: loop body
LE: loop exit
PB: predicated region body
PF: predicated region fallthrough
CT: control target
= control target key end

     0   :  { %s11714_s0 = inlined_call_operand.hbm [shape: f32[1152,75], index: 0, kind: input, shape index: {}]   ;;  %s11715_s1 = inlined_call_operand.hbm [shape: f32[75,64], index: 1, kind: input, shape index: {}]   ;;  %s11716_s2 = inlined_call_operand.hbm [shape: f32[1,64], index: 2, kind: input, shape index: {}]   ;;  %s11717_s3 = inlined_call_operand.hbm [shape: f32[12,768,128], index: 3, kind: input, shape index: {}]   ;;  %s11718_s4 = inlined_call_operand.hbm [shape: f32[1,128], index: 4, kind: input, shape index: {}]   ;;  %s11719_s5 = inlined_call_operand.hbm [shape: f32[1,128], index: 5, kind: input, shape index: {}]   ;;  %s11720_s6 = inlined_call_operand.<no memory space> [shape: f32[1,1], index: 6, kind: input, shape index: {}]   ;;  %s11721_s7 = inlined_call_operand.hbm [shape: f32[2,1], index: 7, kind: output, shape index: {}]  }
   0x1   :  { %v12_v0 = vstv %s11720_s6 }
   0x2   :  { %13 = vst [vmem:[#allocation4] sm:$0x1] %v12_v0 }
   0x3   :  { %14 = vsyncpa [#allocation6], 0 }
   0x4   :  { %15 = vsyncpa [#allocation9], 0 }
   0x5   :  { %16 = vsyncpa [#allocation12], 0 }
   0x6   :  { %17 = vsyncpa [#allocation15], 0 }
   0x7   :  { %18 = vsyncpa [#allocation7], 0  ;;  %s10086_s26 = smov [#allocation8]   ;;  %s10087_s28 = smov [#allocation11]  }
   0x8   :  { %s36_s27 = sshll.u32 %s10086_s26, 4  ;;  %s58_s29 = sshll.u32 %s10087_s28, 4  ;;  %s37_s27 = int_to_ptr.vmem [resolvable:$true] %s36_s27  ;;  %s10141_s29 = int_to_ptr.vmem [resolvable:$true] %s58_s29 }
   0x9   :  { %s9922_s9 = scalar_lea.hbm %s11715_s1, 1280 }
   0xa   :  { %p9923_p0 = scmp.ne.s32.totalorder %s11715_s1, %s9922_s9  ;;  %p9926_p1 = scmp.lt.u32.totalorder %s9922_s9, %s11715_s1 }
   0xc   :  { %p9928_p2 = pnand %p9926_p1, %p9923_p0 }
   0xe   :  { %9931 = shalt.err (!%p9928_p2)
}
   0xf   :  { %s9932_s13 = scalar_lea.vmem %s37_s27, 1280  ;;  %p9937_p4 = scmp.lt.s32.totalorder %s37_s27, %s37_s27 }
  0x10   :  { %p9933_p3 = scmp.ne.s32.totalorder %s37_s27, %s9932_s13  ;;  %p9938_p5 = scmp.lt.s32.totalorder %s9932_s13, %s9932_s13 }
  0x12   :  { %p9939_p6 = por %p9938_p5, %p9937_p4 }
  0x14   :  { %p9940_p7 = pnand %p9939_p6, %p9933_p3 }
  0x16   :  { %9943 = shalt.err (!%p9940_p7)
}
  0x17   :  { %s10088_s14 = smov 128   ;;  %s10089_s15 = smov 8  }
  0x18   :  { %42 = dma.hbm_to_vmem [thread:$0]  %s11715_s1, 1280, %s37_s27, [#allocation9], %s10088_s14, %s10088_s14, %s10089_s15  }
  0x19   :  { %s9944_s20 = scalar_lea.hbm %s11717_s3, 147456 }
  0x1a   :  { %p9945_p8 = scmp.ne.s32.totalorder %s11717_s3, %s9944_s20  ;;  %p9948_p9 = scmp.lt.u32.totalorder %s9944_s20, %s11717_s3 }
  0x1c   :  { %p9950_p10 = pnand %p9948_p9, %p9945_p8 }
  0x1e   :  { %9953 = shalt.err (!%p9950_p10)
}
  0x1f   :  { %s9954_s25 = scalar_lea.vmem %s10141_s29, 147456  ;;  %p9959_p12 = scmp.lt.s32.totalorder %s10141_s29, %s10141_s29 }
  0x20   :  { %p9955_p11 = scmp.ne.s32.totalorder %s10141_s29, %s9954_s25  ;;  %p9960_p13 = scmp.lt.s32.totalorder %s9954_s25, %s9954_s25 }
  0x22   :  { %p9961_p0 = por %p9960_p13, %p9959_p12 }
  0x24   :  { %p9962_p1 = pnand %p9961_p0, %p9955_p11 }
  0x26   :  { %9965 = shalt.err (!%p9962_p1)
}
  0x27   :  { %64 = dma.hbm_to_vmem [thread:$0]  %s11717_s3, 147456, %s10141_s29, [#allocation12], %s10088_s14, %s10088_s14, %s10089_s15  }
  0x28   :  { %s10090_s27 = smov [#allocation5]   ;;  %s10091_s30 = smov [#allocation10]  }
  0x29   :  { %s24_s28 = sshll.u32 %s10090_s27, 4  ;;  %s49_s8 = sshll.u32 %s10091_s30, 4  ;;  %s25_s28 = int_to_ptr.vmem [resolvable:$true] %s24_s28  ;;  %s50_s8 = int_to_ptr.vmem [resolvable:$true] %s49_s8 }
  0x2a   :  { %s9966_s11 = scalar_lea.hbm %s11714_s0, 18432 }
  0x2b   :  { %p9967_p2 = scmp.ne.s32.totalorder %s11714_s0, %s9966_s11  ;;  %p9970_p3 = scmp.lt.u32.totalorder %s9966_s11, %s11714_s0 }
  0x2d   :  { %p9972_p4 = pnand %p9970_p3, %p9967_p2 }
  0x2f   :  { %9975 = shalt.err (!%p9972_p4)
}
  0x30   :  { %s9976_s3 = scalar_lea.vmem %s25_s28, 18432  ;;  %p9981_p6 = scmp.lt.s32.totalorder %s25_s28, %s25_s28 }
  0x31   :  { %p9977_p5 = scmp.ne.s32.totalorder %s25_s28, %s9976_s3  ;;  %p9982_p7 = scmp.lt.s32.totalorder %s9976_s3, %s9976_s3 }
  0x33   :  { %p9983_p8 = por %p9982_p7, %p9981_p6 }
  0x35   :  { %p9984_p9 = pnand %p9983_p8, %p9977_p5 }
  0x37   :  { %9987 = shalt.err (!%p9984_p9)
}
  0x38   :  { %30 = dma.hbm_to_vmem [thread:$0]  %s11714_s0, 18432, %s25_s28, [#allocation6], %s10088_s14, %s10088_s14, %s10089_s15  }
  0x39   :  { %s9988_s20 = scalar_lea.hbm %s11716_s2, 16 }
  0x3a   :  { %p9989_p10 = scmp.ne.s32.totalorder %s11716_s2, %s9988_s20  ;;  %p9992_p11 = scmp.lt.u32.totalorder %s9988_s20, %s11716_s2 }
  0x3c   :  { %p9994_p12 = pnand %p9992_p11, %p9989_p10 }
  0x3e   :  { %9997 = shalt.err (!%p9994_p12)
}
  0x3f   :  { %s9998_s25 = scalar_lea.vmem %s50_s8, 16  ;;  %s10002_s1 = scalar_lea.vmem %s50_s8, 32 }
  0x40   :  { %p9999_p13 = scmp.ne.s32.totalorder %s50_s8, %s9998_s25  ;;  %p10003_p0 = scmp.lt.s32.totalorder %s50_s8, %s50_s8 }
  0x41   :  { %p10004_p1 = scmp.lt.s32.totalorder %s10002_s1, %s9998_s25 }
  0x43   :  { %p10005_p2 = por %p10004_p1, %p10003_p0 }
  0x45   :  { %p10006_p3 = pnand %p10005_p2, %p9999_p13 }
  0x47   :  { %10009 = shalt.err (!%p10006_p3)
}
  0x48   :  { %52 = dma.hbm_to_vmem [thread:$0]  %s11716_s2, 16, %s50_s8, [#allocation9]  }
  0x49   :  { %s10092_s15 = smov [#allocation13]   ;;  %s10093_s27 = smov [#allocation14]  }
  0x4a   :  { %s71_s26 = sshll.u32 %s10092_s15, 4  ;;  %s81_s28 = sshll.u32 %s10093_s27, 4  ;;  %s72_s26 = int_to_ptr.vmem [resolvable:$true] %s71_s26  ;;  %s82_s28 = int_to_ptr.vmem [resolvable:$true] %s81_s28 }
  0x4b   :  { %s10010_s10 = scalar_lea.hbm %s11718_s4, 16 }
  0x4c   :  { %p10011_p4 = scmp.ne.s32.totalorder %s11718_s4, %s10010_s10  ;;  %p10014_p5 = scmp.lt.u32.totalorder %s10010_s10, %s11718_s4 }
  0x4e   :  { %p10016_p6 = pnand %p10014_p5, %p10011_p4 }
  0x50   :  { %10019 = shalt.err (!%p10016_p6)
}
  0x51   :  { %s10020_s2 = scalar_lea.vmem %s72_s26, 16  ;;  %s10024_s8 = scalar_lea.vmem %s72_s26, 32 }
  0x52   :  { %p10021_p7 = scmp.ne.s32.totalorder %s72_s26, %s10020_s2  ;;  %p10025_p8 = scmp.lt.s32.totalorder %s72_s26, %s72_s26 }
  0x53   :  { %p10026_p9 = scmp.lt.s32.totalorder %s10024_s8, %s10020_s2 }
  0x55   :  { %p10027_p10 = por %p10026_p9, %p10025_p8 }
  0x57   :  { %p10028_p11 = pnand %p10027_p10, %p10021_p7 }
  0x59   :  { %10031 = shalt.err (!%p10028_p11)
}
  0x5a   :  { %74 = dma.hbm_to_vmem [thread:$0]  %s11718_s4, 16, %s72_s26, [#allocation12]  }
  0x5b   :  { %s10032_s18 = scalar_lea.hbm %s11719_s5, 16 }
  0x5c   :  { %p10033_p12 = scmp.ne.s32.totalorder %s11719_s5, %s10032_s18  ;;  %p10036_p13 = scmp.lt.u32.totalorder %s10032_s18, %s11719_s5 }
  0x5e   :  { %p10038_p0 = pnand %p10036_p13, %p10033_p12 }
  0x60   :  { %10041 = shalt.err (!%p10038_p0)
}
  0x61   :  { %s10042_s23 = scalar_lea.vmem %s82_s28, 16  ;;  %s10046_s24 = scalar_lea.vmem %s82_s28, 32 }
  0x62   :  { %p10043_p1 = scmp.ne.s32.totalorder %s82_s28, %s10042_s23  ;;  %p10047_p2 = scmp.lt.s32.totalorder %s82_s28, %s82_s28 }
  0x63   :  { %p10048_p3 = scmp.lt.s32.totalorder %s10046_s24, %s10042_s23 }
  0x65   :  { %p10049_p4 = por %p10048_p3, %p10047_p2 }
  0x67   :  { %p10050_p5 = pnand %p10049_p4, %p10043_p1 }
  0x69   :  { %10053 = shalt.err (!%p10050_p5)
}
  0x6a   :  { %84 = dma.hbm_to_vmem [thread:$0]  %s11719_s5, 16, %s82_s28, [#allocation15]  }
  0x6b   :  { %10076 = dma.done.wait [#allocation6], 18432  }
  0x6c   :  { %10077 = vsyncadd [#allocation6], 4294948864 }
  0x6d   :  { %10078 = dma.done.wait [#allocation9], 1296  }
  0x6e   :  { %10079 = vsyncadd [#allocation9], 4294966000 }
  0x6f   :  { %10080 = dma.done.wait [#allocation12], 147472  }
  0x70   :  { %10081 = vsyncadd [#allocation12], 4294819824 }
  0x71   :  { %10082 = dma.done.wait [#allocation15], 16  }
  0x72   :  { %10083 = vsyncadd [#allocation15], 4294967280  ;;  %v249_v1 = vld [vmem:[#allocation8] sm:$0xff]  ;;  %v250_v2 = vld [vmem:[#allocation8 + $0x8] sm:$0xff]  ;;  %vm266_vm0 = vcmask 613376   ;;  %vm699_vm1 = vcmask 1042432  }
  0x73   :  { %v251_v3 = vld [vmem:[#allocation8 + $0x10] sm:$0xff]  ;;  %v8731_v4 = vpack.c.bf16 %v250_v2, %v249_v1  ;;  %v252_v5 = vld [vmem:[#allocation8 + $0x18] sm:$0xff]  ;;  %v253_v7 = vld [vmem:[#allocation8 + $0x20] sm:$0xff]  ;;  %vm10094_vm2 = vmmov 1   ;;  %vm1632_vm4 = vcmask 523264   ;;  %s10095_s5 = smov 64  }
  0x74   :  { %v8735_v6 = vpack.c.bf16 %v252_v5, %v251_v3  ;;  %v254_v8 = vld [vmem:[#allocation8 + $0x28] sm:$0xff]  ;;  %v105_v9 = vld [vmem:[#allocation5] sm:$0xff]  ;;  %v255_v11 = vld [vmem:[#allocation8 + $0x30] sm:$0xff]  ;;  %vm1849_vm5 = vcmask 1048064   ;;  %vm6895_vm6 = vcmask 1041408   ;;  %s10097_s1 = smov [#allocation16]  }
  0x75   :  { %8732 = vmatprep.subr.bf16.mxu0 %v8731_v4  ;;  %8515 = vmatprep.mubr.msk.f32.mxu0 %vm266_vm0, %v105_v9  ;;  %v8739_v10 = vpack.c.bf16 %v254_v8, %v253_v7  ;;  %v256_v12 = vld [vmem:[#allocation8 + $0x38] sm:$0xff]  ;;  %v257_v14 = vld [vmem:[#allocation8 + $0x40] sm:$0xff]  ;;  %v258_v15 = vld [vmem:[#allocation8 + $0x48] sm:$0x7]  ;;  %s6920_s0 = sshll.u32 %s10097_s1, 4  ;;  %vm6912_vm7 = vcmask 1024   ;;  %s6921_s0 = int_to_ptr.vmem [resolvable:$true] %s6920_s0 }
  0x76   :  { %8734 = vmatpush3.bf16.msra.mxu0 %v8731_v4  ;;  %v8743_v13 = vpack.c.bf16 %v256_v12, %v255_v11  ;;  %v8747_v16 = vpack.c.bf16 %v258_v15, %v257_v14  ;;  %vm8748_vm3 = vmpackc.low %vm699_vm1, %vm10094_vm2  ;;  %v106_v17 = vld [vmem:[#allocation5 + $0x8] sm:$0xff]  ;;  %v107_v18 = vld [vmem:[#allocation5 + $0x10] sm:$0xff]  ;;  %s10054_s14 = scalar_lea.vmem %s6921_s0, 32  ;;  %p10059_p7 = scmp.lt.s32.totalorder %s6921_s0, %s6921_s0 }
  0x77   :  { %8736 = vmatprep.subr.bf16.mxu0 %v8735_v6  ;;  %v108_v19 = vld [vmem:[#allocation5 + $0x18] sm:$0xff]  ;;  %v109_v20 = vld [vmem:[#allocation5 + $0x20] sm:$0xff]  ;;  %v110_v21 = vld [vmem:[#allocation5 + $0x28] sm:$0xff]  ;;  %p10055_p6 = scmp.ne.s32.totalorder %s6921_s0, %s10054_s14  ;;  %p10060_p8 = scmp.lt.s32.totalorder %s10054_s14, %s10054_s14 }
  0x78   :  { %v111_v22 = vld [vmem:[#allocation5 + $0x30] sm:$0xff]  ;;  %v112_v23 = vld [vmem:[#allocation5 + $0x38] sm:$0xff]  ;;  %v113_v24 = vld [vmem:[#allocation5 + $0x40] sm:$0xff] }
  0x79   :  { %v114_v25 = vld [vmem:[#allocation5 + $0x48] sm:$0xff]  ;;  %v115_v26 = vld [vmem:[#allocation5 + $0x50] sm:$0xff]  ;;  %v116_v27 = vld [vmem:[#allocation5 + $0x58] sm:$0xff]  ;;  %p10061_p9 = por %p10060_p8, %p10059_p7 }
  0x7a   :  { %8738 = vmatpush3.bf16.msra.mxu0 %v8735_v6  ;;  %v117_v28 = vld [vmem:[#allocation5 + $0x60] sm:$0xff]  ;;  %v118_v29 = vld [vmem:[#allocation5 + $0x68] sm:$0xff]  ;;  %v119_v30 = vld [vmem:[#allocation5 + $0x70] sm:$0xff] }
  0x7b   :  { %8740 = vmatprep.subr.bf16.mxu0 %v8739_v10  ;;  %v120_v31 = vld [vmem:[#allocation5 + $0x78] sm:$0xff]  ;;  %v121_v32 = vld [vmem:[#allocation5 + $0x80] sm:$0xff]  ;;  %v122_v33 = vld [vmem:[#allocation5 + $0x88] sm:$0xff]  ;;  %p10062_p10 = pnand %p10061_p9, %p10055_p6 }
  0x7c   :  { %v123_v34 = vld [vmem:[#allocation5 + $0x90] sm:$0xff]  ;;  %v124_v35 = vld [vmem:[#allocation5 + $0x98] sm:$0xff]  ;;  %v125_v36 = vld [vmem:[#allocation5 + $0xa0] sm:$0xff] }
  0x7d   :  { %v126_v37 = vld [vmem:[#allocation5 + $0xa8] sm:$0xff]  ;;  %v127_v38 = vld [vmem:[#allocation5 + $0xb0] sm:$0xff]  ;;  %v128_v39 = vld [vmem:[#allocation5 + $0xb8] sm:$0xff] }
  0x7e   :  { %8742 = vmatpush3.bf16.msra.mxu0 %v8739_v10  ;;  %v129_v40 = vld [vmem:[#allocation5 + $0xc0] sm:$0xff]  ;;  %v130_v41 = vld [vmem:[#allocation5 + $0xc8] sm:$0xff]  ;;  %v131_v42 = vld [vmem:[#allocation5 + $0xd0] sm:$0xff] }
  0x7f   :  { %8744 = vmatprep.subr.bf16.mxu0 %v8743_v13  ;;  %v132_v43 = vld [vmem:[#allocation5 + $0xd8] sm:$0xff]  ;;  %v133_v44 = vld [vmem:[#allocation5 + $0xe0] sm:$0xff]  ;;  %v134_v45 = vld [vmem:[#allocation5 + $0xe8] sm:$0xff] }
  0x80   :  { %v135_v46 = vld [vmem:[#allocation5 + $0xf0] sm:$0xff]  ;;  %v136_v47 = vld [vmem:[#allocation5 + $0xf8] sm:$0xff]  ;;  %v137_v48 = vld [vmem:[#allocation5 + $0x100] sm:$0xff] }
  0x81   :  { %v138_v49 = vld [vmem:[#allocation5 + $0x108] sm:$0xff]  ;;  %v139_v50 = vld [vmem:[#allocation5 + $0x110] sm:$0xff]  ;;  %v140_v51 = vld [vmem:[#allocation5 + $0x118] sm:$0xff] }
  0x82   :  { %8746 = vmatpush3.bf16.msra.mxu0 %v8743_v13  ;;  %v141_v52 = vld [vmem:[#allocation5 + $0x120] sm:$0xff]  ;;  %v142_v53 = vld [vmem:[#allocation5 + $0x128] sm:$0xff]  ;;  %v143_v54 = vld [vmem:[#allocation5 + $0x130] sm:$0xff] }
  0x83   :  { %8749 = vmatprep.subr.msk.bf16.mxu0 %vm8748_vm3, %v8747_v16  ;;  %v144_v55 = vld [vmem:[#allocation5 + $0x138] sm:$0xff]  ;;  %v145_v56 = vld [vmem:[#allocation5 + $0x140] sm:$0xff]  ;;  %v146_v57 = vld [vmem:[#allocation5 + $0x148] sm:$0xff] }
  0x84   :  { %v147_v58 = vld [vmem:[#allocation5 + $0x150] sm:$0xff]  ;;  %v148_v59 = vld [vmem:[#allocation5 + $0x158] sm:$0xff]  ;;  %v149_v60 = vld [vmem:[#allocation5 + $0x160] sm:$0xff] }
  0x85   :  { %v150_v61 = vld [vmem:[#allocation5 + $0x168] sm:$0xff]  ;;  %v151_v62 = vld [vmem:[#allocation5 + $0x170] sm:$0xff]  ;;  %v152_v63 = vld [vmem:[#allocation5 + $0x178] sm:$0xff] }
  0x86   :  { %8752 = vmatpush3.bf16.msk.msra.mxu0 %vm8748_vm3, %v8747_v16  ;;  %v153_v0 = vld [vmem:[#allocation5 + $0x180] sm:$0xff]  ;;  %v154_v1 = vld [vmem:[#allocation5 + $0x188] sm:$0xff]  ;;  %v155_v2 = vld [vmem:[#allocation5 + $0x190] sm:$0xff] }
  0x87   :  { %v156_v3 = vld [vmem:[#allocation5 + $0x198] sm:$0xff]  ;;  %v157_v4 = vld [vmem:[#allocation5 + $0x1a0] sm:$0xff]  ;;  %v158_v5 = vld [vmem:[#allocation5 + $0x1a8] sm:$0xff] }
  0x88   :  { %v159_v6 = vld [vmem:[#allocation5 + $0x1b0] sm:$0xff]  ;;  %v160_v7 = vld [vmem:[#allocation5 + $0x1b8] sm:$0xff]  ;;  %v161_v8 = vld [vmem:[#allocation5 + $0x1c0] sm:$0xff] }
  0x89   :  { %8516 = vmatmul.mubr.msk.f32.vlgmr.msra.gmra.mrb[0].mxu0 %vm266_vm0, %v106_v17  ;;  %v162_v9 = vld [vmem:[#allocation5 + $0x1c8] sm:$0xff]  ;;  %v163_v10 = vld [vmem:[#allocation5 + $0x1d0] sm:$0xff]  ;;  %v164_v11 = vld [vmem:[#allocation5 + $0x1d8] sm:$0xff] }
  0x8a   :  { %8518 = vmatprep.mubr.msk.f32.mxu0 %vm266_vm0, %v107_v18  ;;  %v165_v12 = vld [vmem:[#allocation5 + $0x1e0] sm:$0xff]  ;;  %v166_v13 = vld [vmem:[#allocation5 + $0x1e8] sm:$0xff]  ;;  %v167_v14 = vld [vmem:[#allocation5 + $0x1f0] sm:$0xff] }
  0x8b   :  { %v168_v15 = vld [vmem:[#allocation5 + $0x1f8] sm:$0xff]  ;;  %v169_v16 = vld [vmem:[#allocation5 + $0x200] sm:$0xff]  ;;  %v170_v17 = vld [vmem:[#allocation5 + $0x208] sm:$0xff] }
  0x8c   :  { %v171_v18 = vld [vmem:[#allocation5 + $0x210] sm:$0xff] }
  0x8d   :  { %8519 = vmatmul.mubr.msk.f32.gmra.mrb[2].mxu0 %vm266_vm0, %v108_v19  ;;  %v172_v19 = vld [vmem:[#allocation5 + $0x218] sm:$0xff] }
  0x8e   :  { %8521 = vmatprep.mubr.msk.f32.mxu0 %vm266_vm0, %v109_v20  ;;  %v173_v20 = vld [vmem:[#allocation5 + $0x220] sm:$0xff] }
  0x91   :  { %8522 = vmatmul.mubr.msk.f32.gmra.mrb[4].mxu0 %vm266_vm0, %v110_v21  ;;  %v174_v21 = vld [vmem:[#allocation5 + $0x228] sm:$0xff] }
  0x92   :  { %8524 = vmatprep.mubr.msk.f32.mxu0 %vm266_vm0, %v111_v22  ;;  %v175_v22 = vld [vmem:[#allocation5 + $0x230] sm:$0xff] }
  0x95   :  { %8525 = vmatmul.mubr.msk.f32.gmra.mrb[6].mxu0 %vm266_vm0, %v112_v23  ;;  %v176_v23 = vld [vmem:[#allocation5 + $0x238] sm:$0xff] }
  0x96   :  { %8527 = vmatprep.mubr.msk.f32.mxu0 %vm266_vm0, %v113_v24  ;;  %v177_v24 = vld [vmem:[#allocation5 + $0x240] sm:$0xff] }
  0x99   :  { %8528 = vmatmul.mubr.msk.f32.gmra.mrb[8].mxu0 %vm266_vm0, %v114_v25  ;;  %v178_v25 = vld [vmem:[#allocation5 + $0x248] sm:$0xff] }
  0x9a   :  { %8530 = vmatprep.mubr.msk.f32.mxu0 %vm266_vm0, %v115_v26  ;;  %v179_v26 = vld [vmem:[#allocation5 + $0x250] sm:$0xff] }
  0x9d   :  { %8531 = vmatmul.mubr.msk.f32.gmra.mrb[10].mxu0 %vm266_vm0, %v116_v27  ;;  %v180_v27 = vld [vmem:[#allocation5 + $0x258] sm:$0xff] }
  0x9e   :  { %8533 = vmatprep.mubr.msk.f32.mxu0 %vm266_vm0, %v117_v28  ;;  %v181_v28 = vld [vmem:[#allocation5 + $0x260] sm:$0xff] }
  0xa1   :  { %8534 = vmatmul.mubr.msk.f32.gmra.mrb[12].mxu0 %vm266_vm0, %v118_v29  ;;  %v182_v29 = vld [vmem:[#allocation5 + $0x268] sm:$0xff] }
  0xa2   :  { %8536 = vmatprep.mubr.msk.f32.mxu0 %vm266_vm0, %v119_v30  ;;  %v183_v30 = vld [vmem:[#allocation5 + $0x270] sm:$0xff] }
  0xa5   :  { %8537 = vmatmul.mubr.msk.f32.gmra.mrb[14].mxu0 %vm266_vm0, %v120_v31  ;;  %v184_v31 = vld [vmem:[#allocation5 + $0x278] sm:$0xff] }
  0xa6   :  { %8539 = vmatprep.mubr.msk.f32.mxu0 %vm266_vm0, %v121_v32  ;;  %v185_v32 = vld [vmem:[#allocation5 + $0x280] sm:$0xff] }
  0xa9   :  { %8540 = vmatmul.mubr.msk.f32.gmra.mrb[16].mxu0 %vm266_vm0, %v122_v33  ;;  %v186_v33 = vld [vmem:[#allocation5 + $0x288] sm:$0xff] }
  0xaa   :  { %8542 = vmatprep.mubr.msk.f32.mxu0 %vm266_vm0, %v123_v34  ;;  %v187_v34 = vld [vmem:[#allocation5 + $0x290] sm:$0xff] }
  0xad   :  { %8543 = vmatmul.mubr.msk.f32.gmra.mrb[18].mxu0 %vm266_vm0, %v124_v35  ;;  %v188_v35 = vld [vmem:[#allocation5 + $0x298] sm:$0xff] }
  0xae   :  { %8545 = vmatprep.mubr.msk.f32.mxu0 %vm266_vm0, %v125_v36  ;;  %v189_v36 = vld [vmem:[#allocation5 + $0x2a0] sm:$0xff] }
  0xb1   :  { %8546 = vmatmul.mubr.msk.f32.gmra.mrb[20].mxu0 %vm266_vm0, %v126_v37  ;;  %v190_v37 = vld [vmem:[#allocation5 + $0x2a8] sm:$0xff] }
  0xb2   :  { %8548 = vmatprep.mubr.msk.f32.mxu0 %vm266_vm0, %v127_v38  ;;  %v191_v38 = vld [vmem:[#allocation5 + $0x2b0] sm:$0xff] }
  0xb5   :  { %8549 = vmatmul.mubr.msk.f32.gmra.mrb[22].mxu0 %vm266_vm0, %v128_v39  ;;  %v192_v39 = vld [vmem:[#allocation5 + $0x2b8] sm:$0xff] }
  0xb6   :  { %8551 = vmatprep.mubr.msk.f32.mxu0 %vm266_vm0, %v129_v40  ;;  %v193_v40 = vld [vmem:[#allocation5 + $0x2c0] sm:$0xff] }
  0xb9   :  { %8552 = vmatmul.mubr.msk.f32.gmra.mrb[24].mxu0 %vm266_vm0, %v130_v41  ;;  %v194_v41 = vld [vmem:[#allocation5 + $0x2c8] sm:$0xff] }
  0xba   :  { %8554 = vmatprep.mubr.msk.f32.mxu0 %vm266_vm0, %v131_v42  ;;  %v195_v42 = vld [vmem:[#allocation5 + $0x2d0] sm:$0xff] }
  0xbd   :  { %8555 = vmatmul.mubr.msk.f32.gmra.mrb[26].mxu0 %vm266_vm0, %v132_v43  ;;  %v196_v43 = vld [vmem:[#allocation5 + $0x2d8] sm:$0xff] }
  0xbe   :  { %8557 = vmatprep.mubr.msk.f32.mxu0 %vm266_vm0, %v133_v44  ;;  %v197_v44 = vld [vmem:[#allocation5 + $0x2e0] sm:$0xff] }
  0xc1   :  { %8558 = vmatmul.mubr.msk.f32.gmra.mrb[28].mxu0 %vm266_vm0, %v134_v45  ;;  %v198_v45 = vld [vmem:[#allocation5 + $0x2e8] sm:$0xff] }
  0xc2   :  { %8560 = vmatprep.mubr.msk.f32.mxu0 %vm266_vm0, %v135_v46  ;;  %v199_v46 = vld [vmem:[#allocation5 + $0x2f0] sm:$0xff] }
  0xc5   :  { %8561 = vmatmul.mubr.msk.f32.gmra.mrb[30].mxu0 %vm266_vm0, %v136_v47  ;;  %v200_v47 = vld [vmem:[#allocation5 + $0x2f8] sm:$0xff] }
  0xc6   :  { %8563 = vmatprep.mubr.msk.f32.mxu0 %vm266_vm0, %v137_v48  ;;  %v201_v48 = vld [vmem:[#allocation5 + $0x300] sm:$0xff] }
  0xc9   :  { %8564 = vmatmul.mubr.msk.f32.gmra.mrb[32].mxu0 %vm266_vm0, %v138_v49  ;;  %v202_v49 = vld [vmem:[#allocation5 + $0x308] sm:$0xff] }
  0xca   :  { %8566 = vmatprep.mubr.msk.f32.mxu0 %vm266_vm0, %v139_v50  ;;  %v203_v50 = vld [vmem:[#allocation5 + $0x310] sm:$0xff] }
  0xcd   :  { %8567 = vmatmul.mubr.msk.f32.gmra.mrb[34].mxu0 %vm266_vm0, %v140_v51  ;;  %v204_v51 = vld [vmem:[#allocation5 + $0x318] sm:$0xff] }
  0xce   :  { %8569 = vmatprep.mubr.msk.f32.mxu0 %vm266_vm0, %v141_v52  ;;  %v205_v52 = vld [vmem:[#allocation5 + $0x320] sm:$0xff] }
  0xd1   :  { %8570 = vmatmul.mubr.msk.f32.gmra.mrb[36].mxu0 %vm266_vm0, %v142_v53  ;;  %v206_v53 = vld [vmem:[#allocation5 + $0x328] sm:$0xff] }
  0xd2   :  { %8572 = vmatprep.mubr.msk.f32.mxu0 %vm266_vm0, %v143_v54  ;;  %v207_v54 = vld [vmem:[#allocation5 + $0x330] sm:$0xff] }
  0xd5   :  { %8573 = vmatmul.mubr.msk.f32.gmra.mrb[38].mxu0 %vm266_vm0, %v144_v55  ;;  %v208_v55 = vld [vmem:[#allocation5 + $0x338] sm:$0xff] }
  0xd6   :  { %8575 = vmatprep.mubr.msk.f32.mxu0 %vm266_vm0, %v145_v56  ;;  %v209_v56 = vld [vmem:[#allocation5 + $0x340] sm:$0xff] }
  0xd9   :  { %8576 = vmatmul.mubr.msk.f32.gmra.mrb[40].mxu0 %vm266_vm0, %v146_v57  ;;  %v210_v57 = vld [vmem:[#allocation5 + $0x348] sm:$0xff] }
  0xda   :  { %8578 = vmatprep.mubr.msk.f32.mxu0 %vm266_vm0, %v147_v58  ;;  %v211_v58 = vld [vmem:[#allocation5 + $0x350] sm:$0xff] }
  0xdd   :  { %8579 = vmatmul.mubr.msk.f32.gmra.mrb[42].mxu0 %vm266_vm0, %v148_v59  ;;  %v10335_v59 = vld [vmem:[#allocation10] ss:$0 sm:$0xff] }
  0xde   :  { %8581 = vmatprep.mubr.msk.f32.mxu0 %vm266_vm0, %v149_v60  ;;  %v212_v60 = vld [vmem:[#allocation5 + $0x358] sm:$0xff] }
  0xe1   :  { %8582 = vmatmul.mubr.msk.f32.gmra.mrb[44].mxu0 %vm266_vm0, %v150_v61  ;;  %v213_v61 = vld [vmem:[#allocation5 + $0x360] sm:$0xff] }
  0xe2   :  { %8584 = vmatprep.mubr.msk.f32.mxu0 %vm266_vm0, %v151_v62 }
  0xe5   :  { %8585 = vmatmul.mubr.msk.f32.gmra.mrb[46].mxu0 %vm266_vm0, %v152_v63 }
  0xe6   :  { %8587 = vmatprep.mubr.msk.f32.mxu0 %vm266_vm0, %v153_v0 }
  0xe9   :  { %8588 = vmatmul.mubr.msk.f32.gmra.mrb[48].mxu0 %vm266_vm0, %v154_v1 }
  0xea   :  { %8590 = vmatprep.mubr.msk.f32.mxu0 %vm266_vm0, %v155_v2  ;;  %v214_v2 = vld [vmem:[#allocation5 + $0x368] sm:$0xff] }
  0xed   :  { %8591 = vmatmul.mubr.msk.f32.gmra.mrb[50].mxu0 %vm266_vm0, %v156_v3 }
  0xee   :  { %8593 = vmatprep.mubr.msk.f32.mxu0 %vm266_vm0, %v157_v4  ;;  %v215_v4 = vld [vmem:[#allocation5 + $0x370] sm:$0xff] }
  0xf1   :  { %8594 = vmatmul.mubr.msk.f32.gmra.mrb[52].mxu0 %vm266_vm0, %v158_v5 }
  0xf2   :  { %8596 = vmatprep.mubr.msk.f32.mxu0 %vm266_vm0, %v159_v6 }
  0xf5   :  { %8597 = vmatmul.mubr.msk.f32.gmra.mrb[54].mxu0 %vm266_vm0, %v160_v7 }
  0xf6   :  { %8599 = vmatprep.mubr.msk.f32.mxu0 %vm266_vm0, %v161_v8 }
  0xf9   :  { %8600 = vmatmul.mubr.msk.f32.gmra.mrb[56].mxu0 %vm266_vm0, %v162_v9 }
  0xfa   :  { %8602 = vmatprep.mubr.msk.f32.mxu0 %vm266_vm0, %v163_v10  ;;  %v216_v10 = vld [vmem:[#allocation5 + $0x378] sm:$0xff] }
  0xfd   :  { %8603 = vmatmul.mubr.msk.f32.gmra.mrb[58].mxu0 %vm266_vm0, %v164_v11 }
  0xfe   :  { %8605 = vmatprep.mubr.msk.f32.mxu0 %vm266_vm0, %v165_v12  ;;  %v217_v12 = vld [vmem:[#allocation5 + $0x380] sm:$0xff] }
 0x101   :  { %8606 = vmatmul.mubr.msk.f32.gmra.mrb[60].mxu0 %vm266_vm0, %v166_v13 }
 0x102   :  { %8608 = vmatprep.mubr.msk.f32.mxu0 %vm266_vm0, %v167_v14 }
 0x105   :  { %8609 = vmatmul.mubr.msk.f32.gmra.mrb[62].mxu0 %vm266_vm0, %v168_v15 }
 0x106   :  { %8611 = vmatprep.mubr.msk.f32.mxu0 %vm266_vm0, %v169_v16 }
 0x109   :  { %8612 = vmatmul.mubr.msk.f32.gmra.mrb[64].mxu0 %vm266_vm0, %v170_v17 }
 0x10a   :  { %8614 = vmatprep.mubr.msk.f32.mxu0 %vm266_vm0, %v171_v18  ;;  %v218_v18 = vld [vmem:[#allocation5 + $0x388] sm:$0xff] }
 0x10d   :  { %8615 = vmatmul.mubr.msk.f32.gmra.mrb[66].mxu0 %vm266_vm0, %v172_v19 }
 0x10e   :  { %8617 = vmatprep.mubr.msk.f32.mxu0 %vm266_vm0, %v173_v20  ;;  %v219_v20 = vld [vmem:[#allocation5 + $0x390] sm:$0xff] }
 0x111   :  { %8618 = vmatmul.mubr.msk.f32.gmra.mrb[68].mxu0 %vm266_vm0, %v174_v21 }
 0x112   :  { %8620 = vmatprep.mubr.msk.f32.mxu0 %vm266_vm0, %v175_v22 }
 0x115   :  { %8621 = vmatmul.mubr.msk.f32.gmra.mrb[70].mxu0 %vm266_vm0, %v176_v23 }
 0x116   :  { %8623 = vmatprep.mubr.msk.f32.mxu0 %vm266_vm0, %v177_v24 }
 0x119   :  { %8624 = vmatmul.mubr.msk.f32.gmra.mrb[72].mxu0 %vm266_vm0, %v178_v25 }
 0x11a   :  { %8626 = vmatprep.mubr.msk.f32.mxu0 %vm266_vm0, %v179_v26  ;;  %v220_v26 = vld [vmem:[#allocation5 + $0x398] sm:$0xff] }
 0x11d   :  { %8627 = vmatmul.mubr.msk.f32.gmra.mrb[74].mxu0 %vm266_vm0, %v180_v27 }
 0x11e   :  { %8629 = vmatprep.mubr.msk.f32.mxu0 %vm266_vm0, %v181_v28  ;;  %v221_v28 = vld [vmem:[#allocation5 + $0x3a0] sm:$0xff] }
 0x121   :  { %8630 = vmatmul.mubr.msk.f32.gmra.mrb[76].mxu0 %vm266_vm0, %v182_v29 }
 0x122   :  { %8632 = vmatprep.mubr.msk.f32.mxu0 %vm266_vm0, %v183_v30 }
 0x125   :  { %8633 = vmatmul.mubr.msk.f32.gmra.mrb[78].mxu0 %vm266_vm0, %v184_v31 }
 0x126   :  { %8635 = vmatprep.mubr.msk.f32.mxu0 %vm266_vm0, %v185_v32 }
 0x129   :  { %8636 = vmatmul.mubr.msk.f32.gmra.mrb[80].mxu0 %vm266_vm0, %v186_v33 }
 0x12a   :  { %8638 = vmatprep.mubr.msk.f32.mxu0 %vm266_vm0, %v187_v34  ;;  %v222_v34 = vld [vmem:[#allocation5 + $0x3a8] sm:$0xff] }
 0x12d   :  { %8639 = vmatmul.mubr.msk.f32.gmra.mrb[82].mxu0 %vm266_vm0, %v188_v35 }
 0x12e   :  { %8641 = vmatprep.mubr.msk.f32.mxu0 %vm266_vm0, %v189_v36  ;;  %v223_v36 = vld [vmem:[#allocation5 + $0x3b0] sm:$0xff] }
 0x131   :  { %8642 = vmatmul.mubr.msk.f32.gmra.mrb[84].mxu0 %vm266_vm0, %v190_v37 }
 0x132   :  { %8644 = vmatprep.mubr.msk.f32.mxu0 %vm266_vm0, %v191_v38 }
 0x135   :  { %8645 = vmatmul.mubr.msk.f32.gmra.mrb[86].mxu0 %vm266_vm0, %v192_v39 }
 0x136   :  { %8647 = vmatprep.mubr.msk.f32.mxu0 %vm266_vm0, %v193_v40 }
 0x139   :  { %8648 = vmatmul.mubr.msk.f32.gmra.mrb[88].mxu0 %vm266_vm0, %v194_v41 }
 0x13a   :  { %8650 = vmatprep.mubr.msk.f32.mxu0 %vm266_vm0, %v195_v42  ;;  %v224_v42 = vld [vmem:[#allocation5 + $0x3b8] sm:$0xff] }
 0x13d   :  { %8651 = vmatmul.mubr.msk.f32.gmra.mrb[90].mxu0 %vm266_vm0, %v196_v43 }
 0x13e   :  { %8653 = vmatprep.mubr.msk.f32.mxu0 %vm266_vm0, %v197_v44  ;;  %v225_v44 = vld [vmem:[#allocation5 + $0x3c0] sm:$0xff] }
 0x141   :  { %8654 = vmatmul.mubr.msk.f32.gmra.mrb[92].mxu0 %vm266_vm0, %v198_v45 }
 0x142   :  { %8656 = vmatprep.mubr.msk.f32.mxu0 %vm266_vm0, %v199_v46 }
 0x145   :  { %8657 = vmatmul.mubr.msk.f32.gmra.mrb[94].mxu0 %vm266_vm0, %v200_v47 }
 0x146   :  { %8659 = vmatprep.mubr.msk.f32.mxu0 %vm266_vm0, %v201_v48 }
 0x149   :  { %8660 = vmatmul.mubr.msk.f32.gmra.mrb[96].mxu0 %vm266_vm0, %v202_v49 }
 0x14a   :  { %8662 = vmatprep.mubr.msk.f32.mxu0 %vm266_vm0, %v203_v50 }
 0x14d   :  { %8663 = vmatmul.mubr.msk.f32.gmra.mrb[98].mxu0 %vm266_vm0, %v204_v51 }
 0x14e   :  { %8665 = vmatprep.mubr.msk.f32.mxu0 %vm266_vm0, %v205_v52 }
 0x151   :  { %8666 = vmatmul.mubr.msk.f32.gmra.mrb[100].mxu0 %vm266_vm0, %v206_v53 }
 0x152   :  { %8668 = vmatprep.mubr.msk.f32.mxu0 %vm266_vm0, %v207_v54 }
 0x155   :  { %8669 = vmatmul.mubr.msk.f32.gmra.mrb[102].mxu0 %vm266_vm0, %v208_v55  ;;  %v226_v55 = vld [vmem:[#allocation5 + $0x3c8] sm:$0xff] }
 0x156   :  { %8671 = vmatprep.mubr.msk.f32.mxu0 %vm266_vm0, %v209_v56 }
 0x159   :  { %8672 = vmatmul.mubr.msk.f32.gmra.mrb[104].mxu0 %vm266_vm0, %v210_v57 }
 0x15a   :  { %8674 = vmatprep.mubr.msk.f32.mxu0 %vm266_vm0, %v211_v58  ;;  %v227_v58 = vld [vmem:[#allocation5 + $0x3d0] sm:$0xff] }
 0x15c   :  { %v8517_v62 = vpop.f32.mrb[0].mxu0 }
 0x15d   :  { %v775_v63 = vadd.f32 %v8517_v62, %v10335_v59  ;;  %v769_v0 = vpop.f32.mrb[1].mxu0  ;;  %8675 = vmatmul.mubr.msk.f32.gmra.mrb[106].mxu0 %vm266_vm0, %v212_v60 }
 0x15e   :  { %v770_v1 = vadd.f32 %v10335_v59, %v769_v0  ;;  %8677 = vmatprep.mubr.msk.f32.mxu0 %vm266_vm0, %v213_v61 }
 0x15f   :  { %v1489_v3 = vmax.f32 %v775_v63, 0.0 }
 0x160   :  { %v1488_v5 = vmax.f32 %v770_v1, 0.0  ;;  %v8520_v6 = vpop.f32.mrb[2].mxu0 }
 0x161   :  { %1634 = vst.msk [vmem:[#allocation2 + $0x8] sm:$0xff] %vm1632_vm4, %v1489_v3  ;;  %v785_v7 = vadd.f32 %v8520_v6, %v10335_v59  ;;  %v779_v8 = vpop.f32.mrb[3].mxu0  ;;  %8678 = vmatmul.mubr.msk.f32.gmra.mrb[108].mxu0 %vm266_vm0, %v214_v2  ;;  %v228_v6 = vld [vmem:[#allocation5 + $0x3d8] sm:$0xff] }
 0x162   :  { %1633 = vst.msk [vmem:[#allocation2] sm:$0xff] %vm1632_vm4, %v1488_v5  ;;  %v780_v9 = vadd.f32 %v10335_v59, %v779_v8  ;;  %8680 = vmatprep.mubr.msk.f32.mxu0 %vm266_vm0, %v215_v4 }
 0x163   :  { %v1491_v11 = vmax.f32 %v785_v7, 0.0 }
 0x164   :  { %v1490_v13 = vmax.f32 %v780_v9, 0.0  ;;  %v8523_v14 = vpop.f32.mrb[4].mxu0  ;;  %v229_v9 = vld [vmem:[#allocation5 + $0x3e0] sm:$0xff] }
 0x165   :  { %1636 = vst.msk [vmem:[#allocation2 + $0x18] sm:$0xff] %vm1632_vm4, %v1491_v11  ;;  %v795_v15 = vadd.f32 %v8523_v14, %v10335_v59  ;;  %v789_v16 = vpop.f32.mrb[5].mxu0  ;;  %8681 = vmatmul.mubr.msk.f32.gmra.mrb[110].mxu0 %vm266_vm0, %v216_v10 }
 0x166   :  { %1635 = vst.msk [vmem:[#allocation2 + $0x10] sm:$0xff] %vm1632_vm4, %v1490_v13  ;;  %v790_v17 = vadd.f32 %v10335_v59, %v789_v16  ;;  %8683 = vmatprep.mubr.msk.f32.mxu0 %vm266_vm0, %v217_v12 }
 0x167   :  { %v1493_v19 = vmax.f32 %v795_v15, 0.0 }
 0x168   :  { %v1492_v21 = vmax.f32 %v790_v17, 0.0  ;;  %v8526_v22 = vpop.f32.mrb[6].mxu0  ;;  %v1778_v47 = vld [vmem:[#allocation2 + $0x8] sm:$0xff] }
 0x169   :  { %1638 = vst.msk [vmem:[#allocation2 + $0x28] sm:$0xff] %vm1632_vm4, %v1493_v19  ;;  %v805_v23 = vadd.f32 %v8526_v22, %v10335_v59  ;;  %v799_v24 = vpop.f32.mrb[7].mxu0  ;;  %8684 = vmatmul.mubr.msk.f32.gmra.mrb[112].mxu0 %vm266_vm0, %v218_v18  ;;  %v1777_v52 = vld [vmem:[#allocation2] sm:$0xff] }
 0x16a   :  { %1637 = vst.msk [vmem:[#allocation2 + $0x20] sm:$0xff] %vm1632_vm4, %v1492_v21  ;;  %v800_v25 = vadd.f32 %v10335_v59, %v799_v24  ;;  %8686 = vmatprep.mubr.msk.f32.mxu0 %vm266_vm0, %v219_v20  ;;  %v230_v20 = vld [vmem:[#allocation5 + $0x3e8] sm:$0xff] }
 0x16b   :  { %v1495_v27 = vmax.f32 %v805_v23, 0.0  ;;  %v231_v23 = vld [vmem:[#allocation5 + $0x3f0] sm:$0xff] }
 0x16c   :  { %v1494_v29 = vmax.f32 %v800_v25, 0.0  ;;  %v8529_v30 = vpop.f32.mrb[8].mxu0  ;;  %v1780_v62 = vld [vmem:[#allocation2 + $0x18] sm:$0xff] }
 0x16d   :  { %1640 = vst.msk [vmem:[#allocation2 + $0x38] sm:$0xff] %vm1632_vm4, %v1495_v27  ;;  %v815_v31 = vadd.f32 %v8529_v30, %v10335_v59  ;;  %v809_v32 = vpop.f32.mrb[9].mxu0  ;;  %8687 = vmatmul.mubr.msk.f32.gmra.mrb[114].mxu0 %vm266_vm0, %v220_v26  ;;  %v1779_v4 = vld [vmem:[#allocation2 + $0x10] sm:$0xff] }
 0x16e   :  { %1639 = vst.msk [vmem:[#allocation2 + $0x30] sm:$0xff] %vm1632_vm4, %v1494_v29  ;;  %v810_v33 = vadd.f32 %v10335_v59, %v809_v32  ;;  %8689 = vmatprep.mubr.msk.f32.mxu0 %vm266_vm0, %v221_v28  ;;  %v232_v29 = vld [vmem:[#allocation5 + $0x3f8] sm:$0xff] }
 0x16f   :  { %v1497_v35 = vmax.f32 %v815_v31, 0.0  ;;  %v233_v31 = vld [vmem:[#allocation5 + $0x400] sm:$0xff] }
 0x170   :  { %v1496_v37 = vmax.f32 %v810_v33, 0.0  ;;  %v8532_v38 = vpop.f32.mrb[10].mxu0  ;;  %v1782_v12 = vld [vmem:[#allocation2 + $0x28] sm:$0xff] }
 0x171   :  { %1642 = vst.msk [vmem:[#allocation2 + $0x48] sm:$0xff] %vm1632_vm4, %v1497_v35  ;;  %v825_v39 = vadd.f32 %v8532_v38, %v10335_v59  ;;  %v819_v40 = vpop.f32.mrb[11].mxu0  ;;  %8690 = vmatmul.mubr.msk.f32.gmra.mrb[116].mxu0 %vm266_vm0, %v222_v34  ;;  %v1781_v17 = vld [vmem:[#allocation2 + $0x20] sm:$0xff] }
 0x172   :  { %1641 = vst.msk [vmem:[#allocation2 + $0x40] sm:$0xff] %vm1632_vm4, %v1496_v37  ;;  %v820_v41 = vadd.f32 %v10335_v59, %v819_v40  ;;  %8692 = vmatprep.mubr.msk.f32.mxu0 %vm266_vm0, %v223_v36  ;;  %v234_v37 = vld [vmem:[#allocation5 + $0x408] sm:$0xff] }
 0x173   :  { %v1499_v43 = vmax.f32 %v825_v39, 0.0  ;;  %v235_v39 = vld [vmem:[#allocation5 + $0x410] sm:$0xff] }
 0x174   :  { %v1498_v45 = vmax.f32 %v820_v41, 0.0  ;;  %v8535_v46 = vpop.f32.mrb[12].mxu0  ;;  %v10372_v48 = vld [vmem:[#allocation2 + $0x38] sm:$0xff] }
 0x175   :  { %1644 = vst.msk [vmem:[#allocation2 + $0x58] sm:$0xff] %vm1632_vm4, %v1499_v43  ;;  %v835_v49 = vadd.f32 %v8535_v46, %v10335_v59  ;;  %v829_v50 = vpop.f32.mrb[13].mxu0  ;;  %8693 = vmatmul.mubr.msk.f32.gmra.mrb[118].mxu0 %vm266_vm0, %v224_v42  ;;  %v10377_v51 = vld [vmem:[#allocation2 + $0x30] sm:$0xff]  ;;  %v1790_v53 = vmax.f32 %v1778_v47, %v10372_v48  ;;  %v237_v47 = vld [vmem:[#allocation5 + $0x420] sm:$0xff] }
 0x176   :  { %1643 = vst.msk [vmem:[#allocation2 + $0x50] sm:$0xff] %vm1632_vm4, %v1498_v45  ;;  %v830_v54 = vadd.f32 %v10335_v59, %v829_v50  ;;  %8695 = vmatprep.mubr.msk.f32.mxu0 %vm266_vm0, %v225_v44  ;;  %v1789_v56 = vmax.f32 %v1777_v52, %v10377_v51  ;;  %v236_v45 = vld [vmem:[#allocation5 + $0x418] sm:$0xff] }
 0x177   :  { %v1501_v57 = vmax.f32 %v835_v49, 0.0  ;;  %1796 = vst.msk [vmem:[#allocation3 + $0x30] sm:$0xff] %vm1632_vm4, %v1790_v53 }
 0x178   :  { %v1500_v60 = vmax.f32 %v830_v54, 0.0  ;;  %v8538_v61 = vpop.f32.mrb[14].mxu0  ;;  %1795 = vst.msk [vmem:[#allocation3] sm:$0xff] %vm1632_vm4, %v1789_v56  ;;  %v10386_v63 = vld [vmem:[#allocation2 + $0x48] sm:$0xff] }
 0x179   :  { %1646 = vst.msk [vmem:[#allocation2 + $0x68] sm:$0xff] %vm1632_vm4, %v1501_v57  ;;  %v845_v0 = vadd.f32 %v8538_v61, %v10335_v59  ;;  %v839_v1 = vpop.f32.mrb[15].mxu0  ;;  %8696 = vmatmul.mubr.msk.f32.gmra.mrb[120].mxu0 %vm266_vm0, %v226_v55  ;;  %v1792_v2 = vmax.f32 %v1780_v62, %v10386_v63  ;;  %v10392_v3 = vld [vmem:[#allocation2 + $0x40] sm:$0xff]  ;;  %v238_v61 = vld [vmem:[#allocation5 + $0x428] sm:$0xff] }
 0x17a   :  { %1645 = vst.msk [vmem:[#allocation2 + $0x60] sm:$0xff] %vm1632_vm4, %v1500_v60  ;;  %v840_v5 = vadd.f32 %v10335_v59, %v839_v1  ;;  %8698 = vmatprep.mubr.msk.f32.mxu0 %vm266_vm0, %v227_v58  ;;  %v1791_v7 = vmax.f32 %v1779_v4, %v10392_v3  ;;  %v239_v1 = vld [vmem:[#allocation5 + $0x430] sm:$0xff] }
 0x17b   :  { %v1503_v8 = vmax.f32 %v845_v0, 0.0  ;;  %1798 = vst.msk [vmem:[#allocation3 + $0x90] sm:$0xff] %vm1632_vm4, %v1792_v2 }
 0x17c   :  { %v1502_v10 = vmax.f32 %v840_v5, 0.0  ;;  %v8541_v11 = vpop.f32.mrb[16].mxu0  ;;  %1797 = vst.msk [vmem:[#allocation3 + $0x60] sm:$0xff] %vm1632_vm4, %v1791_v7  ;;  %v10400_v13 = vld [vmem:[#allocation2 + $0x58] sm:$0xff] }
 0x17d   :  { %1648 = vst.msk [vmem:[#allocation2 + $0x78] sm:$0xff] %vm1632_vm4, %v1503_v8  ;;  %v855_v14 = vadd.f32 %v8541_v11, %v10335_v59  ;;  %v849_v15 = vpop.f32.mrb[17].mxu0  ;;  %8699 = vmatmul.mubr.msk.f32.gmra.mrb[122].mxu0 %vm266_vm0, %v228_v6  ;;  %v10405_v16 = vld [vmem:[#allocation2 + $0x50] sm:$0xff]  ;;  %v1794_v18 = vmax.f32 %v1782_v12, %v10400_v13 }
 0x17e   :  { %1647 = vst.msk [vmem:[#allocation2 + $0x70] sm:$0xff] %vm1632_vm4, %v1502_v10  ;;  %v850_v19 = vadd.f32 %v10335_v59, %v849_v15  ;;  %8701 = vmatprep.mubr.msk.f32.mxu0 %vm266_vm0, %v229_v9  ;;  %v1793_v21 = vmax.f32 %v1781_v17, %v10405_v16 }
 0x17f   :  { %v1505_v22 = vmax.f32 %v855_v14, 0.0  ;;  %1800 = vst.msk [vmem:[#allocation3 + $0xf0] sm:$0xff] %vm1632_vm4, %v1794_v18 }
 0x180   :  { %v1504_v24 = vmax.f32 %v850_v19, 0.0  ;;  %v8544_v25 = vpop.f32.mrb[18].mxu0  ;;  %1799 = vst.msk [vmem:[#allocation3 + $0xc0] sm:$0xff] %vm1632_vm4, %v1793_v21  ;;  %v1802_v52 = vld [vmem:[#allocation2 + $0x68] sm:$0xff] }
 0x181   :  { %1650 = vst.msk [vmem:[#allocation2 + $0x88] sm:$0xff] %vm1632_vm4, %v1505_v22  ;;  %v865_v26 = vadd.f32 %v8544_v25, %v10335_v59  ;;  %v859_v27 = vpop.f32.mrb[19].mxu0  ;;  %8702 = vmatmul.mubr.msk.f32.gmra.mrb[124].mxu0 %vm266_vm0, %v230_v20  ;;  %v1801_v56 = vld [vmem:[#allocation2 + $0x60] sm:$0xff] }
 0x182   :  { %1649 = vst.msk [vmem:[#allocation2 + $0x80] sm:$0xff] %vm1632_vm4, %v1504_v24  ;;  %v860_v28 = vadd.f32 %v10335_v59, %v859_v27  ;;  %8704 = vmatprep.mubr.msk.f32.mxu0 %vm266_vm0, %v231_v23  ;;  %v241_v19 = vld [vmem:[#allocation5 + $0x440] sm:$0xff] }
 0x183   :  { %v1507_v30 = vmax.f32 %v865_v26, 0.0 }
 0x184   :  { %v1506_v32 = vmax.f32 %v860_v28, 0.0  ;;  %v8547_v33 = vpop.f32.mrb[20].mxu0  ;;  %v1804_v7 = vld [vmem:[#allocation2 + $0x78] sm:$0xff] }
 0x185   :  { %1652 = vst.msk [vmem:[#allocation2 + $0x98] sm:$0xff] %vm1632_vm4, %v1507_v30  ;;  %v875_v34 = vadd.f32 %v8547_v33, %v10335_v59  ;;  %v869_v35 = vpop.f32.mrb[21].mxu0  ;;  %8705 = vmatmul.mubr.msk.f32.gmra.mrb[126].mxu0 %vm266_vm0, %v232_v29  ;;  %v1803_v12 = vld [vmem:[#allocation2 + $0x70] sm:$0xff] }
 0x186   :  { %1651 = vst.msk [vmem:[#allocation2 + $0x90] sm:$0xff] %vm1632_vm4, %v1506_v32  ;;  %v870_v36 = vadd.f32 %v10335_v59, %v869_v35  ;;  %8707 = vmatprep.mubr.msk.f32.mxu0 %vm266_vm0, %v233_v31  ;;  %v242_v29 = vld [vmem:[#allocation5 + $0x448] sm:$0xff]  ;;  %v243_v32 = vld [vmem:[#allocation5 + $0x450] sm:$0xff] }
 0x187   :  { %v1509_v38 = vmax.f32 %v875_v34, 0.0 }
 0x188   :  { %v1508_v40 = vmax.f32 %v870_v36, 0.0  ;;  %v8550_v41 = vpop.f32.mrb[22].mxu0  ;;  %v1806_v23 = vld [vmem:[#allocation2 + $0x88] sm:$0xff] }
 0x189   :  { %1654 = vst.msk [vmem:[#allocation2 + $0xa8] sm:$0xff] %vm1632_vm4, %v1509_v38  ;;  %v885_v42 = vadd.f32 %v8550_v41, %v10335_v59  ;;  %v879_v43 = vpop.f32.mrb[23].mxu0  ;;  %8708 = vmatmul.mubr.msk.f32.gmra.mrb[128].mxu0 %vm266_vm0, %v234_v37  ;;  %v1805_v27 = vld [vmem:[#allocation2 + $0x80] sm:$0xff] }
 0x18a   :  { %1653 = vst.msk [vmem:[#allocation2 + $0xa0] sm:$0xff] %vm1632_vm4, %v1508_v40  ;;  %v880_v44 = vadd.f32 %v10335_v59, %v879_v43  ;;  %8710 = vmatprep.mubr.msk.f32.mxu0 %vm266_vm0, %v235_v39  ;;  %v245_v41 = vld [vmem:[#allocation5 + $0x460] sm:$0xff] }
 0x18b   :  { %v1511_v46 = vmax.f32 %v885_v42, 0.0 }
 0x18c   :  { %v1510_v49 = vmax.f32 %v880_v44, 0.0  ;;  %v8553_v50 = vpop.f32.mrb[24].mxu0  ;;  %v10432_v53 = vld [vmem:[#allocation2 + $0x98] sm:$0xff] }
 0x18d   :  { %1656 = vst.msk [vmem:[#allocation2 + $0xb8] sm:$0xff] %vm1632_vm4, %v1511_v46  ;;  %v895_v54 = vadd.f32 %v8553_v50, %v10335_v59  ;;  %v889_v55 = vpop.f32.mrb[25].mxu0  ;;  %8711 = vmatmul.mubr.msk.f32.gmra.mrb[130].mxu0 %vm266_vm0, %v236_v45  ;;  %v10437_v57 = vld [vmem:[#allocation2 + $0x90] sm:$0xff]  ;;  %v1814_v58 = vmax.f32 %v1802_v52, %v10432_v53 }
 0x18e   :  { %1655 = vst.msk [vmem:[#allocation2 + $0xb0] sm:$0xff] %vm1632_vm4, %v1510_v49  ;;  %v890_v60 = vadd.f32 %v10335_v59, %v889_v55  ;;  %8713 = vmatprep.mubr.msk.f32.mxu0 %vm266_vm0, %v237_v47  ;;  %v1813_v62 = vmax.f32 %v1801_v56, %v10437_v57  ;;  %v246_v46 = vld [vmem:[#allocation5 + $0x468] sm:$0xff]  ;;  %v247_v49 = vld [vmem:[#allocation5 + $0x470] sm:$0xff] }
 0x18f   :  { %v1513_v0 = vmax.f32 %v895_v54, 0.0  ;;  %v10445_v2 = vmax.f32 %v1814_v58, %v10372_v48  ;;  %v248_v58 = vld [vmem:[#allocation5 + $0x478] sm:$0xff] }
 0x190   :  { %v1512_v4 = vmax.f32 %v890_v60, 0.0  ;;  %v8556_v5 = vpop.f32.mrb[26].mxu0  ;;  %v1819_v6 = vmax.f32 %v1813_v62, %v10377_v51  ;;  %v10448_v8 = vld [vmem:[#allocation2 + $0xa8] sm:$0xff]  ;;  %v240_v51 = vld [vmem:[#allocation5 + $0x438] sm:$0xff] }
 0x191   :  { %1658 = vst.msk [vmem:[#allocation2 + $0xc8] sm:$0xff] %vm1632_vm4, %v1513_v0  ;;  %v905_v9 = vadd.f32 %v8556_v5, %v10335_v59  ;;  %v899_v10 = vpop.f32.mrb[27].mxu0  ;;  %8714 = vmatmul.mubr.msk.f32.gmra.mrb[132].mxu0 %vm266_vm0, %v238_v61  ;;  %v1816_v11 = vmax.f32 %v1804_v7, %v10448_v8  ;;  %v10454_v14 = vld [vmem:[#allocation2 + $0xa0] sm:$0xff] }
 0x192   :  { %1657 = vst.msk [vmem:[#allocation2 + $0xc0] sm:$0xff] %vm1632_vm4, %v1512_v4  ;;  %v900_v48 = vadd.f32 %v10335_v59, %v899_v10  ;;  %1831 = vrot.lane.b32.xlu0 %v1819_v6, %s10095_s5  ;;  %8716 = vmatprep.mubr.msk.f32.mxu0 %vm266_vm0, %v239_v1  ;;  %v1815_v15 = vmax.f32 %v1803_v12, %v10454_v14 }
 0x193   :  { %v1515_v17 = vmax.f32 %v905_v9, 0.0  ;;  %v1822_v18 = vmax.f32 %v1816_v11, %v10386_v63 }
 0x194   :  { %v1514_v20 = vmax.f32 %v900_v48, 0.0  ;;  %v8559_v21 = vpop.f32.mrb[28].mxu0  ;;  %v10463_v22 = vmax.f32 %v1815_v15, %v10392_v3  ;;  %v10465_v24 = vld [vmem:[#allocation2 + $0xb8] sm:$0xff] }
 0x195   :  { %1660 = vst.msk [vmem:[#allocation2 + $0xd8] sm:$0xff] %vm1632_vm4, %v1515_v17  ;;  %v915_v25 = vadd.f32 %v8559_v21, %v10335_v59  ;;  %v909_v26 = vpop.f32.mrb[29].mxu0  ;;  %8717 = vmatmul.mubr.msk.f32.gmra.mrb[134].mxu0 %vm266_vm0, %v240_v51  ;;  %v10470_v28 = vld [vmem:[#allocation2 + $0xb0] sm:$0xff]  ;;  %v1818_v63 = vmax.f32 %v1806_v23, %v10465_v24 }
 0x196   :  { %1659 = vst.msk [vmem:[#allocation2 + $0xd0] sm:$0xff] %vm1632_vm4, %v1514_v20  ;;  %v910_v3 = vadd.f32 %v10335_v59, %v909_v26  ;;  %1837 = vrot.lane.b32.xlu0 %v1822_v18, %s10095_s5  ;;  %8719 = vmatprep.mubr.msk.f32.mxu0 %vm266_vm0, %v241_v19  ;;  %v1817_v30 = vmax.f32 %v1805_v27, %v10470_v28 }
 0x197   :  { %v1517_v31 = vmax.f32 %v915_v25, 0.0  ;;  %v10479_v33 = vmax.f32 %v1818_v63, %v10400_v13  ;;  %v244_v13 = vld [vmem:[#allocation5 + $0x458] sm:$0xff] }
 0x198   :  { %v1516_v34 = vmax.f32 %v910_v3, 0.0  ;;  %v8562_v35 = vpop.f32.mrb[30].mxu0  ;;  %v10482_v36 = vmax.f32 %v1817_v30, %v10405_v16  ;;  %v1857_v0 = vld [vmem:[#allocation2 + $0xc8] sm:$0xff] }
 0x199   :  { %1662 = vst.msk [vmem:[#allocation2 + $0xe8] sm:$0xff] %vm1632_vm4, %v1517_v31  ;;  %v925_v37 = vadd.f32 %v8562_v35, %v10335_v59  ;;  %v919_v38 = vpop.f32.mrb[31].mxu0  ;;  %8720 = vmatmul.mubr.msk.f32.gmra.mrb[136].mxu0 %vm266_vm0, %v242_v29  ;;  %v1856_v7 = vld [vmem:[#allocation2 + $0xc0] sm:$0xff] }
 0x19a   :  { %1661 = vst.msk [vmem:[#allocation2 + $0xe0] sm:$0xff] %vm1632_vm4, %v1516_v34  ;;  %v920_v39 = vadd.f32 %v10335_v59, %v919_v38  ;;  %8722 = vmatprep.mubr.msk.f32.mxu0 %vm266_vm0, %v243_v32 }
 0x19b   :  { %v1519_v40 = vmax.f32 %v925_v37, 0.0 }
 0x19c   :  { %v1518_v42 = vmax.f32 %v920_v39, 0.0  ;;  %v8565_v43 = vpop.f32.mrb[32].mxu0  ;;  %v1859_v18 = vld [vmem:[#allocation2 + $0xd8] sm:$0xff] }
 0x19d   :  { %1664 = vst.msk [vmem:[#allocation2 + $0xf8] sm:$0xff] %vm1632_vm4, %v1519_v40  ;;  %v935_v16 = vadd.f32 %v8565_v43, %v10335_v59  ;;  %v929_v44 = vpop.f32.mrb[33].mxu0  ;;  %8723 = vmatmul.mubr.msk.f32.gmra.mrb[138].mxu0 %vm266_vm0, %v244_v13  ;;  %v1858_v25 = vld [vmem:[#allocation2 + $0xd0] sm:$0xff] }
 0x19e   :  { %1663 = vst.msk [vmem:[#allocation2 + $0xf0] sm:$0xff] %vm1632_vm4, %v1518_v42  ;;  %v930_v45 = vadd.f32 %v10335_v59, %v929_v44  ;;  %8725 = vmatprep.mubr.msk.f32.mxu0 %vm266_vm0, %v245_v41 }
 0x19f   :  { %v1521_v47 = vmax.f32 %v935_v16, 0.0 }
 0x1a0   :  { %v1520_v50 = vmax.f32 %v930_v45, 0.0  ;;  %v8568_v52 = vpop.f32.mrb[34].mxu0  ;;  %v1861_v31 = vld [vmem:[#allocation2 + $0xe8] sm:$0xff] }
 0x1a1   :  { %1666 = vst.msk [vmem:[#allocation2 + $0x108] sm:$0xff] %vm1632_vm4, %v1521_v47  ;;  %v945_v54 = vadd.f32 %v8568_v52, %v10335_v59  ;;  %v939_v55 = vpop.f32.mrb[35].mxu0  ;;  %8726 = vmatmul.mubr.msk.f32.gmra.mrb[140].mxu0 %vm266_vm0, %v246_v46  ;;  %v1860_v37 = vld [vmem:[#allocation2 + $0xe0] sm:$0xff] }
 0x1a2   :  { %1665 = vst.msk [vmem:[#allocation2 + $0x100] sm:$0xff] %vm1632_vm4, %v1520_v50  ;;  %v940_v56 = vadd.f32 %v10335_v59, %v939_v55  ;;  %8728 = vmatprep.mubr.msk.f32.mxu0 %vm266_vm0, %v247_v49 }
 0x1a3   :  { %v1523_v60 = vmax.f32 %v945_v54, 0.0 }
 0x1a4   :  { %v1522_v61 = vmax.f32 %v940_v56, 0.0  ;;  %v8571_v62 = vpop.f32.mrb[36].mxu0  ;;  %v10502_v1 = vld [vmem:[#allocation2 + $0xf8] sm:$0xff] }
 0x1a5   :  { %1668 = vst.msk [vmem:[#allocation2 + $0x118] sm:$0xff] %vm1632_vm4, %v1523_v60  ;;  %v955_v4 = vadd.f32 %v8571_v62, %v10335_v59  ;;  %v949_v5 = vpop.f32.mrb[37].mxu0  ;;  %8729 = vmatmul.mubr.msk.f32.gmra.mrb[142].mxu0 %vm266_vm0, %v248_v58  ;;  %v10507_v6 = vld [vmem:[#allocation2 + $0xf0] sm:$0xff]  ;;  %v1869_v9 = vmax.f32 %v1857_v0, %v10502_v1 }
 0x1a6   :  { %1667 = vst.msk [vmem:[#allocation2 + $0x110] sm:$0xff] %vm1632_vm4, %v1522_v61  ;;  %v950_v10 = vadd.f32 %v10335_v59, %v949_v5  ;;  %v1868_v11 = vmax.f32 %v1856_v7, %v10507_v6 }
 0x1a7   :  { %v1525_v12 = vmax.f32 %v955_v4, 0.0  ;;  %v1875_v48 = vmax.f32 %v1869_v9, %v10432_v53 }
 0x1a8   :  { %v1524_v51 = vmax.f32 %v950_v10, 0.0  ;;  %v8574_v15 = vpop.f32.mrb[38].mxu0  ;;  %v1874_v17 = vmax.f32 %v1868_v11, %v10437_v57  ;;  %v10515_v19 = vld [vmem:[#allocation2 + $0x108] sm:$0xff] }
 0x1a9   :  { %1670 = vst.msk [vmem:[#allocation2 + $0x128] sm:$0xff] %vm1632_vm4, %v1525_v12  ;;  %v965_v20 = vadd.f32 %v8574_v15, %v10335_v59  ;;  %v959_v21 = vpop.f32.mrb[39].mxu0  ;;  %v1871_v23 = vmax.f32 %v1859_v18, %v10515_v19  ;;  %1881 = vst.msk [vmem:[#allocation3 + $0x38] sm:$0xff] %vm1632_vm4, %v1875_v48  ;;  %v10521_v26 = vld [vmem:[#allocation2 + $0x100] sm:$0xff] }
 0x1aa   :  { %1669 = vst.msk [vmem:[#allocation2 + $0x120] sm:$0xff] %vm1632_vm4, %v1524_v51  ;;  %v960_v53 = vadd.f32 %v10335_v59, %v959_v21  ;;  %1880 = vst.msk [vmem:[#allocation3 + $0x8] sm:$0xff] %vm1632_vm4, %v1874_v17  ;;  %v1870_v57 = vmax.f32 %v1858_v25, %v10521_v26 }
 0x1ab   :  { %v1527_v27 = vmax.f32 %v965_v20, 0.0  ;;  %v1877_v63 = vmax.f32 %v1871_v23, %v10448_v8 }
 0x1ac   :  { %v1526_v3 = vmax.f32 %v960_v53, 0.0  ;;  %v8577_v29 = vpop.f32.mrb[40].mxu0  ;;  %v1876_v30 = vmax.f32 %v1870_v57, %v10454_v14  ;;  %v10529_v32 = vld [vmem:[#allocation2 + $0x118] sm:$0xff] }
 0x1ad   :  { %1672 = vst.msk [vmem:[#allocation2 + $0x138] sm:$0xff] %vm1632_vm4, %v1527_v27  ;;  %v975_v34 = vadd.f32 %v8577_v29, %v10335_v59  ;;  %v969_v35 = vpop.f32.mrb[41].mxu0  ;;  %1883 = vst.msk [vmem:[#allocation3 + $0x98] sm:$0xff] %vm1632_vm4, %v1877_v63  ;;  %v10534_v38 = vld [vmem:[#allocation2 + $0x110] sm:$0xff]  ;;  %v1873_v39 = vmax.f32 %v1861_v31, %v10529_v32 }
 0x1ae   :  { %1671 = vst.msk [vmem:[#allocation2 + $0x130] sm:$0xff] %vm1632_vm4, %v1526_v3  ;;  %v970_v8 = vadd.f32 %v10335_v59, %v969_v35  ;;  %v1872_v14 = vmax.f32 %v1860_v37, %v10534_v38  ;;  %1882 = vst.msk [vmem:[#allocation3 + $0x68] sm:$0xff] %vm1632_vm4, %v1876_v30 }
 0x1af   :  { %v1529_v13 = vmax.f32 %v975_v34, 0.0  ;;  %v1879_v40 = vmax.f32 %v1873_v39, %v10465_v24 }
 0x1b0   :  { %v1528_v41 = vmax.f32 %v970_v8, 0.0  ;;  %v8580_v42 = vpop.f32.mrb[42].mxu0  ;;  %v1878_v43 = vmax.f32 %v1872_v14, %v10470_v28  ;;  %v1887_v4 = vld [vmem:[#allocation2 + $0x128] sm:$0xff] }
 0x1b1   :  { %1674 = vst.msk [vmem:[#allocation2 + $0x148] sm:$0xff] %vm1632_vm4, %v1529_v13  ;;  %v985_v16 = vadd.f32 %v8580_v42, %v10335_v59  ;;  %v979_v44 = vpop.f32.mrb[43].mxu0  ;;  %1885 = vst.msk [vmem:[#allocation3 + $0xf8] sm:$0xff] %vm1632_vm4, %v1879_v40  ;;  %v1886_v10 = vld [vmem:[#allocation2 + $0x120] sm:$0xff] }
 0x1b2   :  { %1673 = vst.msk [vmem:[#allocation2 + $0x140] sm:$0xff] %vm1632_vm4, %v1528_v41  ;;  %v980_v45 = vadd.f32 %v10335_v59, %v979_v44  ;;  %1884 = vst.msk [vmem:[#allocation3 + $0xc8] sm:$0xff] %vm1632_vm4, %v1878_v43 }
 0x1b3   :  { %v1531_v46 = vmax.f32 %v985_v16, 0.0 }
 0x1b4   :  { %v1530_v47 = vmax.f32 %v980_v45, 0.0  ;;  %v8583_v24 = vpop.f32.mrb[44].mxu0  ;;  %v1889_v23 = vld [vmem:[#allocation2 + $0x138] sm:$0xff] }
 0x1b5   :  { %1676 = vst.msk [vmem:[#allocation2 + $0x158] sm:$0xff] %vm1632_vm4, %v1531_v46  ;;  %v995_v28 = vadd.f32 %v8583_v24, %v10335_v59  ;;  %v989_v49 = vpop.f32.mrb[45].mxu0  ;;  %v1888_v63 = vld [vmem:[#allocation2 + $0x130] sm:$0xff] }
 0x1b6   :  { %1675 = vst.msk [vmem:[#allocation2 + $0x150] sm:$0xff] %vm1632_vm4, %v1530_v47  ;;  %v990_v50 = vadd.f32 %v10335_v59, %v989_v49 }
 0x1b7   :  { %v1533_v52 = vmax.f32 %v995_v28, 0.0 }
 0x1b8   :  { %v1532_v54 = vmax.f32 %v990_v50, 0.0  ;;  %v8586_v55 = vpop.f32.mrb[46].mxu0  ;;  %v1891_v37 = vld [vmem:[#allocation2 + $0x148] sm:$0xff] }
 0x1b9   :  { %1678 = vst.msk [vmem:[#allocation2 + $0x168] sm:$0xff] %vm1632_vm4, %v1533_v52  ;;  %v1005_v56 = vadd.f32 %v8586_v55, %v10335_v59  ;;  %v999_v58 = vpop.f32.mrb[47].mxu0  ;;  %v1890_v13 = vld [vmem:[#allocation2 + $0x140] sm:$0xff] }
 0x1ba   :  { %1677 = vst.msk [vmem:[#allocation2 + $0x160] sm:$0xff] %vm1632_vm4, %v1532_v54  ;;  %v1000_v60 = vadd.f32 %v10335_v59, %v999_v58 }
 0x1bb   :  { %v1535_v61 = vmax.f32 %v1005_v56, 0.0 }
 0x1bc   :  { %v1534_v62 = vmax.f32 %v1000_v60, 0.0  ;;  %v8589_v0 = vpop.f32.mrb[48].mxu0  ;;  %v10557_v5 = vld [vmem:[#allocation2 + $0x158] sm:$0xff] }
 0x1bd   :  { %1680 = vst.msk [vmem:[#allocation2 + $0x178] sm:$0xff] %vm1632_vm4, %v1535_v61  ;;  %v1015_v7 = vadd.f32 %v8589_v0, %v10335_v59  ;;  %v1009_v9 = vpop.f32.mrb[49].mxu0  ;;  %v10561_v11 = vld [vmem:[#allocation2 + $0x150] sm:$0xff]  ;;  %v1899_v12 = vmax.f32 %v1887_v4, %v10557_v5 }
 0x1be   :  { %1679 = vst.msk [vmem:[#allocation2 + $0x170] sm:$0xff] %vm1632_vm4, %v1534_v62  ;;  %v1010_v48 = vadd.f32 %v10335_v59, %v1009_v9  ;;  %v1898_v51 = vmax.f32 %v1886_v10, %v10561_v11 }
 0x1bf   :  { %v1537_v15 = vmax.f32 %v1015_v7, 0.0  ;;  %v10568_v17 = vmax.f32 %v1899_v12, %v10502_v1 }
 0x1c0   :  { %v1536_v18 = vmax.f32 %v1010_v48, 0.0  ;;  %v8592_v20 = vpop.f32.mrb[50].mxu0  ;;  %v1904_v21 = vmax.f32 %v1898_v51, %v10507_v6  ;;  %v10571_v25 = vld [vmem:[#allocation2 + $0x168] sm:$0xff] }
 0x1c1   :  { %1682 = vst.msk [vmem:[#allocation2 + $0x188] sm:$0xff] %vm1632_vm4, %v1537_v15  ;;  %v1025_v53 = vadd.f32 %v8592_v20, %v10335_v59  ;;  %v1019_v57 = vpop.f32.mrb[51].mxu0  ;;  %v1901_v27 = vmax.f32 %v1889_v23, %v10571_v25  ;;  %v10576_v3 = vld [vmem:[#allocation2 + $0x160] sm:$0xff] }
 0x1c2   :  { %1681 = vst.msk [vmem:[#allocation2 + $0x180] sm:$0xff] %vm1632_vm4, %v1536_v18  ;;  %v1020_v1 = vadd.f32 %v10335_v59, %v1019_v57  ;;  %1916 = vrot.lane.b32.xlu1 %v1904_v21, %s10095_s5  ;;  %v1900_v6 = vmax.f32 %v1888_v63, %v10576_v3 }
 0x1c3   :  { %v1539_v29 = vmax.f32 %v1025_v53, 0.0  ;;  %v1907_v30 = vmax.f32 %v1901_v27, %v10515_v19 }
 0x1c4   :  { %v1538_v31 = vmax.f32 %v1020_v1, 0.0  ;;  %v8595_v34 = vpop.f32.mrb[52].mxu0  ;;  %v10584_v35 = vmax.f32 %v1900_v6, %v10521_v26  ;;  %v10586_v39 = vld [vmem:[#allocation2 + $0x178] sm:$0xff] }
 0x1c5   :  { %1684 = vst.msk [vmem:[#allocation2 + $0x198] sm:$0xff] %vm1632_vm4, %v1539_v29  ;;  %v1035_v8 = vadd.f32 %v8595_v34, %v10335_v59  ;;  %v1029_v14 = vpop.f32.mrb[53].mxu0  ;;  %v10590_v40 = vld [vmem:[#allocation2 + $0x170] sm:$0xff]  ;;  %v1903_v41 = vmax.f32 %v1891_v37, %v10586_v39 }
 0x1c6   :  { %1683 = vst.msk [vmem:[#allocation2 + $0x190] sm:$0xff] %vm1632_vm4, %v1538_v31  ;;  %v1030_v19 = vadd.f32 %v10335_v59, %v1029_v14  ;;  %1922 = vrot.lane.b32.xlu1 %v1907_v30, %s10095_s5  ;;  %v1902_v26 = vmax.f32 %v1890_v13, %v10590_v40 }
 0x1c7   :  { %v1541_v42 = vmax.f32 %v1035_v8, 0.0  ;;  %v10598_v43 = vmax.f32 %v1903_v41, %v10529_v32 }
 0x1c8   :  { %v1540_v16 = vmax.f32 %v1030_v19, 0.0  ;;  %v8598_v44 = vpop.f32.mrb[54].mxu0  ;;  %v10601_v45 = vmax.f32 %v1902_v26, %v10534_v38  ;;  %v1941_v7 = vld [vmem:[#allocation2 + $0x188] sm:$0xff] }
 0x1c9   :  { %1686 = vst.msk [vmem:[#allocation2 + $0x1a8] sm:$0xff] %vm1632_vm4, %v1541_v42  ;;  %v1045_v46 = vadd.f32 %v8598_v44, %v10335_v59  ;;  %v1039_v47 = vpop.f32.mrb[55].mxu0  ;;  %v1940_v48 = vld [vmem:[#allocation2 + $0x180] sm:$0xff] }
 0x1ca   :  { %1685 = vst.msk [vmem:[#allocation2 + $0x1a0] sm:$0xff] %vm1632_vm4, %v1540_v16  ;;  %v1040_v24 = vadd.f32 %v10335_v59, %v1039_v47 }
 0x1cb   :  { %v1543_v28 = vmax.f32 %v1045_v46, 0.0 }
 0x1cc   :  { %v1542_v49 = vmax.f32 %v1040_v24, 0.0  ;;  %v8601_v50 = vpop.f32.mrb[56].mxu0  ;;  %v1943_v63 = vld [vmem:[#allocation2 + $0x198] sm:$0xff] }
 0x1cd   :  { %1688 = vst.msk [vmem:[#allocation2 + $0x1b8] sm:$0xff] %vm1632_vm4, %v1543_v28  ;;  %v1055_v32 = vadd.f32 %v8601_v50, %v10335_v59  ;;  %v1049_v52 = vpop.f32.mrb[57].mxu0  ;;  %v1942_v31 = vld [vmem:[#allocation2 + $0x190] sm:$0xff] }
 0x1ce   :  { %1687 = vst.msk [vmem:[#allocation2 + $0x1b0] sm:$0xff] %vm1632_vm4, %v1542_v49  ;;  %v1050_v38 = vadd.f32 %v10335_v59, %v1049_v52 }
 0x1cf   :  { %v1545_v54 = vmax.f32 %v1055_v32, 0.0 }
 0x1d0   :  { %v1544_v55 = vmax.f32 %v1050_v38, 0.0  ;;  %v8604_v56 = vpop.f32.mrb[58].mxu0  ;;  %v1945_v19 = vld [vmem:[#allocation2 + $0x1a8] sm:$0xff] }
 0x1d1   :  { %1690 = vst.msk [vmem:[#allocation2 + $0x1c8] sm:$0xff] %vm1632_vm4, %v1545_v54  ;;  %v1065_v58 = vadd.f32 %v8604_v56, %v10335_v59  ;;  %v1059_v60 = vpop.f32.mrb[59].mxu0  ;;  %v1944_v44 = vld [vmem:[#allocation2 + $0x1a0] sm:$0xff] }
 0x1d2   :  { %1689 = vst.msk [vmem:[#allocation2 + $0x1c0] sm:$0xff] %vm1632_vm4, %v1544_v55  ;;  %v1060_v61 = vadd.f32 %v10335_v59, %v1059_v60 }
 0x1d3   :  { %v1547_v62 = vmax.f32 %v1065_v58, 0.0 }
 0x1d4   :  { %v1546_v0 = vmax.f32 %v1060_v61, 0.0  ;;  %v8607_v4 = vpop.f32.mrb[60].mxu0  ;;  %v10615_v9 = vld [vmem:[#allocation2 + $0x1b8] sm:$0xff] }
 0x1d5   :  { %1692 = vst.msk [vmem:[#allocation2 + $0x1d8] sm:$0xff] %vm1632_vm4, %v1547_v62  ;;  %v1075_v10 = vadd.f32 %v8607_v4, %v10335_v59  ;;  %v1069_v12 = vpop.f32.mrb[61].mxu0  ;;  %v10619_v51 = vld [vmem:[#allocation2 + $0x1b0] sm:$0xff]  ;;  %v1953_v15 = vmax.f32 %v1941_v7, %v10615_v9 }
 0x1d6   :  { %1691 = vst.msk [vmem:[#allocation2 + $0x1d0] sm:$0xff] %vm1632_vm4, %v1546_v0  ;;  %v1070_v18 = vadd.f32 %v10335_v59, %v1069_v12  ;;  %v1952_v20 = vmax.f32 %v1940_v48, %v10619_v51 }
 0x1d7   :  { %v1549_v21 = vmax.f32 %v1075_v10, 0.0  ;;  %v1959_v23 = vmax.f32 %v1953_v15, %v10557_v5 }
 0x1d8   :  { %v1548_v53 = vmax.f32 %v1070_v18, 0.0  ;;  %v8610_v57 = vpop.f32.mrb[62].mxu0  ;;  %v1958_v27 = vmax.f32 %v1952_v20, %v10561_v11  ;;  %v10627_v1 = vld [vmem:[#allocation2 + $0x1c8] sm:$0xff] }
 0x1d9   :  { %1694 = vst.msk [vmem:[#allocation2 + $0x1e8] sm:$0xff] %vm1632_vm4, %v1549_v21  ;;  %v1085_v6 = vadd.f32 %v8610_v57, %v10335_v59  ;;  %v1079_v29 = vpop.f32.mrb[63].mxu0  ;;  %v1955_v30 = vmax.f32 %v1943_v63, %v10627_v1  ;;  %1965 = vst.msk [vmem:[#allocation3 + $0x40] sm:$0xff] %vm1632_vm4, %v1959_v23  ;;  %v10633_v34 = vld [vmem:[#allocation2 + $0x1c0] sm:$0xff] }
 0x1da   :  { %1693 = vst.msk [vmem:[#allocation2 + $0x1e0] sm:$0xff] %vm1632_vm4, %v1548_v53  ;;  %v1080_v5 = vadd.f32 %v10335_v59, %v1079_v29  ;;  %1964 = vst.msk [vmem:[#allocation3 + $0x10] sm:$0xff] %vm1632_vm4, %v1958_v27  ;;  %v1954_v11 = vmax.f32 %v1942_v31, %v10633_v34 }
 0x1db   :  { %v1551_v37 = vmax.f32 %v1085_v6, 0.0  ;;  %v1961_v8 = vmax.f32 %v1955_v30, %v10571_v25 }
 0x1dc   :  { %v1550_v14 = vmax.f32 %v1080_v5, 0.0  ;;  %v8613_v13 = vpop.f32.mrb[64].mxu0  ;;  %v1960_v41 = vmax.f32 %v1954_v11, %v10576_v3  ;;  %v10641_v26 = vld [vmem:[#allocation2 + $0x1d8] sm:$0xff] }
 0x1dd   :  { %1696 = vst.msk [vmem:[#allocation2 + $0x1f8] sm:$0xff] %vm1632_vm4, %v1551_v37  ;;  %v1095_v42 = vadd.f32 %v8613_v13, %v10335_v59  ;;  %v1089_v16 = vpop.f32.mrb[65].mxu0  ;;  %1967 = vst.msk [vmem:[#allocation3 + $0xa0] sm:$0xff] %vm1632_vm4, %v1961_v8  ;;  %v10646_v46 = vld [vmem:[#allocation2 + $0x1d0] sm:$0xff]  ;;  %v1957_v47 = vmax.f32 %v1945_v19, %v10641_v26 }
 0x1de   :  { %1695 = vst.msk [vmem:[#allocation2 + $0x1f0] sm:$0xff] %vm1632_vm4, %v1550_v14  ;;  %v1090_v25 = vadd.f32 %v10335_v59, %v1089_v16  ;;  %v1956_v3 = vmax.f32 %v1944_v44, %v10646_v46  ;;  %1966 = vst.msk [vmem:[#allocation3 + $0x70] sm:$0xff] %vm1632_vm4, %v1960_v41  ;;  %v10686_v14 = vld [vmem:[#allocation10] ss:$0 sm:$0xff] }
 0x1df   :  { %v1553_v24 = vmax.f32 %v1095_v42, 0.0  ;;  %v1963_v28 = vmax.f32 %v1957_v47, %v10586_v39 }
 0x1e0   :  { %v1552_v49 = vmax.f32 %v1090_v25, 0.0  ;;  %v8616_v50 = vpop.f32.mrb[66].mxu0  ;;  %v1962_v32 = vmax.f32 %v1956_v3, %v10590_v40  ;;  %v1971_v18 = vld [vmem:[#allocation2 + $0x1e8] sm:$0xff] }
 0x1e1   :  { %1698 = vst.msk [vmem:[#allocation2 + $0x208] sm:$0xff] %vm1632_vm4, %v1553_v24  ;;  %v1105_v52 = vadd.f32 %v8616_v50, %v10335_v59  ;;  %v1099_v38 = vpop.f32.mrb[67].mxu0  ;;  %1969 = vst.msk [vmem:[#allocation3 + $0x100] sm:$0xff] %vm1632_vm4, %v1963_v28  ;;  %v1970_v53 = vld [vmem:[#allocation2 + $0x1e0] sm:$0xff] }
 0x1e2   :  { %1697 = vst.msk [vmem:[#allocation2 + $0x200] sm:$0xff] %vm1632_vm4, %v1552_v49  ;;  %v1100_v54 = vadd.f32 %v10335_v59, %v1099_v38  ;;  %1968 = vst.msk [vmem:[#allocation3 + $0xd0] sm:$0xff] %vm1632_vm4, %v1962_v32 }
 0x1e3   :  { %v1555_v55 = vmax.f32 %v1105_v52, 0.0 }
 0x1e4   :  { %v1554_v56 = vmax.f32 %v1100_v54, 0.0  ;;  %v8619_v39 = vpop.f32.mrb[68].mxu0  ;;  %v1973_v37 = vld [vmem:[#allocation2 + $0x1f8] sm:$0xff] }
 0x1e5   :  { %1700 = vst.msk [vmem:[#allocation2 + $0x218] sm:$0xff] %vm1632_vm4, %v1555_v55  ;;  %v1115_v40 = vadd.f32 %v8619_v39, %v10335_v59  ;;  %v1109_v58 = vpop.f32.mrb[69].mxu0  ;;  %v1972_v19 = vld [vmem:[#allocation2 + $0x1f0] sm:$0xff] }
 0x1e6   :  { %1699 = vst.msk [vmem:[#allocation2 + $0x210] sm:$0xff] %vm1632_vm4, %v1554_v56  ;;  %v1110_v60 = vadd.f32 %v10335_v59, %v1109_v58 }
 0x1e7   :  { %v1557_v61 = vmax.f32 %v1115_v40, 0.0 }
 0x1e8   :  { %v1556_v62 = vmax.f32 %v1110_v60, 0.0  ;;  %v8622_v0 = vpop.f32.mrb[70].mxu0  ;;  %v1975_v24 = vld [vmem:[#allocation2 + $0x208] sm:$0xff] }
 0x1e9   :  { %1702 = vst.msk [vmem:[#allocation2 + $0x228] sm:$0xff] %vm1632_vm4, %v1557_v61  ;;  %v1125_v4 = vadd.f32 %v8622_v0, %v10335_v59  ;;  %v1119_v7 = vpop.f32.mrb[71].mxu0  ;;  %v1974_v32 = vld [vmem:[#allocation2 + $0x200] sm:$0xff] }
 0x1ea   :  { %1701 = vst.msk [vmem:[#allocation2 + $0x220] sm:$0xff] %vm1632_vm4, %v1556_v62  ;;  %v1120_v10 = vadd.f32 %v10335_v59, %v1119_v7 }
 0x1eb   :  { %v1559_v12 = vmax.f32 %v1125_v4, 0.0 }
 0x1ec   :  { %v1558_v48 = vmax.f32 %v1120_v10, 0.0  ;;  %v8625_v15 = vpop.f32.mrb[72].mxu0  ;;  %v10669_v20 = vld [vmem:[#allocation2 + $0x218] sm:$0xff] }
 0x1ed   :  { %1704 = vst.msk [vmem:[#allocation2 + $0x238] sm:$0xff] %vm1632_vm4, %v1559_v12  ;;  %v1135_v21 = vadd.f32 %v8625_v15, %v10335_v59  ;;  %v1129_v23 = vpop.f32.mrb[73].mxu0  ;;  %v10673_v57 = vld [vmem:[#allocation2 + $0x210] sm:$0xff]  ;;  %v1983_v27 = vmax.f32 %v1971_v18, %v10669_v20 }
 0x1ee   :  { %1703 = vst.msk [vmem:[#allocation2 + $0x230] sm:$0xff] %vm1632_vm4, %v1558_v48  ;;  %v1130_v63 = vadd.f32 %v10335_v59, %v1129_v23  ;;  %v1982_v6 = vmax.f32 %v1970_v53, %v10673_v57 }
 0x1ef   :  { %v1561_v29 = vmax.f32 %v1135_v21, 0.0  ;;  %v10680_v30 = vmax.f32 %v1983_v27, %v10615_v9 }
 0x1f0   :  { %v1560_v31 = vmax.f32 %v1130_v63, 0.0  ;;  %v8628_v5 = vpop.f32.mrb[74].mxu0  ;;  %v1988_v11 = vmax.f32 %v1982_v6, %v10619_v51  ;;  %v10683_v8 = vld [vmem:[#allocation2 + $0x228] sm:$0xff] }
 0x1f1   :  { %1706 = vst.msk [vmem:[#allocation2 + $0x248] sm:$0xff] %vm1632_vm4, %v1561_v29  ;;  %v1145_v13 = vadd.f32 %v10686_v14, %v8628_v5  ;;  %v1139_v59 = vpop.f32.mrb[75].mxu0  ;;  %v1985_v41 = vmax.f32 %v1973_v37, %v10683_v8  ;;  %v10690_v42 = vld [vmem:[#allocation2 + $0x220] sm:$0xff] }
 0x1f2   :  { %1705 = vst.msk [vmem:[#allocation2 + $0x240] sm:$0xff] %vm1632_vm4, %v1560_v31  ;;  %v1140_v9 = vadd.f32 %v10686_v14, %v1139_v59  ;;  %2000 = vrot.lane.b32.xlu0 %v1988_v11, %s10095_s5  ;;  %v1984_v51 = vmax.f32 %v1972_v19, %v10690_v42 }
 0x1f3   :  { %v1563_v16 = vmax.f32 %v1145_v13, 0.0  ;;  %v1991_v44 = vmax.f32 %v1985_v41, %v10627_v1 }
 0x1f4   :  { %v1562_v47 = vmax.f32 %v1140_v9, 0.0  ;;  %v8631_v25 = vpop.f32.mrb[76].mxu0  ;;  %v10698_v3 = vmax.f32 %v1984_v51, %v10633_v34  ;;  %v10700_v28 = vld [vmem:[#allocation2 + $0x238] sm:$0xff] }
 0x1f5   :  { %1708 = vst.msk [vmem:[#allocation2 + $0x258] sm:$0xff] %vm1632_vm4, %v1563_v16  ;;  %v1155_v49 = vadd.f32 %v10686_v14, %v8631_v25  ;;  %v1149_v50 = vpop.f32.mrb[77].mxu0  ;;  %2006 = vrot.lane.b32.xlu1 %v1991_v44, %s10095_s5  ;;  %v10705_v52 = vld [vmem:[#allocation2 + $0x230] sm:$0xff]  ;;  %v1987_v1 = vmax.f32 %v1975_v24, %v10700_v28 }
 0x1f6   :  { %1707 = vst.msk [vmem:[#allocation2 + $0x250] sm:$0xff] %vm1632_vm4, %v1562_v47  ;;  %v1150_v34 = vadd.f32 %v10686_v14, %v1149_v50  ;;  %v1986_v38 = vmax.f32 %v1974_v32, %v10705_v52 }
 0x1f7   :  { %v1565_v54 = vmax.f32 %v1155_v49, 0.0  ;;  %v10712_v55 = vmax.f32 %v1987_v1, %v10641_v26 }
 0x1f8   :  { %v1564_v56 = vmax.f32 %v1150_v34, 0.0  ;;  %v8634_v39 = vpop.f32.mrb[78].mxu0  ;;  %v10715_v40 = vmax.f32 %v1986_v38, %v10646_v46  ;;  %v2025_v6 = vld [vmem:[#allocation2 + $0x248] sm:$0xff] }
 0x1f9   :  { %1710 = vst.msk [vmem:[#allocation2 + $0x268] sm:$0xff] %vm1632_vm4, %v1565_v54  ;;  %v1165_v58 = vadd.f32 %v10686_v14, %v8634_v39  ;;  %v1159_v60 = vpop.f32.mrb[79].mxu0  ;;  %v2024_v11 = vld [vmem:[#allocation2 + $0x240] sm:$0xff] }
 0x1fa   :  { %1709 = vst.msk [vmem:[#allocation2 + $0x260] sm:$0xff] %vm1632_vm4, %v1564_v56  ;;  %v1160_v61 = vadd.f32 %v10686_v14, %v1159_v60 }
 0x1fb   :  { %v1567_v62 = vmax.f32 %v1165_v58, 0.0 }
 0x1fc   :  { %v1566_v0 = vmax.f32 %v1160_v61, 0.0  ;;  %v8637_v4 = vpop.f32.mrb[80].mxu0  ;;  %v2027_v25 = vld [vmem:[#allocation2 + $0x258] sm:$0xff] }
 0x1fd   :  { %1712 = vst.msk [vmem:[#allocation2 + $0x278] sm:$0xff] %vm1632_vm4, %v1567_v62  ;;  %v1175_v26 = vadd.f32 %v10686_v14, %v8637_v4  ;;  %v1169_v7 = vpop.f32.mrb[81].mxu0 }
 0x1fe   :  { %1711 = vst.msk [vmem:[#allocation2 + $0x270] sm:$0xff] %vm1632_vm4, %v1566_v0  ;;  %v1170_v46 = vadd.f32 %v10686_v14, %v1169_v7 }
 0x1ff   :  { %v1569_v10 = vmax.f32 %v1175_v26, 0.0 }
 0x200   :  { %v1568_v12 = vmax.f32 %v1170_v46, 0.0  ;;  %v8640_v48 = vpop.f32.mrb[82].mxu0  ;;  %v2029_v60 = vld [vmem:[#allocation2 + $0x268] sm:$0xff] }
 0x201   :  { %1714 = vst.msk [vmem:[#allocation2 + $0x288] sm:$0xff] %vm1632_vm4, %v1569_v10  ;;  %v1185_v15 = vadd.f32 %v10686_v14, %v8640_v48  ;;  %v1179_v18 = vpop.f32.mrb[83].mxu0  ;;  %v2028_v4 = vld [vmem:[#allocation2 + $0x260] sm:$0xff] }
 0x202   :  { %1713 = vst.msk [vmem:[#allocation2 + $0x280] sm:$0xff] %vm1632_vm4, %v1568_v12  ;;  %v1180_v21 = vadd.f32 %v10686_v14, %v1179_v18 }
 0x203   :  { %v1571_v23 = vmax.f32 %v1185_v15, 0.0 }
 0x204   :  { %v1570_v53 = vmax.f32 %v1180_v21, 0.0  ;;  %v8643_v27 = vpop.f32.mrb[84].mxu0  ;;  %v1832_v63 = vpop.permute.xlu0 %1831  ;;  %v10729_v29 = vld [vmem:[#allocation2 + $0x278] sm:$0xff] }
 0x205   :  { %1716 = vst.msk [vmem:[#allocation2 + $0x298] sm:$0xff] %vm1632_vm4, %v1571_v23  ;;  %v1195_v31 = vadd.f32 %v10686_v14, %v8643_v27  ;;  %v1189_v5 = vpop.f32.mrb[85].mxu0  ;;  %v10734_v37 = vld [vmem:[#allocation2 + $0x270] sm:$0xff]  ;;  %v2037_v13 = vmax.f32 %v2025_v6, %v10729_v29 }
 0x206   :  { %1850 = vst.msk [vmem:[#allocation3] sm:$0xff] %vm1849_vm5, %v1832_v63  ;;  %v1190_v59 = vadd.f32 %v10686_v14, %v1189_v5  ;;  %v2036_v41 = vmax.f32 %v2024_v11, %v10734_v37 }
 0x207   :  { %1715 = vst.msk [vmem:[#allocation2 + $0x290] sm:$0xff] %vm1632_vm4, %v1570_v53  ;;  %v1573_v19 = vmax.f32 %v1195_v31, 0.0  ;;  %v2043_v9 = vmax.f32 %v2037_v13, %v10669_v20  ;;  %v2026_v20 = vld [vmem:[#allocation2 + $0x250] sm:$0xff] }
 0x208   :  { %v1572_v51 = vmax.f32 %v1190_v59, 0.0  ;;  %v8646_v16 = vpop.f32.mrb[86].mxu0  ;;  %v1838_v44 = vpop.permute.xlu0 %1837  ;;  %v2042_v47 = vmax.f32 %v2036_v41, %v10673_v57  ;;  %v10742_v24 = vld [vmem:[#allocation2 + $0x288] sm:$0xff] }
 0x209   :  { %1718 = vst.msk [vmem:[#allocation2 + $0x2a8] sm:$0xff] %vm1632_vm4, %v1573_v19  ;;  %v1205_v49 = vadd.f32 %v10686_v14, %v8646_v16  ;;  %v1199_v50 = vpop.f32.mrb[87].mxu0  ;;  %v2039_v32 = vmax.f32 %v2027_v25, %v10742_v24  ;;  %2049 = vst.msk [vmem:[#allocation3 + $0x48] sm:$0xff] %vm1632_vm4, %v2043_v9  ;;  %v10749_v1 = vld [vmem:[#allocation2 + $0x280] sm:$0xff] }
 0x20a   :  { %1853 = vst.msk [vmem:[#allocation3 + $0x90] sm:$0xff] %vm1849_vm5, %v1838_v44  ;;  %v1200_v57 = vadd.f32 %v10686_v14, %v1199_v50  ;;  %v2038_v34 = vmax.f32 %v2026_v20, %v10749_v1 }
 0x20b   :  { %1717 = vst.msk [vmem:[#allocation2 + $0x2a0] sm:$0xff] %vm1632_vm4, %v1572_v51  ;;  %2048 = vst.msk [vmem:[#allocation3 + $0x18] sm:$0xff] %vm1632_vm4, %v2042_v47  ;;  %v1575_v38 = vmax.f32 %v1205_v49, 0.0  ;;  %v2045_v54 = vmax.f32 %v2039_v32, %v10683_v8 }
 0x20c   :  { %v1574_v56 = vmax.f32 %v1200_v57, 0.0  ;;  %v8649_v39 = vpop.f32.mrb[88].mxu0  ;;  %v2044_v58 = vmax.f32 %v2038_v34, %v10690_v42  ;;  %v10757_v61 = vld [vmem:[#allocation2 + $0x298] sm:$0xff] }
 0x20d   :  { %1720 = vst.msk [vmem:[#allocation2 + $0x2b8] sm:$0xff] %vm1632_vm4, %v1575_v38  ;;  %v1215_v62 = vadd.f32 %v10686_v14, %v8649_v39  ;;  %v1209_v0 = vpop.f32.mrb[89].mxu0  ;;  %2051 = vst.msk [vmem:[#allocation3 + $0xa8] sm:$0xff] %vm1632_vm4, %v2045_v54  ;;  %v2041_v7 = vmax.f32 %v2029_v60, %v10757_v61 }
 0x20e   :  { %v10762_v26 = vld [vmem:[#allocation2 + $0x290] sm:$0xff]  ;;  %1719 = vst.msk [vmem:[#allocation2 + $0x2b0] sm:$0xff] %vm1632_vm4, %v1574_v56  ;;  %v1210_v8 = vadd.f32 %v10686_v14, %v1209_v0  ;;  %2050 = vst.msk [vmem:[#allocation3 + $0x78] sm:$0xff] %vm1632_vm4, %v2044_v58 }
 0x20f   :  { %v2040_v42 = vmax.f32 %v2028_v4, %v10762_v26  ;;  %v1577_v46 = vmax.f32 %v1215_v62, 0.0  ;;  %v2047_v10 = vmax.f32 %v2041_v7, %v10700_v28 }
 0x210   :  { %v1576_v12 = vmax.f32 %v1210_v8, 0.0  ;;  %v8652_v48 = vpop.f32.mrb[90].mxu0  ;;  %v2055_v16 = vld [vmem:[#allocation2 + $0x2a8] sm:$0xff] }
 0x211   :  { %v2046_v15 = vmax.f32 %v2040_v42, %v10705_v52  ;;  %1722 = vst.msk [vmem:[#allocation2 + $0x2c8] sm:$0xff] %vm1632_vm4, %v1577_v46  ;;  %v1225_v18 = vadd.f32 %v10686_v14, %v8652_v48  ;;  %v1219_v21 = vpop.f32.mrb[91].mxu0  ;;  %2053 = vst.msk [vmem:[#allocation3 + $0x108] sm:$0xff] %vm1632_vm4, %v2047_v10 }
 0x212   :  { %1721 = vst.msk [vmem:[#allocation2 + $0x2c0] sm:$0xff] %vm1632_vm4, %v1576_v12  ;;  %v1220_v23 = vadd.f32 %v10686_v14, %v1219_v21  ;;  %v2054_v49 = vld [vmem:[#allocation2 + $0x2a0] sm:$0xff] }
 0x213   :  { %2052 = vst.msk [vmem:[#allocation3 + $0xd8] sm:$0xff] %vm1632_vm4, %v2046_v15  ;;  %v1579_v53 = vmax.f32 %v1225_v18, 0.0 }
 0x214   :  { %v1578_v27 = vmax.f32 %v1220_v23, 0.0  ;;  %v8655_v28 = vpop.f32.mrb[92].mxu0  ;;  %v2057_v58 = vld [vmem:[#allocation2 + $0x2b8] sm:$0xff] }
 0x215   :  { %1724 = vst.msk [vmem:[#allocation2 + $0x2d8] sm:$0xff] %vm1632_vm4, %v1579_v53  ;;  %v1235_v52 = vadd.f32 %v10686_v14, %v8655_v28  ;;  %v1229_v63 = vpop.f32.mrb[93].mxu0  ;;  %v2056_v7 = vld [vmem:[#allocation2 + $0x2b0] sm:$0xff] }
 0x216   :  { %1723 = vst.msk [vmem:[#allocation2 + $0x2d0] sm:$0xff] %vm1632_vm4, %v1578_v27  ;;  %v1230_v6 = vadd.f32 %v10686_v14, %v1229_v63 }
 0x217   :  { %v1581_v31 = vmax.f32 %v1235_v52, 0.0 }
 0x218   :  { %v1580_v5 = vmax.f32 %v1230_v6, 0.0  ;;  %v8658_v11 = vpop.f32.mrb[94].mxu0  ;;  %v2059_v15 = vld [vmem:[#allocation2 + $0x2c8] sm:$0xff] }
 0x219   :  { %1726 = vst.msk [vmem:[#allocation2 + $0x2e8] sm:$0xff] %vm1632_vm4, %v1581_v31  ;;  %v1245_v13 = vadd.f32 %v10686_v14, %v8658_v11  ;;  %v1239_v59 = vpop.f32.mrb[95].mxu0  ;;  %v2058_v53 = vld [vmem:[#allocation2 + $0x2c0] sm:$0xff] }
 0x21a   :  { %1725 = vst.msk [vmem:[#allocation2 + $0x2e0] sm:$0xff] %vm1632_vm4, %v1580_v5  ;;  %v1240_v41 = vadd.f32 %v10686_v14, %v1239_v59 }
 0x21b   :  { %v1583_v19 = vmax.f32 %v1245_v13, 0.0 }
 0x21c   :  { %v1582_v9 = vmax.f32 %v1240_v41, 0.0  ;;  %v8661_v51 = vpop.f32.mrb[96].mxu0  ;;  %v10785_v44 = vld [vmem:[#allocation2 + $0x2d8] sm:$0xff] }
 0x21d   :  { %1728 = vst.msk [vmem:[#allocation2 + $0x2f8] sm:$0xff] %vm1632_vm4, %v1583_v19  ;;  %v1255_v47 = vadd.f32 %v10686_v14, %v8661_v51  ;;  %v1249_v25 = vpop.f32.mrb[97].mxu0  ;;  %v10789_v50 = vld [vmem:[#allocation2 + $0x2d0] sm:$0xff]  ;;  %v2067_v32 = vmax.f32 %v2055_v16, %v10785_v44 }
 0x21e   :  { %1727 = vst.msk [vmem:[#allocation2 + $0x2f0] sm:$0xff] %vm1632_vm4, %v1582_v9  ;;  %v1250_v20 = vadd.f32 %v10686_v14, %v1249_v25  ;;  %v2066_v57 = vmax.f32 %v2054_v49, %v10789_v50 }
 0x21f   :  { %v1585_v34 = vmax.f32 %v1255_v47, 0.0  ;;  %v10796_v38 = vmax.f32 %v2067_v32, %v10729_v29 }
 0x220   :  { %v1584_v54 = vmax.f32 %v1250_v20, 0.0  ;;  %v8664_v56 = vpop.f32.mrb[98].mxu0  ;;  %v2072_v39 = vmax.f32 %v2066_v57, %v10734_v37  ;;  %v10799_v60 = vld [vmem:[#allocation2 + $0x2e8] sm:$0xff] }
 0x221   :  { %1730 = vst.msk [vmem:[#allocation2 + $0x308] sm:$0xff] %vm1632_vm4, %v1585_v34  ;;  %v1265_v62 = vadd.f32 %v10686_v14, %v8664_v56  ;;  %v1259_v0 = vpop.f32.mrb[99].mxu0  ;;  %v2069_v4 = vmax.f32 %v2057_v58, %v10799_v60  ;;  %v10804_v8 = vld [vmem:[#allocation2 + $0x2e0] sm:$0xff] }
 0x222   :  { %1729 = vst.msk [vmem:[#allocation2 + $0x300] sm:$0xff] %vm1632_vm4, %v1584_v54  ;;  %v1260_v29 = vadd.f32 %v10686_v14, %v1259_v0  ;;  %2084 = vrot.lane.b32.xlu0 %v2072_v39, %s10095_s5  ;;  %v2068_v37 = vmax.f32 %v2056_v7, %v10804_v8 }
 0x223   :  { %v1587_v42 = vmax.f32 %v1265_v62, 0.0  ;;  %v2075_v46 = vmax.f32 %v2069_v4, %v10742_v24 }
 0x224   :  { %v1586_v10 = vmax.f32 %v1260_v29, 0.0  ;;  %v8667_v12 = vpop.f32.mrb[100].mxu0  ;;  %v10812_v48 = vmax.f32 %v2068_v37, %v10749_v1  ;;  %v10814_v18 = vld [vmem:[#allocation2 + $0x2f8] sm:$0xff] }
 0x225   :  { %1732 = vst.msk [vmem:[#allocation2 + $0x318] sm:$0xff] %vm1632_vm4, %v1587_v42  ;;  %v1275_v21 = vadd.f32 %v10686_v14, %v8667_v12  ;;  %v1269_v23 = vpop.f32.mrb[101].mxu0  ;;  %2090 = vrot.lane.b32.xlu1 %v2075_v46, %s10095_s5  ;;  %v10819_v27 = vld [vmem:[#allocation2 + $0x2f0] sm:$0xff]  ;;  %v2071_v24 = vmax.f32 %v2059_v15, %v10814_v18 }
 0x226   :  { %1731 = vst.msk [vmem:[#allocation2 + $0x310] sm:$0xff] %vm1632_vm4, %v1586_v10  ;;  %v1270_v1 = vadd.f32 %v10686_v14, %v1269_v23  ;;  %v2070_v28 = vmax.f32 %v2058_v53, %v10819_v27 }
 0x227   :  { %v1589_v52 = vmax.f32 %v1275_v21, 0.0  ;;  %v10826_v63 = vmax.f32 %v2071_v24, %v10757_v61 }
 0x228   :  { %v1588_v6 = vmax.f32 %v1270_v1, 0.0  ;;  %v8670_v31 = vpop.f32.mrb[102].mxu0  ;;  %v10829_v5 = vmax.f32 %v2070_v28, %v10762_v26  ;;  %v2109_v39 = vld [vmem:[#allocation2 + $0x308] sm:$0xff] }
 0x229   :  { %1734 = vst.msk [vmem:[#allocation2 + $0x328] sm:$0xff] %vm1632_vm4, %v1589_v52  ;;  %v1285_v11 = vadd.f32 %v10686_v14, %v8670_v31  ;;  %v1279_v13 = vpop.f32.mrb[103].mxu0  ;;  %v2108_v4 = vld [vmem:[#allocation2 + $0x300] sm:$0xff] }
 0x22a   :  { %1733 = vst.msk [vmem:[#allocation2 + $0x320] sm:$0xff] %vm1632_vm4, %v1588_v6  ;;  %v1280_v59 = vadd.f32 %v10686_v14, %v1279_v13 }
 0x22b   :  { %v1591_v41 = vmax.f32 %v1285_v11, 0.0 }
 0x22c   :  { %v1590_v19 = vmax.f32 %v1280_v59, 0.0  ;;  %v8673_v9 = vpop.f32.mrb[104].mxu0  ;;  %v2111_v53 = vld [vmem:[#allocation2 + $0x318] sm:$0xff] }
 0x22d   :  { %1736 = vst.msk [vmem:[#allocation2 + $0x338] sm:$0xff] %vm1632_vm4, %v1591_v41  ;;  %v1295_v61 = vadd.f32 %v10686_v14, %v8673_v9  ;;  %v1289_v51 = vpop.f32.mrb[105].mxu0 }
 0x22e   :  { %1735 = vst.msk [vmem:[#allocation2 + $0x330] sm:$0xff] %vm1632_vm4, %v1590_v19  ;;  %v1290_v26 = vadd.f32 %v10686_v14, %v1289_v51 }
 0x22f   :  { %v1593_v16 = vmax.f32 %v1295_v61, 0.0 }
 0x230   :  { %v1592_v47 = vmax.f32 %v1290_v26, 0.0  ;;  %v8676_v25 = vpop.f32.mrb[106].mxu0  ;;  %v2113_v9 = vld [vmem:[#allocation2 + $0x328] sm:$0xff] }
 0x231   :  { %1738 = vst.msk [vmem:[#allocation2 + $0x348] sm:$0xff] %vm1632_vm4, %v1593_v16  ;;  %v1305_v49 = vadd.f32 %v10686_v14, %v8676_v25  ;;  %v1299_v32 = vpop.f32.mrb[107].mxu0  ;;  %v2112_v16 = vld [vmem:[#allocation2 + $0x320] sm:$0xff] }
 0x232   :  { %1737 = vst.msk [vmem:[#allocation2 + $0x340] sm:$0xff] %vm1632_vm4, %v1592_v47  ;;  %v1300_v20 = vadd.f32 %v10686_v14, %v1299_v32 }
 0x233   :  { %v1595_v57 = vmax.f32 %v1305_v49, 0.0 }
 0x234   :  { %v1594_v34 = vmax.f32 %v1300_v20, 0.0  ;;  %v8679_v54 = vpop.f32.mrb[108].mxu0  ;;  %v1917_v56 = vpop.permute.xlu1 %1916  ;;  %v10843_v58 = vld [vmem:[#allocation2 + $0x338] sm:$0xff] }
 0x235   :  { %1740 = vst.msk [vmem:[#allocation2 + $0x358] sm:$0xff] %vm1632_vm4, %v1595_v57  ;;  %v1315_v62 = vadd.f32 %v10686_v14, %v8679_v54  ;;  %v1309_v0 = vpop.f32.mrb[109].mxu0  ;;  %v10848_v7 = vld [vmem:[#allocation2 + $0x330] sm:$0xff]  ;;  %v2121_v29 = vmax.f32 %v2109_v39, %v10843_v58 }
 0x236   :  { %1934 = vst.msk [vmem:[#allocation3 + $0x8] sm:$0xff] %vm1849_vm5, %v1917_v56  ;;  %v1310_v37 = vadd.f32 %v10686_v14, %v1309_v0  ;;  %v2120_v42 = vmax.f32 %v2108_v4, %v10848_v7 }
 0x237   :  { %1739 = vst.msk [vmem:[#allocation2 + $0x350] sm:$0xff] %vm1632_vm4, %v1594_v34  ;;  %v1597_v46 = vmax.f32 %v1315_v62, 0.0  ;;  %v2127_v10 = vmax.f32 %v2121_v29, %v10785_v44  ;;  %v2110_v44 = vld [vmem:[#allocation2 + $0x310] sm:$0xff] }
 0x238   :  { %v1596_v12 = vmax.f32 %v1310_v37, 0.0  ;;  %v8682_v15 = vpop.f32.mrb[110].mxu0  ;;  %v1923_v21 = vpop.permute.xlu1 %1922  ;;  %v2126_v23 = vmax.f32 %v2120_v42, %v10789_v50  ;;  %v10856_v24 = vld [vmem:[#allocation2 + $0x348] sm:$0xff] }
 0x239   :  { %1742 = vst.msk [vmem:[#allocation2 + $0x368] sm:$0xff] %vm1632_vm4, %v1597_v46  ;;  %v1325_v1 = vadd.f32 %v10686_v14, %v8682_v15  ;;  %v1319_v28 = vpop.f32.mrb[111].mxu0  ;;  %v2123_v52 = vmax.f32 %v2111_v53, %v10856_v24  ;;  %2133 = vst.msk [vmem:[#allocation3 + $0x50] sm:$0xff] %vm1632_vm4, %v2127_v10  ;;  %v10863_v6 = vld [vmem:[#allocation2 + $0x340] sm:$0xff]  ;;  %v2426_v10 = vld [vmem:[#allocation11 + $0x380] sm:$0xff] }
 0x23a   :  { %1937 = vst.msk [vmem:[#allocation3 + $0x98] sm:$0xff] %vm1849_vm5, %v1923_v21  ;;  %v1320_v50 = vadd.f32 %v10686_v14, %v1319_v28  ;;  %v2122_v31 = vmax.f32 %v2110_v44, %v10863_v6  ;;  %v3459_v53 = vld [vmem:[#allocation11 + $0x980] sm:$0xff] }
 0x23b   :  { %1741 = vst.msk [vmem:[#allocation2 + $0x360] sm:$0xff] %vm1632_vm4, %v1596_v12  ;;  %2132 = vst.msk [vmem:[#allocation3 + $0x20] sm:$0xff] %vm1632_vm4, %v2126_v23  ;;  %v1599_v11 = vmax.f32 %v1325_v1, 0.0  ;;  %v2129_v13 = vmax.f32 %v2123_v52, %v10799_v60  ;;  %v2427_v12 = vld [vmem:[#allocation11 + $0x388] sm:$0xff]  ;;  %v2410_v44 = vld [vmem:[#allocation11 + $0x300] sm:$0xff] }
 0x23c   :  { %v1598_v59 = vmax.f32 %v1320_v50, 0.0  ;;  %v8685_v41 = vpop.f32.mrb[112].mxu0  ;;  %v2128_v19 = vmax.f32 %v2122_v31, %v10804_v8  ;;  %v10871_v61 = vld [vmem:[#allocation2 + $0x358] sm:$0xff]  ;;  %v8753_v23 = vpack.c.bf16 %v2427_v12, %v2426_v10 }
 0x23d   :  { %1744 = vst.msk [vmem:[#allocation2 + $0x378] sm:$0xff] %vm1632_vm4, %v1599_v11  ;;  %v1335_v51 = vadd.f32 %v10686_v14, %v8685_v41  ;;  %v1329_v26 = vpop.f32.mrb[113].mxu0  ;;  %2135 = vst.msk [vmem:[#allocation3 + $0xb0] sm:$0xff] %vm1632_vm4, %v2129_v13  ;;  %v2125_v25 = vmax.f32 %v2113_v9, %v10871_v61  ;;  %v3460_v1 = vld [vmem:[#allocation11 + $0x988] sm:$0xff]  ;;  %v3443_v31 = vld [vmem:[#allocation11 + $0x900] sm:$0xff] }
 0x23e   :  { %v10876_v47 = vld [vmem:[#allocation2 + $0x350] sm:$0xff]  ;;  %1743 = vst.msk [vmem:[#allocation2 + $0x370] sm:$0xff] %vm1632_vm4, %v1598_v59  ;;  %v1330_v60 = vadd.f32 %v10686_v14, %v1329_v26  ;;  %2134 = vst.msk [vmem:[#allocation3 + $0x80] sm:$0xff] %vm1632_vm4, %v2128_v19  ;;  %v9041_v52 = vpack.c.bf16 %v3460_v1, %v3459_v53  ;;  %v2411_v50 = vld [vmem:[#allocation11 + $0x308] sm:$0xff]  ;;  %8754 = vmatprep.subr.bf16.mxu1 %v8753_v23 }
 0x23f   :  { %v2124_v8 = vmax.f32 %v2112_v16, %v10876_v47  ;;  %v1601_v49 = vmax.f32 %v1335_v51, 0.0  ;;  %v2131_v32 = vmax.f32 %v2125_v25, %v10814_v18  ;;  %v8755_v13 = vpack.c.bf16 %v2411_v50, %v2410_v44  ;;  %v3444_v59 = vld [vmem:[#allocation11 + $0x908] sm:$0xff]  ;;  %v2428_v41 = vld [vmem:[#allocation11 + $0x390] sm:$0xff]  ;;  %v2429_v19 = vld [vmem:[#allocation11 + $0x398] sm:$0xff] }
 0x240   :  { %v1600_v20 = vmax.f32 %v1330_v60, 0.0  ;;  %v8688_v57 = vpop.f32.mrb[114].mxu0  ;;  %9042 = vmatprep.subr.bf16.mxu0 %v9041_v52  ;;  %v9043_v16 = vpack.c.bf16 %v3444_v59, %v3443_v31  ;;  %v8757_v25 = vpack.c.bf16 %v2429_v19, %v2428_v41  ;;  %v3461_v60 = vld [vmem:[#allocation11 + $0x990] sm:$0xff] }
 0x241   :  { %v2130_v34 = vmax.f32 %v2124_v8, %v10819_v27  ;;  %1746 = vst.msk [vmem:[#allocation2 + $0x388] sm:$0xff] %vm1632_vm4, %v1601_v49  ;;  %v1345_v54 = vadd.f32 %v10686_v14, %v8688_v57  ;;  %v1339_v56 = vpop.f32.mrb[115].mxu0  ;;  %2137 = vst.msk [vmem:[#allocation3 + $0x110] sm:$0xff] %vm1632_vm4, %v2131_v32  ;;  %v3462_v8 = vld [vmem:[#allocation11 + $0x998] sm:$0xff]  ;;  %8756 = vmatpush3.bf16.msra.mxu1 %v8755_v13 }
 0x242   :  { %1745 = vst.msk [vmem:[#allocation2 + $0x380] sm:$0xff] %vm1632_vm4, %v1600_v20  ;;  %v1340_v39 = vadd.f32 %v10686_v14, %v1339_v56  ;;  %v2138_v26 = vld [vmem:[#allocation2 + $0x360] sm:$0xff]  ;;  %v9045_v57 = vpack.c.bf16 %v3462_v8, %v3461_v60  ;;  %9044 = vmatpush3.bf16.msra.mxu0 %v9043_v16  ;;  %8758 = vmatprep.subr.bf16.mxu1 %v8757_v25 }
 0x243   :  { %2136 = vst.msk [vmem:[#allocation3 + $0xe0] sm:$0xff] %vm1632_vm4, %v2130_v34  ;;  %v1603_v62 = vmax.f32 %v1345_v54, 0.0  ;;  %v2412_v34 = vld [vmem:[#allocation11 + $0x310] sm:$0xff]  ;;  %v2413_v54 = vld [vmem:[#allocation11 + $0x318] sm:$0xff] }
 0x244   :  { %v1602_v0 = vmax.f32 %v1340_v39, 0.0  ;;  %v8691_v18 = vpop.f32.mrb[116].mxu0  ;;  %9046 = vmatprep.subr.bf16.mxu0 %v9045_v57 }
 0x245   :  { %1748 = vst.msk [vmem:[#allocation2 + $0x398] sm:$0xff] %vm1632_vm4, %v1603_v62  ;;  %v1355_v27 = vadd.f32 %v10686_v14, %v8691_v18  ;;  %v1349_v4 = vpop.f32.mrb[117].mxu0  ;;  %v8759_v62 = vpack.c.bf16 %v2413_v54, %v2412_v34  ;;  %v3446_v18 = vld [vmem:[#allocation11 + $0x918] sm:$0xff] }
 0x246   :  { %1747 = vst.msk [vmem:[#allocation2 + $0x390] sm:$0xff] %vm1632_vm4, %v1602_v0  ;;  %v1350_v29 = vadd.f32 %v10686_v14, %v1349_v4  ;;  %v3445_v0 = vld [vmem:[#allocation11 + $0x910] sm:$0xff] }
 0x247   :  { %v1605_v37 = vmax.f32 %v1355_v27, 0.0  ;;  %v9047_v4 = vpack.c.bf16 %v3446_v18, %v3445_v0  ;;  %8760 = vmatpush3.bf16.msra.mxu1 %v8759_v62 }
 0x248   :  { %v1604_v42 = vmax.f32 %v1350_v29, 0.0  ;;  %v8694_v46 = vpop.f32.mrb[118].mxu0 }
 0x249   :  { %1750 = vst.msk [vmem:[#allocation2 + $0x3a8] sm:$0xff] %vm1632_vm4, %v1605_v37  ;;  %v1365_v15 = vadd.f32 %v10686_v14, %v8694_v46  ;;  %v1359_v21 = vpop.f32.mrb[119].mxu0  ;;  %v2141_v46 = vld [vmem:[#allocation2 + $0x378] sm:$0xff]  ;;  %9048 = vmatpush3.bf16.msra.mxu0 %v9047_v4 }
 0x24a   :  { %1749 = vst.msk [vmem:[#allocation2 + $0x3a0] sm:$0xff] %vm1632_vm4, %v1604_v42  ;;  %v1360_v28 = vadd.f32 %v10686_v14, %v1359_v21 }
 0x24b   :  { %v1607_v11 = vmax.f32 %v1365_v15, 0.0 }
 0x24c   :  { %v1606_v9 = vmax.f32 %v1360_v28, 0.0  ;;  %v8697_v51 = vpop.f32.mrb[120].mxu0 }
 0x24d   :  { %1752 = vst.msk [vmem:[#allocation2 + $0x3b8] sm:$0xff] %vm1632_vm4, %v1607_v11  ;;  %v1375_v49 = vadd.f32 %v10686_v14, %v8697_v51  ;;  %v1369_v32 = vpop.f32.mrb[121].mxu0  ;;  %v10901_v20 = vld [vmem:[#allocation2 + $0x390] sm:$0xff] }
 0x24e   :  { %1751 = vst.msk [vmem:[#allocation2 + $0x3b0] sm:$0xff] %vm1632_vm4, %v1606_v9  ;;  %v1370_v56 = vadd.f32 %v10686_v14, %v1369_v32  ;;  %v2150_v39 = vmax.f32 %v2138_v26, %v10901_v20 }
 0x24f   :  { %v1609_v27 = vmax.f32 %v1375_v49, 0.0 }
 0x250   :  { %v1608_v29 = vmax.f32 %v1370_v56, 0.0  ;;  %v8700_v37 = vpop.f32.mrb[122].mxu0  ;;  %v2156_v42 = vmax.f32 %v2150_v39, %v10848_v7  ;;  %v10907_v10 = vld [vmem:[#allocation2 + $0x3a8] sm:$0xff] }
 0x251   :  { %1754 = vst.msk [vmem:[#allocation2 + $0x3c8] sm:$0xff] %vm1632_vm4, %v1609_v27  ;;  %v1385_v12 = vadd.f32 %v10686_v14, %v8700_v37  ;;  %v1379_v15 = vpop.f32.mrb[123].mxu0  ;;  %v2153_v21 = vmax.f32 %v2141_v46, %v10907_v10 }
 0x252   :  { %1753 = vst.msk [vmem:[#allocation2 + $0x3c0] sm:$0xff] %vm1632_vm4, %v1608_v29  ;;  %v1380_v23 = vadd.f32 %v10686_v14, %v1379_v15  ;;  %2168 = vrot.lane.b32.xlu0 %v2156_v42, %s10095_s5  ;;  %v10944_v15 = vld [vmem:[#allocation2 + $0x398] sm:$0xff] }
 0x253   :  { %v1611_v53 = vmax.f32 %v1385_v12, 0.0  ;;  %v2159_v7 = vmax.f32 %v2153_v21, %v10856_v24 }
 0x254   :  { %v1610_v1 = vmax.f32 %v1380_v23, 0.0  ;;  %v8703_v28 = vpop.f32.mrb[124].mxu0 }
 0x255   :  { %1756 = vst.msk [vmem:[#allocation2 + $0x3d8] sm:$0xff] %vm1632_vm4, %v1611_v53  ;;  %v1395_v52 = vadd.f32 %v10686_v14, %v8703_v28  ;;  %v1389_v44 = vpop.f32.mrb[125].mxu0  ;;  %2174 = vrot.lane.b32.xlu1 %v2159_v7, %s10095_s5 }
 0x256   :  { %1755 = vst.msk [vmem:[#allocation2 + $0x3d0] sm:$0xff] %vm1632_vm4, %v1610_v1  ;;  %v1390_v50 = vadd.f32 %v10686_v14, %v1389_v44 }
 0x257   :  { %v1613_v31 = vmax.f32 %v1395_v52, 0.0 }
 0x258   :  { %v1612_v11 = vmax.f32 %v1390_v50, 0.0  ;;  %v8706_v13 = vpop.f32.mrb[126].mxu0  ;;  %v2193_v0 = vld [vmem:[#allocation2 + $0x3c8] sm:$0xff] }
 0x259   :  { %1758 = vst.msk [vmem:[#allocation2 + $0x3e8] sm:$0xff] %vm1632_vm4, %v1613_v31  ;;  %v1405_v24 = vadd.f32 %v10686_v14, %v8706_v13  ;;  %v1399_v59 = vpop.f32.mrb[127].mxu0  ;;  %v2192_v29 = vld [vmem:[#allocation2 + $0x3c0] sm:$0xff] }
 0x25a   :  { %1757 = vst.msk [vmem:[#allocation2 + $0x3e0] sm:$0xff] %vm1632_vm4, %v1612_v11  ;;  %v1400_v41 = vadd.f32 %v10686_v14, %v1399_v59 }
 0x25b   :  { %v1615_v19 = vmax.f32 %v1405_v24, 0.0 }
 0x25c   :  { %v1614_v9 = vmax.f32 %v1400_v41, 0.0  ;;  %v8709_v51 = vpop.f32.mrb[128].mxu0  ;;  %v2195_v52 = vld [vmem:[#allocation2 + $0x3d8] sm:$0xff] }
 0x25d   :  { %1760 = vst.msk [vmem:[#allocation2 + $0x3f8] sm:$0xff] %vm1632_vm4, %v1615_v19  ;;  %v1415_v26 = vadd.f32 %v10686_v14, %v8709_v51  ;;  %v1409_v16 = vpop.f32.mrb[129].mxu0  ;;  %v2194_v13 = vld [vmem:[#allocation2 + $0x3d0] sm:$0xff] }
 0x25e   :  { %1759 = vst.msk [vmem:[#allocation2 + $0x3f0] sm:$0xff] %vm1632_vm4, %v1614_v9  ;;  %v1410_v25 = vadd.f32 %v10686_v14, %v1409_v16  ;;  %v10962_v9 = vld [vmem:[#allocation2 + $0x3a0] sm:$0xff] }
 0x25f   :  { %v1617_v60 = vmax.f32 %v1415_v26, 0.0 }
 0x260   :  { %v1616_v8 = vmax.f32 %v1410_v25, 0.0  ;;  %v8712_v49 = vpop.f32.mrb[130].mxu0  ;;  %v2197_v25 = vld [vmem:[#allocation2 + $0x3e8] sm:$0xff] }
 0x261   :  { %1762 = vst.msk [vmem:[#allocation2 + $0x408] sm:$0xff] %vm1632_vm4, %v1617_v60  ;;  %v1425_v32 = vadd.f32 %v10686_v14, %v8712_v49  ;;  %v1419_v57 = vpop.f32.mrb[131].mxu0 }
 0x262   :  { %1761 = vst.msk [vmem:[#allocation2 + $0x400] sm:$0xff] %vm1632_vm4, %v1616_v8  ;;  %v1420_v34 = vadd.f32 %v10686_v14, %v1419_v57 }
 0x263   :  { %v1619_v54 = vmax.f32 %v1425_v32, 0.0  ;;  %v2196_v32 = vld [vmem:[#allocation2 + $0x3e0] sm:$0xff] }
 0x264   :  { %v1618_v56 = vmax.f32 %v1420_v34, 0.0  ;;  %v8715_v39 = vpop.f32.mrb[132].mxu0  ;;  %v2001_v62 = vpop.permute.xlu0 %2000  ;;  %v10933_v18 = vld [vmem:[#allocation2 + $0x3f8] sm:$0xff] }
 0x265   :  { %1764 = vst.msk [vmem:[#allocation2 + $0x418] sm:$0xff] %vm1632_vm4, %v1619_v54  ;;  %v1435_v27 = vadd.f32 %v10686_v14, %v8715_v39  ;;  %v1429_v4 = vpop.f32.mrb[133].mxu0  ;;  %v10938_v37 = vld [vmem:[#allocation2 + $0x3f0] sm:$0xff]  ;;  %v2205_v42 = vmax.f32 %v2193_v0, %v10933_v18 }
 0x266   :  { %2018 = vst.msk [vmem:[#allocation3 + $0x10] sm:$0xff] %vm1849_vm5, %v2001_v62  ;;  %v1430_v46 = vadd.f32 %v10686_v14, %v1429_v4  ;;  %v2204_v12 = vmax.f32 %v2192_v29, %v10938_v37  ;;  %v10979_v62 = vld [vmem:[#allocation2 + $0x3b0] sm:$0xff] }
 0x267   :  { %1763 = vst.msk [vmem:[#allocation2 + $0x410] sm:$0xff] %vm1632_vm4, %v1618_v56  ;;  %v1621_v21 = vmax.f32 %v1435_v27, 0.0  ;;  %v2007_v23 = vpop.permute.xlu1 %2006  ;;  %v2211_v53 = vmax.f32 %v2205_v42, %v10944_v15  ;;  %v10976_v56 = vld [vmem:[#allocation2 + $0x3b8] sm:$0xff] }
 0x268   :  { %v1620_v7 = vmax.f32 %v1430_v46, 0.0  ;;  %2021 = vst.msk [vmem:[#allocation3 + $0xa0] sm:$0xff] %vm1849_vm5, %v2007_v23  ;;  %v8718_v1 = vpop.f32.mrb[134].mxu0  ;;  %v2210_v28 = vmax.f32 %v2204_v12, %v10901_v20  ;;  %v10949_v44 = vld [vmem:[#allocation2 + $0x408] sm:$0xff]  ;;  %v2430_v23 = vld [vmem:[#allocation11 + $0x3a0] sm:$0xff] }
 0x269   :  { %1766 = vst.msk [vmem:[#allocation2 + $0x428] sm:$0xff] %vm1632_vm4, %v1621_v21  ;;  %v1445_v50 = vadd.f32 %v10686_v14, %v8718_v1  ;;  %v1439_v31 = vpop.f32.mrb[135].mxu0  ;;  %v2207_v11 = vmax.f32 %v2195_v52, %v10949_v44  ;;  %2217 = vst.msk [vmem:[#allocation3 + $0x58] sm:$0xff] %vm1632_vm4, %v2211_v53  ;;  %v10955_v24 = vld [vmem:[#allocation2 + $0x400] sm:$0xff] }
 0x26a   :  { %1765 = vst.msk [vmem:[#allocation2 + $0x420] sm:$0xff] %vm1632_vm4, %v1620_v7  ;;  %v1440_v59 = vadd.f32 %v10686_v14, %v1439_v31  ;;  %2216 = vst.msk [vmem:[#allocation3 + $0x28] sm:$0xff] %vm1632_vm4, %v2210_v28  ;;  %v2206_v20 = vmax.f32 %v2194_v13, %v10955_v24  ;;  %v2431_v53 = vld [vmem:[#allocation11 + $0x3a8] sm:$0xff]  ;;  %v3463_v7 = vld [vmem:[#allocation11 + $0x9a0] sm:$0xff] }
 0x26b   :  { %v1623_v41 = vmax.f32 %v1445_v50, 0.0  ;;  %v2213_v19 = vmax.f32 %v2207_v11, %v10907_v10  ;;  %v8761_v52 = vpack.c.bf16 %v2431_v53, %v2430_v23  ;;  %v3464_v50 = vld [vmem:[#allocation11 + $0x9a8] sm:$0xff]  ;;  %v2414_v31 = vld [vmem:[#allocation11 + $0x320] sm:$0xff]  ;;  %v3450_v23 = vld [vmem:[#allocation11 + $0x938] sm:$0xff] }
 0x26c   :  { %v1622_v51 = vmax.f32 %v1440_v59, 0.0  ;;  %v8721_v26 = vpop.f32.mrb[136].mxu0  ;;  %v2212_v16 = vmax.f32 %v2206_v20, %v10962_v9  ;;  %v10965_v60 = vld [vmem:[#allocation2 + $0x418] sm:$0xff]  ;;  %v9049_v59 = vpack.c.bf16 %v3464_v50, %v3463_v7 }
 0x26d   :  { %1768 = vst.msk [vmem:[#allocation2 + $0x438] sm:$0xff] %vm1632_vm4, %v1623_v41  ;;  %v1455_v8 = vadd.f32 %v10686_v14, %v8721_v26  ;;  %v1449_v49 = vpop.f32.mrb[137].mxu0  ;;  %2219 = vst.msk [vmem:[#allocation3 + $0xb8] sm:$0xff] %vm1632_vm4, %v2213_v19  ;;  %v2209_v10 = vmax.f32 %v2197_v25, %v10965_v60  ;;  %v2415_v20 = vld [vmem:[#allocation11 + $0x328] sm:$0xff]  ;;  %v3447_v41 = vld [vmem:[#allocation11 + $0x920] sm:$0xff]  ;;  %8762 = vmatprep.subr.bf16.mxu1 %v8761_v52 }
 0x26e   :  { %v10970_v57 = vld [vmem:[#allocation2 + $0x410] sm:$0xff]  ;;  %1767 = vst.msk [vmem:[#allocation2 + $0x430] sm:$0xff] %vm1632_vm4, %v1622_v51  ;;  %v1450_v34 = vadd.f32 %v10686_v14, %v1449_v49  ;;  %2218 = vst.msk [vmem:[#allocation3 + $0x88] sm:$0xff] %vm1632_vm4, %v2212_v16  ;;  %v8763_v51 = vpack.c.bf16 %v2415_v20, %v2414_v31  ;;  %v3448_v26 = vld [vmem:[#allocation11 + $0x928] sm:$0xff]  ;;  %9050 = vmatprep.subr.bf16.mxu0 %v9049_v59 }
 0x26f   :  { %v2208_v54 = vmax.f32 %v2196_v32, %v10970_v57  ;;  %v1625_v39 = vmax.f32 %v1455_v8, 0.0  ;;  %v2215_v0 = vmax.f32 %v2209_v10, %v10976_v56  ;;  %v9051_v25 = vpack.c.bf16 %v3448_v26, %v3447_v41  ;;  %v2432_v8 = vld [vmem:[#allocation11 + $0x3b0] sm:$0xff]  ;;  %v2433_v49 = vld [vmem:[#allocation11 + $0x3b8] sm:$0xff]  ;;  %v3467_v52 = vld [vmem:[#allocation11 + $0x9c0] sm:$0xff] }
 0x270   :  { %v1624_v27 = vmax.f32 %v1450_v34, 0.0  ;;  %v8724_v4 = vpop.f32.mrb[138].mxu0  ;;  %v3465_v32 = vld [vmem:[#allocation11 + $0x9b0] sm:$0xff]  ;;  %8764 = vmatpush3.bf16.msra.mxu1 %v8763_v51  ;;  %v2418_v59 = vld [vmem:[#allocation11 + $0x340] sm:$0xff]  ;;  %v2419_v41 = vld [vmem:[#allocation11 + $0x348] sm:$0xff] }
 0x271   :  { %v2214_v29 = vmax.f32 %v2208_v54, %v10979_v62  ;;  %1770 = vst.msk [vmem:[#allocation2 + $0x448] sm:$0xff] %vm1632_vm4, %v1625_v39  ;;  %v1465_v42 = vadd.f32 %v10686_v14, %v8724_v4  ;;  %v1459_v46 = vpop.f32.mrb[139].mxu0  ;;  %2221 = vst.msk [vmem:[#allocation3 + $0x118] sm:$0xff] %vm1632_vm4, %v2215_v0  ;;  %v8765_v54 = vpack.c.bf16 %v2433_v49, %v2432_v8  ;;  %v3466_v39 = vld [vmem:[#allocation11 + $0x9b8] sm:$0xff]  ;;  %v2416_v0 = vld [vmem:[#allocation11 + $0x330] sm:$0xff]  ;;  %9052 = vmatpush3.bf16.msra.mxu0 %v9051_v25 }
 0x272   :  { %1769 = vst.msk [vmem:[#allocation2 + $0x440] sm:$0xff] %vm1632_vm4, %v1624_v27  ;;  %v1460_v12 = vadd.f32 %v10686_v14, %v1459_v46  ;;  %v3449_v46 = vld [vmem:[#allocation11 + $0x930] sm:$0xff]  ;;  %v3452_v25 = vld [vmem:[#allocation11 + $0x948] sm:$0xff] }
 0x273   :  { %2220 = vst.msk [vmem:[#allocation3 + $0xe8] sm:$0xff] %vm1632_vm4, %v2214_v29  ;;  %v1627_v21 = vmax.f32 %v1465_v42, 0.0  ;;  %v9053_v29 = vpack.c.bf16 %v3466_v39, %v3465_v32  ;;  %v2417_v42 = vld [vmem:[#allocation11 + $0x338] sm:$0xff]  ;;  %8766 = vmatprep.subr.bf16.mxu1 %v8765_v54  ;;  %v9055_v7 = vpack.c.bf16 %v3450_v23, %v3449_v46  ;;  %v2222_v31 = vld [vmem:[#allocation2 + $0x420] sm:$0xff] }
 0x274   :  { %v1626_v1 = vmax.f32 %v1460_v12, 0.0  ;;  %v8727_v28 = vpop.f32.mrb[140].mxu0  ;;  %v2225_v26 = vld [vmem:[#allocation2 + $0x438] sm:$0xff]  ;;  %v2436_v49 = vld [vmem:[#allocation11 + $0x3d0] sm:$0xff]  ;;  %v2437_v32 = vld [vmem:[#allocation11 + $0x3d8] sm:$0xff] }
 0x275   :  { %1772 = vst.msk [vmem:[#allocation2 + $0x458] sm:$0xff] %vm1632_vm4, %v1627_v21  ;;  %v1475_v11 = vadd.f32 %v10686_v14, %v8727_v28  ;;  %v1469_v13 = vpop.f32.mrb[141].mxu0  ;;  %v8767_v21 = vpack.c.bf16 %v2417_v42, %v2416_v0  ;;  %9054 = vmatprep.subr.bf16.mxu0 %v9053_v29  ;;  %v2435_v28 = vld [vmem:[#allocation11 + $0x3c8] sm:$0xff]  ;;  %v8773_v39 = vpack.c.bf16 %v2437_v32, %v2436_v49  ;;  %v3470_v0 = vld [vmem:[#allocation11 + $0x9d8] sm:$0xff]  ;;  %v3453_v46 = vld [vmem:[#allocation11 + $0x950] sm:$0xff] }
 0x276   :  { %1771 = vst.msk [vmem:[#allocation2 + $0x450] sm:$0xff] %vm1632_vm4, %v1626_v1  ;;  %v1470_v19 = vadd.f32 %v10686_v14, %v1469_v13  ;;  %v2434_v1 = vld [vmem:[#allocation11 + $0x3c0] sm:$0xff]  ;;  %v3468_v13 = vld [vmem:[#allocation11 + $0x9c8] sm:$0xff]  ;;  %9056 = vmatpush3.bf16.msra.mxu0 %v9055_v7  ;;  %v2421_v42 = vld [vmem:[#allocation11 + $0x358] sm:$0xff] }
 0x277   :  { %v1629_v16 = vmax.f32 %v1475_v11, 0.0  ;;  %8768 = vmatpush3.bf16.msra.mxu1 %v8767_v21  ;;  %v8769_v11 = vpack.c.bf16 %v2435_v28, %v2434_v1  ;;  %v3454_v21 = vld [vmem:[#allocation11 + $0x958] sm:$0xff]  ;;  %v2439_v7 = vld [vmem:[#allocation11 + $0x3e8] sm:$0xff]  ;;  %v3471_v1 = vld [vmem:[#allocation11 + $0x9e0] sm:$0xff] }
 0x278   :  { %v1628_v10 = vmax.f32 %v1470_v19, 0.0  ;;  %v8730_v34 = vpop.f32.mrb[142].mxu0  ;;  %v3451_v19 = vld [vmem:[#allocation11 + $0x940] sm:$0xff]  ;;  %v3458_v32 = vld [vmem:[#allocation11 + $0x978] sm:$0xff] }
 0x279   :  { %1774 = vst.msk [vmem:[#allocation2 + $0x468] sm:$0xff] %vm1632_vm4, %v1629_v16  ;;  %v1485_v27 = vadd.f32 %v10686_v14, %v8730_v34  ;;  %v1479_v4 = vpop.f32.mrb[143].mxu0  ;;  %8770 = vmatprep.subr.bf16.mxu1 %v8769_v11  ;;  %v8771_v16 = vpack.c.bf16 %v2419_v41, %v2418_v59  ;;  %v9059_v8 = vpack.c.bf16 %v3452_v25, %v3451_v19  ;;  %v2423_v11 = vld [vmem:[#allocation11 + $0x368] sm:$0xff]  ;;  %v2441_v41 = vld [vmem:[#allocation11 + $0x3f8] sm:$0xff]  ;;  %v3473_v19 = vld [vmem:[#allocation11 + $0x9f0] sm:$0xff] }
 0x27a   :  { %1773 = vst.msk [vmem:[#allocation2 + $0x460] sm:$0xff] %vm1632_vm4, %v1628_v10  ;;  %v1480_v12 = vadd.f32 %v10686_v14, %v1479_v4  ;;  %v9057_v14 = vpack.c.bf16 %v3468_v13, %v3467_v52  ;;  %v3469_v10 = vld [vmem:[#allocation11 + $0x9d0] sm:$0xff]  ;;  %v3472_v52 = vld [vmem:[#allocation11 + $0x9e8] sm:$0xff]  ;;  %v3455_v13 = vld [vmem:[#allocation11 + $0x960] sm:$0xff] }
 0x27b   :  { %v1631_v53 = vmax.f32 %v1485_v27, 0.0  ;;  %8772 = vmatpush3.bf16.msra.mxu1 %v8771_v16  ;;  %v2420_v27 = vld [vmem:[#allocation11 + $0x350] sm:$0xff]  ;;  %v9061_v29 = vpack.c.bf16 %v3470_v0, %v3469_v10  ;;  %v3456_v59 = vld [vmem:[#allocation11 + $0x968] sm:$0xff]  ;;  %v2425_v25 = vld [vmem:[#allocation11 + $0x378] sm:$0xff] }
 0x27c   :  { %v1630_v50 = vmax.f32 %v1480_v12, 0.0  ;;  %9058 = vmatprep.subr.bf16.mxu0 %v9057_v14  ;;  %8774 = vmatprep.subr.bf16.mxu1 %v8773_v39  ;;  %v8775_v12 = vpack.c.bf16 %v2421_v42, %v2420_v27  ;;  %v2440_v14 = vld [vmem:[#allocation11 + $0x3f0] sm:$0xff]  ;;  %v3524_v0 = vld [vmem:[#allocation11 + $0xb88] sm:$0xff] }
 0x27d   :  { %1776 = vst.msk [vmem:[#allocation2 + $0x478] sm:$0xff] %vm1632_vm4, %v1631_v53  ;;  %v2228_v20 = vld [vmem:[#allocation2 + $0x450] sm:$0xff]  ;;  %9060 = vmatpush3.bf16.msra.mxu0 %v9059_v8  ;;  %v9063_v53 = vpack.c.bf16 %v3454_v21, %v3453_v46  ;;  %v2424_v16 = vld [vmem:[#allocation11 + $0x370] sm:$0xff] }
 0x27e   :  { %1775 = vst.msk [vmem:[#allocation2 + $0x470] sm:$0xff] %vm1632_vm4, %v1630_v50  ;;  %v2234_v51 = vmax.f32 %v2222_v31, %v2228_v20  ;;  %9062 = vmatprep.subr.bf16.mxu0 %v9061_v29  ;;  %v2422_v50 = vld [vmem:[#allocation11 + $0x360] sm:$0xff]  ;;  %v9065_v31 = vpack.c.bf16 %v3472_v52, %v3471_v1  ;;  %v9067_v20 = vpack.c.bf16 %v3456_v59, %v3455_v13  ;;  %v2223_v46 = vld [vmem:[#allocation2 + $0x428] sm:$0xff] }
 0x27f   :  { %8776 = vmatpush3.bf16.msra.mxu1 %v8775_v12  ;;  %v8783_v49 = vpack.c.bf16 %v2425_v25, %v2424_v16  ;;  %v2229_v29 = vld [vmem:[#allocation2 + $0x458] sm:$0xff] }
 0x280   :  { %v2240_v34 = vmax.f32 %v2234_v51, %v10938_v37  ;;  %v2231_v54 = vld [vmem:[#allocation2 + $0x468] sm:$0xff]  ;;  %v2438_v37 = vld [vmem:[#allocation11 + $0x3e0] sm:$0xff]  ;;  %v8781_v51 = vpack.c.bf16 %v2441_v41, %v2440_v14  ;;  %v2235_v21 = vmax.f32 %v2223_v46, %v2229_v29 }
 0x281   :  { %v2237_v4 = vmax.f32 %v2225_v26, %v2231_v54  ;;  %v8777_v28 = vpack.c.bf16 %v2439_v7, %v2438_v37  ;;  %9064 = vmatpush3.bf16.msra.mxu0 %v9063_v53  ;;  %v3474_v26 = vld [vmem:[#allocation11 + $0x9f8] sm:$0xff]  ;;  %v2459_v54 = vld [vmem:[#allocation11 + $0x488] sm:$0xff] }
 0x282   :  { %2252 = vrot.lane.b32.xlu0 %v2240_v34, %s10095_s5  ;;  %9066 = vmatprep.subr.bf16.mxu0 %v9065_v31  ;;  %v9069_v8 = vpack.c.bf16 %v3474_v26, %v3473_v19  ;;  %v2458_v34 = vld [vmem:[#allocation11 + $0x480] sm:$0xff] }
 0x283   :  { %v2243_v23 = vmax.f32 %v2237_v4, %v10949_v44  ;;  %8778 = vmatprep.subr.bf16.mxu1 %v8777_v28  ;;  %v8779_v44 = vpack.c.bf16 %v2423_v11, %v2422_v50  ;;  %v8785_v39 = vpack.c.bf16 %v2459_v54, %v2458_v34  ;;  %v2139_v4 = vld [vmem:[#allocation2 + $0x368] sm:$0xff] }
 0x284   :  { %v2233_v37 = vld [vmem:[#allocation2 + $0x478] sm:$0xff] }
 0x285   :  { %2258 = vrot.lane.b32.xlu1 %v2243_v23, %s10095_s5  ;;  %8780 = vmatpush3.bf16.msra.mxu1 %v8779_v44  ;;  %v2232_v23 = vld [vmem:[#allocation2 + $0x470] sm:$0xff] }
 0x286   :  { %1833 = vrot.lane.b32.xlu0 %v10445_v2, %s10095_s5  ;;  %9068 = vmatpush3.bf16.msra.mxu0 %v9067_v20  ;;  %v3457_v2 = vld [vmem:[#allocation11 + $0x970] sm:$0xff] }
 0x287   :  { %8782 = vmatprep.subr.bf16.mxu1 %v8781_v51  ;;  %v9071_v10 = vpack.c.bf16 %v3458_v32, %v3457_v2  ;;  %9070 = vmatprep.subr.bf16.mxu0 %v9069_v8 }
 0x289   :  { %1839 = vrot.lane.b32.xlu1 %v10482_v36, %s10095_s5  ;;  %8784 = vmatpush3.bf16.msra.mxu1 %v8783_v49  ;;  %v3523_v36 = vld [vmem:[#allocation11 + $0xb80] sm:$0xff] }
 0x28a   :  { %1918 = vrot.lane.b32.xlu0 %v10568_v17, %s10095_s5  ;;  %9072 = vmatpush3.bf16.msra.mxu0 %v9071_v10  ;;  %v9105_v27 = vpack.c.bf16 %v3524_v0, %v3523_v36  ;;  %v2151_v17 = vmax.f32 %v2139_v4, %v10944_v15  ;;  %v10096_v10 = vmov 1966171168  }
 0x28b   :  { %8786 = vmatprep.subr.bf16.mxu1 %v8785_v39  ;;  %v2511_v34 = vunpack.c.l.s4 %v10096_v10 }
 0x28c   :  { %9106 = vmatprep.subr.bf16.mxu0 %v9105_v27 }
 0x28d   :  { %1924 = vrot.lane.b32.xlu1 %v10601_v45, %s10095_s5  ;;  %v2142_v45 = vld [vmem:[#allocation2 + $0x380] sm:$0xff] }
 0x28e   :  { %2002 = vrot.lane.b32.xlu0 %v10680_v30, %s10095_s5  ;;  %v2154_v42 = vmax.f32 %v2142_v45, %v10979_v62  ;;  %v2157_v30 = vmax.f32 %v2151_v17, %v10843_v58  ;;  %v2241_v62 = vmax.f32 %v2235_v21, %v10933_v18  ;;  %v2230_v18 = vld [vmem:[#allocation2 + $0x460] sm:$0xff] }
 0x291   :  { %2008 = vrot.lane.b32.xlu1 %v10715_v40, %s10095_s5  ;;  %v2226_v40 = vld [vmem:[#allocation2 + $0x440] sm:$0xff] }
 0x292   :  { %2086 = vrot.lane.b32.xlu0 %v10796_v38, %s10095_s5  ;;  %v2160_v38 = vmax.f32 %v2154_v42, %v10876_v47  ;;  %v2238_v53 = vmax.f32 %v2226_v40, %v2232_v23 }
 0x294   :  { %v2085_v12 = vpop.permute.xlu0 %2084  ;;  %v2244_v58 = vmax.f32 %v2238_v53, %v10970_v57 }
 0x295   :  { %2102 = vst.msk [vmem:[#allocation3 + $0x18] sm:$0xff] %vm1849_vm5, %v2085_v12  ;;  %2092 = vrot.lane.b32.xlu1 %v10829_v5, %s10095_s5  ;;  %v2140_v5 = vld [vmem:[#allocation2 + $0x370] sm:$0xff] }
 0x296   :  { %2170 = vrot.lane.b32.xlu0 %v2157_v30, %s10095_s5  ;;  %v2152_v47 = vmax.f32 %v2140_v5, %v10962_v9 }
 0x297   :  { %v2091_v15 = vpop.permute.xlu1 %2090 }
 0x298   :  { %2105 = vst.msk [vmem:[#allocation3 + $0xa8] sm:$0xff] %vm1849_vm5, %v2091_v15  ;;  %v2158_v57 = vmax.f32 %v2152_v47, %v10863_v6 }
 0x299   :  { %2176 = vrot.lane.b32.xlu1 %v2160_v38, %s10095_s5 }
 0x29a   :  { %2254 = vrot.lane.b32.xlu0 %v2241_v62, %s10095_s5 }
 0x29c   :  { %v2390_v52 = vld [vmem:[#allocation3 + $0x2] ss:$8 sm:$0xf]  ;;  %v2398_v50 = vld [vmem:[#allocation3 + $0x3] ss:$8 sm:$0xf] }
 0x29d   :  { %2260 = vrot.lane.b32.xlu1 %v2244_v58, %s10095_s5  ;;  %v3423_v13 = vld [vmem:[#allocation3 + $0x6] ss:$8 sm:$0xf]  ;;  %v3431_v44 = vld [vmem:[#allocation3 + $0x7] ss:$8 sm:$0xf] }
 0x29e   :  { %1835 = vrot.lane.b32.xlu0 %v10463_v22, %s10095_s5  ;;  %v2143_v22 = vld [vmem:[#allocation2 + $0x388] sm:$0xff] }
 0x29f   :  { %v2394_v14 = vld [vmem:[#allocation3 + $0x92] ss:$8 sm:$0xf]  ;;  %v2284_v19 = vld [vmem:[#allocation3 + $0x1] ss:$8 sm:$0xf] }
 0x2a0   :  { %v2288_v51 = vld [vmem:[#allocation3 + $0x91] ss:$8 sm:$0xf]  ;;  %v2402_v16 = vld [vmem:[#allocation3 + $0x93] ss:$8 sm:$0xf] }
 0x2a1   :  { %1841 = vrot.lane.b32.xlu1 %v10479_v33, %s10095_s5  ;;  %v2155_v33 = vmax.f32 %v2143_v22, %v10976_v56  ;;  %v3427_v36 = vld [vmem:[#allocation3 + $0x96] ss:$8 sm:$0xf]  ;;  %v3435_v27 = vld [vmem:[#allocation3 + $0x97] ss:$8 sm:$0xf]  ;;  %v2512_v22 = vunpack.c.0.s8 %v2511_v34 }
 0x2a2   :  { %1920 = vrot.lane.b32.xlu0 %v10584_v35, %s10095_s5  ;;  %v2224_v35 = vld [vmem:[#allocation2 + $0x430] sm:$0xff]  ;;  %v3525_v34 = vld [vmem:[#allocation11 + $0xb90] sm:$0xff] }
 0x2a3   :  { %v2276_v42 = vld [vmem:[#allocation3] ss:$8 sm:$0xf] }
 0x2a4   :  { %v2280_v46 = vld [vmem:[#allocation3 + $0x90] ss:$8 sm:$0xf] }
 0x2a5   :  { %1926 = vrot.lane.b32.xlu1 %v10598_v43, %s10095_s5  ;;  %v2236_v43 = vmax.f32 %v2224_v35, %v2230_v18  ;;  %v3051_v35 = vld [vmem:[#allocation3 + $0x95] ss:$8 sm:$0xf] }
 0x2a6   :  { %2004 = vrot.lane.b32.xlu0 %v10698_v3, %s10095_s5  ;;  %v2227_v3 = vld [vmem:[#allocation2 + $0x448] sm:$0xff] }
 0x2a7   :  { %v2239_v9 = vmax.f32 %v2227_v3, %v2233_v37  ;;  %v2242_v7 = vmax.f32 %v2236_v43, %v10955_v24 }
 0x2a9   :  { %2010 = vrot.lane.b32.xlu1 %v10712_v55, %s10095_s5  ;;  %v2161_v55 = vmax.f32 %v2155_v33, %v10871_v61  ;;  %v2513_v61 = vlaneseq  ;;  %v3047_v33 = vld [vmem:[#allocation3 + $0x5] ss:$8 sm:$0xf] }
 0x2aa   :  { %2088 = vrot.lane.b32.xlu0 %v10812_v48, %s10095_s5  ;;  %v2245_v48 = vmax.f32 %v2239_v9, %v10965_v60 }
 0x2ab   :  { %v11062_v28 = vshrl.u32 %v2513_v61, 7 }
 0x2ad   :  { %2094 = vrot.lane.b32.xlu1 %v10826_v63, %s10095_s5 }
 0x2ae   :  { %2172 = vrot.lane.b32.xlu0 %v2158_v57, %s10095_s5 }
 0x2b1   :  { %2178 = vrot.lane.b32.xlu1 %v2161_v55, %s10095_s5 }
 0x2b2   :  { %2256 = vrot.lane.b32.xlu0 %v2242_v7, %s10095_s5 }
 0x2b5   :  { %2262 = vrot.lane.b32.xlu1 %v2245_v48, %s10095_s5 }
 0x2c4   :  { %v2169_v6 = vpop.permute.xlu0 %2168 }
 0x2c5   :  { %2186 = vst.msk [vmem:[#allocation3 + $0x20] sm:$0xff] %vm1849_vm5, %v2169_v6 }
 0x2c7   :  { %v2175_v63 = vpop.permute.xlu1 %2174 }
 0x2c8   :  { %2189 = vst.msk [vmem:[#allocation3 + $0xb0] sm:$0xff] %vm1849_vm5, %v2175_v63 }
 0x2f4   :  { %v2253_v56 = vpop.permute.xlu0 %2252 }
 0x2f5   :  { %2270 = vst.msk [vmem:[#allocation3 + $0x28] sm:$0xff] %vm1849_vm5, %v2253_v56 }
 0x2f7   :  { %v2259_v1 = vpop.permute.xlu1 %2258 }
 0x2f8   :  { %2273 = vst.msk [vmem:[#allocation3 + $0xb8] sm:$0xff] %vm1849_vm5, %v2259_v1  ;;  %v1834_v24 = vpop.permute.xlu0 %1833 }
 0x2f9   :  { %1851 = vst.msk [vmem:[#allocation3 + $0x30] sm:$0xff] %vm1849_vm5, %v1834_v24 }
 0x2fb   :  { %v1840_v60 = vpop.permute.xlu1 %1839 }
 0x2fc   :  { %1854 = vst.msk [vmem:[#allocation3 + $0xc0] sm:$0xff] %vm1849_vm5, %v1840_v60  ;;  %v1919_v31 = vpop.permute.xlu0 %1918  ;;  %v2391_v11 = vld [vmem:[#allocation3 + $0x2] ss:$8 sm:$0x30]  ;;  %v11099_v60 = vsub.s32 %v2512_v22, %v11062_v28 }
 0x2fd   :  { %1935 = vst.msk [vmem:[#allocation3 + $0x38] sm:$0xff] %vm1849_vm5, %v1919_v31  ;;  %v2285_v59 = vld [vmem:[#allocation3 + $0x1] ss:$8 sm:$0x30]  ;;  %v2392_v20 = vor.u32 %v2391_v11, %v2390_v52 }
 0x2fe   :  { %v2399_v41 = vld [vmem:[#allocation3 + $0x3] ss:$8 sm:$0x30]  ;;  %v3424_v25 = vld [vmem:[#allocation3 + $0x6] ss:$8 sm:$0x30]  ;;  %v2286_v12 = vor.u32 %v2285_v59, %v2284_v19 }
 0x2ff   :  { %v11066_v26 = vor.u32 %v2399_v41, %v2398_v50  ;;  %v3432_v8 = vld [vmem:[#allocation3 + $0x7] ss:$8 sm:$0x30]  ;;  %v1925_v49 = vpop.permute.xlu1 %1924  ;;  %v2289_v2 = vld [vmem:[#allocation3 + $0x91] ss:$8 sm:$0x30]  ;;  %v3425_v39 = vor.u32 %v3424_v25, %v3423_v13 }
 0x300   :  { %v2395_v32 = vld [vmem:[#allocation3 + $0x92] ss:$8 sm:$0x30]  ;;  %v3048_v54 = vld [vmem:[#allocation3 + $0x5] ss:$8 sm:$0x30]  ;;  %v11068_v0 = vor.u32 %v3432_v8, %v3431_v44  ;;  %v2003_v4 = vpop.permute.xlu0 %2002  ;;  %v2290_v30 = vor.u32 %v2289_v2, %v2288_v51 }
 0x301   :  { %1938 = vst.msk [vmem:[#allocation3 + $0xc8] sm:$0xff] %vm1849_vm5, %v1925_v49  ;;  %v2396_v17 = vor.u32 %v2395_v32, %v2394_v14  ;;  %v2403_v29 = vld [vmem:[#allocation3 + $0x93] ss:$8 sm:$0x30]  ;;  %2019 = vst.msk [vmem:[#allocation3 + $0x40] sm:$0xff] %vm1849_vm5, %v2003_v4  ;;  %v2405_v23 = vmax.f32 %v2392_v20, %v11066_v26  ;;  %v11080_v3 = vor.u32 %v3048_v54, %v3047_v33  ;;  %v2460_v8 = vld [vmem:[#allocation11 + $0x490] sm:$0xff] }
 0x302   :  { %v3052_v45 = vld [vmem:[#allocation3 + $0x95] ss:$8 sm:$0x30]  ;;  %v11072_v21 = vor.u32 %v2403_v29, %v2402_v16  ;;  %v3428_v40 = vld [vmem:[#allocation3 + $0x96] ss:$8 sm:$0x30]  ;;  %v3438_v62 = vmax.f32 %v3425_v39, %v11068_v0 }
 0x303   :  { %v3436_v15 = vld [vmem:[#allocation3 + $0x97] ss:$8 sm:$0x30]  ;;  %v3429_v38 = vor.u32 %v3428_v40, %v3427_v36  ;;  %v2277_v58 = vld [vmem:[#allocation3] ss:$8 sm:$0x30]  ;;  %v2009_v47 = vpop.permute.xlu1 %2008  ;;  %v11082_v55 = vor.u32 %v3052_v45, %v3051_v35  ;;  %v11086_v7 = vmax.f32 %v2405_v23, %v2286_v12 }
 0x304   :  { %v11075_v53 = vor.u32 %v3436_v15, %v3435_v27  ;;  %v2281_v5 = vld [vmem:[#allocation3 + $0x90] ss:$8 sm:$0x30]  ;;  %v2406_v18 = vmax.f32 %v2396_v17, %v11072_v21  ;;  %v2278_v57 = vor.u32 %v2277_v58, %v2276_v42  ;;  %2022 = vst.msk [vmem:[#allocation3 + $0xd0] sm:$0xff] %vm1849_vm5, %v2009_v47  ;;  %v2087_v37 = vpop.permute.xlu0 %2086  ;;  %v3440_v56 = vmax.f32 %v3438_v62, %v11080_v3  ;;  %v2443_v20 = vld [vmem:[#allocation11 + $0x408] sm:$0xff]  ;;  %v2444_v4 = vld [vmem:[#allocation11 + $0x410] sm:$0xff] }
 0x305   :  { %v2282_v43 = vor.u32 %v2281_v5, %v2280_v46  ;;  %2103 = vst.msk [vmem:[#allocation3 + $0x48] sm:$0xff] %vm1849_vm5, %v2087_v37  ;;  %v2442_v59 = vld [vmem:[#allocation11 + $0x400] sm:$0xff]  ;;  %v3508_v51 = vld [vmem:[#allocation11 + $0xb08] sm:$0xff]  ;;  %v2461_v49 = vld [vmem:[#allocation11 + $0x498] sm:$0xff] }
 0x306   :  { %v3439_v9 = vmax.f32 %v3429_v38, %v11075_v53  ;;  %v11088_v48 = vmax.f32 %v2406_v18, %v2290_v30  ;;  %v11090_v6 = vmax.f32 %v2278_v57, %v2286_v12  ;;  %v3507_v19 = vld [vmem:[#allocation11 + $0xb00] sm:$0xff]  ;;  %v8787_v32 = vpack.c.bf16 %v2443_v20, %v2442_v59  ;;  %v3526_v54 = vld [vmem:[#allocation11 + $0xb98] sm:$0xff]  ;;  %v3509_v29 = vld [vmem:[#allocation11 + $0xb10] sm:$0xff] }
 0x307   :  { %v11092_v63 = vmax.f32 %v2282_v43, %v2290_v30  ;;  %v2093_v1 = vpop.permute.xlu1 %2092  ;;  %v9107_v27 = vpack.c.bf16 %v3508_v51, %v3507_v19  ;;  %v2445_v17 = vld [vmem:[#allocation11 + $0x418] sm:$0xff]  ;;  %v8789_v12 = vpack.c.bf16 %v2461_v49, %v2460_v8  ;;  %v2462_v23 = vld [vmem:[#allocation11 + $0x4a0] sm:$0xff]  ;;  %v2463_v40 = vld [vmem:[#allocation11 + $0x4a8] sm:$0xff]  ;;  %v9109_v38 = vpack.c.bf16 %v3526_v54, %v3525_v34 }
 0x308   :  { %v3441_v61 = vmax.f32 %v3439_v9, %v11082_v55  ;;  %v2508_v24 = vcombine.low %v11086_v7, %v11088_v48  ;;  %2106 = vst.msk [vmem:[#allocation3 + $0xd8] sm:$0xff] %vm1849_vm5, %v2093_v1  ;;  %v2171_v50 = vpop.permute.xlu0 %2170  ;;  %v3510_v30 = vld [vmem:[#allocation11 + $0xb18] sm:$0xff]  ;;  %v3527_v62 = vld [vmem:[#allocation11 + $0xba0] sm:$0xff]  ;;  %v3528_v58 = vld [vmem:[#allocation11 + $0xba8] sm:$0xff]  ;;  %v8791_v47 = vpack.c.bf16 %v2445_v17, %v2444_v4  ;;  %v8793_v57 = vpack.c.bf16 %v2463_v40, %v2462_v23 }
 0x309   :  { %v2774_v52 = vcombine.low %v11090_v6, %v11092_v63  ;;  %2187 = vst.msk [vmem:[#allocation3 + $0x50] sm:$0xff] %vm1849_vm5, %v2171_v50  ;;  %v2446_v18 = vld [vmem:[#allocation11 + $0x420] sm:$0xff]  ;;  %v2447_v22 = vld [vmem:[#allocation11 + $0x428] sm:$0xff]  ;;  %v2775_v33 = vcombine.high %v11090_v6, %v11092_v63  ;;  %v9111_v35 = vpack.c.bf16 %v3510_v30, %v3509_v29  ;;  %v2464_v9 = vld [vmem:[#allocation11 + $0x4b0] sm:$0xff] }
 0x30a   :  { %v3541_v31 = vcombine.low %v3440_v56, %v3441_v61  ;;  %v3542_v11 = vcombine.high %v3440_v56, %v3441_v61  ;;  %v2516_v13 = vrot.slane %v2508_v24, %v11099_v60  ;;  %v3511_v43 = vld [vmem:[#allocation11 + $0xb20] sm:$0xff]  ;;  %v3512_v37 = vld [vmem:[#allocation11 + $0xb28] sm:$0xff]  ;;  %v9113_v61 = vpack.c.bf16 %v3528_v58, %v3527_v62  ;;  %v2465_v1 = vld [vmem:[#allocation11 + $0x4b8] sm:$0xff] }
 0x30b   :  { %v2177_v28 = vpop.permute.xlu1 %2176  ;;  %v3529_v24 = vld [vmem:[#allocation11 + $0xbb0] sm:$0xff]  ;;  %v3530_v50 = vld [vmem:[#allocation11 + $0xbb8] sm:$0xff]  ;;  %v11142_v19 = vld [vmem:[#allocation11 + $0x4c0] sm:$0xff]  ;;  %v9115_v8 = vpack.c.bf16 %v3512_v37, %v3511_v43  ;;  %v8797_v49 = vpack.c.bf16 %v2465_v1, %v2464_v9 }
 0x30c   :  { %v3549_v44 = vrot.slane %v3541_v31, %v11099_v60  ;;  %v11108_v14 = vrot.slane %v3542_v11, %v11099_v60  ;;  %v2524_v41 = vcombine.high %v2516_v13, %v2516_v13  ;;  %2190 = vst.msk [vmem:[#allocation3 + $0xe0] sm:$0xff] %vm1849_vm5, %v2177_v28  ;;  %v2255_v16 = vpop.permute.xlu0 %2254  ;;  %v11119_v36 = vrot.slane %v2516_v13, %v11099_v60  ;;  %v11133_v11 = vld [vmem:[#allocation11 + $0x430] sm:$0xff]  ;;  %v11135_v13 = vld [vmem:[#allocation11 + $0x438] sm:$0xff]  ;;  %v11144_v51 = vld [vmem:[#allocation11 + $0x4c8] sm:$0xff] }
 0x30d   :  { %2271 = vst.msk [vmem:[#allocation3 + $0x58] sm:$0xff] %vm1849_vm5, %v2255_v16  ;;  %v11139_v59 = vld [vmem:[#allocation11 + $0xb38] sm:$0xff]  ;;  %v9117_v54 = vpack.c.bf16 %v3530_v50, %v3529_v24  ;;  %v11153_v30 = vld [vmem:[#allocation11 + $0x448] sm:$0xff]  ;;  %v11162_v62 = vld [vmem:[#allocation11 + $0xb40] sm:$0xff] }
 0x30e   :  { %v3557_v25 = vcombine.high %v3549_v44, %v3549_v44  ;;  %v2546_v2 = vrot.slane %v2524_v41, %v11099_v60  ;;  %v3558_v10 = vcombine.high %v11108_v14, %v11108_v14  ;;  %v11122_v42 = vrot.slane %v3549_v44, %v11099_v60  ;;  %v11137_v44 = vld [vmem:[#allocation11 + $0xb30] sm:$0xff]  ;;  %v3516_v58 = vld [vmem:[#allocation11 + $0xb48] sm:$0xff]  ;;  %v3534_v43 = vld [vmem:[#allocation11 + $0xbd8] sm:$0xff] }
 0x30f   :  { %v2261_v46 = vpop.permute.xlu1 %2260  ;;  %v8795_v41 = vpack.c.bf16 %v2447_v22, %v2446_v18  ;;  %v3807_v16 = vld [vmem:[#allocation3 + $0x30] ss:$8 sm:$0xf]  ;;  %v4575_v18 = vld [vmem:[#allocation3 + $0x34] ss:$8 sm:$0xf] }
 0x310   :  { %v11116_v39 = vrot.slane %v3557_v25, %v11099_v60  ;;  %v2555_v45 = vcombine.high %v2546_v2, %v2546_v2  ;;  %2626 = vmatprep.mubr.f32.mxu1 %v2546_v2  ;;  %2274 = vst.msk [vmem:[#allocation3 + $0xe8] sm:$0xff] %vm1849_vm5, %v2261_v46  ;;  %v1836_v15 = vpop.permute.xlu0 %1835  ;;  %v3586_v5 = vrot.slane %v3558_v10, %v11099_v60  ;;  %v3815_v25 = vld [vmem:[#allocation3 + $0x31] ss:$8 sm:$0xf] }
 0x311   :  { %2627 = vmatmul.mubr.f32.vlgmr.msra.gmra.mrb[0].mxu1 %v11119_v36  ;;  %1852 = vst.msk [vmem:[#allocation3 + $0x60] sm:$0xff] %vm1849_vm5, %v1836_v15  ;;  %v11146_v2 = vld [vmem:[#allocation11 + $0xbc0] sm:$0xff]  ;;  %v3532_v46 = vld [vmem:[#allocation11 + $0xbc8] sm:$0xff]  ;;  %v8799_v15 = vpack.c.bf16 %v11135_v13, %v11133_v11  ;;  %v2375_v63 = vld [vmem:[#allocation11 + $0x290] sm:$0xff] }
 0x312   :  { %3659 = vmatprep.mubr.f32.mxu0 %v11116_v39  ;;  %8788 = vmatpush3.bf16.msra.mxu1 %v8787_v32  ;;  %v3811_v32 = vld [vmem:[#allocation3 + $0xc0] ss:$8 sm:$0xf]  ;;  %v3819_v10 = vld [vmem:[#allocation3 + $0xc1] ss:$8 sm:$0xf]  ;;  %v9121_v50 = vpack.c.bf16 %v3532_v46, %v11146_v2  ;;  %v9123_v2 = vpack.c.bf16 %v3516_v58, %v11162_v62 }
 0x313   :  { %3660 = vmatmul.mubr.f32.vlgmr.msra.gmra.mrb[144].mxu0 %v11122_v42  ;;  %2696 = vmatprep.mubr.f32.mxu1 %v2555_v45  ;;  %v1842_v56 = vpop.permute.xlu1 %1841  ;;  %v4583_v13 = vld [vmem:[#allocation3 + $0x35] ss:$8 sm:$0xf] }
 0x314   :  { %9108 = vmatpush3.bf16.msra.mxu0 %v9107_v27  ;;  %3799 = vmatprep.mubr.f32.mxu0 %v3586_v5  ;;  %1855 = vst.msk [vmem:[#allocation3 + $0xf0] sm:$0xff] %vm1849_vm5, %v1842_v56  ;;  %v1921_v31 = vpop.permute.xlu0 %1920  ;;  %v3808_v20 = vld [vmem:[#allocation3 + $0x30] ss:$8 sm:$0x30]  ;;  %v2468_v5 = vld [vmem:[#allocation11 + $0x4d0] sm:$0xff]  ;;  %v2471_v46 = vld [vmem:[#allocation11 + $0x4e8] sm:$0xff] }
 0x315   :  { %8790 = vmatprep.subr.bf16.mxu1 %v8789_v12  ;;  %9110 = vmatprep.subr.bf16.mxu0 %v9109_v38  ;;  %v3816_v28 = vld [vmem:[#allocation3 + $0x31] ss:$8 sm:$0x30]  ;;  %1936 = vst.msk [vmem:[#allocation3 + $0x68] sm:$0xff] %vm1849_vm5, %v1921_v31  ;;  %v3809_v27 = vor.u32 %v3808_v20, %v3807_v16  ;;  %v9119_v38 = vpack.c.bf16 %v11139_v59, %v11137_v44  ;;  %v3536_v62 = vld [vmem:[#allocation11 + $0xbe8] sm:$0xff] }
 0x316   :  { %8792 = vmatpush3.bf16.msra.mxu1 %v8791_v47  ;;  %v11148_v17 = vor.u32 %v3816_v28, %v3815_v25  ;;  %v11151_v12 = vld [vmem:[#allocation11 + $0x440] sm:$0xff]  ;;  %v2469_v47 = vld [vmem:[#allocation11 + $0x4d8] sm:$0xff] }
 0x317   :  { %8794 = vmatprep.subr.bf16.mxu1 %v8793_v57  ;;  %v1927_v34 = vpop.permute.xlu1 %1926  ;;  %v3812_v4 = vld [vmem:[#allocation3 + $0xc0] ss:$8 sm:$0x30]  ;;  %v3820_v29 = vld [vmem:[#allocation3 + $0xc1] ss:$8 sm:$0x30] }
 0x318   :  { %9112 = vmatpush3.bf16.msra.mxu0 %v9111_v35  ;;  %1939 = vst.msk [vmem:[#allocation3 + $0xf8] sm:$0xff] %vm1849_vm5, %v1927_v34  ;;  %v2005_v45 = vpop.permute.xlu0 %2004  ;;  %v3813_v23 = vor.u32 %v3812_v4, %v3811_v32  ;;  %v11155_v40 = vor.u32 %v3820_v29, %v3819_v10  ;;  %v4576_v22 = vld [vmem:[#allocation3 + $0x34] ss:$8 sm:$0x30]  ;;  %v8801_v35 = vpack.c.bf16 %v11144_v51, %v11142_v19  ;;  %v3533_v57 = vld [vmem:[#allocation11 + $0xbd0] sm:$0xff]  ;;  %v2453_v16 = vld [vmem:[#allocation11 + $0x458] sm:$0xff] }
 0x319   :  { %9114 = vmatprep.subr.bf16.mxu0 %v9113_v61  ;;  %2020 = vst.msk [vmem:[#allocation3 + $0x70] sm:$0xff] %vm1849_vm5, %v2005_v45  ;;  %v4204_v9 = vld [vmem:[#allocation3 + $0xc3] ss:$8 sm:$0x30]  ;;  %v4577_v56 = vor.u32 %v4576_v22, %v4575_v18  ;;  %v3822_v31 = vmax.f32 %v3809_v27, %v11148_v17  ;;  %v8803_v19 = vpack.c.bf16 %v11153_v30, %v11151_v12  ;;  %v2470_v45 = vld [vmem:[#allocation11 + $0x4e0] sm:$0xff] }
 0x31a   :  { %8796 = vmatpush3.bf16.msra.mxu1 %v8795_v41  ;;  %v3823_v37 = vmax.f32 %v3813_v23, %v11155_v40  ;;  %v4579_v61 = vld [vmem:[#allocation3 + $0xc4] ss:$8 sm:$0xf]  ;;  %v4584_v44 = vld [vmem:[#allocation3 + $0x35] ss:$8 sm:$0x30]  ;;  %v8805_v32 = vpack.c.bf16 %v2469_v47, %v2468_v5  ;;  %v9125_v29 = vpack.c.bf16 %v3534_v43, %v3533_v57  ;;  %v8809_v22 = vpack.c.bf16 %v2471_v46, %v2470_v45 }
 0x31b   :  { %8798 = vmatprep.subr.bf16.mxu1 %v8797_v49  ;;  %v4580_v1 = vld [vmem:[#allocation3 + $0xc4] ss:$8 sm:$0x30]  ;;  %v2011_v24 = vpop.permute.xlu1 %2010  ;;  %v11170_v20 = vor.u32 %v4584_v44, %v4583_v13  ;;  %v4587_v28 = vld [vmem:[#allocation3 + $0xc5] ss:$8 sm:$0xf]  ;;  %v2509_v13 = vcombine.high %v11086_v7, %v11088_v48 }
 0x31c   :  { %9116 = vmatpush3.bf16.msra.mxu0 %v9115_v8  ;;  %v4581_v11 = vor.u32 %v4580_v1, %v4579_v61  ;;  %2023 = vst.msk [vmem:[#allocation3 + $0x100] sm:$0xff] %vm1849_vm5, %v2011_v24  ;;  %v2089_v59 = vpop.permute.xlu0 %2088  ;;  %v4588_v41 = vld [vmem:[#allocation3 + $0xc5] ss:$8 sm:$0x30]  ;;  %v11176_v25 = vmax.f32 %v3823_v37, %v11075_v53  ;;  %v11183_v53 = vmax.f32 %v3822_v31, %v11068_v0  ;;  %v2455_v57 = vld [vmem:[#allocation11 + $0x468] sm:$0xff]  ;;  %v3519_v43 = vld [vmem:[#allocation11 + $0xb60] sm:$0xff] }
 0x31d   :  { %9118 = vmatprep.subr.bf16.mxu0 %v9117_v54  ;;  %2104 = vst.msk [vmem:[#allocation3 + $0x78] sm:$0xff] %vm1849_vm5, %v2089_v59  ;;  %v2452_v51 = vld [vmem:[#allocation11 + $0x450] sm:$0xff]  ;;  %v4200_v8 = vld [vmem:[#allocation3 + $0x33] ss:$8 sm:$0x30]  ;;  %v11178_v49 = vor.u32 %v4588_v41, %v4587_v28  ;;  %v3518_v34 = vld [vmem:[#allocation11 + $0xb58] sm:$0xff]  ;;  %v4590_v27 = vmax.f32 %v4577_v56, %v11170_v20 }
 0x31e   :  { %8800 = vmatpush3.bf16.msra.mxu1 %v8799_v15  ;;  %v3517_v10 = vld [vmem:[#allocation11 + $0xb50] sm:$0xff]  ;;  %v8807_v5 = vpack.c.bf16 %v2453_v16, %v2452_v51  ;;  %v3925_v0 = vcombine.low %v11183_v53, %v11176_v25  ;;  %v3520_v61 = vld [vmem:[#allocation11 + $0xb68] sm:$0xff]  ;;  %v2473_v24 = vld [vmem:[#allocation11 + $0x4f8] sm:$0xff] }
 0x31f   :  { %8802 = vmatprep.subr.bf16.mxu1 %v8801_v35  ;;  %v4203_v54 = vld [vmem:[#allocation3 + $0xc3] ss:$8 sm:$0xf]  ;;  %v2095_v4 = vpop.permute.xlu1 %2094  ;;  %v4591_v23 = vmax.f32 %v4581_v11, %v11178_v49  ;;  %v9127_v18 = vpack.c.bf16 %v3518_v34, %v3517_v10  ;;  %v9131_v41 = vpack.c.bf16 %v3520_v61, %v3519_v43 }
 0x320   :  { %9120 = vmatpush3.bf16.msra.mxu0 %v9119_v38  ;;  %v4199_v12 = vld [vmem:[#allocation3 + $0x33] ss:$8 sm:$0xf]  ;;  %v11185_v30 = vor.u32 %v4204_v9, %v4203_v54  ;;  %2107 = vst.msk [vmem:[#allocation3 + $0x108] sm:$0xff] %vm1849_vm5, %v2095_v4  ;;  %v2173_v15 = vpop.permute.xlu0 %2172  ;;  %v11207_v28 = vrot.slane %v3925_v0, %v11099_v60 }
 0x321   :  { %9122 = vmatprep.subr.bf16.mxu0 %v9121_v50  ;;  %v3535_v38 = vld [vmem:[#allocation11 + $0xbe0] sm:$0xff]  ;;  %v11189_v58 = vor.u32 %v4200_v8, %v4199_v12  ;;  %2188 = vst.msk [vmem:[#allocation3 + $0x80] sm:$0xff] %vm1849_vm5, %v2173_v15  ;;  %v2472_v1 = vld [vmem:[#allocation11 + $0x4f0] sm:$0xff]  ;;  %v3538_v11 = vld [vmem:[#allocation11 + $0xbf8] sm:$0xff] }
 0x322   :  { %8804 = vmatpush3.bf16.msra.mxu1 %v8803_v19  ;;  %v11195_v47 = vmax.f32 %v4591_v23, %v11185_v30  ;;  %v2454_v35 = vld [vmem:[#allocation11 + $0x460] sm:$0xff]  ;;  %v9129_v56 = vpack.c.bf16 %v3536_v62, %v3535_v38  ;;  %v3537_v31 = vld [vmem:[#allocation11 + $0xbf0] sm:$0xff]  ;;  %v8813_v19 = vpack.c.bf16 %v2473_v24, %v2472_v1  ;;  %v2457_v16 = vld [vmem:[#allocation11 + $0x478] sm:$0xff]  ;;  %v2554_v24 = vcombine.high %v11119_v36, %v11119_v36 }
 0x323   :  { %8806 = vmatprep.subr.bf16.mxu1 %v8805_v32  ;;  %v11198_v37 = vmax.f32 %v4590_v27, %v11189_v58  ;;  %v2179_v9 = vpop.permute.xlu1 %2178  ;;  %v8811_v59 = vpack.c.bf16 %v2455_v57, %v2454_v35  ;;  %v2456_v51 = vld [vmem:[#allocation11 + $0x470] sm:$0xff]  ;;  %v9133_v7 = vpack.c.bf16 %v3538_v11, %v3537_v31  ;;  %v3522_v48 = vld [vmem:[#allocation11 + $0xb78] sm:$0xff]  ;;  %v2490_v32 = vld [vmem:[#allocation11 + $0x580] sm:$0xff]  ;;  %v11211_v27 = vrot.slane %v2509_v13, %v11099_v60 }
 0x324   :  { %9124 = vmatpush3.bf16.msra.mxu0 %v9123_v2  ;;  %2191 = vst.msk [vmem:[#allocation3 + $0x110] sm:$0xff] %vm1849_vm5, %v2179_v9  ;;  %v2257_v50 = vpop.permute.xlu0 %2256  ;;  %v3521_v8 = vld [vmem:[#allocation11 + $0xb70] sm:$0xff]  ;;  %v2491_v10 = vld [vmem:[#allocation11 + $0x588] sm:$0xff]  ;;  %v3875_v34 = vld [vmem:[#allocation11 + $0xd80] sm:$0xff]  ;;  %v8815_v4 = vpack.c.bf16 %v2457_v16, %v2456_v51 }
 0x325   :  { %9126 = vmatprep.subr.bf16.mxu0 %v9125_v29  ;;  %v4693_v44 = vcombine.low %v11198_v37, %v11195_v47  ;;  %2272 = vst.msk [vmem:[#allocation3 + $0x88] sm:$0xff] %vm1849_vm5, %v2257_v50  ;;  %v3876_v54 = vld [vmem:[#allocation11 + $0xd88] sm:$0xff]  ;;  %v3941_v29 = vcombine.high %v11207_v28, %v11207_v28  ;;  %v9135_v46 = vpack.c.bf16 %v3522_v48, %v3521_v8  ;;  %v2474_v23 = vld [vmem:[#allocation11 + $0x500] sm:$0xff]  ;;  %v3877_v9 = vld [vmem:[#allocation11 + $0xd90] sm:$0xff] }
 0x326   :  { %8808 = vmatpush3.bf16.msra.mxu1 %v8807_v5  ;;  %v8817_v12 = vpack.c.bf16 %v2491_v10, %v2490_v32  ;;  %v2475_v15 = vld [vmem:[#allocation11 + $0x508] sm:$0xff]  ;;  %v9169_v38 = vpack.c.bf16 %v3876_v54, %v3875_v34  ;;  %v3859_v62 = vld [vmem:[#allocation11 + $0xd00] sm:$0xff]  ;;  %v2525_v0 = vcombine.high %v11211_v27, %v11211_v27  ;;  %v2476_v61 = vld [vmem:[#allocation11 + $0x510] sm:$0xff] }
 0x327   :  { %8810 = vmatprep.subr.bf16.mxu1 %v8809_v22  ;;  %v2263_v2 = vpop.permute.xlu1 %2262  ;;  %v3860_v5 = vld [vmem:[#allocation11 + $0xd08] sm:$0xff]  ;;  %v2493_v22 = vld [vmem:[#allocation11 + $0x598] sm:$0xff]  ;;  %v8819_v57 = vpack.c.bf16 %v2475_v15, %v2474_v23  ;;  %v11222_v43 = vrot.slane %v3941_v29, %v11099_v60  ;;  %v3861_v11 = vld [vmem:[#allocation11 + $0xd10] sm:$0xff] }
 0x328   :  { %9128 = vmatpush3.bf16.msra.mxu0 %v9127_v18  ;;  %2275 = vst.msk [vmem:[#allocation3 + $0x118] sm:$0xff] %vm1849_vm5, %v2263_v2  ;;  %v2492_v18 = vld [vmem:[#allocation11 + $0x590] sm:$0xff]  ;;  %v9171_v50 = vpack.c.bf16 %v3860_v5, %v3859_v62  ;;  %v2477_v31 = vld [vmem:[#allocation11 + $0x518] sm:$0xff]  ;;  %v2494_v51 = vld [vmem:[#allocation11 + $0x5a0] sm:$0xff]  ;;  %v2553_v2 = vrot.slane %v2525_v0, %v11099_v60 }
 0x329   :  { %9130 = vmatprep.subr.bf16.mxu0 %v9129_v56  ;;  %v3878_v56 = vld [vmem:[#allocation11 + $0xd98] sm:$0xff]  ;;  %v2495_v16 = vld [vmem:[#allocation11 + $0x5a8] sm:$0xff]  ;;  %v3879_v36 = vld [vmem:[#allocation11 + $0xda0] sm:$0xff]  ;;  %v3972_v34 = vcombine.high %v11222_v43, %v11222_v43  ;;  %v8823_v54 = vpack.c.bf16 %v2477_v31, %v2476_v61 }
 0x32a   :  { %8812 = vmatpush3.bf16.msra.mxu1 %v8811_v59  ;;  %v3039_v1 = vld [vmem:[#allocation3 + $0x4] ss:$8 sm:$0xf]  ;;  %v8825_v29 = vpack.c.bf16 %v2495_v16, %v2494_v51 }
 0x32b   :  { %8814 = vmatprep.subr.bf16.mxu1 %v8813_v19  ;;  %v3862_v13 = vld [vmem:[#allocation11 + $0xd18] sm:$0xff]  ;;  %v8821_v19 = vpack.c.bf16 %v2493_v22, %v2492_v18  ;;  %v3880_v48 = vld [vmem:[#allocation11 + $0xda8] sm:$0xff]  ;;  %v3863_v23 = vld [vmem:[#allocation11 + $0xd20] sm:$0xff] }
 0x32c   :  { %9132 = vmatpush3.bf16.msra.mxu0 %v9131_v41  ;;  %v3043_v59 = vld [vmem:[#allocation3 + $0x94] ss:$8 sm:$0xf]  ;;  %v3572_v41 = vrot.slane %v11108_v14, %v11099_v60  ;;  %v5736_v45 = vld [vmem:[#allocation3 + $0x63] ss:$8 sm:$0x30] }
 0x32d   :  { %9134 = vmatprep.subr.bf16.mxu0 %v9133_v7  ;;  %v3040_v8 = vld [vmem:[#allocation3 + $0x4] ss:$8 sm:$0x30]  ;;  %v9173_v7 = vpack.c.bf16 %v3878_v56, %v3877_v9  ;;  %v3044_v10 = vld [vmem:[#allocation3 + $0x94] ss:$8 sm:$0x30] }
 0x32e   :  { %8816 = vmatpush3.bf16.msra.mxu1 %v8815_v4  ;;  %v3041_v32 = vor.u32 %v3040_v8, %v3039_v1  ;;  %v3045_v14 = vor.u32 %v3044_v10, %v3043_v59  ;;  %v9175_v4 = vpack.c.bf16 %v3862_v13, %v3861_v11  ;;  %v3864_v62 = vld [vmem:[#allocation11 + $0xd28] sm:$0xff]  ;;  %v2496_v5 = vld [vmem:[#allocation11 + $0x5b0] sm:$0xff]  ;;  %v2497_v0 = vld [vmem:[#allocation11 + $0x5b8] sm:$0xff] }
 0x32f   :  { %8818 = vmatprep.subr.bf16.mxu1 %v8817_v12  ;;  %v2479_v12 = vld [vmem:[#allocation11 + $0x528] sm:$0xff]  ;;  %v3881_v22 = vld [vmem:[#allocation11 + $0xdb0] sm:$0xff]  ;;  %v2481_v1 = vld [vmem:[#allocation11 + $0x538] sm:$0xff]  ;;  %v8829_v31 = vpack.c.bf16 %v2497_v0, %v2496_v5 }
 0x330   :  { %9136 = vmatpush3.bf16.msra.mxu0 %v9135_v46  ;;  %v2478_v46 = vld [vmem:[#allocation11 + $0x520] sm:$0xff]  ;;  %v3054_v15 = vmax.f32 %v3041_v32, %v11080_v3  ;;  %v3055_v18 = vmax.f32 %v3045_v14, %v11082_v55  ;;  %v2480_v61 = vld [vmem:[#allocation11 + $0x530] sm:$0xff]  ;;  %v3866_v11 = vld [vmem:[#allocation11 + $0xd38] sm:$0xff] }
 0x331   :  { %9170 = vmatprep.subr.bf16.mxu0 %v9169_v38  ;;  %2697 = vmatmul.mubr.f32.vlgmr.msra.gmra.mrb[2].mxu1 %v2554_v24  ;;  %v9177_v38 = vpack.c.bf16 %v3880_v48, %v3879_v36  ;;  %v8827_v56 = vpack.c.bf16 %v2479_v12, %v2478_v46  ;;  %v3865_v24 = vld [vmem:[#allocation11 + $0xd30] sm:$0xff]  ;;  %v2498_v55 = vld [vmem:[#allocation11 + $0x5c0] sm:$0xff]  ;;  %v2483_v10 = vld [vmem:[#allocation11 + $0x548] sm:$0xff] }
 0x332   :  { %8820 = vmatpush3.bf16.msra.mxu1 %v8819_v57  ;;  %2766 = vmatprep.mubr.f32.mxu1 %v2553_v2  ;;  %v3882_v57 = vld [vmem:[#allocation11 + $0xdb8] sm:$0xff]  ;;  %v11234_v9 = vmax.f32 %v3054_v15, %v11066_v26  ;;  %v11237_v3 = vmax.f32 %v3055_v18, %v11072_v21  ;;  %v4196_v13 = vld [vmem:[#allocation3 + $0xc2] ss:$8 sm:$0x30]  ;;  %v3883_v26 = vld [vmem:[#allocation11 + $0xdc0] sm:$0xff]  ;;  %v8831_v2 = vpack.c.bf16 %v2481_v1, %v2480_v61 }
 0x333   :  { %3800 = vmatmul.mubr.f32.vlgmr.msra.gmra.mrb[146].mxu0 %v3572_v41  ;;  %8822 = vmatprep.subr.bf16.mxu1 %v8821_v19  ;;  %v9181_v59 = vpack.c.bf16 %v3882_v57, %v3881_v22  ;;  %v2499_v41 = vld [vmem:[#allocation11 + $0x5c8] sm:$0xff]  ;;  %v4192_v21 = vld [vmem:[#allocation3 + $0x32] ss:$8 sm:$0x30]  ;;  %v9183_v48 = vpack.c.bf16 %v3866_v11, %v3865_v24  ;;  %v2484_v18 = vld [vmem:[#allocation11 + $0x550] sm:$0xff] }
 0x334   :  { %9172 = vmatpush3.bf16.msra.mxu0 %v9171_v50  ;;  %4113 = vmatprep.mubr.f32.mxu0 %v3972_v34  ;;  %v9179_v50 = vpack.c.bf16 %v3864_v62, %v3863_v23  ;;  %v3884_v19 = vld [vmem:[#allocation11 + $0xdc8] sm:$0xff]  ;;  %v3157_v51 = vcombine.low %v11234_v9, %v11237_v3  ;;  %v8833_v32 = vpack.c.bf16 %v2499_v41, %v2498_v55  ;;  %v3867_v34 = vld [vmem:[#allocation11 + $0xd40] sm:$0xff]  ;;  %v2501_v46 = vld [vmem:[#allocation11 + $0x5d8] sm:$0xff] }
 0x335   :  { %9174 = vmatprep.subr.bf16.mxu0 %v9173_v7  ;;  %v4195_v8 = vld [vmem:[#allocation3 + $0xc2] ss:$8 sm:$0xf]  ;;  %v9185_v14 = vpack.c.bf16 %v3884_v19, %v3883_v26  ;;  %v5740_v16 = vld [vmem:[#allocation3 + $0xf3] ss:$8 sm:$0x30] }
 0x336   :  { %8824 = vmatpush3.bf16.msra.mxu1 %v8823_v54  ;;  %v2482_v7 = vld [vmem:[#allocation11 + $0x540] sm:$0xff]  ;;  %v4197_v36 = vor.u32 %v4196_v13, %v4195_v8  ;;  %v3885_v23 = vld [vmem:[#allocation11 + $0xdd0] sm:$0xff]  ;;  %v3886_v15 = vld [vmem:[#allocation11 + $0xdd8] sm:$0xff] }
 0x337   :  { %8826 = vmatprep.subr.bf16.mxu1 %v8825_v29  ;;  %v4191_v54 = vld [vmem:[#allocation3 + $0x32] ss:$8 sm:$0xf] }
 0x338   :  { %9176 = vmatpush3.bf16.msra.mxu0 %v9175_v4  ;;  %v3868_v4 = vld [vmem:[#allocation11 + $0xd48] sm:$0xff]  ;;  %v2500_v29 = vld [vmem:[#allocation11 + $0x5d0] sm:$0xff]  ;;  %v4193_v12 = vor.u32 %v4192_v21, %v4191_v54  ;;  %v4207_v62 = vmax.f32 %v4197_v36, %v11185_v30  ;;  %v2485_v22 = vld [vmem:[#allocation11 + $0x558] sm:$0xff] }
 0x339   :  { %9178 = vmatprep.subr.bf16.mxu0 %v9177_v38  ;;  %v8835_v38 = vpack.c.bf16 %v2483_v10, %v2482_v7  ;;  %v9187_v5 = vpack.c.bf16 %v3868_v4, %v3867_v34  ;;  %v8837_v0 = vpack.c.bf16 %v2501_v46, %v2500_v29  ;;  %v3869_v57 = vld [vmem:[#allocation11 + $0xd50] sm:$0xff]  ;;  %v3870_v61 = vld [vmem:[#allocation11 + $0xd58] sm:$0xff]  ;;  %v2502_v1 = vld [vmem:[#allocation11 + $0x5e0] sm:$0xff]  ;;  %v8839_v55 = vpack.c.bf16 %v2485_v22, %v2484_v18 }
 0x33a   :  { %8828 = vmatpush3.bf16.msra.mxu1 %v8827_v56  ;;  %v9189_v56 = vpack.c.bf16 %v3886_v15, %v3885_v23  ;;  %v2503_v24 = vld [vmem:[#allocation11 + $0x5e8] sm:$0xff]  ;;  %v2486_v13 = vld [vmem:[#allocation11 + $0x560] sm:$0xff]  ;;  %v11246_v30 = vmax.f32 %v4207_v62, %v11155_v40  ;;  %v2505_v7 = vld [vmem:[#allocation11 + $0x5f8] sm:$0xff]  ;;  %v11257_v18 = vrot.slane %v2774_v52, %v11099_v60 }
 0x33b   :  { %8830 = vmatprep.subr.bf16.mxu1 %v8829_v31  ;;  %v3887_v31 = vld [vmem:[#allocation11 + $0xde0] sm:$0xff]  ;;  %v3888_v11 = vld [vmem:[#allocation11 + $0xde8] sm:$0xff]  ;;  %v8841_v41 = vpack.c.bf16 %v2503_v24, %v2502_v1  ;;  %v2489_v10 = vld [vmem:[#allocation11 + $0x578] sm:$0xff] }
 0x33c   :  { %9180 = vmatpush3.bf16.msra.mxu0 %v9179_v50  ;;  %v4206_v50 = vmax.f32 %v4193_v12, %v11189_v58  ;;  %v2487_v26 = vld [vmem:[#allocation11 + $0x568] sm:$0xff]  ;;  %v3871_v19 = vld [vmem:[#allocation11 + $0xd60] sm:$0xff]  ;;  %v9193_v8 = vpack.c.bf16 %v3888_v11, %v3887_v31  ;;  %v3889_v58 = vld [vmem:[#allocation11 + $0xdf0] sm:$0xff] }
 0x33d   :  { %9182 = vmatprep.subr.bf16.mxu0 %v9181_v59  ;;  %v9191_v59 = vpack.c.bf16 %v3870_v61, %v3869_v57  ;;  %v3872_v21 = vld [vmem:[#allocation11 + $0xd68] sm:$0xff]  ;;  %v8843_v40 = vpack.c.bf16 %v2487_v26, %v2486_v13  ;;  %v3873_v34 = vld [vmem:[#allocation11 + $0xd70] sm:$0xff]  ;;  %v3874_v54 = vld [vmem:[#allocation11 + $0xd78] sm:$0xff]  ;;  %v11266_v26 = vrot.slane %v11207_v28, %v11099_v60 }
 0x33e   :  { %8832 = vmatpush3.bf16.msra.mxu1 %v8831_v2  ;;  %v2504_v2 = vld [vmem:[#allocation11 + $0x5f0] sm:$0xff]  ;;  %v11249_v36 = vmax.f32 %v4206_v50, %v11148_v17  ;;  %v2310_v4 = vld [vmem:[#allocation11 + $0x88] sm:$0xff]  ;;  %v9195_v46 = vpack.c.bf16 %v3872_v21, %v3871_v19  ;;  %v4227_v23 = vld [vmem:[#allocation11 + $0xf80] sm:$0xff] }
 0x33f   :  { %8834 = vmatprep.subr.bf16.mxu1 %v8833_v32  ;;  %v2488_v32 = vld [vmem:[#allocation11 + $0x570] sm:$0xff]  ;;  %v8845_v12 = vpack.c.bf16 %v2505_v7, %v2504_v2  ;;  %v4228_v15 = vld [vmem:[#allocation11 + $0xf88] sm:$0xff]  ;;  %v4211_v1 = vld [vmem:[#allocation11 + $0xf00] sm:$0xff] }
 0x340   :  { %9184 = vmatpush3.bf16.msra.mxu0 %v9183_v48  ;;  %v3890_v48 = vld [vmem:[#allocation11 + $0xdf8] sm:$0xff]  ;;  %v4309_v29 = vcombine.low %v11249_v36, %v11246_v30  ;;  %v5344_v17 = vld [vmem:[#allocation3 + $0x60] ss:$8 sm:$0x30]  ;;  %v9233_v19 = vpack.c.bf16 %v4228_v15, %v4227_v23 }
 0x341   :  { %9186 = vmatprep.subr.bf16.mxu0 %v9185_v14  ;;  %v2309_v14 = vld [vmem:[#allocation11 + $0x80] sm:$0xff]  ;;  %v5352_v57 = vld [vmem:[#allocation3 + $0x61] ss:$8 sm:$0x30]  ;;  %v2312_v52 = vld [vmem:[#allocation11 + $0x98] sm:$0xff] }
 0x342   :  { %8836 = vmatpush3.bf16.msra.mxu1 %v8835_v38  ;;  %v9197_v38 = vpack.c.bf16 %v3890_v48, %v3889_v58  ;;  %v5343_v62 = vld [vmem:[#allocation3 + $0x60] ss:$8 sm:$0xf]  ;;  %v5351_v22 = vld [vmem:[#allocation3 + $0x61] ss:$8 sm:$0xf]  ;;  %v11260_v50 = vrot.slane %v4309_v29, %v11099_v60  ;;  %v8849_v13 = vpack.c.bf16 %v2310_v4, %v2309_v14  ;;  %v2790_v48 = vcombine.high %v11257_v18, %v11257_v18 }
 0x343   :  { %8838 = vmatprep.subr.bf16.mxu1 %v8837_v0  ;;  %v2293_v0 = vld [vmem:[#allocation11] sm:$0xff]  ;;  %v2294_v61 = vld [vmem:[#allocation11 + $0x8] sm:$0xff]  ;;  %v5345_v31 = vor.u32 %v5344_v17, %v5343_v62  ;;  %v11262_v11 = vor.u32 %v5352_v57, %v5351_v22  ;;  %v4229_v21 = vld [vmem:[#allocation11 + $0xf90] sm:$0xff] }
 0x344   :  { %9188 = vmatpush3.bf16.msra.mxu0 %v9187_v5  ;;  %v5348_v5 = vld [vmem:[#allocation3 + $0xf0] ss:$8 sm:$0x30]  ;;  %v4212_v24 = vld [vmem:[#allocation11 + $0xf08] sm:$0xff]  ;;  %v4213_v28 = vld [vmem:[#allocation11 + $0xf10] sm:$0xff] }
 0x345   :  { %9190 = vmatprep.subr.bf16.mxu0 %v9189_v56  ;;  %v8847_v56 = vpack.c.bf16 %v2489_v10, %v2488_v32  ;;  %v4968_v2 = vld [vmem:[#allocation3 + $0x37] ss:$8 sm:$0x30]  ;;  %v4972_v7 = vld [vmem:[#allocation3 + $0xc7] ss:$8 sm:$0x30]  ;;  %v5358_v29 = vmax.f32 %v5345_v31, %v11262_v11 }
 0x346   :  { %8840 = vmatpush3.bf16.msra.mxu1 %v8839_v55  ;;  %v9199_v55 = vpack.c.bf16 %v3874_v54, %v3873_v34  ;;  %v5355_v32 = vld [vmem:[#allocation3 + $0xf1] ss:$8 sm:$0xf]  ;;  %v4325_v34 = vcombine.high %v11260_v50, %v11260_v50  ;;  %v4967_v15 = vld [vmem:[#allocation3 + $0x37] ss:$8 sm:$0xf] }
 0x347   :  { %8842 = vmatprep.subr.bf16.mxu1 %v8841_v41  ;;  %v5347_v41 = vld [vmem:[#allocation3 + $0xf0] ss:$8 sm:$0xf]  ;;  %v5356_v10 = vld [vmem:[#allocation3 + $0xf1] ss:$8 sm:$0x30]  ;;  %v11279_v22 = vor.u32 %v4968_v2, %v4967_v15 }
 0x348   :  { %9192 = vmatpush3.bf16.msra.mxu0 %v9191_v59  ;;  %v2311_v59 = vld [vmem:[#allocation11 + $0x90] sm:$0xff]  ;;  %v5349_v58 = vor.u32 %v5348_v5, %v5347_v41  ;;  %v2296_v14 = vld [vmem:[#allocation11 + $0x18] sm:$0xff]  ;;  %v11272_v4 = vor.u32 %v5356_v10, %v5355_v32  ;;  %v2313_v5 = vld [vmem:[#allocation11 + $0xa0] sm:$0xff] }
 0x349   :  { %9194 = vmatprep.subr.bf16.mxu0 %v9193_v8  ;;  %v4230_v8 = vld [vmem:[#allocation11 + $0xf98] sm:$0xff]  ;;  %v2295_v54 = vld [vmem:[#allocation11 + $0x10] sm:$0xff]  ;;  %v8853_v23 = vpack.c.bf16 %v2312_v52, %v2311_v59  ;;  %v4232_v31 = vld [vmem:[#allocation11 + $0xfa8] sm:$0xff] }
 0x34a   :  { %8844 = vmatpush3.bf16.msra.mxu1 %v8843_v40  ;;  %v8851_v40 = vpack.c.bf16 %v2294_v61, %v2293_v0  ;;  %v4971_v17 = vld [vmem:[#allocation3 + $0xc7] ss:$8 sm:$0xf]  ;;  %v9237_v61 = vpack.c.bf16 %v4230_v8, %v4229_v21  ;;  %v6124_v32 = vld [vmem:[#allocation3 + $0xf5] ss:$8 sm:$0x30] }
 0x34b   :  { %8846 = vmatprep.subr.bf16.mxu1 %v8845_v12  ;;  %v9235_v12 = vpack.c.bf16 %v4212_v24, %v4211_v1  ;;  %v4214_v62 = vld [vmem:[#allocation11 + $0xf18] sm:$0xff]  ;;  %v2314_v0 = vld [vmem:[#allocation11 + $0xa8] sm:$0xff]  ;;  %v11281_v57 = vor.u32 %v4972_v7, %v4971_v17  ;;  %v8855_v1 = vpack.c.bf16 %v2296_v14, %v2295_v54  ;;  %v4231_v24 = vld [vmem:[#allocation11 + $0xfa0] sm:$0xff] }
 0x34c   :  { %9196 = vmatpush3.bf16.msra.mxu0 %v9195_v46  ;;  %v2539_v46 = vrot.slane %v11211_v27, %v11099_v60  ;;  %v11285_v27 = vrot.slane %v2790_v48, %v11099_v60  ;;  %v9239_v52 = vpack.c.bf16 %v4214_v62, %v4213_v28  ;;  %v8857_v41 = vpack.c.bf16 %v2314_v0, %v2313_v5  ;;  %v2298_v21 = vld [vmem:[#allocation11 + $0x28] sm:$0xff]  ;;  %v4215_v8 = vld [vmem:[#allocation11 + $0xf20] sm:$0xff]  ;;  %v2316_v48 = vld [vmem:[#allocation11 + $0xb8] sm:$0xff] }
 0x34d   :  { %9198 = vmatprep.subr.bf16.mxu0 %v9197_v38  ;;  %v3971_v38 = vcombine.high %v11266_v26, %v11266_v26  ;;  %v9241_v2 = vpack.c.bf16 %v4232_v31, %v4231_v24  ;;  %v4216_v7 = vld [vmem:[#allocation11 + $0xf28] sm:$0xff]  ;;  %v4233_v10 = vld [vmem:[#allocation11 + $0xfb0] sm:$0xff]  ;;  %v4218_v15 = vld [vmem:[#allocation11 + $0xf38] sm:$0xff] }
 0x34e   :  { %8848 = vmatpush3.bf16.msra.mxu1 %v8847_v56  ;;  %v5359_v56 = vmax.f32 %v5349_v58, %v11272_v4  ;;  %v2315_v58 = vld [vmem:[#allocation11 + $0xb0] sm:$0xff]  ;;  %v9243_v14 = vpack.c.bf16 %v4216_v7, %v4215_v8  ;;  %v2317_v17 = vld [vmem:[#allocation11 + $0xc0] sm:$0xff]  ;;  %v4236_v5 = vld [vmem:[#allocation11 + $0xfc8] sm:$0xff] }
 0x34f   :  { %8850 = vmatprep.subr.bf16.mxu1 %v8849_v13  ;;  %v11291_v13 = vmax.f32 %v5358_v29, %v11279_v22  ;;  %v8861_v28 = vpack.c.bf16 %v2316_v48, %v2315_v58  ;;  %v2299_v29 = vld [vmem:[#allocation11 + $0x30] sm:$0xff]  ;;  %v4235_v62 = vld [vmem:[#allocation11 + $0xfc0] sm:$0xff]  ;;  %v2320_v8 = vld [vmem:[#allocation11 + $0xd8] sm:$0xff] }
 0x350   :  { %9200 = vmatpush3.bf16.msra.mxu0 %v9199_v55  ;;  %v11288_v55 = vrot.slane %v4325_v34, %v11099_v60  ;;  %v11294_v59 = vmax.f32 %v5359_v56, %v11281_v57  ;;  %v2301_v56 = vld [vmem:[#allocation11 + $0x40] sm:$0xff]  ;;  %v4238_v7 = vld [vmem:[#allocation11 + $0xfd8] sm:$0xff]  ;;  %v2303_v58 = vld [vmem:[#allocation11 + $0x50] sm:$0xff] }
 0x351   :  { %9234 = vmatprep.subr.bf16.mxu0 %v9233_v19  ;;  %2767 = vmatmul.mubr.f32.vlgmr.msra.gmra.mrb[4].mxu1 %v2539_v46  ;;  %v2297_v19 = vld [vmem:[#allocation11 + $0x20] sm:$0xff]  ;;  %v2300_v46 = vld [vmem:[#allocation11 + $0x38] sm:$0xff] }
 0x352   :  { %8852 = vmatpush3.bf16.msra.mxu1 %v8851_v40  ;;  %2892 = vmatprep.mubr.f32.mxu1 %v11285_v27  ;;  %v4234_v40 = vld [vmem:[#allocation11 + $0xfb8] sm:$0xff]  ;;  %v8859_v54 = vpack.c.bf16 %v2298_v21, %v2297_v19  ;;  %v8863_v0 = vpack.c.bf16 %v2300_v46, %v2299_v29  ;;  %v9249_v21 = vpack.c.bf16 %v4236_v5, %v4235_v62  ;;  %v4221_v29 = vld [vmem:[#allocation11 + $0xf50] sm:$0xff]  ;;  %v4240_v62 = vld [vmem:[#allocation11 + $0xfe8] sm:$0xff] }
 0x353   :  { %4114 = vmatmul.mubr.f32.vlgmr.msra.gmra.mrb[148].mxu0 %v3971_v38  ;;  %8854 = vmatprep.subr.bf16.mxu1 %v8853_v23  ;;  %v9245_v23 = vpack.c.bf16 %v4234_v40, %v4233_v10  ;;  %v2318_v38 = vld [vmem:[#allocation11 + $0xc8] sm:$0xff]  ;;  %v6112_v19 = vld [vmem:[#allocation3 + $0x64] ss:$8 sm:$0x30] }
 0x354   :  { %9236 = vmatpush3.bf16.msra.mxu0 %v9235_v12  ;;  %4427 = vmatprep.mubr.f32.mxu0 %v11288_v55  ;;  %v4217_v12 = vld [vmem:[#allocation11 + $0xf30] sm:$0xff]  ;;  %v8865_v31 = vpack.c.bf16 %v2318_v38, %v2317_v17  ;;  %v2304_v48 = vld [vmem:[#allocation11 + $0x58] sm:$0xff]  ;;  %v6116_v40 = vld [vmem:[#allocation3 + $0xf4] ss:$8 sm:$0x30] }
 0x355   :  { %9238 = vmatprep.subr.bf16.mxu0 %v9237_v61  ;;  %v2302_v61 = vld [vmem:[#allocation11 + $0x48] sm:$0xff]  ;;  %v9247_v24 = vpack.c.bf16 %v4218_v15, %v4217_v12  ;;  %v4222_v46 = vld [vmem:[#allocation11 + $0xf58] sm:$0xff]  ;;  %v4239_v38 = vld [vmem:[#allocation11 + $0xfe0] sm:$0xff] }
 0x356   :  { %8856 = vmatpush3.bf16.msra.mxu1 %v8855_v1  ;;  %v4219_v1 = vld [vmem:[#allocation11 + $0xf40] sm:$0xff]  ;;  %v6120_v15 = vld [vmem:[#allocation3 + $0x65] ss:$8 sm:$0x30] }
 0x357   :  { %8858 = vmatprep.subr.bf16.mxu1 %v8857_v41  ;;  %v2319_v41 = vld [vmem:[#allocation11 + $0xd0] sm:$0xff] }
 0x358   :  { %9240 = vmatpush3.bf16.msra.mxu0 %v9239_v52  ;;  %v4220_v52 = vld [vmem:[#allocation11 + $0xf48] sm:$0xff] }
 0x359   :  { %9242 = vmatprep.subr.bf16.mxu0 %v9241_v2  ;;  %v4237_v2 = vld [vmem:[#allocation11 + $0xfd0] sm:$0xff]  ;;  %v9251_v17 = vpack.c.bf16 %v4220_v52, %v4219_v1 }
 0x35a   :  { %8860 = vmatpush3.bf16.msra.mxu1 %v8859_v54  ;;  %v6111_v10 = vld [vmem:[#allocation3 + $0x64] ss:$8 sm:$0xf]  ;;  %v8867_v54 = vpack.c.bf16 %v2302_v61, %v2301_v56  ;;  %v6119_v34 = vld [vmem:[#allocation3 + $0x65] ss:$8 sm:$0xf]  ;;  %v9253_v35 = vpack.c.bf16 %v4238_v7, %v4237_v2 }
 0x35b   :  { %8862 = vmatprep.subr.bf16.mxu1 %v8861_v28  ;;  %v2322_v28 = vld [vmem:[#allocation11 + $0xe8] sm:$0xff]  ;;  %v6113_v12 = vor.u32 %v6112_v19, %v6111_v10  ;;  %v11302_v56 = vor.u32 %v6120_v15, %v6119_v34  ;;  %v8871_v19 = vpack.c.bf16 %v2304_v48, %v2303_v58  ;;  %v2305_v10 = vld [vmem:[#allocation11 + $0x60] sm:$0xff]  ;;  %v9257_v34 = vpack.c.bf16 %v4240_v62, %v4239_v38  ;;  %v2324_v15 = vld [vmem:[#allocation11 + $0xf8] sm:$0xff] }
 0x35c   :  { %9244 = vmatpush3.bf16.msra.mxu0 %v9243_v14  ;;  %v2321_v14 = vld [vmem:[#allocation11 + $0xe0] sm:$0xff]  ;;  %v4224_v7 = vld [vmem:[#allocation11 + $0xf68] sm:$0xff]  ;;  %v4241_v48 = vld [vmem:[#allocation11 + $0xff0] sm:$0xff] }
 0x35d   :  { %9246 = vmatprep.subr.bf16.mxu0 %v9245_v23  ;;  %v8869_v23 = vpack.c.bf16 %v2320_v8, %v2319_v41  ;;  %v6115_v5 = vld [vmem:[#allocation3 + $0xf4] ss:$8 sm:$0xf]  ;;  %v6123_v61 = vld [vmem:[#allocation3 + $0xf5] ss:$8 sm:$0xf]  ;;  %v6126_v52 = vmax.f32 %v6113_v12, %v11302_v56  ;;  %v9255_v41 = vpack.c.bf16 %v4222_v46, %v4221_v29  ;;  %v4310_v29 = vcombine.high %v11249_v36, %v11246_v30 }
 0x35e   :  { %8864 = vmatpush3.bf16.msra.mxu1 %v8863_v0  ;;  %v6117_v0 = vor.u32 %v6116_v40, %v6115_v5  ;;  %v11304_v1 = vor.u32 %v6124_v32, %v6123_v61  ;;  %v5735_v8 = vld [vmem:[#allocation3 + $0x63] ss:$8 sm:$0xf] }
 0x35f   :  { %8866 = vmatprep.subr.bf16.mxu1 %v8865_v31  ;;  %v4223_v31 = vld [vmem:[#allocation11 + $0xf60] sm:$0xff]  ;;  %v2323_v40 = vld [vmem:[#allocation11 + $0xf0] sm:$0xff]  ;;  %v4242_v5 = vld [vmem:[#allocation11 + $0xff8] sm:$0xff] }
 0x360   :  { %9248 = vmatpush3.bf16.msra.mxu0 %v9247_v24  ;;  %v2306_v24 = vld [vmem:[#allocation11 + $0x68] sm:$0xff]  ;;  %v6127_v32 = vmax.f32 %v6117_v0, %v11304_v1  ;;  %v4226_v38 = vld [vmem:[#allocation11 + $0xf78] sm:$0xff]  ;;  %v2341_v62 = vld [vmem:[#allocation11 + $0x180] sm:$0xff] }
 0x361   :  { %9250 = vmatprep.subr.bf16.mxu0 %v9249_v21  ;;  %v8873_v21 = vpack.c.bf16 %v2322_v28, %v2321_v14  ;;  %v5739_v2 = vld [vmem:[#allocation3 + $0xf3] ss:$8 sm:$0xf]  ;;  %v8875_v12 = vpack.c.bf16 %v2306_v24, %v2305_v10  ;;  %v11325_v24 = vrot.slane %v4310_v29, %v11099_v60 }
 0x362   :  { %8868 = vmatpush3.bf16.msra.mxu1 %v8867_v54  ;;  %v11307_v54 = vor.u32 %v5736_v45, %v5735_v8  ;;  %v11309_v58 = vor.u32 %v5740_v16, %v5739_v2  ;;  %v9259_v45 = vpack.c.bf16 %v4224_v7, %v4223_v31  ;;  %v8877_v16 = vpack.c.bf16 %v2324_v15, %v2323_v40  ;;  %v2307_v14 = vld [vmem:[#allocation11 + $0x70] sm:$0xff]  ;;  %v2308_v28 = vld [vmem:[#allocation11 + $0x78] sm:$0xff]  ;;  %v2342_v0 = vld [vmem:[#allocation11 + $0x188] sm:$0xff] }
 0x363   :  { %8870 = vmatprep.subr.bf16.mxu1 %v8869_v23  ;;  %v9261_v23 = vpack.c.bf16 %v4242_v5, %v4241_v48  ;;  %v4291_v61 = vld [vmem:[#allocation11 + $0x1180] sm:$0xff]  ;;  %v8879_v10 = vpack.c.bf16 %v2308_v28, %v2307_v14  ;;  %v2343_v7 = vld [vmem:[#allocation11 + $0x190] sm:$0xff]  ;;  %v2344_v40 = vld [vmem:[#allocation11 + $0x198] sm:$0xff]  ;;  %v11335_v28 = vrot.slane %v11260_v50, %v11099_v60 }
 0x364   :  { %9252 = vmatpush3.bf16.msra.mxu0 %v9251_v17  ;;  %v11315_v46 = vmax.f32 %v6126_v52, %v11307_v54  ;;  %v4225_v17 = vld [vmem:[#allocation11 + $0xf70] sm:$0xff]  ;;  %v8881_v52 = vpack.c.bf16 %v2342_v0, %v2341_v62  ;;  %v4275_v2 = vld [vmem:[#allocation11 + $0x1100] sm:$0xff]  ;;  %v4294_v5 = vld [vmem:[#allocation11 + $0x1198] sm:$0xff] }
 0x365   :  { %9254 = vmatprep.subr.bf16.mxu0 %v9253_v35  ;;  %v11318_v35 = vmax.f32 %v6127_v32, %v11309_v58  ;;  %v9263_v31 = vpack.c.bf16 %v4226_v38, %v4225_v17  ;;  %v4326_v32 = vcombine.high %v11325_v24, %v11325_v24  ;;  %v4293_v48 = vld [vmem:[#allocation11 + $0x1190] sm:$0xff]  ;;  %v8885_v17 = vpack.c.bf16 %v2344_v40, %v2343_v7  ;;  %v2345_v38 = vld [vmem:[#allocation11 + $0x1a0] sm:$0xff]  ;;  %v2346_v62 = vld [vmem:[#allocation11 + $0x1a8] sm:$0xff] }
 0x366   :  { %8872 = vmatpush3.bf16.msra.mxu1 %v8871_v19  ;;  %v4292_v19 = vld [vmem:[#allocation11 + $0x1188] sm:$0xff]  ;;  %v4277_v14 = vld [vmem:[#allocation11 + $0x1110] sm:$0xff]  ;;  %v9301_v0 = vpack.c.bf16 %v4294_v5, %v4293_v48  ;;  %v2348_v7 = vld [vmem:[#allocation11 + $0x1b8] sm:$0xff] }
 0x367   :  { %8874 = vmatprep.subr.bf16.mxu1 %v8873_v21  ;;  %v6229_v30 = vcombine.low %v11315_v46, %v11318_v35  ;;  %v6230_v36 = vcombine.high %v11315_v46, %v11318_v35  ;;  %v2326_v21 = vld [vmem:[#allocation11 + $0x108] sm:$0xff]  ;;  %v9297_v8 = vpack.c.bf16 %v4292_v19, %v4291_v61  ;;  %v4295_v61 = vld [vmem:[#allocation11 + $0x11a0] sm:$0xff]  ;;  %v4297_v40 = vld [vmem:[#allocation11 + $0x11b0] sm:$0xff] }
 0x368   :  { %9256 = vmatpush3.bf16.msra.mxu0 %v9255_v41  ;;  %v2325_v41 = vld [vmem:[#allocation11 + $0x100] sm:$0xff]  ;;  %v4296_v19 = vld [vmem:[#allocation11 + $0x11a8] sm:$0xff]  ;;  %v4298_v48 = vld [vmem:[#allocation11 + $0x11b8] sm:$0xff] }
 0x369   :  { %9258 = vmatprep.subr.bf16.mxu0 %v9257_v34  ;;  %v4276_v34 = vld [vmem:[#allocation11 + $0x1108] sm:$0xff]  ;;  %v8883_v15 = vpack.c.bf16 %v2326_v21, %v2325_v41  ;;  %v2329_v41 = vld [vmem:[#allocation11 + $0x120] sm:$0xff] }
 0x36a   :  { %8876 = vmatpush3.bf16.msra.mxu1 %v8875_v12  ;;  %v11331_v12 = vrot.slane %v11257_v18, %v11099_v60  ;;  %v9299_v29 = vpack.c.bf16 %v4276_v34, %v4275_v2  ;;  %v2821_v18 = vcombine.high %v11285_v27, %v11285_v27  ;;  %v2330_v21 = vld [vmem:[#allocation11 + $0x128] sm:$0xff]  ;;  %v9305_v2 = vpack.c.bf16 %v4296_v19, %v4295_v61  ;;  %v2347_v34 = vld [vmem:[#allocation11 + $0x1b0] sm:$0xff] }
 0x36b   :  { %8878 = vmatprep.subr.bf16.mxu1 %v8877_v16  ;;  %v2328_v16 = vld [vmem:[#allocation11 + $0x118] sm:$0xff]  ;;  %v4280_v27 = vld [vmem:[#allocation11 + $0x1128] sm:$0xff]  ;;  %v8893_v5 = vpack.c.bf16 %v2348_v7, %v2347_v34 }
 0x36c   :  { %9260 = vmatpush3.bf16.msra.mxu0 %v9259_v45  ;;  %v2327_v45 = vld [vmem:[#allocation11 + $0x110] sm:$0xff] }
 0x36d   :  { %9262 = vmatprep.subr.bf16.mxu0 %v9261_v23  ;;  %v4278_v23 = vld [vmem:[#allocation11 + $0x1118] sm:$0xff]  ;;  %v8887_v50 = vpack.c.bf16 %v2328_v16, %v2327_v45  ;;  %v4281_v16 = vld [vmem:[#allocation11 + $0x1130] sm:$0xff] }
 0x36e   :  { %8880 = vmatpush3.bf16.msra.mxu1 %v8879_v10  ;;  %v4354_v10 = vrot.slane %v4326_v32, %v11099_v60  ;;  %v2332_v45 = vld [vmem:[#allocation11 + $0x138] sm:$0xff] }
 0x36f   :  { %8882 = vmatprep.subr.bf16.mxu1 %v8881_v52  ;;  %v8889_v52 = vpack.c.bf16 %v2346_v62, %v2345_v38  ;;  %v2350_v38 = vld [vmem:[#allocation11 + $0x1c8] sm:$0xff]  ;;  %v4299_v62 = vld [vmem:[#allocation11 + $0x11c0] sm:$0xff] }
 0x370   :  { %9264 = vmatpush3.bf16.msra.mxu0 %v9263_v31  ;;  %v9303_v31 = vpack.c.bf16 %v4278_v23, %v4277_v14  ;;  %v9309_v14 = vpack.c.bf16 %v4298_v48, %v4297_v40  ;;  %v4282_v23 = vld [vmem:[#allocation11 + $0x1138] sm:$0xff]  ;;  %v2335_v48 = vld [vmem:[#allocation11 + $0x150] sm:$0xff] }
 0x371   :  { %9298 = vmatprep.subr.bf16.mxu0 %v9297_v8  ;;  %2893 = vmatmul.mubr.f32.vlgmr.msra.gmra.mrb[6].mxu1 %v11331_v12  ;;  %v4279_v8 = vld [vmem:[#allocation11 + $0x1120] sm:$0xff]  ;;  %v9311_v61 = vpack.c.bf16 %v4282_v23, %v4281_v16  ;;  %v2354_v16 = vld [vmem:[#allocation11 + $0x1e8] sm:$0xff] }
 0x372   :  { %8884 = vmatpush3.bf16.msra.mxu1 %v8883_v15  ;;  %2962 = vmatprep.mubr.f32.mxu1 %v2821_v18  ;;  %v8891_v15 = vpack.c.bf16 %v2330_v21, %v2329_v41  ;;  %v9307_v32 = vpack.c.bf16 %v4280_v27, %v4279_v8  ;;  %v4300_v18 = vld [vmem:[#allocation11 + $0x11c8] sm:$0xff]  ;;  %v2351_v21 = vld [vmem:[#allocation11 + $0x1d0] sm:$0xff]  ;;  %v2352_v8 = vld [vmem:[#allocation11 + $0x1d8] sm:$0xff] }
 0x373   :  { %4428 = vmatmul.mubr.f32.vlgmr.msra.gmra.mrb[150].mxu0 %v11335_v28  ;;  %8886 = vmatprep.subr.bf16.mxu1 %v8885_v17  ;;  %v2349_v17 = vld [vmem:[#allocation11 + $0x1c0] sm:$0xff]  ;;  %v4284_v41 = vld [vmem:[#allocation11 + $0x1148] sm:$0xff]  ;;  %v4302_v27 = vld [vmem:[#allocation11 + $0x11d8] sm:$0xff]  ;;  %v8901_v40 = vpack.c.bf16 %v2352_v8, %v2351_v21  ;;  %v11346_v8 = vrot.slane %v4693_v44, %v11099_v60  ;;  %v11352_v44 = vrot.slane %v2775_v33, %v11099_v60 }
 0x374   :  { %9300 = vmatpush3.bf16.msra.mxu0 %v9299_v29  ;;  %4567 = vmatprep.mubr.f32.mxu0 %v4354_v10  ;;  %v2331_v29 = vld [vmem:[#allocation11 + $0x130] sm:$0xff]  ;;  %v8897_v19 = vpack.c.bf16 %v2350_v38, %v2349_v17  ;;  %v2333_v10 = vld [vmem:[#allocation11 + $0x140] sm:$0xff]  ;;  %v4304_v23 = vld [vmem:[#allocation11 + $0x11e8] sm:$0xff] }
 0x375   :  { %9302 = vmatprep.subr.bf16.mxu0 %v9301_v0  ;;  %v8895_v0 = vpack.c.bf16 %v2332_v45, %v2331_v29  ;;  %v4286_v29 = vld [vmem:[#allocation11 + $0x1158] sm:$0xff]  ;;  %v2353_v45 = vld [vmem:[#allocation11 + $0x1e0] sm:$0xff]  ;;  %v2791_v6 = vcombine.high %v11352_v44, %v11352_v44 }
 0x376   :  { %8888 = vmatpush3.bf16.msra.mxu1 %v8887_v50  ;;  %v2334_v50 = vld [vmem:[#allocation11 + $0x148] sm:$0xff]  ;;  %v2376_v33 = vld [vmem:[#allocation11 + $0x298] sm:$0xff] }
 0x377   :  { %8890 = vmatprep.subr.bf16.mxu1 %v8889_v52  ;;  %v9313_v52 = vpack.c.bf16 %v4300_v18, %v4299_v62  ;;  %v8899_v34 = vpack.c.bf16 %v2334_v50, %v2333_v10  ;;  %v8905_v62 = vpack.c.bf16 %v2354_v16, %v2353_v45  ;;  %v2337_v18 = vld [vmem:[#allocation11 + $0x160] sm:$0xff]  ;;  %v4288_v10 = vld [vmem:[#allocation11 + $0x1168] sm:$0xff]  ;;  %v2355_v50 = vld [vmem:[#allocation11 + $0x1f0] sm:$0xff] }
 0x378   :  { %9304 = vmatpush3.bf16.msra.mxu0 %v9303_v31  ;;  %v4283_v31 = vld [vmem:[#allocation11 + $0x1140] sm:$0xff]  ;;  %v4644_v45 = vld [vmem:[#allocation11 + $0x1388] sm:$0xff] }
 0x379   :  { %9306 = vmatprep.subr.bf16.mxu0 %v9305_v2  ;;  %v4301_v2 = vld [vmem:[#allocation11 + $0x11d0] sm:$0xff]  ;;  %v9315_v7 = vpack.c.bf16 %v4284_v41, %v4283_v31  ;;  %v2356_v31 = vld [vmem:[#allocation11 + $0x1f8] sm:$0xff] }
 0x37a   :  { %8892 = vmatpush3.bf16.msra.mxu1 %v8891_v15  ;;  %v2336_v15 = vld [vmem:[#allocation11 + $0x158] sm:$0xff] }
 0x37b   :  { %8894 = vmatprep.subr.bf16.mxu1 %v8893_v5  ;;  %v9317_v5 = vpack.c.bf16 %v4302_v27, %v4301_v2  ;;  %v8903_v17 = vpack.c.bf16 %v2336_v15, %v2335_v48  ;;  %v4306_v41 = vld [vmem:[#allocation11 + $0x11f8] sm:$0xff]  ;;  %v8909_v27 = vpack.c.bf16 %v2356_v31, %v2355_v50  ;;  %v4645_v50 = vld [vmem:[#allocation11 + $0x1390] sm:$0xff] }
 0x37c   :  { %9308 = vmatpush3.bf16.msra.mxu0 %v9307_v32  ;;  %v4285_v32 = vld [vmem:[#allocation11 + $0x1150] sm:$0xff]  ;;  %v4290_v15 = vld [vmem:[#allocation11 + $0x1178] sm:$0xff] }
 0x37d   :  { %9310 = vmatprep.subr.bf16.mxu0 %v9309_v14  ;;  %v4303_v14 = vld [vmem:[#allocation11 + $0x11e0] sm:$0xff]  ;;  %v9319_v38 = vpack.c.bf16 %v4286_v29, %v4285_v32  ;;  %v4646_v31 = vld [vmem:[#allocation11 + $0x1398] sm:$0xff] }
 0x37e   :  { %8896 = vmatpush3.bf16.msra.mxu1 %v8895_v0  ;;  %v2338_v0 = vld [vmem:[#allocation11 + $0x168] sm:$0xff]  ;;  %v2373_v32 = vld [vmem:[#allocation11 + $0x280] sm:$0xff] }
 0x37f   :  { %8898 = vmatprep.subr.bf16.mxu1 %v8897_v19  ;;  %v9321_v19 = vpack.c.bf16 %v4304_v23, %v4303_v14  ;;  %v8907_v21 = vpack.c.bf16 %v2338_v0, %v2337_v18  ;;  %v4643_v29 = vld [vmem:[#allocation11 + $0x1380] sm:$0xff]  ;;  %v4709_v14 = vcombine.high %v11346_v8, %v11346_v8 }
 0x380   :  { %9312 = vmatpush3.bf16.msra.mxu0 %v9311_v61  ;;  %v4287_v61 = vld [vmem:[#allocation11 + $0x1160] sm:$0xff]  ;;  %v9361_v18 = vpack.c.bf16 %v4644_v45, %v4643_v29  ;;  %v4648_v45 = vld [vmem:[#allocation11 + $0x13a8] sm:$0xff] }
 0x381   :  { %9314 = vmatprep.subr.bf16.mxu0 %v9313_v52  ;;  %v4305_v52 = vld [vmem:[#allocation11 + $0x11f0] sm:$0xff]  ;;  %v9323_v2 = vpack.c.bf16 %v4288_v10, %v4287_v61  ;;  %v4627_v0 = vld [vmem:[#allocation11 + $0x1300] sm:$0xff]  ;;  %v4628_v61 = vld [vmem:[#allocation11 + $0x1308] sm:$0xff]  ;;  %v11359_v10 = vrot.slane %v4709_v14, %v11099_v60 }
 0x382   :  { %8900 = vmatpush3.bf16.msra.mxu1 %v8899_v34  ;;  %v2339_v34 = vld [vmem:[#allocation11 + $0x170] sm:$0xff]  ;;  %v9325_v48 = vpack.c.bf16 %v4306_v41, %v4305_v52  ;;  %v2820_v52 = vcombine.high %v11331_v12, %v11331_v12  ;;  %v9363_v41 = vpack.c.bf16 %v4628_v61, %v4627_v0  ;;  %v4647_v29 = vld [vmem:[#allocation11 + $0x13a0] sm:$0xff]  ;;  %v2380_v61 = vld [vmem:[#allocation11 + $0x2b8] sm:$0xff] }
 0x383   :  { %8902 = vmatprep.subr.bf16.mxu1 %v8901_v40  ;;  %v4289_v40 = vld [vmem:[#allocation11 + $0x1170] sm:$0xff]  ;;  %v4740_v12 = vcombine.high %v11359_v10, %v11359_v10 }
 0x384   :  { %9316 = vmatpush3.bf16.msra.mxu0 %v9315_v7  ;;  %v2340_v7 = vld [vmem:[#allocation11 + $0x178] sm:$0xff]  ;;  %v9327_v23 = vpack.c.bf16 %v4290_v15, %v4289_v40  ;;  %v2378_v15 = vld [vmem:[#allocation11 + $0x2a8] sm:$0xff]  ;;  %v2379_v0 = vld [vmem:[#allocation11 + $0x2b0] sm:$0xff] }
 0x385   :  { %9318 = vmatprep.subr.bf16.mxu0 %v9317_v5  ;;  %v2374_v5 = vld [vmem:[#allocation11 + $0x288] sm:$0xff]  ;;  %v8911_v16 = vpack.c.bf16 %v2340_v7, %v2339_v34  ;;  %v4340_v34 = vrot.slane %v11325_v24, %v11099_v60  ;;  %v8917_v7 = vpack.c.bf16 %v2376_v33, %v2375_v63  ;;  %v4630_v40 = vld [vmem:[#allocation11 + $0x1318] sm:$0xff] }
 0x386   :  { %8904 = vmatpush3.bf16.msra.mxu1 %v8903_v17  ;;  %v8913_v17 = vpack.c.bf16 %v2374_v5, %v2373_v32  ;;  %v2819_v32 = vrot.slane %v2791_v6, %v11099_v60  ;;  %v9365_v5 = vpack.c.bf16 %v4646_v31, %v4645_v50  ;;  %v4649_v6 = vld [vmem:[#allocation11 + $0x13b0] sm:$0xff]  ;;  %v4650_v63 = vld [vmem:[#allocation11 + $0x13b8] sm:$0xff] }
 0x387   :  { %8906 = vmatprep.subr.bf16.mxu1 %v8905_v62  ;;  %v2358_v62 = vld [vmem:[#allocation11 + $0x208] sm:$0xff]  ;;  %v2364_v50 = vld [vmem:[#allocation11 + $0x238] sm:$0xff]  ;;  %v4633_v31 = vld [vmem:[#allocation11 + $0x1330] sm:$0xff] }
 0x388   :  { %9320 = vmatpush3.bf16.msra.mxu0 %v9319_v38  ;;  %v2357_v38 = vld [vmem:[#allocation11 + $0x200] sm:$0xff] }
 0x389   :  { %9322 = vmatprep.subr.bf16.mxu0 %v9321_v19  ;;  %v8915_v19 = vpack.c.bf16 %v2358_v62, %v2357_v38  ;;  %v4631_v38 = vld [vmem:[#allocation11 + $0x1320] sm:$0xff]  ;;  %v9369_v62 = vpack.c.bf16 %v4648_v45, %v4647_v29 }
 0x38a   :  { %8908 = vmatpush3.bf16.msra.mxu1 %v8907_v21  ;;  %v2359_v21 = vld [vmem:[#allocation11 + $0x210] sm:$0xff]  ;;  %v2365_v29 = vld [vmem:[#allocation11 + $0x240] sm:$0xff] }
 0x38b   :  { %8910 = vmatprep.subr.bf16.mxu1 %v8909_v27  ;;  %v4629_v27 = vld [vmem:[#allocation11 + $0x1310] sm:$0xff] }
 0x38c   :  { %9324 = vmatpush3.bf16.msra.mxu0 %v9323_v2  ;;  %v2360_v2 = vld [vmem:[#allocation11 + $0x218] sm:$0xff]  ;;  %v9367_v24 = vpack.c.bf16 %v4630_v40, %v4629_v27  ;;  %v4651_v40 = vld [vmem:[#allocation11 + $0x13c0] sm:$0xff] }
 0x38d   :  { %9326 = vmatprep.subr.bf16.mxu0 %v9325_v48  ;;  %v2377_v48 = vld [vmem:[#allocation11 + $0x2a0] sm:$0xff]  ;;  %v4964_v27 = vld [vmem:[#allocation3 + $0xc6] ss:$8 sm:$0x30] }
 0x38e   :  { %8912 = vmatpush3.bf16.msra.mxu1 %v8911_v16  ;;  %v8919_v16 = vpack.c.bf16 %v2360_v2, %v2359_v21  ;;  %v8921_v14 = vpack.c.bf16 %v2378_v15, %v2377_v48  ;;  %v4634_v21 = vld [vmem:[#allocation11 + $0x1338] sm:$0xff]  ;;  %v2381_v2 = vld [vmem:[#allocation11 + $0x2c0] sm:$0xff]  ;;  %v4652_v48 = vld [vmem:[#allocation11 + $0x13c8] sm:$0xff] }
 0x38f   :  { %8914 = vmatprep.subr.bf16.mxu1 %v8913_v17  ;;  %v2362_v17 = vld [vmem:[#allocation11 + $0x228] sm:$0xff] }
 0x390   :  { %9328 = vmatpush3.bf16.msra.mxu0 %v9327_v23  ;;  %v2361_v23 = vld [vmem:[#allocation11 + $0x220] sm:$0xff] }
 0x391   :  { %9362 = vmatprep.subr.bf16.mxu0 %v9361_v18  ;;  %2963 = vmatmul.mubr.f32.vlgmr.msra.gmra.mrb[8].mxu1 %v2820_v52  ;;  %v4632_v18 = vld [vmem:[#allocation11 + $0x1328] sm:$0xff]  ;;  %v8923_v33 = vpack.c.bf16 %v2362_v17, %v2361_v23  ;;  %v9377_v17 = vpack.c.bf16 %v4652_v48, %v4651_v40  ;;  %v4655_v40 = vld [vmem:[#allocation11 + $0x13e0] sm:$0xff] }
 0x392   :  { %8916 = vmatpush3.bf16.msra.mxu1 %v8915_v19  ;;  %3032 = vmatprep.mubr.f32.mxu1 %v2819_v32  ;;  %v2363_v19 = vld [vmem:[#allocation11 + $0x230] sm:$0xff]  ;;  %v9371_v52 = vpack.c.bf16 %v4632_v18, %v4631_v38  ;;  %v4960_v15 = vld [vmem:[#allocation3 + $0x36] ss:$8 sm:$0x30]  ;;  %v2384_v18 = vld [vmem:[#allocation11 + $0x2d8] sm:$0xff] }
 0x393   :  { %4568 = vmatmul.mubr.f32.vlgmr.msra.gmra.mrb[152].mxu0 %v4340_v34  ;;  %8918 = vmatprep.subr.bf16.mxu1 %v8917_v7  ;;  %v9373_v34 = vpack.c.bf16 %v4650_v63, %v4649_v6  ;;  %v2382_v7 = vld [vmem:[#allocation11 + $0x2c8] sm:$0xff]  ;;  %v4654_v6 = vld [vmem:[#allocation11 + $0x13d8] sm:$0xff] }
 0x394   :  { %9364 = vmatpush3.bf16.msra.mxu0 %v9363_v41  ;;  %4881 = vmatprep.mubr.f32.mxu0 %v4740_v12  ;;  %v8925_v41 = vpack.c.bf16 %v2380_v61, %v2379_v0  ;;  %v4963_v32 = vld [vmem:[#allocation3 + $0xc6] ss:$8 sm:$0xf]  ;;  %v9375_v12 = vpack.c.bf16 %v4634_v21, %v4633_v31 }
 0x395   :  { %9366 = vmatprep.subr.bf16.mxu0 %v9365_v5  ;;  %v8927_v5 = vpack.c.bf16 %v2364_v50, %v2363_v19  ;;  %v4965_v45 = vor.u32 %v4964_v27, %v4963_v32  ;;  %v4959_v23 = vld [vmem:[#allocation3 + $0x36] ss:$8 sm:$0xf] }
 0x396   :  { %8920 = vmatpush3.bf16.msra.mxu1 %v8919_v16  ;;  %v8929_v16 = vpack.c.bf16 %v2382_v7, %v2381_v2  ;;  %v4636_v38 = vld [vmem:[#allocation11 + $0x1348] sm:$0xff]  ;;  %v4961_v0 = vor.u32 %v4960_v15, %v4959_v23  ;;  %v4653_v61 = vld [vmem:[#allocation11 + $0x13d0] sm:$0xff]  ;;  %v4638_v2 = vld [vmem:[#allocation11 + $0x1358] sm:$0xff] }
 0x397   :  { %8922 = vmatprep.subr.bf16.mxu1 %v8921_v14  ;;  %v4635_v14 = vld [vmem:[#allocation11 + $0x1340] sm:$0xff]  ;;  %v2367_v31 = vld [vmem:[#allocation11 + $0x250] sm:$0xff]  ;;  %v9381_v21 = vpack.c.bf16 %v4654_v6, %v4653_v61  ;;  %v4656_v48 = vld [vmem:[#allocation11 + $0x13e8] sm:$0xff] }
 0x398   :  { %9368 = vmatpush3.bf16.msra.mxu0 %v9367_v24  ;;  %v2366_v24 = vld [vmem:[#allocation11 + $0x248] sm:$0xff]  ;;  %v9379_v19 = vpack.c.bf16 %v4636_v38, %v4635_v14  ;;  %v2385_v27 = vld [vmem:[#allocation11 + $0x2e0] sm:$0xff]  ;;  %v4974_v7 = vmax.f32 %v4961_v0, %v11279_v22  ;;  %v2387_v14 = vld [vmem:[#allocation11 + $0x2f0] sm:$0xff] }
 0x399   :  { %9370 = vmatprep.subr.bf16.mxu0 %v9369_v62  ;;  %v2383_v62 = vld [vmem:[#allocation11 + $0x2d0] sm:$0xff]  ;;  %v8931_v63 = vpack.c.bf16 %v2366_v24, %v2365_v29  ;;  %v2369_v29 = vld [vmem:[#allocation11 + $0x260] sm:$0xff]  ;;  %v4640_v24 = vld [vmem:[#allocation11 + $0x1368] sm:$0xff] }
 0x39a   :  { %8924 = vmatpush3.bf16.msra.mxu1 %v8923_v33  ;;  %v4975_v33 = vmax.f32 %v4965_v45, %v11281_v57  ;;  %v8933_v50 = vpack.c.bf16 %v2384_v18, %v2383_v62  ;;  %v2370_v45 = vld [vmem:[#allocation11 + $0x268] sm:$0xff]  ;;  %v2388_v23 = vld [vmem:[#allocation11 + $0x2f8] sm:$0xff]  ;;  %v11374_v22 = vmax.f32 %v4974_v7, %v11170_v20  ;;  %v2371_v61 = vld [vmem:[#allocation11 + $0x270] sm:$0xff] }
 0x39b   :  { %8926 = vmatprep.subr.bf16.mxu1 %v8925_v41  ;;  %v4637_v41 = vld [vmem:[#allocation11 + $0x1350] sm:$0xff]  ;;  %v4658_v38 = vld [vmem:[#allocation11 + $0x13f8] sm:$0xff]  ;;  %v8941_v0 = vpack.c.bf16 %v2388_v23, %v2387_v14  ;;  %v3076_v20 = vld [vmem:[#allocation11 + $0x688] sm:$0xff] }
 0x39c   :  { %9372 = vmatpush3.bf16.msra.mxu0 %v9371_v52  ;;  %v2368_v52 = vld [vmem:[#allocation11 + $0x258] sm:$0xff]  ;;  %v11371_v57 = vmax.f32 %v4975_v33, %v11178_v49  ;;  %v9383_v32 = vpack.c.bf16 %v4638_v2, %v4637_v41  ;;  %v8939_v49 = vpack.c.bf16 %v2370_v45, %v2369_v29  ;;  %v11382_v41 = vrot.slane %v3157_v51, %v11099_v60  ;;  %v3059_v7 = vld [vmem:[#allocation11 + $0x600] sm:$0xff]  ;;  %v4980_v51 = vld [vmem:[#allocation11 + $0x1508] sm:$0xff] }
 0x39d   :  { %9374 = vmatprep.subr.bf16.mxu0 %v9373_v34  ;;  %v2386_v34 = vld [vmem:[#allocation11 + $0x2e8] sm:$0xff]  ;;  %v8935_v15 = vpack.c.bf16 %v2368_v52, %v2367_v31  ;;  %v2372_v6 = vld [vmem:[#allocation11 + $0x278] sm:$0xff]  ;;  %v4995_v31 = vld [vmem:[#allocation11 + $0x1580] sm:$0xff] }
 0x39e   :  { %8928 = vmatpush3.bf16.msra.mxu1 %v8927_v5  ;;  %v8937_v5 = vpack.c.bf16 %v2386_v34, %v2385_v27  ;;  %v5077_v62 = vcombine.low %v11374_v22, %v11371_v57  ;;  %v4996_v52 = vld [vmem:[#allocation11 + $0x1588] sm:$0xff]  ;;  %v3077_v29 = vld [vmem:[#allocation11 + $0x690] sm:$0xff]  ;;  %v3078_v45 = vld [vmem:[#allocation11 + $0x698] sm:$0xff] }
 0x39f   :  { %8930 = vmatprep.subr.bf16.mxu1 %v8929_v16  ;;  %v9385_v16 = vpack.c.bf16 %v4656_v48, %v4655_v40  ;;  %v3060_v40 = vld [vmem:[#allocation11 + $0x608] sm:$0xff]  ;;  %v11389_v48 = vrot.slane %v11346_v8, %v11099_v60  ;;  %v4998_v14 = vld [vmem:[#allocation11 + $0x1598] sm:$0xff]  ;;  %v2805_v8 = vrot.slane %v11352_v44, %v11099_v60 }
 0x3a0   :  { %9376 = vmatpush3.bf16.msra.mxu0 %v9375_v12  ;;  %v4639_v12 = vld [vmem:[#allocation11 + $0x1360] sm:$0xff]  ;;  %v11385_v2 = vrot.slane %v5077_v62, %v11099_v60  ;;  %v5000_v44 = vld [vmem:[#allocation11 + $0x15a8] sm:$0xff] }
 0x3a1   :  { %9378 = vmatprep.subr.bf16.mxu0 %v9377_v17  ;;  %v4657_v17 = vld [vmem:[#allocation11 + $0x13f0] sm:$0xff]  ;;  %v9387_v18 = vpack.c.bf16 %v4640_v24, %v4639_v12  ;;  %v8947_v12 = vpack.c.bf16 %v3060_v40, %v3059_v7  ;;  %v4739_v62 = vcombine.high %v11389_v48, %v11389_v48  ;;  %v4984_v40 = vld [vmem:[#allocation11 + $0x1528] sm:$0xff] }
 0x3a2   :  { %8932 = vmatpush3.bf16.msra.mxu1 %v8931_v63  ;;  %v4641_v63 = vld [vmem:[#allocation11 + $0x1370] sm:$0xff]  ;;  %v9389_v33 = vpack.c.bf16 %v4658_v38, %v4657_v17  ;;  %v3062_v38 = vld [vmem:[#allocation11 + $0x618] sm:$0xff] }
 0x3a3   :  { %8934 = vmatprep.subr.bf16.mxu1 %v8933_v50  ;;  %v3075_v50 = vld [vmem:[#allocation11 + $0x680] sm:$0xff]  ;;  %v4997_v24 = vld [vmem:[#allocation11 + $0x1590] sm:$0xff] }
 0x3a4   :  { %9380 = vmatpush3.bf16.msra.mxu0 %v9379_v19  ;;  %v4642_v19 = vld [vmem:[#allocation11 + $0x1378] sm:$0xff]  ;;  %v8945_v34 = vpack.c.bf16 %v3076_v20, %v3075_v50  ;;  %v3061_v17 = vld [vmem:[#allocation11 + $0x610] sm:$0xff] }
 0x3a5   :  { %9382 = vmatprep.subr.bf16.mxu0 %v9381_v21  ;;  %v8943_v21 = vpack.c.bf16 %v2372_v6, %v2371_v61  ;;  %v9391_v27 = vpack.c.bf16 %v4642_v19, %v4641_v63  ;;  %v3079_v61 = vld [vmem:[#allocation11 + $0x6a0] sm:$0xff]  ;;  %v3080_v6 = vld [vmem:[#allocation11 + $0x6a8] sm:$0xff]  ;;  %v8951_v20 = vpack.c.bf16 %v3062_v38, %v3061_v17 }
 0x3a6   :  { %8936 = vmatpush3.bf16.msra.mxu1 %v8935_v15  ;;  %v9425_v15 = vpack.c.bf16 %v4996_v52, %v4995_v31  ;;  %v4999_v19 = vld [vmem:[#allocation11 + $0x15a0] sm:$0xff]  ;;  %v8953_v52 = vpack.c.bf16 %v3080_v6, %v3079_v61  ;;  %v3084_v38 = vld [vmem:[#allocation11 + $0x6c8] sm:$0xff] }
 0x3a7   :  { %8938 = vmatprep.subr.bf16.mxu1 %v8937_v5  ;;  %v3173_v5 = vcombine.high %v11382_v41, %v11382_v41  ;;  %v9433_v7 = vpack.c.bf16 %v5000_v44, %v4999_v19  ;;  %v3083_v17 = vld [vmem:[#allocation11 + $0x6c0] sm:$0xff] }
 0x3a8   :  { %9384 = vmatpush3.bf16.msra.mxu0 %v9383_v32  ;;  %v4979_v32 = vld [vmem:[#allocation11 + $0x1500] sm:$0xff]  ;;  %v8961_v61 = vpack.c.bf16 %v3084_v38, %v3083_v17  ;;  %v3072_v38 = vld [vmem:[#allocation11 + $0x668] sm:$0xff] }
 0x3a9   :  { %9386 = vmatprep.subr.bf16.mxu0 %v9385_v16  ;;  %v5093_v16 = vcombine.high %v11385_v2, %v11385_v2  ;;  %v9427_v23 = vpack.c.bf16 %v4980_v51, %v4979_v32  ;;  %v11400_v63 = vrot.slane %v3173_v5, %v11099_v60  ;;  %v3082_v32 = vld [vmem:[#allocation11 + $0x6b8] sm:$0xff]  ;;  %v5001_v51 = vld [vmem:[#allocation11 + $0x15b0] sm:$0xff]  ;;  %v3067_v6 = vld [vmem:[#allocation11 + $0x640] sm:$0xff] }
 0x3aa   :  { %8940 = vmatpush3.bf16.msra.mxu1 %v8939_v49  ;;  %v4981_v49 = vld [vmem:[#allocation11 + $0x1510] sm:$0xff]  ;;  %v5002_v5 = vld [vmem:[#allocation11 + $0x15b8] sm:$0xff]  ;;  %v4987_v19 = vld [vmem:[#allocation11 + $0x1540] sm:$0xff] }
 0x3ab   :  { %8942 = vmatprep.subr.bf16.mxu1 %v8941_v0  ;;  %v4982_v0 = vld [vmem:[#allocation11 + $0x1518] sm:$0xff]  ;;  %v11403_v50 = vrot.slane %v5093_v16, %v11099_v60  ;;  %v3065_v16 = vld [vmem:[#allocation11 + $0x630] sm:$0xff]  ;;  %v3071_v17 = vld [vmem:[#allocation11 + $0x660] sm:$0xff] }
 0x3ac   :  { %9388 = vmatpush3.bf16.msra.mxu0 %v9387_v18  ;;  %v8949_v18 = vpack.c.bf16 %v3078_v45, %v3077_v29  ;;  %v9431_v31 = vpack.c.bf16 %v4982_v0, %v4981_v49  ;;  %v5003_v49 = vld [vmem:[#allocation11 + $0x15c0] sm:$0xff] }
 0x3ad   :  { %9390 = vmatprep.subr.bf16.mxu0 %v9389_v33  ;;  %v9429_v33 = vpack.c.bf16 %v4998_v14, %v4997_v24  ;;  %v3066_v24 = vld [vmem:[#allocation11 + $0x638] sm:$0xff]  ;;  %v4985_v14 = vld [vmem:[#allocation11 + $0x1530] sm:$0xff] }
 0x3ae   :  { %8944 = vmatpush3.bf16.msra.mxu1 %v8943_v21  ;;  %v3063_v21 = vld [vmem:[#allocation11 + $0x620] sm:$0xff] }
 0x3af   :  { %8946 = vmatprep.subr.bf16.mxu1 %v8945_v34  ;;  %v4983_v34 = vld [vmem:[#allocation11 + $0x1520] sm:$0xff] }
 0x3b0   :  { %9392 = vmatpush3.bf16.msra.mxu0 %v9391_v27  ;;  %v3064_v27 = vld [vmem:[#allocation11 + $0x628] sm:$0xff]  ;;  %v9435_v45 = vpack.c.bf16 %v4984_v40, %v4983_v34 }
 0x3b1   :  { %9426 = vmatprep.subr.bf16.mxu0 %v9425_v15  ;;  %3033 = vmatmul.mubr.f32.vlgmr.msra.gmra.mrb[10].mxu1 %v2805_v8  ;;  %v3081_v15 = vld [vmem:[#allocation11 + $0x6b0] sm:$0xff]  ;;  %v8955_v29 = vpack.c.bf16 %v3064_v27, %v3063_v21  ;;  %v9437_v8 = vpack.c.bf16 %v5002_v5, %v5001_v51  ;;  %v5006_v27 = vld [vmem:[#allocation11 + $0x15d8] sm:$0xff] }
 0x3b2   :  { %8948 = vmatpush3.bf16.msra.mxu1 %v8947_v12  ;;  %3275 = vmatprep.mubr.f32.mxu1 %v11400_v63  ;;  %v8957_v12 = vpack.c.bf16 %v3082_v32, %v3081_v15  ;;  %v5005_v21 = vld [vmem:[#allocation11 + $0x15d0] sm:$0xff]  ;;  %v3070_v32 = vld [vmem:[#allocation11 + $0x658] sm:$0xff] }
 0x3b3   :  { %4882 = vmatmul.mubr.f32.vlgmr.msra.gmra.mrb[154].mxu0 %v4739_v62  ;;  %8950 = vmatprep.subr.bf16.mxu1 %v8949_v18  ;;  %v5004_v62 = vld [vmem:[#allocation11 + $0x15c8] sm:$0xff]  ;;  %v8959_v18 = vpack.c.bf16 %v3066_v24, %v3065_v16  ;;  %v3069_v15 = vld [vmem:[#allocation11 + $0x650] sm:$0xff]  ;;  %v9445_v5 = vpack.c.bf16 %v5006_v27, %v5005_v21  ;;  %v5007_v16 = vld [vmem:[#allocation11 + $0x15e0] sm:$0xff] }
 0x3b4   :  { %9428 = vmatpush3.bf16.msra.mxu0 %v9427_v23  ;;  %5195 = vmatprep.mubr.f32.mxu0 %v11403_v50  ;;  %v4986_v23 = vld [vmem:[#allocation11 + $0x1538] sm:$0xff]  ;;  %v9441_v44 = vpack.c.bf16 %v5004_v62, %v5003_v49  ;;  %v4989_v51 = vld [vmem:[#allocation11 + $0x1550] sm:$0xff]  ;;  %v5008_v24 = vld [vmem:[#allocation11 + $0x15e8] sm:$0xff] }
 0x3b5   :  { %9430 = vmatprep.subr.bf16.mxu0 %v9429_v33  ;;  %v9439_v0 = vpack.c.bf16 %v4986_v23, %v4985_v14  ;;  %v3068_v33 = vld [vmem:[#allocation11 + $0x648] sm:$0xff]  ;;  %v8967_v14 = vpack.c.bf16 %v3070_v32, %v3069_v15  ;;  %v4991_v49 = vld [vmem:[#allocation11 + $0x1560] sm:$0xff]  ;;  %v9449_v62 = vpack.c.bf16 %v5008_v24, %v5007_v16  ;;  %v3074_v21 = vld [vmem:[#allocation11 + $0x678] sm:$0xff] }
 0x3b6   :  { %8952 = vmatpush3.bf16.msra.mxu1 %v8951_v20  ;;  %v4988_v20 = vld [vmem:[#allocation11 + $0x1548] sm:$0xff]  ;;  %v8963_v34 = vpack.c.bf16 %v3068_v33, %v3067_v6  ;;  %v5009_v6 = vld [vmem:[#allocation11 + $0x15f0] sm:$0xff]  ;;  %v5010_v33 = vld [vmem:[#allocation11 + $0x15f8] sm:$0xff] }
 0x3b7   :  { %8954 = vmatprep.subr.bf16.mxu1 %v8953_v52  ;;  %v3086_v52 = vld [vmem:[#allocation11 + $0x6d8] sm:$0xff]  ;;  %v4993_v27 = vld [vmem:[#allocation11 + $0x1570] sm:$0xff]  ;;  %v3108_v15 = vld [vmem:[#allocation11 + $0x788] sm:$0xff] }
 0x3b8   :  { %9432 = vmatpush3.bf16.msra.mxu0 %v9431_v31  ;;  %v3085_v31 = vld [vmem:[#allocation11 + $0x6d0] sm:$0xff]  ;;  %v5059_v32 = vld [vmem:[#allocation11 + $0x1780] sm:$0xff] }
 0x3b9   :  { %9434 = vmatprep.subr.bf16.mxu0 %v9433_v7  ;;  %v9443_v7 = vpack.c.bf16 %v4988_v20, %v4987_v19  ;;  %v8965_v40 = vpack.c.bf16 %v3086_v52, %v3085_v31  ;;  %v8971_v19 = vpack.c.bf16 %v3072_v38, %v3071_v17  ;;  %v3073_v52 = vld [vmem:[#allocation11 + $0x670] sm:$0xff]  ;;  %v5043_v24 = vld [vmem:[#allocation11 + $0x1700] sm:$0xff] }
 0x3ba   :  { %8956 = vmatpush3.bf16.msra.mxu1 %v8955_v29  ;;  %v4990_v29 = vld [vmem:[#allocation11 + $0x1558] sm:$0xff] }
 0x3bb   :  { %8958 = vmatprep.subr.bf16.mxu1 %v8957_v12  ;;  %v3088_v12 = vld [vmem:[#allocation11 + $0x6e8] sm:$0xff] }
 0x3bc   :  { %9436 = vmatpush3.bf16.msra.mxu0 %v9435_v45  ;;  %v3087_v45 = vld [vmem:[#allocation11 + $0x6e0] sm:$0xff] }
 0x3bd   :  { %9438 = vmatprep.subr.bf16.mxu0 %v9437_v8  ;;  %v9447_v8 = vpack.c.bf16 %v4990_v29, %v4989_v51  ;;  %v8969_v23 = vpack.c.bf16 %v3088_v12, %v3087_v45  ;;  %v5060_v51 = vld [vmem:[#allocation11 + $0x1788] sm:$0xff]  ;;  %v3091_v45 = vld [vmem:[#allocation11 + $0x700] sm:$0xff] }
 0x3be   :  { %8960 = vmatpush3.bf16.msra.mxu1 %v8959_v18  ;;  %v4992_v18 = vld [vmem:[#allocation11 + $0x1568] sm:$0xff]  ;;  %v9489_v16 = vpack.c.bf16 %v5060_v51, %v5059_v32  ;;  %v3095_v32 = vld [vmem:[#allocation11 + $0x720] sm:$0xff] }
 0x3bf   :  { %8962 = vmatprep.subr.bf16.mxu1 %v8961_v61  ;;  %v3090_v61 = vld [vmem:[#allocation11 + $0x6f8] sm:$0xff]  ;;  %v9451_v20 = vpack.c.bf16 %v4992_v18, %v4991_v49  ;;  %v3092_v12 = vld [vmem:[#allocation11 + $0x708] sm:$0xff]  ;;  %v5061_v49 = vld [vmem:[#allocation11 + $0x1790] sm:$0xff]  ;;  %v11416_v18 = vrot.slane %v11382_v41, %v11099_v60  ;;  %v3204_v41 = vcombine.high %v11400_v63, %v11400_v63 }
 0x3c0   :  { %9440 = vmatpush3.bf16.msra.mxu0 %v9439_v0  ;;  %v3089_v0 = vld [vmem:[#allocation11 + $0x6f0] sm:$0xff]  ;;  %v8979_v17 = vpack.c.bf16 %v3092_v12, %v3091_v45  ;;  %v3096_v51 = vld [vmem:[#allocation11 + $0x728] sm:$0xff]  ;;  %v3114_v45 = vld [vmem:[#allocation11 + $0x7b8] sm:$0xff] }
 0x3c1   :  { %9442 = vmatprep.subr.bf16.mxu0 %v9441_v44  ;;  %v5078_v44 = vcombine.high %v11374_v22, %v11371_v57  ;;  %v8973_v31 = vpack.c.bf16 %v3090_v61, %v3089_v0  ;;  %v3093_v61 = vld [vmem:[#allocation11 + $0x710] sm:$0xff]  ;;  %v5048_v63 = vld [vmem:[#allocation11 + $0x1728] sm:$0xff] }
 0x3c2   :  { %8964 = vmatpush3.bf16.msra.mxu1 %v8963_v34  ;;  %v9453_v34 = vpack.c.bf16 %v5010_v33, %v5009_v6  ;;  %v3094_v6 = vld [vmem:[#allocation11 + $0x718] sm:$0xff]  ;;  %v5045_v33 = vld [vmem:[#allocation11 + $0x1710] sm:$0xff] }
 0x3c3   :  { %8966 = vmatprep.subr.bf16.mxu1 %v8965_v40  ;;  %v3107_v40 = vld [vmem:[#allocation11 + $0x780] sm:$0xff]  ;;  %v11410_v29 = vrot.slane %v5078_v44, %v11099_v60  ;;  %v5065_v12 = vld [vmem:[#allocation11 + $0x17b0] sm:$0xff] }
 0x3c4   :  { %9444 = vmatpush3.bf16.msra.mxu0 %v9443_v7  ;;  %v4994_v7 = vld [vmem:[#allocation11 + $0x1578] sm:$0xff]  ;;  %v8977_v22 = vpack.c.bf16 %v3108_v15, %v3107_v40 }
 0x3c5   :  { %9446 = vmatprep.subr.bf16.mxu0 %v9445_v5  ;;  %v8975_v5 = vpack.c.bf16 %v3074_v21, %v3073_v52  ;;  %v9455_v57 = vpack.c.bf16 %v4994_v7, %v4993_v27  ;;  %v5094_v38 = vcombine.high %v11410_v29, %v11410_v29  ;;  %v3112_v52 = vld [vmem:[#allocation11 + $0x7a8] sm:$0xff]  ;;  %v5063_v27 = vld [vmem:[#allocation11 + $0x17a0] sm:$0xff] }
 0x3c6   :  { %8968 = vmatpush3.bf16.msra.mxu1 %v8967_v14  ;;  %v5044_v14 = vld [vmem:[#allocation11 + $0x1708] sm:$0xff] }
 0x3c7   :  { %8970 = vmatprep.subr.bf16.mxu1 %v8969_v23  ;;  %v3110_v23 = vld [vmem:[#allocation11 + $0x798] sm:$0xff]  ;;  %v9491_v0 = vpack.c.bf16 %v5044_v14, %v5043_v24  ;;  %v5122_v7 = vrot.slane %v5094_v38, %v11099_v60  ;;  %v8987_v24 = vpack.c.bf16 %v3096_v51, %v3095_v32  ;;  %v5049_v38 = vld [vmem:[#allocation11 + $0x1730] sm:$0xff] }
 0x3c8   :  { %9448 = vmatpush3.bf16.msra.mxu0 %v9447_v8  ;;  %v3109_v8 = vld [vmem:[#allocation11 + $0x790] sm:$0xff] }
 0x3c9   :  { %9450 = vmatprep.subr.bf16.mxu0 %v9449_v62  ;;  %v5062_v62 = vld [vmem:[#allocation11 + $0x1798] sm:$0xff]  ;;  %v8981_v44 = vpack.c.bf16 %v3110_v23, %v3109_v8  ;;  %v3097_v23 = vld [vmem:[#allocation11 + $0x730] sm:$0xff] }
 0x3ca   :  { %8972 = vmatpush3.bf16.msra.mxu1 %v8971_v19  ;;  %v11420_v19 = vrot.slane %v11385_v2, %v11099_v60  ;;  %v9493_v21 = vpack.c.bf16 %v5062_v62, %v5061_v49  ;;  %v8983_v2 = vpack.c.bf16 %v3094_v6, %v3093_v61  ;;  %v5050_v62 = vld [vmem:[#allocation11 + $0x1738] sm:$0xff]  ;;  %v3116_v61 = vld [vmem:[#allocation11 + $0x7c8] sm:$0xff]  ;;  %v5067_v6 = vld [vmem:[#allocation11 + $0x17c0] sm:$0xff] }
 0x3cb   :  { %8974 = vmatprep.subr.bf16.mxu1 %v8973_v31  ;;  %v3111_v31 = vld [vmem:[#allocation11 + $0x7a0] sm:$0xff] }
 0x3cc   :  { %9452 = vmatpush3.bf16.msra.mxu0 %v9451_v20  ;;  %v5046_v20 = vld [vmem:[#allocation11 + $0x1718] sm:$0xff]  ;;  %v8985_v15 = vpack.c.bf16 %v3112_v52, %v3111_v31  ;;  %v3099_v52 = vld [vmem:[#allocation11 + $0x740] sm:$0xff] }
 0x3cd   :  { %9454 = vmatprep.subr.bf16.mxu0 %v9453_v34  ;;  %v5064_v34 = vld [vmem:[#allocation11 + $0x17a8] sm:$0xff]  ;;  %v9495_v40 = vpack.c.bf16 %v5046_v20, %v5045_v33  ;;  %v9503_v20 = vpack.c.bf16 %v5050_v62, %v5049_v38 }
 0x3ce   :  { %8976 = vmatpush3.bf16.msra.mxu1 %v8975_v5  ;;  %v5047_v5 = vld [vmem:[#allocation11 + $0x1720] sm:$0xff]  ;;  %v5068_v33 = vld [vmem:[#allocation11 + $0x17c8] sm:$0xff] }
 0x3cf   :  { %8978 = vmatprep.subr.bf16.mxu1 %v8977_v22  ;;  %v3113_v22 = vld [vmem:[#allocation11 + $0x7b0] sm:$0xff]  ;;  %v9499_v14 = vpack.c.bf16 %v5048_v63, %v5047_v5  ;;  %v3102_v63 = vld [vmem:[#allocation11 + $0x758] sm:$0xff]  ;;  %v3104_v62 = vld [vmem:[#allocation11 + $0x768] sm:$0xff] }
 0x3d0   :  { %9456 = vmatpush3.bf16.msra.mxu0 %v9455_v57  ;;  %v9497_v57 = vpack.c.bf16 %v5064_v34, %v5063_v27  ;;  %v8989_v8 = vpack.c.bf16 %v3114_v45, %v3113_v22  ;;  %v9505_v27 = vpack.c.bf16 %v5068_v33, %v5067_v6  ;;  %v5052_v34 = vld [vmem:[#allocation11 + $0x1748] sm:$0xff]  ;;  %v5053_v22 = vld [vmem:[#allocation11 + $0x1750] sm:$0xff] }
 0x3d1   :  { %9490 = vmatprep.subr.bf16.mxu0 %v9489_v16  ;;  %3276 = vmatmul.mubr.f32.vlgmr.msra.gmra.mrb[12].mxu1 %v11416_v18  ;;  %v5066_v16 = vld [vmem:[#allocation11 + $0x17b8] sm:$0xff]  ;;  %v5056_v33 = vld [vmem:[#allocation11 + $0x1768] sm:$0xff] }
 0x3d2   :  { %8980 = vmatpush3.bf16.msra.mxu1 %v8979_v17  ;;  %3345 = vmatprep.mubr.f32.mxu1 %v3204_v41  ;;  %v3098_v17 = vld [vmem:[#allocation11 + $0x738] sm:$0xff]  ;;  %v9501_v49 = vpack.c.bf16 %v5066_v16, %v5065_v12  ;;  %v3100_v41 = vld [vmem:[#allocation11 + $0x748] sm:$0xff]  ;;  %v3119_v16 = vld [vmem:[#allocation11 + $0x7e0] sm:$0xff] }
 0x3d3   :  { %5196 = vmatmul.mubr.f32.vlgmr.msra.gmra.mrb[156].mxu0 %v11420_v19  ;;  %8982 = vmatprep.subr.bf16.mxu1 %v8981_v44  ;;  %v8991_v44 = vpack.c.bf16 %v3098_v17, %v3097_v23  ;;  %v8995_v32 = vpack.c.bf16 %v3100_v41, %v3099_v52  ;;  %v5054_v12 = vld [vmem:[#allocation11 + $0x1758] sm:$0xff]  ;;  %v5073_v41 = vld [vmem:[#allocation11 + $0x17f0] sm:$0xff] }
 0x3d4   :  { %9492 = vmatpush3.bf16.msra.mxu0 %v9491_v0  ;;  %5335 = vmatprep.mubr.f32.mxu0 %v5122_v7  ;;  %v3115_v0 = vld [vmem:[#allocation11 + $0x7c0] sm:$0xff]  ;;  %v3117_v7 = vld [vmem:[#allocation11 + $0x7d0] sm:$0xff]  ;;  %v9511_v17 = vpack.c.bf16 %v5054_v12, %v5053_v22 }
 0x3d5   :  { %9494 = vmatprep.subr.bf16.mxu0 %v9493_v21  ;;  %v8993_v31 = vpack.c.bf16 %v3116_v61, %v3115_v0  ;;  %v5051_v21 = vld [vmem:[#allocation11 + $0x1740] sm:$0xff] }
 0x3d6   :  { %8984 = vmatpush3.bf16.msra.mxu1 %v8983_v2  ;;  %v3118_v2 = vld [vmem:[#allocation11 + $0x7d8] sm:$0xff]  ;;  %v9507_v51 = vpack.c.bf16 %v5052_v34, %v5051_v21  ;;  %v5055_v0 = vld [vmem:[#allocation11 + $0x1760] sm:$0xff] }
 0x3d7   :  { %8986 = vmatprep.subr.bf16.mxu1 %v8985_v15  ;;  %v5070_v15 = vld [vmem:[#allocation11 + $0x17d8] sm:$0xff]  ;;  %v8997_v5 = vpack.c.bf16 %v3118_v2, %v3117_v7  ;;  %v11722_v2 = vcombine.low %v11291_v13, %v11294_v59  ;;  %v3139_v12 = vld [vmem:[#allocation11 + $0x880] sm:$0xff] }
 0x3d8   :  { %9496 = vmatpush3.bf16.msra.mxu0 %v9495_v40  ;;  %v5069_v40 = vld [vmem:[#allocation11 + $0x17d0] sm:$0xff]  ;;  %v5074_v21 = vld [vmem:[#allocation11 + $0x17f8] sm:$0xff] }
 0x3d9   :  { %9498 = vmatprep.subr.bf16.mxu0 %v9497_v57  ;;  %v3101_v57 = vld [vmem:[#allocation11 + $0x750] sm:$0xff]  ;;  %v9509_v45 = vpack.c.bf16 %v5070_v15, %v5069_v40  ;;  %v11433_v40 = vrot.slane %v11722_v2, %v11099_v60  ;;  %v9517_v22 = vpack.c.bf16 %v5074_v21, %v5073_v41  ;;  %v5414_v21 = vld [vmem:[#allocation11 + $0x1998] sm:$0xff] }
 0x3da   :  { %8988 = vmatpush3.bf16.msra.mxu1 %v8987_v24  ;;  %v3120_v24 = vld [vmem:[#allocation11 + $0x7e8] sm:$0xff]  ;;  %v8999_v23 = vpack.c.bf16 %v3102_v63, %v3101_v57  ;;  %v3106_v57 = vld [vmem:[#allocation11 + $0x778] sm:$0xff]  ;;  %v5057_v63 = vld [vmem:[#allocation11 + $0x1770] sm:$0xff] }
 0x3db   :  { %8990 = vmatprep.subr.bf16.mxu1 %v8989_v8  ;;  %v5072_v8 = vld [vmem:[#allocation11 + $0x17e8] sm:$0xff]  ;;  %v9001_v38 = vpack.c.bf16 %v3120_v24, %v3119_v16  ;;  %v5411_v24 = vld [vmem:[#allocation11 + $0x1980] sm:$0xff]  ;;  %v5413_v41 = vld [vmem:[#allocation11 + $0x1990] sm:$0xff] }
 0x3dc   :  { %9500 = vmatpush3.bf16.msra.mxu0 %v9499_v14  ;;  %v5071_v14 = vld [vmem:[#allocation11 + $0x17e0] sm:$0xff]  ;;  %v3140_v16 = vld [vmem:[#allocation11 + $0x888] sm:$0xff]  ;;  %v3125_v2 = vld [vmem:[#allocation11 + $0x810] sm:$0xff] }
 0x3dd   :  { %9502 = vmatprep.subr.bf16.mxu0 %v9501_v49  ;;  %v3103_v49 = vld [vmem:[#allocation11 + $0x760] sm:$0xff]  ;;  %v9513_v6 = vpack.c.bf16 %v5072_v8, %v5071_v14  ;;  %v5412_v14 = vld [vmem:[#allocation11 + $0x1988] sm:$0xff]  ;;  %v11723_v8 = vcombine.high %v11234_v9, %v11237_v3  ;;  %v3141_v3 = vld [vmem:[#allocation11 + $0x890] sm:$0xff] }
 0x3de   :  { %8992 = vmatpush3.bf16.msra.mxu1 %v8991_v44  ;;  %v3121_v44 = vld [vmem:[#allocation11 + $0x7f0] sm:$0xff]  ;;  %v9003_v7 = vpack.c.bf16 %v3104_v62, %v3103_v49  ;;  %v9009_v62 = vpack.c.bf16 %v3140_v16, %v3139_v12  ;;  %v9557_v16 = vpack.c.bf16 %v5414_v21, %v5413_v41 }
 0x3df   :  { %8994 = vmatprep.subr.bf16.mxu1 %v8993_v31  ;;  %v3129_v21 = vld [vmem:[#allocation11 + $0x830] sm:$0xff] }
 0x3e0   :  { %9504 = vmatpush3.bf16.msra.mxu0 %v9503_v20  ;;  %v3122_v20 = vld [vmem:[#allocation11 + $0x7f8] sm:$0xff] }
 0x3e1   :  { %9506 = vmatprep.subr.bf16.mxu0 %v9505_v27 }
 0x3e2   :  { %8996 = vmatpush3.bf16.msra.mxu1 %v8995_v32  ;;  %v9515_v32 = vpack.c.bf16 %v5056_v33, %v5055_v0  ;;  %v3123_v0 = vld [vmem:[#allocation11 + $0x800] sm:$0xff] }
 0x3e3   :  { %8998 = vmatprep.subr.bf16.mxu1 %v8997_v5  ;;  %v3105_v5 = vld [vmem:[#allocation11 + $0x770] sm:$0xff]  ;;  %v5395_v33 = vld [vmem:[#allocation11 + $0x1900] sm:$0xff] }
 0x3e4   :  { %9508 = vmatpush3.bf16.msra.mxu0 %v9507_v51  ;;  %v7267_v61 = vpop.f32.mrb[0].mxu1  ;;  %v9005_v51 = vpack.c.bf16 %v3122_v20, %v3121_v44  ;;  %v5396_v44 = vld [vmem:[#allocation11 + $0x1908] sm:$0xff]  ;;  %v3142_v20 = vld [vmem:[#allocation11 + $0x898] sm:$0xff] }
 0x3e5   :  { %9510 = vmatprep.subr.bf16.mxu0 %v9509_v45  ;;  %v7268_v52 = vpop.f32.mrb[1].mxu1  ;;  %v5058_v45 = vld [vmem:[#allocation11 + $0x1778] sm:$0xff] }
 0x3e6   :  { %v7582_v31 = vpop.f32.mrb[144].mxu0  ;;  %v11427_v27 = vadd.f32 %v7268_v52, %v7267_v61  ;;  %9000 = vmatpush3.bf16.msra.mxu1 %v8999_v23  ;;  %v11441_v23 = vrot.slane %v11723_v8, %v11099_v60  ;;  %v9519_v49 = vpack.c.bf16 %v5058_v45, %v5057_v63  ;;  %v3124_v61 = vld [vmem:[#allocation11 + $0x808] sm:$0xff]  ;;  %v5398_v63 = vld [vmem:[#allocation11 + $0x1918] sm:$0xff] }
 0x3e7   :  { %v7583_v34 = vpop.f32.mrb[145].mxu0  ;;  %9002 = vmatprep.subr.bf16.mxu1 %v9001_v38  ;;  %v5477_v38 = vcombine.high %v11433_v40, %v11433_v40  ;;  %v3144_v45 = vld [vmem:[#allocation11 + $0x8a8] sm:$0xff] }
 0x3e8   :  { %v11435_v15 = vadd.f32 %v7583_v34, %v7582_v31  ;;  %9512 = vmatpush3.bf16.msra.mxu0 %v9511_v17  ;;  %v9007_v17 = vpack.c.bf16 %v3106_v57, %v3105_v5  ;;  %v3174_v9 = vcombine.high %v11441_v23, %v11441_v23  ;;  %v9011_v31 = vpack.c.bf16 %v3124_v61, %v3123_v0  ;;  %v5400_v61 = vld [vmem:[#allocation11 + $0x1928] sm:$0xff] }
 0x3e9   :  { %9514 = vmatprep.subr.bf16.mxu0 %v9513_v6  ;;  %v9553_v6 = vpack.c.bf16 %v5412_v14, %v5411_v24  ;;  %v11448_v52 = vrot.slane %v5477_v38, %v11099_v60  ;;  %v3203_v34 = vcombine.high %v11416_v18, %v11416_v18  ;;  %v5108_v5 = vrot.slane %v11410_v29, %v11099_v60  ;;  %v5415_v24 = vld [vmem:[#allocation11 + $0x19a0] sm:$0xff]  ;;  %v5416_v14 = vld [vmem:[#allocation11 + $0x19a8] sm:$0xff] }
 0x3ea   :  { %9004 = vmatpush3.bf16.msra.mxu1 %v9003_v7  ;;  %v9555_v7 = vpack.c.bf16 %v5396_v44, %v5395_v33  ;;  %v9013_v57 = vpack.c.bf16 %v3142_v20, %v3141_v3  ;;  %v3202_v12 = vrot.slane %v3174_v9, %v11099_v60  ;;  %v3127_v38 = vld [vmem:[#allocation11 + $0x820] sm:$0xff]  ;;  %v9561_v0 = vpack.c.bf16 %v5416_v14, %v5415_v24  ;;  %v3146_v33 = vld [vmem:[#allocation11 + $0x8b8] sm:$0xff]  ;;  %v5417_v44 = vld [vmem:[#allocation11 + $0x19b0] sm:$0xff] }
 0x3eb   :  { %9006 = vmatprep.subr.bf16.mxu1 %v9005_v51  ;;  %v5397_v51 = vld [vmem:[#allocation11 + $0x1910] sm:$0xff]  ;;  %v5508_v18 = vcombine.high %v11448_v52, %v11448_v52  ;;  %v5418_v9 = vld [vmem:[#allocation11 + $0x19b8] sm:$0xff] }
 0x3ec   :  { %9516 = vmatpush3.bf16.msra.mxu0 %v9515_v32  ;;  %v3126_v32 = vld [vmem:[#allocation11 + $0x818] sm:$0xff]  ;;  %v9559_v29 = vpack.c.bf16 %v5398_v63, %v5397_v51  ;;  %v5419_v63 = vld [vmem:[#allocation11 + $0x19c0] sm:$0xff] }
 0x3ed   :  { %9518 = vmatprep.subr.bf16.mxu0 %v9517_v22  ;;  %v3143_v22 = vld [vmem:[#allocation11 + $0x8a0] sm:$0xff]  ;;  %v9015_v8 = vpack.c.bf16 %v3126_v32, %v3125_v2  ;;  %v5728_v2 = vld [vmem:[#allocation3 + $0x62] ss:$8 sm:$0x30]  ;;  %v9565_v32 = vpack.c.bf16 %v5418_v9, %v5417_v44  ;;  %v5402_v51 = vld [vmem:[#allocation11 + $0x1938] sm:$0xff] }
 0x3ee   :  { %9008 = vmatpush3.bf16.msra.mxu1 %v9007_v17  ;;  %v9017_v17 = vpack.c.bf16 %v3144_v45, %v3143_v22  ;;  %v5732_v20 = vld [vmem:[#allocation3 + $0xf2] ss:$8 sm:$0x30]  ;;  %v5420_v22 = vld [vmem:[#allocation11 + $0x19c8] sm:$0xff] }
 0x3ef   :  { %9010 = vmatprep.subr.bf16.mxu1 %v9009_v62  ;;  %v5399_v62 = vld [vmem:[#allocation11 + $0x1920] sm:$0xff] }
 0x3f0   :  { %9520 = vmatpush3.bf16.msra.mxu0 %v9519_v49  ;;  %v3128_v49 = vld [vmem:[#allocation11 + $0x828] sm:$0xff] }
 0x3f1   :  { %9554 = vmatprep.subr.bf16.mxu0 %v9553_v6  ;;  %3346 = vmatmul.mubr.f32.vlgmr.msra.gmra.mrb[14].mxu1 %v3203_v34  ;;  %v3145_v6 = vld [vmem:[#allocation11 + $0x8b0] sm:$0xff]  ;;  %v9019_v3 = vpack.c.bf16 %v3128_v49, %v3127_v38  ;;  %v3130_v34 = vld [vmem:[#allocation11 + $0x838] sm:$0xff]  ;;  %v9569_v38 = vpack.c.bf16 %v5420_v22, %v5419_v63  ;;  %v5404_v49 = vld [vmem:[#allocation11 + $0x1948] sm:$0xff] }
 0x3f2   :  { %9012 = vmatpush3.bf16.msra.mxu1 %v9011_v31  ;;  %3415 = vmatprep.mubr.f32.mxu1 %v3202_v12  ;;  %v9563_v31 = vpack.c.bf16 %v5400_v61, %v5399_v62  ;;  %v9021_v41 = vpack.c.bf16 %v3146_v33, %v3145_v6  ;;  %v5731_v45 = vld [vmem:[#allocation3 + $0xf2] ss:$8 sm:$0xf]  ;;  %v9023_v12 = vpack.c.bf16 %v3130_v34, %v3129_v21 }
 0x3f3   :  { %5336 = vmatmul.mubr.f32.vlgmr.msra.gmra.mrb[158].mxu0 %v5108_v5  ;;  %9014 = vmatprep.subr.bf16.mxu1 %v9013_v57  ;;  %v3147_v5 = vld [vmem:[#allocation11 + $0x8c0] sm:$0xff]  ;;  %v3148_v57 = vld [vmem:[#allocation11 + $0x8c8] sm:$0xff]  ;;  %v5733_v24 = vor.u32 %v5732_v20, %v5731_v45  ;;  %v3149_v62 = vld [vmem:[#allocation11 + $0x8d0] sm:$0xff] }
 0x3f4   :  { %9556 = vmatpush3.bf16.msra.mxu0 %v9555_v7  ;;  %5649 = vmatprep.mubr.f32.mxu0 %v5508_v18  ;;  %v5401_v7 = vld [vmem:[#allocation11 + $0x1930] sm:$0xff]  ;;  %v9025_v18 = vpack.c.bf16 %v3148_v57, %v3147_v5  ;;  %v5422_v33 = vld [vmem:[#allocation11 + $0x19d8] sm:$0xff]  ;;  %v5423_v5 = vld [vmem:[#allocation11 + $0x19e0] sm:$0xff] }
 0x3f5   :  { %9558 = vmatprep.subr.bf16.mxu0 %v9557_v16  ;;  %v5727_v16 = vld [vmem:[#allocation3 + $0x62] ss:$8 sm:$0xf]  ;;  %v9567_v14 = vpack.c.bf16 %v5402_v51, %v5401_v7  ;;  %v5743_v9 = vmax.f32 %v5733_v24, %v11309_v58 }
 0x3f6   :  { %9016 = vmatpush3.bf16.msra.mxu1 %v9015_v8  ;;  %v3131_v8 = vld [vmem:[#allocation11 + $0x840] sm:$0xff]  ;;  %v5729_v61 = vor.u32 %v5728_v2, %v5727_v16  ;;  %v5421_v6 = vld [vmem:[#allocation11 + $0x19d0] sm:$0xff]  ;;  %v5406_v7 = vld [vmem:[#allocation11 + $0x1958] sm:$0xff] }
 0x3f7   :  { %9018 = vmatprep.subr.bf16.mxu1 %v9017_v17  ;;  %v5403_v17 = vld [vmem:[#allocation11 + $0x1940] sm:$0xff]  ;;  %v5405_v21 = vld [vmem:[#allocation11 + $0x1950] sm:$0xff]  ;;  %v9573_v34 = vpack.c.bf16 %v5422_v33, %v5421_v6  ;;  %v3152_v51 = vld [vmem:[#allocation11 + $0x8e8] sm:$0xff]  ;;  %v11460_v58 = vmax.f32 %v5743_v9, %v11272_v4 }
 0x3f8   :  { %9560 = vmatpush3.bf16.msra.mxu0 %v9559_v29  ;;  %v3132_v29 = vld [vmem:[#allocation11 + $0x848] sm:$0xff]  ;;  %v5742_v2 = vmax.f32 %v5729_v61, %v11307_v54  ;;  %v9575_v22 = vpack.c.bf16 %v5406_v7, %v5405_v21  ;;  %v5407_v24 = vld [vmem:[#allocation11 + $0x1960] sm:$0xff]  ;;  %v3154_v54 = vld [vmem:[#allocation11 + $0x8f8] sm:$0xff] }
 0x3f9   :  { %9562 = vmatprep.subr.bf16.mxu0 %v9561_v0  ;;  %v3150_v0 = vld [vmem:[#allocation11 + $0x8d8] sm:$0xff]  ;;  %v9027_v44 = vpack.c.bf16 %v3132_v29, %v3131_v8  ;;  %v5424_v57 = vld [vmem:[#allocation11 + $0x19e8] sm:$0xff]  ;;  %v3153_v29 = vld [vmem:[#allocation11 + $0x8f0] sm:$0xff] }
 0x3fa   :  { %9020 = vmatpush3.bf16.msra.mxu1 %v9019_v3  ;;  %v9571_v3 = vpack.c.bf16 %v5404_v49, %v5403_v17  ;;  %v9029_v20 = vpack.c.bf16 %v3150_v0, %v3149_v62  ;;  %v3136_v16 = vld [vmem:[#allocation11 + $0x868] sm:$0xff]  ;;  %v11463_v17 = vmax.f32 %v5742_v2, %v11262_v11  ;;  %v5425_v4 = vld [vmem:[#allocation11 + $0x19f0] sm:$0xff]  ;;  %v5426_v62 = vld [vmem:[#allocation11 + $0x19f8] sm:$0xff] }
 0x3fb   :  { %9022 = vmatprep.subr.bf16.mxu1 %v9021_v41  ;;  %v3134_v41 = vld [vmem:[#allocation11 + $0x858] sm:$0xff]  ;;  %v5408_v8 = vld [vmem:[#allocation11 + $0x1968] sm:$0xff]  ;;  %v9581_v21 = vpack.c.bf16 %v5426_v62, %v5425_v4  ;;  %v3491_v7 = vld [vmem:[#allocation11 + $0xa80] sm:$0xff]  ;;  %v3188_v4 = vrot.slane %v11441_v23, %v11099_v60 }
 0x3fc   :  { %9564 = vmatpush3.bf16.msra.mxu0 %v9563_v31  ;;  %v3133_v31 = vld [vmem:[#allocation11 + $0x850] sm:$0xff]  ;;  %v5845_v33 = vcombine.low %v11463_v17, %v11460_v58  ;;  %v9579_v9 = vpack.c.bf16 %v5408_v8, %v5407_v24  ;;  %v3138_v11 = vld [vmem:[#allocation11 + $0x878] sm:$0xff]  ;;  %v5764_v2 = vld [vmem:[#allocation11 + $0x1b88] sm:$0xff] }
 0x3fd   :  { %9566 = vmatprep.subr.bf16.mxu0 %v9565_v32  ;;  %v3151_v32 = vld [vmem:[#allocation11 + $0x8e0] sm:$0xff]  ;;  %v9031_v63 = vpack.c.bf16 %v3134_v41, %v3133_v31  ;;  %v5409_v31 = vld [vmem:[#allocation11 + $0x1970] sm:$0xff]  ;;  %v3494_v8 = vld [vmem:[#allocation11 + $0xa98] sm:$0xff] }
 0x3fe   :  { %9024 = vmatpush3.bf16.msra.mxu1 %v9023_v12  ;;  %v9033_v45 = vpack.c.bf16 %v3152_v51, %v3151_v32  ;;  %v3135_v12 = vld [vmem:[#allocation11 + $0x860] sm:$0xff]  ;;  %v3492_v32 = vld [vmem:[#allocation11 + $0xa88] sm:$0xff] }
 0x3ff   :  { %9026 = vmatprep.subr.bf16.mxu1 %v9025_v18  ;;  %v9577_v18 = vpack.c.bf16 %v5424_v57, %v5423_v5  ;;  %v9035_v6 = vpack.c.bf16 %v3136_v16, %v3135_v12  ;;  %v5763_v51 = vld [vmem:[#allocation11 + $0x1b80] sm:$0xff]  ;;  %v11473_v57 = vrot.slane %v5845_v33, %v11099_v60  ;;  %v3476_v12 = vld [vmem:[#allocation11 + $0xa08] sm:$0xff] }
 0x400   :  { %9568 = vmatpush3.bf16.msra.mxu0 %v9567_v14  ;;  %v9617_v16 = vpack.c.bf16 %v5764_v2, %v5763_v51  ;;  %v5747_v24 = vld [vmem:[#allocation11 + $0x1b00] sm:$0xff]  ;;  %v5768_v23 = vld [vmem:[#allocation11 + $0x1ba8] sm:$0xff] }
 0x401   :  { %9570 = vmatprep.subr.bf16.mxu0 %v9569_v38  ;;  %v3479_v2 = vld [vmem:[#allocation11 + $0xa20] sm:$0xff] }
 0x402   :  { %9028 = vmatpush3.bf16.msra.mxu1 %v9027_v44 }
 0x403   :  { %9030 = vmatprep.subr.bf16.mxu1 %v9029_v20  ;;  %v3137_v20 = vld [vmem:[#allocation11 + $0x870] sm:$0xff] }
 0x404   :  { %9572 = vmatpush3.bf16.msra.mxu0 %v9571_v3  ;;  %v7302_v14 = vpop.f32.mrb[2].mxu1  ;;  %v9037_v3 = vpack.c.bf16 %v3154_v54, %v3153_v29  ;;  %v9039_v5 = vpack.c.bf16 %v3138_v11, %v3137_v20  ;;  %v5861_v54 = vcombine.high %v11473_v57, %v11473_v57  ;;  %v3496_v20 = vld [vmem:[#allocation11 + $0xaa8] sm:$0xff]  ;;  %v3588_v11 = vcombine.high %v11116_v39, %v11116_v39 }
 0x405   :  { %9574 = vmatprep.subr.bf16.mxu0 %v9573_v34  ;;  %v7303_v49 = vpop.f32.mrb[3].mxu1  ;;  %v5410_v34 = vld [vmem:[#allocation11 + $0x1978] sm:$0xff] }
 0x406   :  { %v7652_v38 = vpop.f32.mrb[146].mxu0  ;;  %v7304_v0 = vadd.f32 %v7303_v49, %v7302_v14  ;;  %9032 = vmatpush3.bf16.msra.mxu1 %v9031_v63  ;;  %v9583_v63 = vpack.c.bf16 %v5410_v34, %v5409_v31  ;;  %v5748_v14 = vld [vmem:[#allocation11 + $0x1b08] sm:$0xff]  ;;  %v5766_v49 = vld [vmem:[#allocation11 + $0x1b98] sm:$0xff]  ;;  %v11488_v34 = vrot.slane %v5861_v54, %v11099_v60 }
 0x407   :  { %v7653_v61 = vpop.f32.mrb[147].mxu0  ;;  %9034 = vmatprep.subr.bf16.mxu1 %v9033_v45  ;;  %v3475_v45 = vld [vmem:[#allocation11 + $0xa00] sm:$0xff]  ;;  %v9619_v62 = vpack.c.bf16 %v5748_v14, %v5747_v24  ;;  %v5770_v24 = vld [vmem:[#allocation11 + $0x1bb8] sm:$0xff] }
 0x408   :  { %v11467_v44 = vadd.f32 %v7653_v61, %v7652_v38  ;;  %9576 = vmatpush3.bf16.msra.mxu0 %v9575_v22  ;;  %v11470_v41 = vadd.f32 %v7304_v0, %v11427_v27  ;;  %v9073_v22 = vpack.c.bf16 %v3492_v32, %v3491_v7  ;;  %v11477_v27 = vrot.slane %v11433_v40, %v11099_v60  ;;  %v5765_v38 = vld [vmem:[#allocation11 + $0x1b90] sm:$0xff]  ;;  %v3478_v0 = vld [vmem:[#allocation11 + $0xa18] sm:$0xff] }
 0x409   :  { %9578 = vmatprep.subr.bf16.mxu0 %v9577_v18  ;;  %v3493_v18 = vld [vmem:[#allocation11 + $0xa90] sm:$0xff]  ;;  %v9075_v29 = vpack.c.bf16 %v3476_v12, %v3475_v45  ;;  %v9621_v31 = vpack.c.bf16 %v5766_v49, %v5765_v38  ;;  %v3498_v12 = vld [vmem:[#allocation11 + $0xab8] sm:$0xff] }
 0x40a   :  { %9036 = vmatpush3.bf16.msra.mxu1 %v9035_v6  ;;  %v3477_v40 = vld [vmem:[#allocation11 + $0xa10] sm:$0xff]  ;;  %v5507_v6 = vcombine.high %v11477_v27, %v11477_v27  ;;  %v9077_v33 = vpack.c.bf16 %v3494_v8, %v3493_v18  ;;  %v3482_v54 = vld [vmem:[#allocation11 + $0xa38] sm:$0xff] }
 0x40b   :  { %9038 = vmatprep.subr.bf16.mxu1 %v9037_v3  ;;  %v5749_v61 = vld [vmem:[#allocation11 + $0x1b10] sm:$0xff]  ;;  %v3495_v3 = vld [vmem:[#allocation11 + $0xaa0] sm:$0xff]  ;;  %v9079_v7 = vpack.c.bf16 %v3478_v0, %v3477_v40  ;;  %v3500_v40 = vld [vmem:[#allocation11 + $0xac8] sm:$0xff] }
 0x40c   :  { %9580 = vmatpush3.bf16.msra.mxu0 %v9579_v9  ;;  %v5750_v9 = vld [vmem:[#allocation11 + $0x1b18] sm:$0xff]  ;;  %v9081_v51 = vpack.c.bf16 %v3496_v20, %v3495_v3  ;;  %v3497_v45 = vld [vmem:[#allocation11 + $0xab0] sm:$0xff]  ;;  %v5771_v0 = vld [vmem:[#allocation11 + $0x1bc0] sm:$0xff] }
 0x40d   :  { %9582 = vmatprep.subr.bf16.mxu0 %v9581_v21  ;;  %v5767_v21 = vld [vmem:[#allocation11 + $0x1ba0] sm:$0xff]  ;;  %v9623_v32 = vpack.c.bf16 %v5750_v9, %v5749_v61  ;;  %v9085_v8 = vpack.c.bf16 %v3498_v12, %v3497_v45  ;;  %v5753_v38 = vld [vmem:[#allocation11 + $0x1b30] sm:$0xff]  ;;  %v5772_v61 = vld [vmem:[#allocation11 + $0x1bc8] sm:$0xff] }
 0x40e   :  { %9040 = vmatpush3.bf16.msra.mxu1 %v9039_v5  ;;  %v3480_v5 = vld [vmem:[#allocation11 + $0xa28] sm:$0xff]  ;;  %v9625_v39 = vpack.c.bf16 %v5768_v23, %v5767_v21  ;;  %v3483_v3 = vld [vmem:[#allocation11 + $0xa40] sm:$0xff]  ;;  %v3501_v23 = vld [vmem:[#allocation11 + $0xad0] sm:$0xff] }
 0x40f   :  { %9074 = vmatprep.subr.bf16.mxu1 %v9073_v22  ;;  %v5752_v22 = vld [vmem:[#allocation11 + $0x1b28] sm:$0xff]  ;;  %v9083_v14 = vpack.c.bf16 %v3480_v5, %v3479_v2  ;;  %v5757_v45 = vld [vmem:[#allocation11 + $0x1b50] sm:$0xff] }
 0x410   :  { %9584 = vmatpush3.bf16.msra.mxu0 %v9583_v63  ;;  %v5751_v63 = vld [vmem:[#allocation11 + $0x1b20] sm:$0xff]  ;;  %v3484_v20 = vld [vmem:[#allocation11 + $0xa48] sm:$0xff] }
 0x411   :  { %9618 = vmatprep.subr.bf16.mxu0 %v9617_v16  ;;  %3416 = vmatmul.mubr.f32.vlgmr.msra.gmra.mrb[16].mxu1 %v3188_v4  ;;  %v5769_v16 = vld [vmem:[#allocation11 + $0x1bb0] sm:$0xff]  ;;  %v9627_v18 = vpack.c.bf16 %v5752_v22, %v5751_v63  ;;  %v5754_v4 = vld [vmem:[#allocation11 + $0x1b38] sm:$0xff]  ;;  %v5756_v21 = vld [vmem:[#allocation11 + $0x1b48] sm:$0xff]  ;;  %v9091_v2 = vpack.c.bf16 %v3484_v20, %v3483_v3 }
 0x412   :  { %9076 = vmatpush3.bf16.msra.mxu1 %v9075_v29  ;;  %3729 = vmatprep.mubr.f32.mxu1 %v3588_v11  ;;  %v3481_v29 = vld [vmem:[#allocation11 + $0xa30] sm:$0xff]  ;;  %v9629_v49 = vpack.c.bf16 %v5770_v24, %v5769_v16  ;;  %v5755_v11 = vld [vmem:[#allocation11 + $0x1b40] sm:$0xff]  ;;  %v3486_v22 = vld [vmem:[#allocation11 + $0xa58] sm:$0xff] }
 0x413   :  { %5650 = vmatmul.mubr.f32.vlgmr.msra.gmra.mrb[160].mxu0 %v5507_v6  ;;  %9078 = vmatprep.subr.bf16.mxu1 %v9077_v33  ;;  %v9087_v6 = vpack.c.bf16 %v3482_v54, %v3481_v29  ;;  %v9631_v33 = vpack.c.bf16 %v5754_v4, %v5753_v38  ;;  %v9635_v5 = vpack.c.bf16 %v5756_v21, %v5755_v11  ;;  %v5758_v16 = vld [vmem:[#allocation11 + $0x1b58] sm:$0xff]  ;;  %v3503_v24 = vld [vmem:[#allocation11 + $0xae0] sm:$0xff]  ;;  %v3488_v4 = vld [vmem:[#allocation11 + $0xa68] sm:$0xff] }
 0x414   :  { %9620 = vmatpush3.bf16.msra.mxu0 %v9619_v62  ;;  %5963 = vmatprep.mubr.f32.mxu0 %v11488_v34  ;;  %v3499_v62 = vld [vmem:[#allocation11 + $0xac0] sm:$0xff]  ;;  %v9639_v54 = vpack.c.bf16 %v5758_v16, %v5757_v45  ;;  %v5777_v20 = vld [vmem:[#allocation11 + $0x1bf0] sm:$0xff]  ;;  %v5778_v11 = vld [vmem:[#allocation11 + $0x1bf8] sm:$0xff] }
 0x415   :  { %9622 = vmatprep.subr.bf16.mxu0 %v9621_v31  ;;  %v9089_v9 = vpack.c.bf16 %v3500_v40, %v3499_v62  ;;  %v9633_v31 = vpack.c.bf16 %v5772_v61, %v5771_v0  ;;  %v5759_v62 = vld [vmem:[#allocation11 + $0x1b60] sm:$0xff]  ;;  %v5760_v61 = vld [vmem:[#allocation11 + $0x1b68] sm:$0xff]  ;;  %v9645_v45 = vpack.c.bf16 %v5778_v11, %v5777_v20  ;;  %v3829_v20 = vld [vmem:[#allocation11 + $0xc10] sm:$0xff] }
 0x416   :  { %9080 = vmatpush3.bf16.msra.mxu1 %v9079_v7  ;;  %v3502_v7 = vld [vmem:[#allocation11 + $0xad8] sm:$0xff]  ;;  %v3843_v16 = vld [vmem:[#allocation11 + $0xc80] sm:$0xff] }
 0x417   :  { %9082 = vmatprep.subr.bf16.mxu1 %v9081_v51  ;;  %v5774_v51 = vld [vmem:[#allocation11 + $0x1bd8] sm:$0xff]  ;;  %v9093_v63 = vpack.c.bf16 %v3502_v7, %v3501_v23  ;;  %v5846_v7 = vcombine.high %v11463_v17, %v11460_v58 }
 0x418   :  { %9624 = vmatpush3.bf16.msra.mxu0 %v9623_v32  ;;  %v5773_v32 = vld [vmem:[#allocation11 + $0x1bd0] sm:$0xff]  ;;  %v3830_v11 = vld [vmem:[#allocation11 + $0xc18] sm:$0xff] }
 0x419   :  { %9626 = vmatprep.subr.bf16.mxu0 %v9625_v39  ;;  %v3485_v39 = vld [vmem:[#allocation11 + $0xa50] sm:$0xff]  ;;  %v9637_v12 = vpack.c.bf16 %v5774_v51, %v5773_v32  ;;  %v9643_v51 = vpack.c.bf16 %v5760_v61, %v5759_v62  ;;  %v11499_v17 = vrot.slane %v5846_v7, %v11099_v60  ;;  %v5814_v7 = vld [vmem:[#allocation11 + $0x1d18] sm:$0xff] }
 0x41a   :  { %9084 = vmatpush3.bf16.msra.mxu1 %v9083_v14  ;;  %v3504_v14 = vld [vmem:[#allocation11 + $0xae8] sm:$0xff]  ;;  %v9095_v29 = vpack.c.bf16 %v3486_v22, %v3485_v39  ;;  %v5761_v39 = vld [vmem:[#allocation11 + $0x1b70] sm:$0xff] }
 0x41b   :  { %9086 = vmatprep.subr.bf16.mxu1 %v9085_v8  ;;  %v5776_v8 = vld [vmem:[#allocation11 + $0x1be8] sm:$0xff]  ;;  %v9097_v38 = vpack.c.bf16 %v3504_v14, %v3503_v24  ;;  %v5827_v14 = vld [vmem:[#allocation11 + $0x1d80] sm:$0xff]  ;;  %v3845_v62 = vld [vmem:[#allocation11 + $0xc90] sm:$0xff]  ;;  %v5862_v61 = vcombine.high %v11499_v17, %v11499_v17 }
 0x41c   :  { %9628 = vmatpush3.bf16.msra.mxu0 %v9627_v18  ;;  %v5775_v18 = vld [vmem:[#allocation11 + $0x1be0] sm:$0xff]  ;;  %v3844_v24 = vld [vmem:[#allocation11 + $0xc88] sm:$0xff] }
 0x41d   :  { %9630 = vmatprep.subr.bf16.mxu0 %v9629_v49  ;;  %v3487_v49 = vld [vmem:[#allocation11 + $0xa60] sm:$0xff]  ;;  %v9641_v0 = vpack.c.bf16 %v5776_v8, %v5775_v18  ;;  %v5828_v18 = vld [vmem:[#allocation11 + $0x1d88] sm:$0xff] }
 0x41e   :  { %9088 = vmatpush3.bf16.msra.mxu1 %v9087_v6  ;;  %v3505_v6 = vld [vmem:[#allocation11 + $0xaf0] sm:$0xff]  ;;  %v9099_v23 = vpack.c.bf16 %v3488_v4, %v3487_v49  ;;  %v5811_v49 = vld [vmem:[#allocation11 + $0x1d00] sm:$0xff]  ;;  %v5812_v4 = vld [vmem:[#allocation11 + $0x1d08] sm:$0xff] }
 0x41f   :  { %9090 = vmatprep.subr.bf16.mxu1 %v9089_v9 }
 0x420   :  { %9632 = vmatpush3.bf16.msra.mxu0 %v9631_v33  ;;  %v3506_v33 = vld [vmem:[#allocation11 + $0xaf8] sm:$0xff] }
 0x421   :  { %9634 = vmatprep.subr.bf16.mxu0 %v9633_v31 }
 0x422   :  { %9092 = vmatpush3.bf16.msra.mxu1 %v9091_v2  ;;  %v9101_v2 = vpack.c.bf16 %v3506_v33, %v3505_v6  ;;  %v5829_v6 = vld [vmem:[#allocation11 + $0x1d90] sm:$0xff]  ;;  %v5830_v33 = vld [vmem:[#allocation11 + $0x1d98] sm:$0xff] }
 0x423   :  { %9094 = vmatprep.subr.bf16.mxu1 %v9093_v63  ;;  %v3490_v63 = vld [vmem:[#allocation11 + $0xa78] sm:$0xff] }
 0x424   :  { %9636 = vmatpush3.bf16.msra.mxu0 %v9635_v5  ;;  %v7337_v40 = vpop.f32.mrb[4].mxu1  ;;  %v3489_v5 = vld [vmem:[#allocation11 + $0xa70] sm:$0xff] }
 0x425   :  { %9638 = vmatprep.subr.bf16.mxu0 %v9637_v12  ;;  %v7338_v3 = vpop.f32.mrb[5].mxu1  ;;  %v5762_v12 = vld [vmem:[#allocation11 + $0x1b78] sm:$0xff]  ;;  %v9103_v58 = vpack.c.bf16 %v3490_v63, %v3489_v5  ;;  %v9685_v5 = vpack.c.bf16 %v5830_v33, %v5829_v6  ;;  %v5831_v63 = vld [vmem:[#allocation11 + $0x1da0] sm:$0xff]  ;;  %v3852_v33 = vld [vmem:[#allocation11 + $0xcc8] sm:$0xff] }
 0x426   :  { %v7722_v9 = vpop.f32.mrb[148].mxu0  ;;  %v7339_v31 = vadd.f32 %v7338_v3, %v7337_v40  ;;  %9096 = vmatpush3.bf16.msra.mxu1 %v9095_v29  ;;  %v9647_v8 = vpack.c.bf16 %v5762_v12, %v5761_v39  ;;  %v9137_v29 = vpack.c.bf16 %v3844_v24, %v3843_v16  ;;  %v3846_v40 = vld [vmem:[#allocation11 + $0xc98] sm:$0xff]  ;;  %v9683_v3 = vpack.c.bf16 %v5812_v4, %v5811_v49  ;;  %v5832_v39 = vld [vmem:[#allocation11 + $0x1da8] sm:$0xff]  ;;  %v3831_v16 = vld [vmem:[#allocation11 + $0xc20] sm:$0xff] }
 0x427   :  { %v7723_v21 = vpop.f32.mrb[149].mxu0  ;;  %9098 = vmatprep.subr.bf16.mxu1 %v9097_v38  ;;  %v3828_v38 = vld [vmem:[#allocation11 + $0xc08] sm:$0xff]  ;;  %v3833_v4 = vld [vmem:[#allocation11 + $0xc30] sm:$0xff]  ;;  %v3851_v6 = vld [vmem:[#allocation11 + $0xcc0] sm:$0xff] }
 0x428   :  { %v11493_v32 = vadd.f32 %v7723_v21, %v7722_v9  ;;  %9640 = vmatpush3.bf16.msra.mxu0 %v9639_v54  ;;  %v11496_v22 = vadd.f32 %v7339_v31, %v11470_v41  ;;  %v3827_v54 = vld [vmem:[#allocation11 + $0xc00] sm:$0xff]  ;;  %v9681_v41 = vpack.c.bf16 %v5828_v18, %v5827_v14  ;;  %v3587_v9 = vcombine.high %v11122_v42, %v11122_v42  ;;  %v5813_v31 = vld [vmem:[#allocation11 + $0x1d10] sm:$0xff]  ;;  %v3832_v24 = vld [vmem:[#allocation11 + $0xc28] sm:$0xff] }
 0x429   :  { %9642 = vmatprep.subr.bf16.mxu0 %v9641_v0  ;;  %v9139_v0 = vpack.c.bf16 %v3828_v38, %v3827_v54  ;;  %v11507_v21 = vrot.slane %v11473_v57, %v11099_v60  ;;  %v5890_v42 = vrot.slane %v5862_v61, %v11099_v60  ;;  %v9687_v57 = vpack.c.bf16 %v5814_v7, %v5813_v31  ;;  %v5815_v14 = vld [vmem:[#allocation11 + $0x1d20] sm:$0xff]  ;;  %v5833_v54 = vld [vmem:[#allocation11 + $0x1db0] sm:$0xff]  ;;  %v5834_v38 = vld [vmem:[#allocation11 + $0x1db8] sm:$0xff] }
 0x42a   :  { %9100 = vmatpush3.bf16.msra.mxu1 %v9099_v23  ;;  %v9141_v23 = vpack.c.bf16 %v3846_v40, %v3845_v62  ;;  %v9689_v18 = vpack.c.bf16 %v5832_v39, %v5831_v63  ;;  %v3834_v62 = vld [vmem:[#allocation11 + $0xc38] sm:$0xff]  ;;  %v5817_v40 = vld [vmem:[#allocation11 + $0x1d30] sm:$0xff]  ;;  %v9153_v31 = vpack.c.bf16 %v3852_v33, %v3851_v6  ;;  %v3836_v7 = vld [vmem:[#allocation11 + $0xc48] sm:$0xff] }
 0x42b   :  { %9102 = vmatprep.subr.bf16.mxu1 %v9101_v2  ;;  %v3848_v2 = vld [vmem:[#allocation11 + $0xca8] sm:$0xff]  ;;  %v5818_v61 = vld [vmem:[#allocation11 + $0x1d38] sm:$0xff]  ;;  %v3853_v63 = vld [vmem:[#allocation11 + $0xcd0] sm:$0xff] }
 0x42c   :  { %9644 = vmatpush3.bf16.msra.mxu0 %v9643_v51  ;;  %v3847_v51 = vld [vmem:[#allocation11 + $0xca0] sm:$0xff]  ;;  %v3854_v39 = vld [vmem:[#allocation11 + $0xcd8] sm:$0xff]  ;;  %v5824_v33 = vld [vmem:[#allocation11 + $0x1d68] sm:$0xff] }
 0x42d   :  { %9646 = vmatprep.subr.bf16.mxu0 %v9645_v45  ;;  %v9143_v45 = vpack.c.bf16 %v3830_v11, %v3829_v20  ;;  %v9145_v12 = vpack.c.bf16 %v3848_v2, %v3847_v51  ;;  %v9151_v20 = vpack.c.bf16 %v3834_v62, %v3833_v4  ;;  %v9695_v11 = vpack.c.bf16 %v5818_v61, %v5817_v40  ;;  %v5819_v51 = vld [vmem:[#allocation11 + $0x1d40] sm:$0xff]  ;;  %v3840_v40 = vld [vmem:[#allocation11 + $0xc68] sm:$0xff] }
 0x42e   :  { %9104 = vmatpush3.bf16.msra.mxu1 %v9103_v58  ;;  %v5816_v58 = vld [vmem:[#allocation11 + $0x1d28] sm:$0xff]  ;;  %v3839_v62 = vld [vmem:[#allocation11 + $0xc60] sm:$0xff] }
 0x42f   :  { %9138 = vmatprep.subr.bf16.mxu1 %v9137_v29  ;;  %v3850_v29 = vld [vmem:[#allocation11 + $0xcb8] sm:$0xff] }
 0x430   :  { %9648 = vmatpush3.bf16.msra.mxu0 %v9647_v8  ;;  %v3849_v8 = vld [vmem:[#allocation11 + $0xcb0] sm:$0xff] }
 0x431   :  { %9682 = vmatprep.subr.bf16.mxu0 %v9681_v41  ;;  %3730 = vmatmul.mubr.f32.vlgmr.msra.gmra.mrb[18].mxu1 %v3587_v9  ;;  %v9147_v41 = vpack.c.bf16 %v3832_v24, %v3831_v16  ;;  %v9149_v49 = vpack.c.bf16 %v3850_v29, %v3849_v8  ;;  %v5835_v9 = vld [vmem:[#allocation11 + $0x1dc0] sm:$0xff]  ;;  %v9157_v16 = vpack.c.bf16 %v3854_v39, %v3853_v63  ;;  %v3837_v24 = vld [vmem:[#allocation11 + $0xc50] sm:$0xff]  ;;  %v5822_v8 = vld [vmem:[#allocation11 + $0x1d58] sm:$0xff] }
 0x432   :  { %9140 = vmatpush3.bf16.msra.mxu1 %v9139_v0  ;;  %4043 = vmatprep.mubr.f32.mxu1 %v11222_v43  ;;  %v9691_v43 = vpack.c.bf16 %v5816_v58, %v5815_v14  ;;  %v9693_v0 = vpack.c.bf16 %v5834_v38, %v5833_v54  ;;  %v3838_v14 = vld [vmem:[#allocation11 + $0xc58] sm:$0xff]  ;;  %v3855_v29 = vld [vmem:[#allocation11 + $0xce0] sm:$0xff]  ;;  %v3856_v54 = vld [vmem:[#allocation11 + $0xce8] sm:$0xff] }
 0x433   :  { %5964 = vmatmul.mubr.f32.vlgmr.msra.gmra.mrb[162].mxu0 %v11507_v21  ;;  %9142 = vmatprep.subr.bf16.mxu1 %v9141_v23  ;;  %v3835_v23 = vld [vmem:[#allocation11 + $0xc40] sm:$0xff]  ;;  %v9161_v4 = vpack.c.bf16 %v3856_v54, %v3855_v29  ;;  %v11724_v29 = vcombine.high %v11183_v53, %v11176_v25  ;;  %v3909_v53 = vld [vmem:[#allocation11 + $0xe90] sm:$0xff] }
 0x434   :  { %9684 = vmatpush3.bf16.msra.mxu0 %v9683_v3  ;;  %6103 = vmatprep.mubr.f32.mxu0 %v5890_v42  ;;  %v5836_v3 = vld [vmem:[#allocation11 + $0x1dc8] sm:$0xff]  ;;  %v5837_v42 = vld [vmem:[#allocation11 + $0x1dd0] sm:$0xff]  ;;  %v5839_v38 = vld [vmem:[#allocation11 + $0x1de0] sm:$0xff] }
 0x435   :  { %9686 = vmatprep.subr.bf16.mxu0 %v9685_v5  ;;  %v9697_v2 = vpack.c.bf16 %v5836_v3, %v5835_v9  ;;  %v5820_v5 = vld [vmem:[#allocation11 + $0x1d48] sm:$0xff]  ;;  %v3857_v9 = vld [vmem:[#allocation11 + $0xcf0] sm:$0xff]  ;;  %v3858_v3 = vld [vmem:[#allocation11 + $0xcf8] sm:$0xff]  ;;  %v11527_v54 = vrot.slane %v11724_v29, %v11099_v60 }
 0x436   :  { %9144 = vmatpush3.bf16.msra.mxu1 %v9143_v45  ;;  %v5838_v45 = vld [vmem:[#allocation11 + $0x1dd8] sm:$0xff]  ;;  %v6167_v29 = vld [vmem:[#allocation11 + $0x1f20] sm:$0xff] }
 0x437   :  { %9146 = vmatprep.subr.bf16.mxu1 %v9145_v12  ;;  %v9699_v12 = vpack.c.bf16 %v5820_v5, %v5819_v51  ;;  %v9701_v58 = vpack.c.bf16 %v5838_v45, %v5837_v42  ;;  %v11516_v5 = vrot.slane %v6229_v30, %v11099_v60  ;;  %v9165_v42 = vpack.c.bf16 %v3858_v3, %v3857_v9  ;;  %v3841_v45 = vld [vmem:[#allocation11 + $0xc70] sm:$0xff]  ;;  %v6180_v30 = vld [vmem:[#allocation11 + $0x1f88] sm:$0xff]  ;;  %v6182_v3 = vld [vmem:[#allocation11 + $0x1f98] sm:$0xff] }
 0x438   :  { %9688 = vmatpush3.bf16.msra.mxu0 %v9687_v57  ;;  %v9155_v57 = vpack.c.bf16 %v3836_v7, %v3835_v23  ;;  %v5842_v23 = vld [vmem:[#allocation11 + $0x1df8] sm:$0xff]  ;;  %v3942_v25 = vcombine.high %v11527_v54, %v11527_v54  ;;  %v6181_v9 = vld [vmem:[#allocation11 + $0x1f90] sm:$0xff] }
 0x439   :  { %9690 = vmatprep.subr.bf16.mxu0 %v9689_v18  ;;  %v5821_v18 = vld [vmem:[#allocation11 + $0x1d50] sm:$0xff] }
 0x43a   :  { %9148 = vmatpush3.bf16.msra.mxu1 %v9147_v41  ;;  %v5840_v41 = vld [vmem:[#allocation11 + $0x1de8] sm:$0xff] }
 0x43b   :  { %9150 = vmatprep.subr.bf16.mxu1 %v9149_v49  ;;  %v9703_v49 = vpack.c.bf16 %v5822_v8, %v5821_v18  ;;  %v9705_v6 = vpack.c.bf16 %v5840_v41, %v5839_v38  ;;  %v3907_v18 = vld [vmem:[#allocation11 + $0xe80] sm:$0xff]  ;;  %v6245_v41 = vcombine.high %v11516_v5, %v11516_v5 }
 0x43c   :  { %9692 = vmatpush3.bf16.msra.mxu0 %v9691_v43  ;;  %v9159_v43 = vpack.c.bf16 %v3838_v14, %v3837_v24  ;;  %v5826_v14 = vld [vmem:[#allocation11 + $0x1d78] sm:$0xff]  ;;  %v6179_v8 = vld [vmem:[#allocation11 + $0x1f80] sm:$0xff] }
 0x43d   :  { %9694 = vmatprep.subr.bf16.mxu0 %v9693_v0  ;;  %v5823_v0 = vld [vmem:[#allocation11 + $0x1d60] sm:$0xff] }
 0x43e   :  { %9152 = vmatpush3.bf16.msra.mxu1 %v9151_v20  ;;  %v9707_v39 = vpack.c.bf16 %v5824_v33, %v5823_v0  ;;  %v6164_v0 = vld [vmem:[#allocation11 + $0x1f08] sm:$0xff]  ;;  %v11534_v33 = vrot.slane %v6245_v41, %v11099_v60  ;;  %v3913_v41 = vld [vmem:[#allocation11 + $0xeb0] sm:$0xff] }
 0x43f   :  { %9154 = vmatprep.subr.bf16.mxu1 %v9153_v31  ;;  %v5841_v31 = vld [vmem:[#allocation11 + $0x1df0] sm:$0xff] }
 0x440   :  { %9696 = vmatpush3.bf16.msra.mxu0 %v9695_v11  ;;  %v9709_v24 = vpack.c.bf16 %v5842_v23, %v5841_v31  ;;  %v3894_v31 = vld [vmem:[#allocation11 + $0xe18] sm:$0xff]  ;;  %v6165_v23 = vld [vmem:[#allocation11 + $0x1f10] sm:$0xff] }
 0x441   :  { %9698 = vmatprep.subr.bf16.mxu0 %v9697_v2  ;;  %v9163_v2 = vpack.c.bf16 %v3840_v40, %v3839_v62  ;;  %v9745_v62 = vpack.c.bf16 %v6180_v30, %v6179_v8  ;;  %v6163_v40 = vld [vmem:[#allocation11 + $0x1f00] sm:$0xff]  ;;  %v3896_v30 = vld [vmem:[#allocation11 + $0xe28] sm:$0xff] }
 0x442   :  { %9156 = vmatpush3.bf16.msra.mxu1 %v9155_v57  ;;  %v3842_v57 = vld [vmem:[#allocation11 + $0xc78] sm:$0xff]  ;;  %v3895_v8 = vld [vmem:[#allocation11 + $0xe20] sm:$0xff] }
 0x443   :  { %9158 = vmatprep.subr.bf16.mxu1 %v9157_v16  ;;  %v9167_v38 = vpack.c.bf16 %v3842_v57, %v3841_v45  ;;  %v3970_v45 = vrot.slane %v3942_v25, %v11099_v60  ;;  %v9749_v57 = vpack.c.bf16 %v6182_v3, %v6181_v9  ;;  %v6496_v9 = vld [vmem:[#allocation3 + $0x66] ss:$8 sm:$0x30] }
 0x444   :  { %9700 = vmatpush3.bf16.msra.mxu0 %v9699_v12  ;;  %v7372_v61 = vpop.f32.mrb[6].mxu1  ;;  %v5825_v12 = vld [vmem:[#allocation11 + $0x1d70] sm:$0xff] }
 0x445   :  { %9702 = vmatprep.subr.bf16.mxu0 %v9701_v58  ;;  %v7373_v11 = vpop.f32.mrb[7].mxu1  ;;  %v3908_v58 = vld [vmem:[#allocation11 + $0xe88] sm:$0xff] }
 0x446   :  { %v7792_v20 = vpop.f32.mrb[150].mxu0  ;;  %v7374_v7 = vadd.f32 %v7373_v11, %v7372_v61  ;;  %9160 = vmatpush3.bf16.msra.mxu1 %v9159_v43  ;;  %v9201_v43 = vpack.c.bf16 %v3908_v58, %v3907_v18  ;;  %v3910_v61 = vld [vmem:[#allocation11 + $0xe98] sm:$0xff]  ;;  %v3893_v11 = vld [vmem:[#allocation11 + $0xe10] sm:$0xff] }
 0x447   :  { %v7793_v51 = vpop.f32.mrb[151].mxu0  ;;  %9162 = vmatprep.subr.bf16.mxu1 %v9161_v4  ;;  %v3892_v4 = vld [vmem:[#allocation11 + $0xe08] sm:$0xff]  ;;  %v9207_v18 = vpack.c.bf16 %v3894_v31, %v3893_v11  ;;  %v6170_v31 = vld [vmem:[#allocation11 + $0x1f38] sm:$0xff] }
 0x448   :  { %v11518_v63 = vadd.f32 %v7793_v51, %v7792_v20  ;;  %9704 = vmatpush3.bf16.msra.mxu0 %v9703_v49  ;;  %v11521_v16 = vadd.f32 %v7374_v7, %v11496_v22  ;;  %v9711_v22 = vpack.c.bf16 %v5826_v14, %v5825_v12  ;;  %v3891_v49 = vld [vmem:[#allocation11 + $0xe00] sm:$0xff]  ;;  %v9747_v20 = vpack.c.bf16 %v6164_v0, %v6163_v40 }
 0x449   :  { %9706 = vmatprep.subr.bf16.mxu0 %v9705_v6  ;;  %v9203_v6 = vpack.c.bf16 %v3892_v4, %v3891_v49  ;;  %v5876_v7 = vrot.slane %v11499_v17, %v11099_v60  ;;  %v9205_v51 = vpack.c.bf16 %v3910_v61, %v3909_v53  ;;  %v6183_v12 = vld [vmem:[#allocation11 + $0x1fa0] sm:$0xff]  ;;  %v6276_v14 = vcombine.high %v11534_v33, %v11534_v33  ;;  %v6186_v49 = vld [vmem:[#allocation11 + $0x1fb8] sm:$0xff]  ;;  %v3897_v53 = vld [vmem:[#allocation11 + $0xe30] sm:$0xff] }
 0x44a   :  { %9164 = vmatpush3.bf16.msra.mxu1 %v9163_v2  ;;  %v6166_v2 = vld [vmem:[#allocation11 + $0x1f18] sm:$0xff]  ;;  %v9211_v4 = vpack.c.bf16 %v3896_v30, %v3895_v8  ;;  %v6508_v40 = vld [vmem:[#allocation3 + $0xf7] ss:$8 sm:$0x30] }
 0x44b   :  { %9166 = vmatprep.subr.bf16.mxu1 %v9165_v42  ;;  %v3912_v42 = vld [vmem:[#allocation11 + $0xea8] sm:$0xff]  ;;  %v9751_v17 = vpack.c.bf16 %v6166_v2, %v6165_v23  ;;  %v3898_v61 = vld [vmem:[#allocation11 + $0xe38] sm:$0xff]  ;;  %v3915_v23 = vld [vmem:[#allocation11 + $0xec0] sm:$0xff] }
 0x44c   :  { %9708 = vmatpush3.bf16.msra.mxu0 %v9707_v39  ;;  %v3911_v39 = vld [vmem:[#allocation11 + $0xea0] sm:$0xff]  ;;  %v6188_v2 = vld [vmem:[#allocation11 + $0x1fc8] sm:$0xff] }
 0x44d   :  { %9710 = vmatprep.subr.bf16.mxu0 %v9709_v24  ;;  %v6184_v24 = vld [vmem:[#allocation11 + $0x1fa8] sm:$0xff]  ;;  %v9209_v58 = vpack.c.bf16 %v3912_v42, %v3911_v39  ;;  %v9215_v42 = vpack.c.bf16 %v3898_v61, %v3897_v53  ;;  %v6171_v8 = vld [vmem:[#allocation11 + $0x1f40] sm:$0xff]  ;;  %v3902_v53 = vld [vmem:[#allocation11 + $0xe58] sm:$0xff] }
 0x44e   :  { %9168 = vmatpush3.bf16.msra.mxu1 %v9167_v38  ;;  %v6168_v38 = vld [vmem:[#allocation11 + $0x1f28] sm:$0xff]  ;;  %v6173_v61 = vld [vmem:[#allocation11 + $0x1f50] sm:$0xff] }
 0x44f   :  { %9202 = vmatprep.subr.bf16.mxu1 %v9201_v43  ;;  %v6185_v43 = vld [vmem:[#allocation11 + $0x1fb0] sm:$0xff]  ;;  %v9755_v0 = vpack.c.bf16 %v6168_v38, %v6167_v29  ;;  %v6172_v29 = vld [vmem:[#allocation11 + $0x1f48] sm:$0xff]  ;;  %v3918_v38 = vld [vmem:[#allocation11 + $0xed8] sm:$0xff] }
 0x450   :  { %9712 = vmatpush3.bf16.msra.mxu0 %v9711_v22  ;;  %v3914_v22 = vld [vmem:[#allocation11 + $0xeb8] sm:$0xff]  ;;  %v9757_v11 = vpack.c.bf16 %v6186_v49, %v6185_v43  ;;  %v6189_v43 = vld [vmem:[#allocation11 + $0x1fd0] sm:$0xff] }
 0x451   :  { %9746 = vmatprep.subr.bf16.mxu0 %v9745_v62  ;;  %4044 = vmatmul.mubr.f32.vlgmr.msra.gmra.mrb[20].mxu1 %v11266_v26  ;;  %v9753_v26 = vpack.c.bf16 %v6184_v24, %v6183_v12  ;;  %v6500_v62 = vld [vmem:[#allocation3 + $0xf6] ss:$8 sm:$0x30]  ;;  %v9213_v25 = vpack.c.bf16 %v3914_v22, %v3913_v41  ;;  %v6507_v39 = vld [vmem:[#allocation3 + $0xf7] ss:$8 sm:$0xf] }
 0x452   :  { %9204 = vmatpush3.bf16.msra.mxu1 %v9203_v6  ;;  %4183 = vmatprep.mubr.f32.mxu1 %v3970_v45  ;;  %v6169_v6 = vld [vmem:[#allocation11 + $0x1f30] sm:$0xff]  ;;  %v6509_v24 = vor.u32 %v6508_v40, %v6507_v39  ;;  %v6190_v49 = vld [vmem:[#allocation11 + $0x1fd8] sm:$0xff]  ;;  %v9763_v40 = vpack.c.bf16 %v6172_v29, %v6171_v8 }
 0x453   :  { %6104 = vmatmul.mubr.f32.vlgmr.msra.gmra.mrb[164].mxu0 %v5876_v7  ;;  %9206 = vmatprep.subr.bf16.mxu1 %v9205_v51  ;;  %v6499_v3 = vld [vmem:[#allocation3 + $0xf6] ss:$8 sm:$0xf]  ;;  %v6503_v12 = vld [vmem:[#allocation3 + $0x67] ss:$8 sm:$0xf] }
 0x454   :  { %9748 = vmatpush3.bf16.msra.mxu0 %v9747_v20  ;;  %6417 = vmatprep.mubr.f32.mxu0 %v6276_v14  ;;  %v6504_v20 = vld [vmem:[#allocation3 + $0x67] ss:$8 sm:$0x30]  ;;  %v3916_v7 = vld [vmem:[#allocation11 + $0xec8] sm:$0xff]  ;;  %v6187_v51 = vld [vmem:[#allocation11 + $0x1fc0] sm:$0xff]  ;;  %v9759_v14 = vpack.c.bf16 %v6170_v31, %v6169_v6  ;;  %v9765_v6 = vpack.c.bf16 %v6190_v49, %v6189_v43 }
 0x455   :  { %9750 = vmatprep.subr.bf16.mxu0 %v9749_v57  ;;  %v6495_v45 = vld [vmem:[#allocation3 + $0x66] ss:$8 sm:$0xf]  ;;  %v6501_v57 = vor.u32 %v6500_v62, %v6499_v3  ;;  %v9761_v30 = vpack.c.bf16 %v6188_v2, %v6187_v51  ;;  %v6505_v22 = vor.u32 %v6504_v20, %v6503_v12 }
 0x456   :  { %9208 = vmatpush3.bf16.msra.mxu1 %v9207_v18  ;;  %v9217_v18 = vpack.c.bf16 %v3916_v7, %v3915_v23  ;;  %v6497_v41 = vor.u32 %v6496_v9, %v6495_v45  ;;  %v6174_v3 = vld [vmem:[#allocation11 + $0x1f58] sm:$0xff]  ;;  %v3920_v31 = vld [vmem:[#allocation11 + $0xee8] sm:$0xff]  ;;  %v6191_v9 = vld [vmem:[#allocation11 + $0x1fe0] sm:$0xff] }
 0x457   :  { %9210 = vmatprep.subr.bf16.mxu1 %v9209_v58  ;;  %v3900_v58 = vld [vmem:[#allocation11 + $0xe48] sm:$0xff]  ;;  %v6511_v62 = vmax.f32 %v6501_v57, %v6509_v24  ;;  %v9767_v2 = vpack.c.bf16 %v6174_v3, %v6173_v61  ;;  %v6175_v57 = vld [vmem:[#allocation11 + $0x1f60] sm:$0xff]  ;;  %v6194_v29 = vld [vmem:[#allocation11 + $0x1ff8] sm:$0xff] }
 0x458   :  { %9752 = vmatpush3.bf16.msra.mxu0 %v9751_v17  ;;  %v3899_v17 = vld [vmem:[#allocation11 + $0xe40] sm:$0xff]  ;;  %v6510_v23 = vmax.f32 %v6497_v41, %v6505_v22  ;;  %v6192_v20 = vld [vmem:[#allocation11 + $0x1fe8] sm:$0xff] }
 0x459   :  { %9754 = vmatprep.subr.bf16.mxu0 %v9753_v26  ;;  %v3917_v26 = vld [vmem:[#allocation11 + $0xed0] sm:$0xff]  ;;  %v11543_v51 = vmax.f32 %v6511_v62, %v11304_v1  ;;  %v3904_v45 = vld [vmem:[#allocation11 + $0xe68] sm:$0xff]  ;;  %v9769_v24 = vpack.c.bf16 %v6192_v20, %v6191_v9  ;;  %v4259_v61 = vld [vmem:[#allocation11 + $0x1080] sm:$0xff] }
 0x45a   :  { %9212 = vmatpush3.bf16.msra.mxu1 %v9211_v4  ;;  %v9219_v4 = vpack.c.bf16 %v3900_v58, %v3899_v17  ;;  %v3922_v17 = vld [vmem:[#allocation11 + $0xef8] sm:$0xff]  ;;  %v11546_v58 = vmax.f32 %v6510_v23, %v11302_v56  ;;  %v6193_v1 = vld [vmem:[#allocation11 + $0x1ff0] sm:$0xff]  ;;  %v6531_v3 = vld [vmem:[#allocation11 + $0x2180] sm:$0xff] }
 0x45b   :  { %9214 = vmatprep.subr.bf16.mxu1 %v9213_v25  ;;  %v3901_v25 = vld [vmem:[#allocation11 + $0xe50] sm:$0xff]  ;;  %v3906_v56 = vld [vmem:[#allocation11 + $0xe78] sm:$0xff] }
 0x45c   :  { %9756 = vmatpush3.bf16.msra.mxu0 %v9755_v0  ;;  %v9221_v0 = vpack.c.bf16 %v3918_v38, %v3917_v26  ;;  %v9223_v7 = vpack.c.bf16 %v3902_v53, %v3901_v25  ;;  %v6613_v22 = vcombine.low %v11546_v58, %v11543_v51  ;;  %v3905_v62 = vld [vmem:[#allocation11 + $0xe70] sm:$0xff]  ;;  %v9773_v25 = vpack.c.bf16 %v6194_v29, %v6193_v1  ;;  %v6178_v53 = vld [vmem:[#allocation11 + $0x1f78] sm:$0xff] }
 0x45d   :  { %9758 = vmatprep.subr.bf16.mxu0 %v9757_v11  ;;  %v3919_v11 = vld [vmem:[#allocation11 + $0xee0] sm:$0xff]  ;;  %v4246_v1 = vld [vmem:[#allocation11 + $0x1018] sm:$0xff]  ;;  %v6517_v29 = vld [vmem:[#allocation11 + $0x2110] sm:$0xff] }
 0x45e   :  { %9216 = vmatpush3.bf16.msra.mxu1 %v9215_v42  ;;  %v9225_v39 = vpack.c.bf16 %v3920_v31, %v3919_v11  ;;  %v3903_v42 = vld [vmem:[#allocation11 + $0xe60] sm:$0xff]  ;;  %v6532_v11 = vld [vmem:[#allocation11 + $0x2188] sm:$0xff]  ;;  %v9231_v31 = vpack.c.bf16 %v3906_v56, %v3905_v62  ;;  %v11556_v23 = vrot.slane %v6613_v22, %v11099_v60 }
 0x45f   :  { %9218 = vmatprep.subr.bf16.mxu1 %v9217_v18  ;;  %v3921_v18 = vld [vmem:[#allocation11 + $0xef0] sm:$0xff]  ;;  %v9227_v41 = vpack.c.bf16 %v3904_v45, %v3903_v42  ;;  %v6515_v42 = vld [vmem:[#allocation11 + $0x2100] sm:$0xff]  ;;  %v6516_v45 = vld [vmem:[#allocation11 + $0x2108] sm:$0xff] }
 0x460   :  { %9760 = vmatpush3.bf16.msra.mxu0 %v9759_v14  ;;  %v6176_v14 = vld [vmem:[#allocation11 + $0x1f68] sm:$0xff]  ;;  %v4263_v22 = vld [vmem:[#allocation11 + $0x10a0] sm:$0xff] }
 0x461   :  { %9762 = vmatprep.subr.bf16.mxu0 %v9761_v30  ;;  %v9771_v49 = vpack.c.bf16 %v6176_v14, %v6175_v57  ;;  %v4261_v57 = vld [vmem:[#allocation11 + $0x1090] sm:$0xff]  ;;  %v6629_v14 = vcombine.high %v11556_v23, %v11556_v23  ;;  %v6535_v56 = vld [vmem:[#allocation11 + $0x21a0] sm:$0xff] }
 0x462   :  { %9220 = vmatpush3.bf16.msra.mxu1 %v9219_v4  ;;  %v9229_v4 = vpack.c.bf16 %v3922_v17, %v3921_v18  ;;  %v6533_v18 = vld [vmem:[#allocation11 + $0x2190] sm:$0xff]  ;;  %v6534_v17 = vld [vmem:[#allocation11 + $0x2198] sm:$0xff] }
 0x463   :  { %9222 = vmatprep.subr.bf16.mxu1 %v9221_v0  ;;  %v9813_v62 = vpack.c.bf16 %v6534_v17, %v6533_v18  ;;  %v6522_v18 = vld [vmem:[#allocation11 + $0x2138] sm:$0xff]  ;;  %v4267_v17 = vld [vmem:[#allocation11 + $0x10c0] sm:$0xff] }
 0x464   :  { %9764 = vmatpush3.bf16.msra.mxu0 %v9763_v40  ;;  %v7407_v12 = vpop.f32.mrb[8].mxu1  ;;  %v6177_v40 = vld [vmem:[#allocation11 + $0x1f70] sm:$0xff] }
 0x465   :  { %9766 = vmatprep.subr.bf16.mxu0 %v9765_v6  ;;  %v7408_v30 = vpop.f32.mrb[9].mxu1  ;;  %v4260_v6 = vld [vmem:[#allocation11 + $0x1088] sm:$0xff]  ;;  %v9775_v9 = vpack.c.bf16 %v6178_v53, %v6177_v40  ;;  %v11571_v40 = vrot.slane %v6629_v14, %v11099_v60 }
 0x466   :  { %v7862_v8 = vpop.f32.mrb[152].mxu0  ;;  %v7409_v26 = vadd.f32 %v7408_v30, %v7407_v12  ;;  %9224 = vmatpush3.bf16.msra.mxu1 %v9223_v7  ;;  %v9265_v20 = vpack.c.bf16 %v4260_v6, %v4259_v61  ;;  %v4243_v7 = vld [vmem:[#allocation11 + $0x1000] sm:$0xff]  ;;  %v4262_v12 = vld [vmem:[#allocation11 + $0x1098] sm:$0xff]  ;;  %v9811_v30 = vpack.c.bf16 %v6516_v45, %v6515_v42 }
 0x467   :  { %v7863_v38 = vpop.f32.mrb[153].mxu0  ;;  %9226 = vmatprep.subr.bf16.mxu1 %v9225_v39  ;;  %v9809_v39 = vpack.c.bf16 %v6532_v11, %v6531_v3  ;;  %v4247_v6 = vld [vmem:[#allocation11 + $0x1020] sm:$0xff]  ;;  %v4248_v3 = vld [vmem:[#allocation11 + $0x1028] sm:$0xff] }
 0x468   :  { %v11550_v43 = vadd.f32 %v7863_v38, %v7862_v8  ;;  %9768 = vmatpush3.bf16.msra.mxu0 %v9767_v2  ;;  %v11553_v0 = vadd.f32 %v7409_v26, %v11521_v16  ;;  %v4244_v2 = vld [vmem:[#allocation11 + $0x1008] sm:$0xff]  ;;  %v11560_v16 = vrot.slane %v11516_v5, %v11099_v60  ;;  %v3956_v8 = vrot.slane %v11527_v54, %v11099_v60  ;;  %v4245_v5 = vld [vmem:[#allocation11 + $0x1010] sm:$0xff]  ;;  %v6519_v11 = vld [vmem:[#allocation11 + $0x2120] sm:$0xff] }
 0x469   :  { %9770 = vmatprep.subr.bf16.mxu0 %v9769_v24  ;;  %v9267_v24 = vpack.c.bf16 %v4244_v2, %v4243_v7  ;;  %v9269_v38 = vpack.c.bf16 %v4262_v12, %v4261_v57  ;;  %v6536_v54 = vld [vmem:[#allocation11 + $0x21a8] sm:$0xff]  ;;  %v6537_v7 = vld [vmem:[#allocation11 + $0x21b0] sm:$0xff]  ;;  %v6538_v2 = vld [vmem:[#allocation11 + $0x21b8] sm:$0xff] }
 0x46a   :  { %9228 = vmatpush3.bf16.msra.mxu1 %v9227_v41  ;;  %v6275_v26 = vcombine.high %v11560_v16, %v11560_v16  ;;  %v6518_v41 = vld [vmem:[#allocation11 + $0x2118] sm:$0xff]  ;;  %v4249_v57 = vld [vmem:[#allocation11 + $0x1030] sm:$0xff]  ;;  %v9821_v14 = vpack.c.bf16 %v6538_v2, %v6537_v7  ;;  %v4272_v7 = vld [vmem:[#allocation11 + $0x10e8] sm:$0xff] }
 0x46b   :  { %9230 = vmatprep.subr.bf16.mxu1 %v9229_v4  ;;  %v4356_v4 = vcombine.high %v11288_v55, %v11288_v55  ;;  %v9815_v53 = vpack.c.bf16 %v6518_v41, %v6517_v29  ;;  %v9817_v55 = vpack.c.bf16 %v6536_v54, %v6535_v56  ;;  %v4250_v12 = vld [vmem:[#allocation11 + $0x1038] sm:$0xff]  ;;  %v4252_v41 = vld [vmem:[#allocation11 + $0x1048] sm:$0xff]  ;;  %v6541_v54 = vld [vmem:[#allocation11 + $0x21d0] sm:$0xff] }
 0x46c   :  { %9772 = vmatpush3.bf16.msra.mxu0 %v9771_v49  ;;  %v4264_v49 = vld [vmem:[#allocation11 + $0x10a8] sm:$0xff]  ;;  %v4270_v56 = vld [vmem:[#allocation11 + $0x10d8] sm:$0xff]  ;;  %v6543_v2 = vld [vmem:[#allocation11 + $0x21e0] sm:$0xff] }
 0x46d   :  { %9774 = vmatprep.subr.bf16.mxu0 %v9773_v25  ;;  %v9271_v25 = vpack.c.bf16 %v4246_v1, %v4245_v5  ;;  %v9273_v61 = vpack.c.bf16 %v4264_v49, %v4263_v22  ;;  %v6540_v5 = vld [vmem:[#allocation11 + $0x21c8] sm:$0xff]  ;;  %v9279_v1 = vpack.c.bf16 %v4250_v12, %v4249_v57  ;;  %v6523_v22 = vld [vmem:[#allocation11 + $0x2140] sm:$0xff] }
 0x46e   :  { %9232 = vmatpush3.bf16.msra.mxu1 %v9231_v31  ;;  %v6520_v31 = vld [vmem:[#allocation11 + $0x2128] sm:$0xff]  ;;  %v4255_v12 = vld [vmem:[#allocation11 + $0x1060] sm:$0xff] }
 0x46f   :  { %9266 = vmatprep.subr.bf16.mxu1 %v9265_v20  ;;  %v4266_v20 = vld [vmem:[#allocation11 + $0x10b8] sm:$0xff]  ;;  %v9819_v42 = vpack.c.bf16 %v6520_v31, %v6519_v11 }
 0x470   :  { %9776 = vmatpush3.bf16.msra.mxu0 %v9775_v9  ;;  %v4265_v9 = vld [vmem:[#allocation11 + $0x10b0] sm:$0xff]  ;;  %v4254_v11 = vld [vmem:[#allocation11 + $0x1058] sm:$0xff] }
 0x471   :  { %9810 = vmatprep.subr.bf16.mxu0 %v9809_v39  ;;  %4184 = vmatmul.mubr.f32.vlgmr.msra.gmra.mrb[22].mxu1 %v3956_v8  ;;  %v9275_v39 = vpack.c.bf16 %v4248_v3, %v4247_v6  ;;  %v9277_v45 = vpack.c.bf16 %v4266_v20, %v4265_v9  ;;  %v4268_v8 = vld [vmem:[#allocation11 + $0x10c8] sm:$0xff]  ;;  %v4253_v3 = vld [vmem:[#allocation11 + $0x1050] sm:$0xff]  ;;  %v6526_v9 = vld [vmem:[#allocation11 + $0x2158] sm:$0xff] }
 0x472   :  { %9268 = vmatpush3.bf16.msra.mxu1 %v9267_v24  ;;  %4497 = vmatprep.mubr.f32.mxu1 %v4356_v4  ;;  %v6521_v24 = vld [vmem:[#allocation11 + $0x2130] sm:$0xff]  ;;  %v6524_v4 = vld [vmem:[#allocation11 + $0x2148] sm:$0xff]  ;;  %v4271_v20 = vld [vmem:[#allocation11 + $0x10e0] sm:$0xff] }
 0x473   :  { %6418 = vmatmul.mubr.f32.vlgmr.msra.gmra.mrb[166].mxu0 %v6275_v26  ;;  %9270 = vmatprep.subr.bf16.mxu1 %v9269_v38  ;;  %v9823_v29 = vpack.c.bf16 %v6522_v18, %v6521_v24  ;;  %v9281_v26 = vpack.c.bf16 %v4268_v8, %v4267_v17  ;;  %v4251_v38 = vld [vmem:[#allocation11 + $0x1040] sm:$0xff]  ;;  %v9289_v57 = vpack.c.bf16 %v4272_v7, %v4271_v20  ;;  %v4256_v24 = vld [vmem:[#allocation11 + $0x1068] sm:$0xff] }
 0x474   :  { %9812 = vmatpush3.bf16.msra.mxu0 %v9811_v30  ;;  %6731 = vmatprep.mubr.f32.mxu0 %v11571_v40  ;;  %v6539_v30 = vld [vmem:[#allocation11 + $0x21c0] sm:$0xff]  ;;  %v6528_v8 = vld [vmem:[#allocation11 + $0x2168] sm:$0xff] }
 0x475   :  { %9814 = vmatprep.subr.bf16.mxu0 %v9813_v62  ;;  %v9825_v49 = vpack.c.bf16 %v6540_v5, %v6539_v30  ;;  %v4269_v62 = vld [vmem:[#allocation11 + $0x10d0] sm:$0xff]  ;;  %v4274_v5 = vld [vmem:[#allocation11 + $0x10f8] sm:$0xff]  ;;  %v6596_v20 = vld [vmem:[#allocation11 + $0x2388] sm:$0xff] }
 0x476   :  { %9272 = vmatpush3.bf16.msra.mxu1 %v9271_v25  ;;  %v6542_v25 = vld [vmem:[#allocation11 + $0x21d8] sm:$0xff]  ;;  %v9285_v6 = vpack.c.bf16 %v4270_v56, %v4269_v62  ;;  %v4273_v30 = vld [vmem:[#allocation11 + $0x10f0] sm:$0xff] }
 0x477   :  { %9274 = vmatprep.subr.bf16.mxu1 %v9273_v61  ;;  %v9827_v61 = vpack.c.bf16 %v6524_v4, %v6523_v22  ;;  %v9829_v31 = vpack.c.bf16 %v6542_v25, %v6541_v54  ;;  %v6614_v4 = vcombine.high %v11546_v58, %v11543_v51  ;;  %v9293_v54 = vpack.c.bf16 %v4274_v5, %v4273_v30  ;;  %v4257_v25 = vld [vmem:[#allocation11 + $0x1070] sm:$0xff] }
 0x478   :  { %9816 = vmatpush3.bf16.msra.mxu0 %v9815_v53  ;;  %v9283_v53 = vpack.c.bf16 %v4252_v41, %v4251_v38  ;;  %v6546_v38 = vld [vmem:[#allocation11 + $0x21f8] sm:$0xff]  ;;  %v4355_v30 = vcombine.high %v11335_v28, %v11335_v28 }
 0x479   :  { %9818 = vmatprep.subr.bf16.mxu0 %v9817_v55  ;;  %v6525_v55 = vld [vmem:[#allocation11 + $0x2150] sm:$0xff]  ;;  %v11582_v58 = vrot.slane %v6614_v4, %v11099_v60  ;;  %v4616_v4 = vld [vmem:[#allocation11 + $0x12a8] sm:$0xff] }
 0x47a   :  { %9276 = vmatpush3.bf16.msra.mxu1 %v9275_v39  ;;  %v6544_v39 = vld [vmem:[#allocation11 + $0x21e8] sm:$0xff] }
 0x47b   :  { %9278 = vmatprep.subr.bf16.mxu1 %v9277_v45  ;;  %v9831_v45 = vpack.c.bf16 %v6526_v9, %v6525_v55  ;;  %v9833_v17 = vpack.c.bf16 %v6544_v39, %v6543_v2  ;;  %v4611_v55 = vld [vmem:[#allocation11 + $0x1280] sm:$0xff] }
 0x47c   :  { %9820 = vmatpush3.bf16.msra.mxu0 %v9819_v42  ;;  %v9287_v42 = vpack.c.bf16 %v4254_v11, %v4253_v3  ;;  %v6530_v11 = vld [vmem:[#allocation11 + $0x2178] sm:$0xff]  ;;  %v6595_v9 = vld [vmem:[#allocation11 + $0x2380] sm:$0xff] }
 0x47d   :  { %9822 = vmatprep.subr.bf16.mxu0 %v9821_v14  ;;  %v6527_v14 = vld [vmem:[#allocation11 + $0x2160] sm:$0xff] }
 0x47e   :  { %9280 = vmatpush3.bf16.msra.mxu1 %v9279_v1  ;;  %v9835_v56 = vpack.c.bf16 %v6528_v8, %v6527_v14  ;;  %v4595_v39 = vld [vmem:[#allocation11 + $0x1200] sm:$0xff]  ;;  %v6598_v8 = vld [vmem:[#allocation11 + $0x2398] sm:$0xff] }
 0x47f   :  { %9282 = vmatprep.subr.bf16.mxu1 %v9281_v26  ;;  %v6545_v26 = vld [vmem:[#allocation11 + $0x21f0] sm:$0xff] }
 0x480   :  { %9824 = vmatpush3.bf16.msra.mxu0 %v9823_v29  ;;  %v9837_v3 = vpack.c.bf16 %v6546_v38, %v6545_v26  ;;  %v6581_v26 = vld [vmem:[#allocation11 + $0x2310] sm:$0xff]  ;;  %v11590_v38 = vrot.slane %v11556_v23, %v11099_v60 }
 0x481   :  { %9826 = vmatprep.subr.bf16.mxu0 %v9825_v49  ;;  %v9291_v49 = vpack.c.bf16 %v4256_v24, %v4255_v12  ;;  %v4613_v12 = vld [vmem:[#allocation11 + $0x1290] sm:$0xff]  ;;  %v4614_v24 = vld [vmem:[#allocation11 + $0x1298] sm:$0xff] }
 0x482   :  { %9284 = vmatpush3.bf16.msra.mxu1 %v9283_v53  ;;  %v4258_v53 = vld [vmem:[#allocation11 + $0x1078] sm:$0xff] }
 0x483   :  { %9286 = vmatprep.subr.bf16.mxu1 %v9285_v6  ;;  %v9295_v51 = vpack.c.bf16 %v4258_v53, %v4257_v25  ;;  %v6600_v25 = vld [vmem:[#allocation11 + $0x23a8] sm:$0xff] }
 0x484   :  { %9828 = vmatpush3.bf16.msra.mxu0 %v9827_v61  ;;  %v7442_v18 = vpop.f32.mrb[10].mxu1  ;;  %v6529_v61 = vld [vmem:[#allocation11 + $0x2170] sm:$0xff] }
 0x485   :  { %9830 = vmatprep.subr.bf16.mxu0 %v9829_v31  ;;  %v7443_v29 = vpop.f32.mrb[11].mxu1  ;;  %v4612_v31 = vld [vmem:[#allocation11 + $0x1288] sm:$0xff]  ;;  %v9839_v7 = vpack.c.bf16 %v6530_v11, %v6529_v61 }
 0x486   :  { %v7932_v1 = vpop.f32.mrb[154].mxu0  ;;  %v7444_v41 = vadd.f32 %v7443_v29, %v7442_v18  ;;  %9288 = vmatpush3.bf16.msra.mxu1 %v9287_v42  ;;  %v9329_v2 = vpack.c.bf16 %v4612_v31, %v4611_v55  ;;  %v4596_v42 = vld [vmem:[#allocation11 + $0x1208] sm:$0xff]  ;;  %v6630_v18 = vcombine.high %v11582_v58, %v11582_v58  ;;  %v4598_v29 = vld [vmem:[#allocation11 + $0x1218] sm:$0xff]  ;;  %v6583_v55 = vld [vmem:[#allocation11 + $0x2320] sm:$0xff] }
 0x487   :  { %v7933_v22 = vpop.f32.mrb[155].mxu0  ;;  %9290 = vmatprep.subr.bf16.mxu1 %v9289_v57  ;;  %v6580_v57 = vld [vmem:[#allocation11 + $0x2308] sm:$0xff]  ;;  %v9331_v14 = vpack.c.bf16 %v4596_v42, %v4595_v39 }
 0x488   :  { %v11576_v62 = vadd.f32 %v7933_v22, %v7932_v1  ;;  %9832 = vmatpush3.bf16.msra.mxu0 %v9831_v45  ;;  %v11579_v6 = vadd.f32 %v7444_v41, %v11553_v0  ;;  %v9873_v0 = vpack.c.bf16 %v6596_v20, %v6595_v9  ;;  %v6579_v45 = vld [vmem:[#allocation11 + $0x2300] sm:$0xff]  ;;  %v4597_v1 = vld [vmem:[#allocation11 + $0x1210] sm:$0xff]  ;;  %v9333_v41 = vpack.c.bf16 %v4614_v24, %v4613_v12  ;;  %v6582_v22 = vld [vmem:[#allocation11 + $0x2318] sm:$0xff] }
 0x489   :  { %9834 = vmatprep.subr.bf16.mxu0 %v9833_v17  ;;  %v6597_v17 = vld [vmem:[#allocation11 + $0x2390] sm:$0xff]  ;;  %v9875_v5 = vpack.c.bf16 %v6580_v57, %v6579_v45  ;;  %v6658_v28 = vrot.slane %v6630_v18, %v11099_v60  ;;  %v9335_v53 = vpack.c.bf16 %v4598_v29, %v4597_v1  ;;  %v9879_v23 = vpack.c.bf16 %v6582_v22, %v6581_v26  ;;  %v4600_v11 = vld [vmem:[#allocation11 + $0x1228] sm:$0xff]  ;;  %v4602_v45 = vld [vmem:[#allocation11 + $0x1238] sm:$0xff] }
 0x48a   :  { %9292 = vmatpush3.bf16.msra.mxu1 %v9291_v49  ;;  %v4615_v49 = vld [vmem:[#allocation11 + $0x12a0] sm:$0xff]  ;;  %v6584_v9 = vld [vmem:[#allocation11 + $0x2328] sm:$0xff]  ;;  %v4617_v20 = vld [vmem:[#allocation11 + $0x12b0] sm:$0xff] }
 0x48b   :  { %9294 = vmatprep.subr.bf16.mxu1 %v9293_v54  ;;  %v6599_v54 = vld [vmem:[#allocation11 + $0x23a0] sm:$0xff]  ;;  %v9337_v61 = vpack.c.bf16 %v4616_v4, %v4615_v49  ;;  %v6585_v57 = vld [vmem:[#allocation11 + $0x2330] sm:$0xff]  ;;  %v6586_v24 = vld [vmem:[#allocation11 + $0x2338] sm:$0xff] }
 0x48c   :  { %9836 = vmatpush3.bf16.msra.mxu0 %v9835_v56  ;;  %v9877_v56 = vpack.c.bf16 %v6598_v8, %v6597_v17  ;;  %v9881_v31 = vpack.c.bf16 %v6600_v25, %v6599_v54  ;;  %v4620_v18 = vld [vmem:[#allocation11 + $0x12c8] sm:$0xff]  ;;  %v6603_v17 = vld [vmem:[#allocation11 + $0x23c0] sm:$0xff]  ;;  %v4621_v4 = vld [vmem:[#allocation11 + $0x12d0] sm:$0xff] }
 0x48d   :  { %9838 = vmatprep.subr.bf16.mxu0 %v9837_v3  ;;  %v4599_v3 = vld [vmem:[#allocation11 + $0x1220] sm:$0xff]  ;;  %v6604_v8 = vld [vmem:[#allocation11 + $0x23c8] sm:$0xff]  ;;  %v6605_v54 = vld [vmem:[#allocation11 + $0x23d0] sm:$0xff] }
 0x48e   :  { %9296 = vmatpush3.bf16.msra.mxu1 %v9295_v51  ;;  %v4618_v51 = vld [vmem:[#allocation11 + $0x12b8] sm:$0xff]  ;;  %v9339_v39 = vpack.c.bf16 %v4600_v11, %v4599_v3  ;;  %v4603_v29 = vld [vmem:[#allocation11 + $0x1240] sm:$0xff]  ;;  %v4604_v26 = vld [vmem:[#allocation11 + $0x1248] sm:$0xff]  ;;  %v9889_v22 = vpack.c.bf16 %v6604_v8, %v6603_v17 }
 0x48f   :  { %9330 = vmatprep.subr.bf16.mxu1 %v9329_v2  ;;  %v6602_v2 = vld [vmem:[#allocation11 + $0x23b8] sm:$0xff]  ;;  %v9341_v42 = vpack.c.bf16 %v4618_v51, %v4617_v20  ;;  %v6588_v49 = vld [vmem:[#allocation11 + $0x2348] sm:$0xff]  ;;  %v6589_v11 = vld [vmem:[#allocation11 + $0x2350] sm:$0xff] }
 0x490   :  { %9840 = vmatpush3.bf16.msra.mxu0 %v9839_v7  ;;  %v6601_v7 = vld [vmem:[#allocation11 + $0x23b0] sm:$0xff]  ;;  %v6606_v25 = vld [vmem:[#allocation11 + $0x23d8] sm:$0xff]  ;;  %v4624_v20 = vld [vmem:[#allocation11 + $0x12e8] sm:$0xff] }
 0x491   :  { %9874 = vmatprep.subr.bf16.mxu0 %v9873_v0  ;;  %4498 = vmatmul.mubr.f32.vlgmr.msra.gmra.mrb[24].mxu1 %v4355_v30  ;;  %v4601_v0 = vld [vmem:[#allocation11 + $0x1230] sm:$0xff]  ;;  %v9885_v12 = vpack.c.bf16 %v6602_v2, %v6601_v7  ;;  %v4606_v3 = vld [vmem:[#allocation11 + $0x1258] sm:$0xff]  ;;  %v6607_v51 = vld [vmem:[#allocation11 + $0x23e0] sm:$0xff] }
 0x492   :  { %9332 = vmatpush3.bf16.msra.mxu1 %v9331_v14  ;;  %4811 = vmatprep.mubr.f32.mxu1 %v11359_v10  ;;  %v9883_v10 = vpack.c.bf16 %v6584_v9, %v6583_v55  ;;  %v4619_v14 = vld [vmem:[#allocation11 + $0x12c0] sm:$0xff]  ;;  %v9343_v30 = vpack.c.bf16 %v4602_v45, %v4601_v0  ;;  %v9893_v55 = vpack.c.bf16 %v6606_v25, %v6605_v54  ;;  %v6608_v7 = vld [vmem:[#allocation11 + $0x23e8] sm:$0xff]  ;;  %v6593_v54 = vld [vmem:[#allocation11 + $0x2370] sm:$0xff] }
 0x493   :  { %6732 = vmatmul.mubr.f32.vlgmr.msra.gmra.mrb[168].mxu0 %v11590_v38  ;;  %9334 = vmatprep.subr.bf16.mxu1 %v9333_v41  ;;  %v9345_v1 = vpack.c.bf16 %v4620_v18, %v4619_v14  ;;  %v6587_v41 = vld [vmem:[#allocation11 + $0x2340] sm:$0xff]  ;;  %v4608_v0 = vld [vmem:[#allocation11 + $0x1268] sm:$0xff]  ;;  %v4625_v14 = vld [vmem:[#allocation11 + $0x12f0] sm:$0xff] }
 0x494   :  { %9876 = vmatpush3.bf16.msra.mxu0 %v9875_v5  ;;  %6871 = vmatprep.mubr.f32.mxu0 %v6658_v28  ;;  %v9887_v5 = vpack.c.bf16 %v6586_v24, %v6585_v57  ;;  %v9347_v28 = vpack.c.bf16 %v4604_v26, %v4603_v29  ;;  %v4623_v9 = vld [vmem:[#allocation11 + $0x12e0] sm:$0xff]  ;;  %v6592_v24 = vld [vmem:[#allocation11 + $0x2368] sm:$0xff]  ;;  %v4626_v18 = vld [vmem:[#allocation11 + $0x12f8] sm:$0xff] }
 0x495   :  { %9878 = vmatprep.subr.bf16.mxu0 %v9877_v56  ;;  %v4622_v56 = vld [vmem:[#allocation11 + $0x12d8] sm:$0xff]  ;;  %v6591_v45 = vld [vmem:[#allocation11 + $0x2360] sm:$0xff] }
 0x496   :  { %9336 = vmatpush3.bf16.msra.mxu1 %v9335_v53  ;;  %v9891_v53 = vpack.c.bf16 %v6588_v49, %v6587_v41  ;;  %v9357_v49 = vpack.c.bf16 %v4626_v18, %v4625_v14  ;;  %v4663_v14 = vld [vmem:[#allocation11 + $0x1420] sm:$0xff]  ;;  %v4664_v18 = vld [vmem:[#allocation11 + $0x1428] sm:$0xff] }
 0x497   :  { %9338 = vmatprep.subr.bf16.mxu1 %v9337_v61  ;;  %v4605_v61 = vld [vmem:[#allocation11 + $0x1250] sm:$0xff] }
 0x498   :  { %9880 = vmatpush3.bf16.msra.mxu0 %v9879_v23  ;;  %v9349_v23 = vpack.c.bf16 %v4622_v56, %v4621_v4  ;;  %v9351_v2 = vpack.c.bf16 %v4606_v3, %v4605_v61  ;;  %v4609_v4 = vld [vmem:[#allocation11 + $0x1270] sm:$0xff]  ;;  %v4610_v56 = vld [vmem:[#allocation11 + $0x1278] sm:$0xff]  ;;  %v11725_v61 = vcombine.high %v11198_v37, %v11195_v47 }
 0x499   :  { %9882 = vmatprep.subr.bf16.mxu0 %v9881_v31  ;;  %v6590_v31 = vld [vmem:[#allocation11 + $0x2358] sm:$0xff]  ;;  %v4661_v37 = vld [vmem:[#allocation11 + $0x1410] sm:$0xff] }
 0x49a   :  { %9340 = vmatpush3.bf16.msra.mxu1 %v9339_v39  ;;  %v9895_v39 = vpack.c.bf16 %v6590_v31, %v6589_v11  ;;  %v11603_v3 = vrot.slane %v11725_v61, %v11099_v60  ;;  %v9359_v11 = vpack.c.bf16 %v4610_v56, %v4609_v4  ;;  %v4667_v4 = vld [vmem:[#allocation11 + $0x1440] sm:$0xff]  ;;  %v4668_v56 = vld [vmem:[#allocation11 + $0x1448] sm:$0xff]  ;;  %v4670_v61 = vld [vmem:[#allocation11 + $0x1458] sm:$0xff] }
 0x49b   :  { %9342 = vmatprep.subr.bf16.mxu1 %v9341_v42  ;;  %v4607_v42 = vld [vmem:[#allocation11 + $0x1260] sm:$0xff] }
 0x49c   :  { %9884 = vmatpush3.bf16.msra.mxu0 %v9883_v10  ;;  %v9353_v10 = vpack.c.bf16 %v4624_v20, %v4623_v9  ;;  %v9355_v26 = vpack.c.bf16 %v4608_v0, %v4607_v42  ;;  %v4659_v9 = vld [vmem:[#allocation11 + $0x1400] sm:$0xff]  ;;  %v4660_v20 = vld [vmem:[#allocation11 + $0x1408] sm:$0xff]  ;;  %v6644_v42 = vrot.slane %v11582_v58, %v11099_v60 }
 0x49d   :  { %9886 = vmatprep.subr.bf16.mxu0 %v9885_v12  ;;  %v9897_v12 = vpack.c.bf16 %v6608_v7, %v6607_v51  ;;  %v4677_v51 = vld [vmem:[#allocation11 + $0x1490] sm:$0xff]  ;;  %v4678_v7 = vld [vmem:[#allocation11 + $0x1498] sm:$0xff]  ;;  %v4679_v0 = vld [vmem:[#allocation11 + $0x14a0] sm:$0xff] }
 0x49e   :  { %9344 = vmatpush3.bf16.msra.mxu1 %v9343_v30  ;;  %v6609_v30 = vld [vmem:[#allocation11 + $0x23f0] sm:$0xff]  ;;  %v9397_v47 = vpack.c.bf16 %v4678_v7, %v4677_v51  ;;  %v4672_v51 = vld [vmem:[#allocation11 + $0x1468] sm:$0xff] }
 0x49f   :  { %9346 = vmatprep.subr.bf16.mxu1 %v9345_v1 }
 0x4a0   :  { %9888 = vmatpush3.bf16.msra.mxu0 %v9887_v5  ;;  %v6610_v5 = vld [vmem:[#allocation11 + $0x23f8] sm:$0xff] }
 0x4a1   :  { %9890 = vmatprep.subr.bf16.mxu0 %v9889_v22  ;;  %v9899_v22 = vpack.c.bf16 %v6592_v24, %v6591_v45  ;;  %v9901_v25 = vpack.c.bf16 %v6610_v5, %v6609_v30  ;;  %v4680_v45 = vld [vmem:[#allocation11 + $0x14a8] sm:$0xff]  ;;  %v9403_v30 = vpack.c.bf16 %v4664_v18, %v4663_v14  ;;  %v4665_v5 = vld [vmem:[#allocation11 + $0x1430] sm:$0xff]  ;;  %v5027_v18 = vld [vmem:[#allocation11 + $0x1680] sm:$0xff] }
 0x4a2   :  { %9348 = vmatpush3.bf16.msra.mxu1 %v9347_v28  ;;  %v6594_v28 = vld [vmem:[#allocation11 + $0x2378] sm:$0xff]  ;;  %v9401_v24 = vpack.c.bf16 %v4680_v45, %v4679_v0 }
 0x4a3   :  { %9350 = vmatprep.subr.bf16.mxu1 %v9349_v23  ;;  %v4676_v23 = vld [vmem:[#allocation11 + $0x1488] sm:$0xff] }
 0x4a4   :  { %9892 = vmatpush3.bf16.msra.mxu0 %v9891_v53  ;;  %v7477_v57 = vpop.f32.mrb[12].mxu1  ;;  %v4675_v53 = vld [vmem:[#allocation11 + $0x1480] sm:$0xff] }
 0x4a5   :  { %9894 = vmatprep.subr.bf16.mxu0 %v9893_v55  ;;  %v7478_v8 = vpop.f32.mrb[13].mxu1  ;;  %v9903_v55 = vpack.c.bf16 %v6594_v28, %v6593_v54  ;;  %v9393_v31 = vpack.c.bf16 %v4676_v23, %v4675_v53  ;;  %v4685_v54 = vld [vmem:[#allocation11 + $0x14d0] sm:$0xff]  ;;  %v9411_v28 = vpack.c.bf16 %v4668_v56, %v4667_v4  ;;  %v5124_v56 = vcombine.high %v11403_v50, %v11403_v50  ;;  %v5036_v50 = vld [vmem:[#allocation11 + $0x16c8] sm:$0xff] }
 0x4a6   :  { %v8002_v17 = vpop.f32.mrb[156].mxu0  ;;  %v11595_v1 = vadd.f32 %v7478_v8, %v7477_v57  ;;  %9352 = vmatpush3.bf16.msra.mxu1 %v9351_v2  ;;  %v4710_v2 = vcombine.high %v11603_v3, %v11603_v3  ;;  %v4682_v8 = vld [vmem:[#allocation11 + $0x14b8] sm:$0xff]  ;;  %v4669_v23 = vld [vmem:[#allocation11 + $0x1450] sm:$0xff] }
 0x4a7   :  { %v8003_v29 = vpop.f32.mrb[157].mxu0  ;;  %9354 = vmatprep.subr.bf16.mxu1 %v9353_v10  ;;  %v4662_v10 = vld [vmem:[#allocation11 + $0x1418] sm:$0xff]  ;;  %v5013_v4 = vld [vmem:[#allocation11 + $0x1610] sm:$0xff] }
 0x4a8   :  { %v11597_v41 = vadd.f32 %v8003_v29, %v8002_v17  ;;  %9896 = vmatpush3.bf16.msra.mxu0 %v9895_v39  ;;  %v9395_v39 = vpack.c.bf16 %v4660_v20, %v4659_v9  ;;  %v4738_v57 = vrot.slane %v4710_v2, %v11099_v60  ;;  %v4681_v17 = vld [vmem:[#allocation11 + $0x14b0] sm:$0xff]  ;;  %v4666_v29 = vld [vmem:[#allocation11 + $0x1438] sm:$0xff]  ;;  %v4671_v20 = vld [vmem:[#allocation11 + $0x1460] sm:$0xff] }
 0x4a9   :  { %9898 = vmatprep.subr.bf16.mxu0 %v9897_v12  ;;  %v9399_v12 = vpack.c.bf16 %v4662_v10, %v4661_v37  ;;  %v9405_v58 = vpack.c.bf16 %v4682_v8, %v4681_v17  ;;  %v4689_v2 = vld [vmem:[#allocation11 + $0x14f0] sm:$0xff]  ;;  %v9419_v0 = vpack.c.bf16 %v4672_v51, %v4671_v20  ;;  %v5028_v17 = vld [vmem:[#allocation11 + $0x1688] sm:$0xff]  ;;  %v5018_v20 = vld [vmem:[#allocation11 + $0x1638] sm:$0xff] }
 0x4aa   :  { %9356 = vmatpush3.bf16.msra.mxu1 %v9355_v26  ;;  %v4683_v26 = vld [vmem:[#allocation11 + $0x14c0] sm:$0xff] }
 0x4ab   :  { %9358 = vmatprep.subr.bf16.mxu1 %v9357_v49  ;;  %v5035_v51 = vld [vmem:[#allocation11 + $0x16c0] sm:$0xff] }
 0x4ac   :  { %9900 = vmatpush3.bf16.msra.mxu0 %v9899_v22  ;;  %v9407_v22 = vpack.c.bf16 %v4666_v29, %v4665_v5  ;;  %v5012_v5 = vld [vmem:[#allocation11 + $0x1608] sm:$0xff]  ;;  %v5029_v29 = vld [vmem:[#allocation11 + $0x1690] sm:$0xff] }
 0x4ad   :  { %9902 = vmatprep.subr.bf16.mxu0 %v9901_v25  ;;  %v4686_v25 = vld [vmem:[#allocation11 + $0x14d8] sm:$0xff] }
 0x4ae   :  { %9360 = vmatpush3.bf16.msra.mxu1 %v9359_v11  ;;  %v9413_v53 = vpack.c.bf16 %v4686_v25, %v4685_v54  ;;  %v4687_v11 = vld [vmem:[#allocation11 + $0x14e0] sm:$0xff]  ;;  %v5032_v25 = vld [vmem:[#allocation11 + $0x16a8] sm:$0xff] }
 0x4af   :  { %9394 = vmatprep.subr.bf16.mxu1 %v9393_v31  ;;  %v9415_v31 = vpack.c.bf16 %v4670_v61, %v4669_v23  ;;  %v5031_v54 = vld [vmem:[#allocation11 + $0x16a0] sm:$0xff]  ;;  %v5016_v61 = vld [vmem:[#allocation11 + $0x1628] sm:$0xff] }
 0x4b0   :  { %9904 = vmatpush3.bf16.msra.mxu0 %v9903_v55  ;;  %v4688_v55 = vld [vmem:[#allocation11 + $0x14e8] sm:$0xff]  ;;  %v5015_v23 = vld [vmem:[#allocation11 + $0x1620] sm:$0xff] }
 0x4b1   :  { %4812 = vmatmul.mubr.f32.vlgmr.msra.gmra.mrb[26].mxu1 %v11389_v48  ;;  %v4684_v48 = vld [vmem:[#allocation11 + $0x14c8] sm:$0xff]  ;;  %v9417_v9 = vpack.c.bf16 %v4688_v55, %v4687_v11  ;;  %v5033_v11 = vld [vmem:[#allocation11 + $0x16b0] sm:$0xff]  ;;  %v5034_v55 = vld [vmem:[#allocation11 + $0x16b8] sm:$0xff] }
 0x4b2   :  { %9396 = vmatpush3.bf16.msra.mxu1 %v9395_v39  ;;  %4951 = vmatprep.mubr.f32.mxu1 %v4738_v57  ;;  %v9409_v49 = vpack.c.bf16 %v4684_v48, %v4683_v26  ;;  %v4690_v39 = vld [vmem:[#allocation11 + $0x14f8] sm:$0xff] }
 0x4b3   :  { %6872 = vmatmul.mubr.f32.vlgmr.msra.gmra.mrb[170].mxu0 %v6644_v42  ;;  %9398 = vmatprep.subr.bf16.mxu1 %v9397_v47  ;;  %v9421_v57 = vpack.c.bf16 %v4690_v39, %v4689_v2  ;;  %v5030_v26 = vld [vmem:[#allocation11 + $0x1698] sm:$0xff]  ;;  %v9473_v2 = vpack.c.bf16 %v5036_v50, %v5035_v51  ;;  %v5019_v39 = vld [vmem:[#allocation11 + $0x1640] sm:$0xff] }
 0x4b4   :  { %v5382_v51 = vld [vmem:[#allocation11 + $0x1898] sm:$0xff] }
 0x4b6   :  { %9400 = vmatpush3.bf16.msra.mxu1 %v9399_v12  ;;  %v4673_v12 = vld [vmem:[#allocation11 + $0x1470] sm:$0xff] }
 0x4b7   :  { %9402 = vmatprep.subr.bf16.mxu1 %v9401_v24  ;;  %v4674_v24 = vld [vmem:[#allocation11 + $0x1478] sm:$0xff] }
 0x4b8   :  { %v9423_v8 = vpack.c.bf16 %v4674_v24, %v4673_v12  ;;  %v5022_v12 = vld [vmem:[#allocation11 + $0x1658] sm:$0xff]  ;;  %v5039_v24 = vld [vmem:[#allocation11 + $0x16e0] sm:$0xff] }
 0x4ba   :  { %9404 = vmatpush3.bf16.msra.mxu1 %v9403_v30  ;;  %v9457_v30 = vpack.c.bf16 %v5028_v17, %v5027_v18  ;;  %v5040_v18 = vld [vmem:[#allocation11 + $0x16e8] sm:$0xff] }
 0x4bb   :  { %9406 = vmatprep.subr.bf16.mxu1 %v9405_v58  ;;  %v5011_v58 = vld [vmem:[#allocation11 + $0x1600] sm:$0xff] }
 0x4bc   :  { %v9459_v48 = vpack.c.bf16 %v5012_v5, %v5011_v58  ;;  %v5024_v58 = vld [vmem:[#allocation11 + $0x1668] sm:$0xff] }
 0x4be   :  { %9408 = vmatpush3.bf16.msra.mxu1 %v9407_v22  ;;  %v4724_v22 = vrot.slane %v11603_v3, %v11099_v60  ;;  %v9467_v3 = vpack.c.bf16 %v5016_v61, %v5015_v23  ;;  %v5379_v23 = vld [vmem:[#allocation11 + $0x1880] sm:$0xff]  ;;  %v5380_v61 = vld [vmem:[#allocation11 + $0x1888] sm:$0xff] }
 0x4bf   :  { %9410 = vmatprep.subr.bf16.mxu1 %v9409_v49  ;;  %v9461_v49 = vpack.c.bf16 %v5030_v26, %v5029_v29  ;;  %v5041_v29 = vld [vmem:[#allocation11 + $0x16f0] sm:$0xff]  ;;  %v5042_v26 = vld [vmem:[#allocation11 + $0x16f8] sm:$0xff] }
 0x4c2   :  { %9412 = vmatpush3.bf16.msra.mxu1 %v9411_v28 }
 0x4c3   :  { %9414 = vmatprep.subr.bf16.mxu1 %v9413_v53  ;;  %v9465_v53 = vpack.c.bf16 %v5032_v25, %v5031_v54  ;;  %v9485_v54 = vpack.c.bf16 %v5042_v26, %v5041_v29  ;;  %v5025_v25 = vld [vmem:[#allocation11 + $0x1670] sm:$0xff]  ;;  %v5372_v29 = vld [vmem:[#allocation11 + $0x1848] sm:$0xff] }
 0x4c4   :  { %v7512_v7 = vpop.f32.mrb[14].mxu1  ;;  %v5389_v26 = vld [vmem:[#allocation11 + $0x18d0] sm:$0xff] }
 0x4c5   :  { %v7513_v37 = vpop.f32.mrb[15].mxu1 }
 0x4c6   :  { %v8072_v47 = vpop.f32.mrb[158].mxu0  ;;  %v7514_v10 = vadd.f32 %v7513_v37, %v7512_v7  ;;  %9416 = vmatpush3.bf16.msra.mxu1 %v9415_v31  ;;  %v9469_v31 = vpack.c.bf16 %v5034_v55, %v5033_v11  ;;  %v5037_v37 = vld [vmem:[#allocation11 + $0x16d0] sm:$0xff] }
 0x4c7   :  { %v8073_v42 = vpop.f32.mrb[159].mxu0  ;;  %9418 = vmatprep.subr.bf16.mxu1 %v9417_v9  ;;  %v5017_v9 = vld [vmem:[#allocation11 + $0x1630] sm:$0xff] }
 0x4c8   :  { %v11611_v45 = vadd.f32 %v8073_v42, %v8072_v47  ;;  %v11614_v14 = vadd.f32 %v7514_v10, %v11595_v1  ;;  %v5014_v1 = vld [vmem:[#allocation11 + $0x1618] sm:$0xff]  ;;  %v9471_v7 = vpack.c.bf16 %v5018_v20, %v5017_v9  ;;  %v5020_v47 = vld [vmem:[#allocation11 + $0x1648] sm:$0xff]  ;;  %v5381_v20 = vld [vmem:[#allocation11 + $0x1890] sm:$0xff] }
 0x4c9   :  { %v9463_v28 = vpack.c.bf16 %v5014_v1, %v5013_v4  ;;  %v5038_v10 = vld [vmem:[#allocation11 + $0x16d8] sm:$0xff]  ;;  %v9475_v42 = vpack.c.bf16 %v5020_v47, %v5019_v39  ;;  %v5364_v9 = vld [vmem:[#allocation11 + $0x1808] sm:$0xff]  ;;  %v5383_v47 = vld [vmem:[#allocation11 + $0x18a0] sm:$0xff] }
 0x4ca   :  { %9420 = vmatpush3.bf16.msra.mxu1 %v9419_v0  ;;  %v9477_v0 = vpack.c.bf16 %v5038_v10, %v5037_v37  ;;  %v5366_v39 = vld [vmem:[#allocation11 + $0x1818] sm:$0xff] }
 0x4cb   :  { %9422 = vmatprep.subr.bf16.mxu1 %v9421_v57  ;;  %v5021_v57 = vld [vmem:[#allocation11 + $0x1650] sm:$0xff] }
 0x4cc   :  { %v9479_v17 = vpack.c.bf16 %v5022_v12, %v5021_v57  ;;  %v5385_v57 = vld [vmem:[#allocation11 + $0x18b0] sm:$0xff]  ;;  %v5386_v12 = vld [vmem:[#allocation11 + $0x18b8] sm:$0xff] }
 0x4ce   :  { %9424 = vmatpush3.bf16.msra.mxu1 %v9423_v8  ;;  %v9481_v8 = vpack.c.bf16 %v5040_v18, %v5039_v24  ;;  %v5369_v18 = vld [vmem:[#allocation11 + $0x1830] sm:$0xff] }
 0x4cf   :  { %9458 = vmatprep.subr.bf16.mxu1 %v9457_v30  ;;  %v5023_v30 = vld [vmem:[#allocation11 + $0x1660] sm:$0xff] }
 0x4d0   :  { %v9483_v1 = vpack.c.bf16 %v5024_v58, %v5023_v30  ;;  %v5388_v30 = vld [vmem:[#allocation11 + $0x18c8] sm:$0xff] }
 0x4d1   :  { %4952 = vmatmul.mubr.f32.vlgmr.msra.gmra.mrb[28].mxu1 %v4724_v22 }
 0x4d2   :  { %9460 = vmatpush3.bf16.msra.mxu1 %v9459_v48  ;;  %5265 = vmatprep.mubr.f32.mxu1 %v5124_v56 }
 0x4d3   :  { %9462 = vmatprep.subr.bf16.mxu1 %v9461_v49 }
 0x4d6   :  { %9464 = vmatpush3.bf16.msra.mxu1 %v9463_v28  ;;  %v5026_v28 = vld [vmem:[#allocation11 + $0x1678] sm:$0xff] }
 0x4d7   :  { %9466 = vmatprep.subr.bf16.mxu1 %v9465_v53  ;;  %v9487_v55 = vpack.c.bf16 %v5026_v28, %v5025_v25  ;;  %v5392_v25 = vld [vmem:[#allocation11 + $0x18e8] sm:$0xff] }
 0x4da   :  { %9468 = vmatpush3.bf16.msra.mxu1 %v9467_v3  ;;  %v9521_v3 = vpack.c.bf16 %v5380_v61, %v5379_v23  ;;  %v5375_v23 = vld [vmem:[#allocation11 + $0x1860] sm:$0xff]  ;;  %v5376_v61 = vld [vmem:[#allocation11 + $0x1868] sm:$0xff] }
 0x4db   :  { %9470 = vmatprep.subr.bf16.mxu1 %v9469_v31  ;;  %v5363_v31 = vld [vmem:[#allocation11 + $0x1800] sm:$0xff] }
 0x4dc   :  { %v9523_v50 = vpack.c.bf16 %v5364_v9, %v5363_v31  ;;  %v5394_v31 = vld [vmem:[#allocation11 + $0x18f8] sm:$0xff] }
 0x4de   :  { %9472 = vmatpush3.bf16.msra.mxu1 %v9471_v7  ;;  %v5123_v7 = vcombine.high %v11420_v19, %v11420_v19  ;;  %v9533_v19 = vpack.c.bf16 %v5386_v12, %v5385_v57 }
 0x4df   :  { %9474 = vmatprep.subr.bf16.mxu1 %v9473_v2  ;;  %v5365_v2 = vld [vmem:[#allocation11 + $0x1810] sm:$0xff] }
 0x4e0   :  { %v9527_v37 = vpack.c.bf16 %v5366_v39, %v5365_v2  ;;  %v5377_v39 = vld [vmem:[#allocation11 + $0x1870] sm:$0xff] }
 0x4e2   :  { %9476 = vmatpush3.bf16.msra.mxu1 %v9475_v42  ;;  %v5367_v42 = vld [vmem:[#allocation11 + $0x1820] sm:$0xff] }
 0x4e3   :  { %9478 = vmatprep.subr.bf16.mxu1 %v9477_v0  ;;  %v5368_v0 = vld [vmem:[#allocation11 + $0x1828] sm:$0xff] }
 0x4e4   :  { %v7547_v5 = vpop.f32.mrb[16].mxu1  ;;  %v9531_v24 = vpack.c.bf16 %v5368_v0, %v5367_v42  ;;  %v11726_v42 = vcombine.high %v11291_v13, %v11294_v59 }
 0x4e5   :  { %v7548_v22 = vpop.f32.mrb[17].mxu1 }
 0x4e6   :  { %v8142_v48 = vpop.f32.mrb[160].mxu0  ;;  %v7549_v49 = vadd.f32 %v7548_v22, %v7547_v5  ;;  %9480 = vmatpush3.bf16.msra.mxu1 %v9479_v17  ;;  %v5370_v17 = vld [vmem:[#allocation11 + $0x1838] sm:$0xff]  ;;  %v11636_v0 = vrot.slane %v11726_v42, %v11099_v60 }
 0x4e7   :  { %v8143_v4 = vpop.f32.mrb[161].mxu0  ;;  %9482 = vmatprep.subr.bf16.mxu1 %v9481_v8  ;;  %v5387_v8 = vld [vmem:[#allocation11 + $0x18c0] sm:$0xff]  ;;  %v9535_v58 = vpack.c.bf16 %v5370_v17, %v5369_v18  ;;  %v5428_v18 = vld [vmem:[#allocation11 + $0x1a08] sm:$0xff] }
 0x4e8   :  { %v11620_v56 = vadd.f32 %v8143_v4, %v8142_v48  ;;  %v3418_v53 = vadd.f32 %v7549_v49, %v11614_v14  ;;  %v9525_v14 = vpack.c.bf16 %v5382_v51, %v5381_v20  ;;  %v9537_v5 = vpack.c.bf16 %v5388_v30, %v5387_v8  ;;  %v5390_v48 = vld [vmem:[#allocation11 + $0x18d8] sm:$0xff]  ;;  %v5373_v4 = vld [vmem:[#allocation11 + $0x1850] sm:$0xff] }
 0x4e9   :  { %v9541_v49 = vpack.c.bf16 %v5390_v48, %v5389_v26  ;;  %v5478_v17 = vcombine.high %v11636_v0, %v11636_v0  ;;  %v5446_v8 = vld [vmem:[#allocation11 + $0x1a98] sm:$0xff] }
 0x4ea   :  { %v11624_v11 = vadd.f32 %v3418_v53, %v11579_v6  ;;  %9484 = vmatpush3.bf16.msra.mxu1 %v9483_v1  ;;  %v5384_v6 = vld [vmem:[#allocation11 + $0x18a8] sm:$0xff]  ;;  %v5374_v1 = vld [vmem:[#allocation11 + $0x1858] sm:$0xff] }
 0x4eb   :  { %9486 = vmatprep.subr.bf16.mxu1 %v9485_v54  ;;  %v9529_v10 = vpack.c.bf16 %v5384_v6, %v5383_v47  ;;  %v5391_v54 = vld [vmem:[#allocation11 + $0x18e0] sm:$0xff]  ;;  %v9543_v28 = vpack.c.bf16 %v5374_v1, %v5373_v4  ;;  %v5378_v47 = vld [vmem:[#allocation11 + $0x1878] sm:$0xff] }
 0x4ec   :  { %v9545_v53 = vpack.c.bf16 %v5392_v25, %v5391_v54  ;;  %v9551_v12 = vpack.c.bf16 %v5378_v47, %v5377_v39  ;;  %v5450_v4 = vld [vmem:[#allocation11 + $0x1ab8] sm:$0xff]  ;;  %v5433_v25 = vld [vmem:[#allocation11 + $0x1a30] sm:$0xff]  ;;  %v5456_v39 = vld [vmem:[#allocation11 + $0x1ae8] sm:$0xff] }
 0x4ee   :  { %9488 = vmatpush3.bf16.msra.mxu1 %v9487_v55 }
 0x4ef   :  { %9522 = vmatprep.subr.bf16.mxu1 %v9521_v3  ;;  %v5393_v3 = vld [vmem:[#allocation11 + $0x18f0] sm:$0xff] }
 0x4f0   :  { %v9549_v2 = vpack.c.bf16 %v5394_v31, %v5393_v3  ;;  %v5436_v3 = vld [vmem:[#allocation11 + $0x1a48] sm:$0xff]  ;;  %v5453_v31 = vld [vmem:[#allocation11 + $0x1ad0] sm:$0xff] }
 0x4f1   :  { %5266 = vmatmul.mubr.f32.vlgmr.msra.gmra.mrb[30].mxu1 %v5123_v7  ;;  %v9547_v7 = vpack.c.bf16 %v5376_v61, %v5375_v23  ;;  %v5452_v23 = vld [vmem:[#allocation11 + $0x1ac8] sm:$0xff] }
 0x4f2   :  { %9524 = vmatpush3.bf16.msra.mxu1 %v9523_v50  ;;  %5579 = vmatprep.mubr.f32.mxu1 %v11448_v52  ;;  %v5371_v52 = vld [vmem:[#allocation11 + $0x1840] sm:$0xff] }
 0x4f3   :  { %9526 = vmatprep.subr.bf16.mxu1 %v9525_v14  ;;  %v9539_v22 = vpack.c.bf16 %v5372_v29, %v5371_v52  ;;  %v5447_v52 = vld [vmem:[#allocation11 + $0x1aa0] sm:$0xff]  ;;  %v5448_v29 = vld [vmem:[#allocation11 + $0x1aa8] sm:$0xff] }
 0x4f4   :  { %v9593_v48 = vpack.c.bf16 %v5448_v29, %v5447_v52  ;;  %v5796_v52 = vld [vmem:[#allocation11 + $0x1c88] sm:$0xff] }
 0x4f6   :  { %9528 = vmatpush3.bf16.msra.mxu1 %v9527_v37  ;;  %v5443_v37 = vld [vmem:[#allocation11 + $0x1a80] sm:$0xff] }
 0x4f7   :  { %9530 = vmatprep.subr.bf16.mxu1 %v9529_v10  ;;  %v5444_v10 = vld [vmem:[#allocation11 + $0x1a88] sm:$0xff] }
 0x4fa   :  { %9532 = vmatpush3.bf16.msra.mxu1 %v9531_v24  ;;  %v9585_v24 = vpack.c.bf16 %v5444_v10, %v5443_v37  ;;  %v5439_v37 = vld [vmem:[#allocation11 + $0x1a60] sm:$0xff]  ;;  %v5440_v10 = vld [vmem:[#allocation11 + $0x1a68] sm:$0xff] }
 0x4fb   :  { %9534 = vmatprep.subr.bf16.mxu1 %v9533_v19  ;;  %v5427_v19 = vld [vmem:[#allocation11 + $0x1a00] sm:$0xff] }
 0x4fc   :  { %v9587_v13 = vpack.c.bf16 %v5428_v18, %v5427_v19 }
 0x4fe   :  { %9536 = vmatpush3.bf16.msra.mxu1 %v9535_v58  ;;  %v5429_v58 = vld [vmem:[#allocation11 + $0x1a10] sm:$0xff] }
 0x4ff   :  { %9538 = vmatprep.subr.bf16.mxu1 %v9537_v5  ;;  %v5506_v5 = vrot.slane %v5478_v17, %v11099_v60 }
 0x502   :  { %9540 = vmatpush3.bf16.msra.mxu1 %v9539_v22  ;;  %v5431_v22 = vld [vmem:[#allocation11 + $0x1a20] sm:$0xff] }
 0x503   :  { %9542 = vmatprep.subr.bf16.mxu1 %v9541_v49  ;;  %v5449_v49 = vld [vmem:[#allocation11 + $0x1ab0] sm:$0xff] }
 0x504   :  { %v7617_v55 = vpop.f32.mrb[18].mxu1  ;;  %v9597_v54 = vpack.c.bf16 %v5450_v4, %v5449_v49  ;;  %v5798_v49 = vld [vmem:[#allocation11 + $0x1c98] sm:$0xff] }
 0x505   :  { %v7618_v20 = vpop.f32.mrb[19].mxu1 }
 0x506   :  { %v8212_v9 = vpop.f32.mrb[162].mxu0  ;;  %v7619_v51 = vadd.f32 %v7618_v20, %v7617_v55  ;;  %9544 = vmatpush3.bf16.msra.mxu1 %v9543_v28  ;;  %v5434_v28 = vld [vmem:[#allocation11 + $0x1a38] sm:$0xff]  ;;  %v5435_v55 = vld [vmem:[#allocation11 + $0x1a40] sm:$0xff] }
 0x507   :  { %v8213_v50 = vpop.f32.mrb[163].mxu0  ;;  %9546 = vmatprep.subr.bf16.mxu1 %v9545_v53  ;;  %v5451_v53 = vld [vmem:[#allocation11 + $0x1ac0] sm:$0xff]  ;;  %v9599_v61 = vpack.c.bf16 %v5434_v28, %v5433_v25  ;;  %v9603_v20 = vpack.c.bf16 %v5436_v3, %v5435_v55  ;;  %v5781_v25 = vld [vmem:[#allocation11 + $0x1c10] sm:$0xff]  ;;  %v5892_v28 = vcombine.high %v11488_v34, %v11488_v34  ;;  %v5784_v3 = vld [vmem:[#allocation11 + $0x1c28] sm:$0xff] }
 0x508   :  { %v11629_v14 = vadd.f32 %v8213_v50, %v8212_v9  ;;  %v3732_v6 = vadd.f32 %v7619_v51, %v11435_v15  ;;  %v5445_v15 = vld [vmem:[#allocation11 + $0x1a90] sm:$0xff]  ;;  %v5454_v9 = vld [vmem:[#allocation11 + $0x1ad8] sm:$0xff]  ;;  %v5783_v55 = vld [vmem:[#allocation11 + $0x1c20] sm:$0xff] }
 0x509   :  { %v9589_v59 = vpack.c.bf16 %v5446_v8, %v5445_v15  ;;  %v9605_v51 = vpack.c.bf16 %v5454_v9, %v5453_v31  ;;  %v5437_v50 = vld [vmem:[#allocation11 + $0x1a50] sm:$0xff]  ;;  %v9611_v15 = vpack.c.bf16 %v5440_v10, %v5439_v37  ;;  %v5802_v9 = vld [vmem:[#allocation11 + $0x1cb8] sm:$0xff]  ;;  %v5804_v34 = vld [vmem:[#allocation11 + $0x1cc8] sm:$0xff] }
 0x50a   :  { %v3802_v57 = vadd.f32 %v11467_v44, %v3732_v6  ;;  %9548 = vmatpush3.bf16.msra.mxu1 %v9547_v7  ;;  %v5430_v44 = vld [vmem:[#allocation11 + $0x1a18] sm:$0xff]  ;;  %v5801_v31 = vld [vmem:[#allocation11 + $0x1cb0] sm:$0xff] }
 0x50b   :  { %9550 = vmatprep.subr.bf16.mxu1 %v9549_v2  ;;  %v9591_v26 = vpack.c.bf16 %v5430_v44, %v5429_v58  ;;  %v5438_v7 = vld [vmem:[#allocation11 + $0x1a58] sm:$0xff]  ;;  %v5455_v2 = vld [vmem:[#allocation11 + $0x1ae0] sm:$0xff]  ;;  %v5805_v37 = vld [vmem:[#allocation11 + $0x1cd0] sm:$0xff] }
 0x50c   :  { %v11642_v30 = vadd.f32 %v3802_v57, %v11624_v11  ;;  %v5432_v11 = vld [vmem:[#allocation11 + $0x1a28] sm:$0xff]  ;;  %v9607_v47 = vpack.c.bf16 %v5438_v7, %v5437_v50  ;;  %v9609_v6 = vpack.c.bf16 %v5456_v39, %v5455_v2  ;;  %v5457_v57 = vld [vmem:[#allocation11 + $0x1af0] sm:$0xff]  ;;  %v5442_v58 = vld [vmem:[#allocation11 + $0x1a78] sm:$0xff] }
 0x50d   :  { %v9595_v1 = vpack.c.bf16 %v5432_v11, %v5431_v22  ;;  %v5780_v22 = vld [vmem:[#allocation11 + $0x1c08] sm:$0xff]  ;;  %v5797_v11 = vld [vmem:[#allocation11 + $0x1c90] sm:$0xff]  ;;  %v5786_v50 = vld [vmem:[#allocation11 + $0x1c38] sm:$0xff] }
 0x50e   :  { %9552 = vmatpush3.bf16.msra.mxu1 %v9551_v12  ;;  %v5458_v12 = vld [vmem:[#allocation11 + $0x1af8] sm:$0xff]  ;;  %v5803_v7 = vld [vmem:[#allocation11 + $0x1cc0] sm:$0xff] }
 0x50f   :  { %9586 = vmatprep.subr.bf16.mxu1 %v9585_v24  ;;  %v9665_v39 = vpack.c.bf16 %v5804_v34, %v5803_v7  ;;  %v5806_v10 = vld [vmem:[#allocation11 + $0x1cd8] sm:$0xff] }
 0x511   :  { %5580 = vmatmul.mubr.f32.vlgmr.msra.gmra.mrb[32].mxu1 %v11477_v27  ;;  %v9601_v27 = vpack.c.bf16 %v5452_v23, %v5451_v53  ;;  %v5799_v53 = vld [vmem:[#allocation11 + $0x1ca0] sm:$0xff]  ;;  %v5800_v23 = vld [vmem:[#allocation11 + $0x1ca8] sm:$0xff] }
 0x512   :  { %9588 = vmatpush3.bf16.msra.mxu1 %v9587_v13  ;;  %5719 = vmatprep.mubr.f32.mxu1 %v5506_v5  ;;  %v9613_v13 = vpack.c.bf16 %v5458_v12, %v5457_v57  ;;  %v5795_v5 = vld [vmem:[#allocation11 + $0x1c80] sm:$0xff]  ;;  %v9669_v57 = vpack.c.bf16 %v5806_v10, %v5805_v37  ;;  %v5789_v12 = vld [vmem:[#allocation11 + $0x1c50] sm:$0xff] }
 0x513   :  { %9590 = vmatprep.subr.bf16.mxu1 %v9589_v59  ;;  %v5441_v59 = vld [vmem:[#allocation11 + $0x1a70] sm:$0xff] }
 0x514   :  { %v9615_v29 = vpack.c.bf16 %v5442_v58, %v5441_v59  ;;  %v5792_v59 = vld [vmem:[#allocation11 + $0x1c68] sm:$0xff]  ;;  %v6137_v10 = vld [vmem:[#allocation11 + $0x1e30] sm:$0xff] }
 0x516   :  { %9592 = vmatpush3.bf16.msra.mxu1 %v9591_v26  ;;  %v9649_v26 = vpack.c.bf16 %v5796_v52, %v5795_v5  ;;  %v5809_v5 = vld [vmem:[#allocation11 + $0x1cf0] sm:$0xff]  ;;  %v5810_v52 = vld [vmem:[#allocation11 + $0x1cf8] sm:$0xff] }
 0x517   :  { %9594 = vmatprep.subr.bf16.mxu1 %v9593_v48  ;;  %v5779_v48 = vld [vmem:[#allocation11 + $0x1c00] sm:$0xff] }
 0x518   :  { %v9651_v4 = vpack.c.bf16 %v5780_v22, %v5779_v48 }
 0x51a   :  { %9596 = vmatpush3.bf16.msra.mxu1 %v9595_v1  ;;  %v5492_v1 = vrot.slane %v11636_v0, %v11099_v60  ;;  %v9659_v0 = vpack.c.bf16 %v5784_v3, %v5783_v55  ;;  %v6132_v55 = vld [vmem:[#allocation11 + $0x1e08] sm:$0xff]  ;;  %v6149_v3 = vld [vmem:[#allocation11 + $0x1e90] sm:$0xff] }
 0x51b   :  { %9598 = vmatprep.subr.bf16.mxu1 %v9597_v54  ;;  %v9653_v54 = vpack.c.bf16 %v5798_v49, %v5797_v11 }
 0x51e   :  { %9600 = vmatpush3.bf16.msra.mxu1 %v9599_v61 }
 0x51f   :  { %9602 = vmatprep.subr.bf16.mxu1 %v9601_v27  ;;  %v9657_v27 = vpack.c.bf16 %v5800_v23, %v5799_v53 }
 0x522   :  { %9604 = vmatpush3.bf16.msra.mxu1 %v9603_v20  ;;  %v9661_v20 = vpack.c.bf16 %v5802_v9, %v5801_v31  ;;  %v6150_v31 = vld [vmem:[#allocation11 + $0x1e98] sm:$0xff] }
 0x523   :  { %9606 = vmatprep.subr.bf16.mxu1 %v9605_v51  ;;  %v5785_v51 = vld [vmem:[#allocation11 + $0x1c30] sm:$0xff] }
 0x524   :  { %v7687_v42 = vpop.f32.mrb[20].mxu1  ;;  %v9663_v2 = vpack.c.bf16 %v5786_v50, %v5785_v51  ;;  %v6134_v51 = vld [vmem:[#allocation11 + $0x1e18] sm:$0xff]  ;;  %v6151_v50 = vld [vmem:[#allocation11 + $0x1ea0] sm:$0xff] }
 0x525   :  { %v7688_v19 = vpop.f32.mrb[21].mxu1 }
 0x526   :  { %v8282_v24 = vpop.f32.mrb[164].mxu0  ;;  %v7689_v18 = vadd.f32 %v7688_v19, %v7687_v42  ;;  %9608 = vmatpush3.bf16.msra.mxu1 %v9607_v47  ;;  %v5787_v47 = vld [vmem:[#allocation11 + $0x1c40] sm:$0xff] }
 0x527   :  { %v8283_v17 = vpop.f32.mrb[165].mxu0  ;;  %9610 = vmatprep.subr.bf16.mxu1 %v9609_v6  ;;  %v5788_v6 = vld [vmem:[#allocation11 + $0x1c48] sm:$0xff]  ;;  %v5807_v19 = vld [vmem:[#allocation11 + $0x1ce0] sm:$0xff] }
 0x528   :  { %v11646_v8 = vadd.f32 %v8283_v17, %v8282_v24  ;;  %v11649_v44 = vadd.f32 %v11493_v32, %v7689_v18  ;;  %v5782_v32 = vld [vmem:[#allocation11 + $0x1c18] sm:$0xff]  ;;  %v9667_v42 = vpack.c.bf16 %v5788_v6, %v5787_v47  ;;  %v5808_v18 = vld [vmem:[#allocation11 + $0x1ce8] sm:$0xff]  ;;  %v6153_v47 = vld [vmem:[#allocation11 + $0x1eb0] sm:$0xff] }
 0x529   :  { %v9655_v61 = vpack.c.bf16 %v5782_v32, %v5781_v25  ;;  %v5790_v24 = vld [vmem:[#allocation11 + $0x1c58] sm:$0xff]  ;;  %v6147_v32 = vld [vmem:[#allocation11 + $0x1e80] sm:$0xff] }
 0x52a   :  { %9612 = vmatpush3.bf16.msra.mxu1 %v9611_v15  ;;  %v9671_v17 = vpack.c.bf16 %v5790_v24, %v5789_v12  ;;  %v9673_v15 = vpack.c.bf16 %v5808_v18, %v5807_v19  ;;  %v6154_v6 = vld [vmem:[#allocation11 + $0x1eb8] sm:$0xff]  ;;  %v6156_v12 = vld [vmem:[#allocation11 + $0x1ec8] sm:$0xff] }
 0x52b   :  { %9614 = vmatprep.subr.bf16.mxu1 %v9613_v13  ;;  %v5791_v13 = vld [vmem:[#allocation11 + $0x1c60] sm:$0xff]  ;;  %v6140_v18 = vld [vmem:[#allocation11 + $0x1e48] sm:$0xff] }
 0x52c   :  { %v9675_v11 = vpack.c.bf16 %v5792_v59, %v5791_v13 }
 0x52e   :  { %9616 = vmatpush3.bf16.msra.mxu1 %v9615_v29 }
 0x52f   :  { %9650 = vmatprep.subr.bf16.mxu1 %v9649_v26 }
 0x531   :  { %5720 = vmatmul.mubr.f32.vlgmr.msra.gmra.mrb[34].mxu1 %v5492_v1  ;;  %v5793_v1 = vld [vmem:[#allocation11 + $0x1c70] sm:$0xff] }
 0x532   :  { %9652 = vmatpush3.bf16.msra.mxu1 %v9651_v4  ;;  %6033 = vmatprep.mubr.f32.mxu1 %v5892_v28  ;;  %v9677_v4 = vpack.c.bf16 %v5810_v52, %v5809_v5  ;;  %v6148_v28 = vld [vmem:[#allocation11 + $0x1e88] sm:$0xff]  ;;  %v6142_v5 = vld [vmem:[#allocation11 + $0x1e58] sm:$0xff]  ;;  %v6159_v52 = vld [vmem:[#allocation11 + $0x1ee0] sm:$0xff] }
 0x533   :  { %9654 = vmatprep.subr.bf16.mxu1 %v9653_v54  ;;  %v5794_v54 = vld [vmem:[#allocation11 + $0x1c78] sm:$0xff] }
 0x534   :  { %v9679_v23 = vpack.c.bf16 %v5794_v54, %v5793_v1  ;;  %v6161_v1 = vld [vmem:[#allocation11 + $0x1ef0] sm:$0xff]  ;;  %v6162_v54 = vld [vmem:[#allocation11 + $0x1ef8] sm:$0xff] }
 0x536   :  { %9656 = vmatpush3.bf16.msra.mxu1 %v9655_v61  ;;  %v9713_v61 = vpack.c.bf16 %v6148_v28, %v6147_v32 }
 0x537   :  { %9658 = vmatprep.subr.bf16.mxu1 %v9657_v27  ;;  %v6131_v27 = vld [vmem:[#allocation11 + $0x1e00] sm:$0xff] }
 0x538   :  { %v9715_v9 = vpack.c.bf16 %v6132_v55, %v6131_v27  ;;  %v9741_v55 = vpack.c.bf16 %v6162_v54, %v6161_v1  ;;  %v6224_v1 = vld [vmem:[#allocation11 + $0x20e8] sm:$0xff] }
 0x53a   :  { %9660 = vmatpush3.bf16.msra.mxu1 %v9659_v0  ;;  %v5891_v0 = vcombine.high %v11507_v21, %v11507_v21  ;;  %v9725_v21 = vpack.c.bf16 %v6154_v6, %v6153_v47 }
 0x53b   :  { %9662 = vmatprep.subr.bf16.mxu1 %v9661_v20  ;;  %v6133_v20 = vld [vmem:[#allocation11 + $0x1e10] sm:$0xff] }
 0x53c   :  { %v9719_v7 = vpack.c.bf16 %v6134_v51, %v6133_v20  ;;  %v11671_v20 = vrot.slane %v6230_v36, %v11099_v60  ;;  %v6197_v36 = vld [vmem:[#allocation11 + $0x2010] sm:$0xff] }
 0x53e   :  { %9664 = vmatpush3.bf16.msra.mxu1 %v9663_v2  ;;  %v6135_v2 = vld [vmem:[#allocation11 + $0x1e20] sm:$0xff] }
 0x53f   :  { %9666 = vmatprep.subr.bf16.mxu1 %v9665_v39  ;;  %v6136_v39 = vld [vmem:[#allocation11 + $0x1e28] sm:$0xff] }
 0x540   :  { %v9723_v37 = vpack.c.bf16 %v6136_v39, %v6135_v2  ;;  %v6246_v2 = vcombine.high %v11671_v20, %v11671_v20  ;;  %v6214_v39 = vld [vmem:[#allocation11 + $0x2098] sm:$0xff] }
 0x542   :  { %9668 = vmatpush3.bf16.msra.mxu1 %v9667_v42  ;;  %v6138_v42 = vld [vmem:[#allocation11 + $0x1e38] sm:$0xff]  ;;  %v6274_v6 = vrot.slane %v6246_v2, %v11099_v60  ;;  %v6563_v2 = vld [vmem:[#allocation11 + $0x2280] sm:$0xff] }
 0x543   :  { %9670 = vmatprep.subr.bf16.mxu1 %v9669_v57  ;;  %v6155_v57 = vld [vmem:[#allocation11 + $0x1ec0] sm:$0xff]  ;;  %v9727_v24 = vpack.c.bf16 %v6138_v42, %v6137_v10 }
 0x544   :  { %v7757_v58 = vpop.f32.mrb[22].mxu1  ;;  %v9729_v19 = vpack.c.bf16 %v6156_v12, %v6155_v57  ;;  %v6199_v57 = vld [vmem:[#allocation11 + $0x2020] sm:$0xff]  ;;  %v6217_v12 = vld [vmem:[#allocation11 + $0x20b0] sm:$0xff] }
 0x545   :  { %v7758_v26 = vpop.f32.mrb[23].mxu1 }
 0x546   :  { %v8352_v29 = vpop.f32.mrb[166].mxu0  ;;  %v7759_v48 = vadd.f32 %v7758_v26, %v7757_v58  ;;  %9672 = vmatpush3.bf16.msra.mxu1 %v9671_v17  ;;  %v6157_v17 = vld [vmem:[#allocation11 + $0x1ed0] sm:$0xff] }
 0x547   :  { %v8353_v22 = vpop.f32.mrb[167].mxu0  ;;  %9674 = vmatprep.subr.bf16.mxu1 %v9673_v15  ;;  %v6158_v15 = vld [vmem:[#allocation11 + $0x1ed8] sm:$0xff]  ;;  %v6141_v58 = vld [vmem:[#allocation11 + $0x1e50] sm:$0xff] }
 0x548   :  { %v11655_v49 = vadd.f32 %v8353_v22, %v8352_v29  ;;  %v4186_v25 = vadd.f32 %v7759_v48, %v11649_v44  ;;  %v9717_v44 = vpack.c.bf16 %v6150_v31, %v6149_v3  ;;  %v9733_v59 = vpack.c.bf16 %v6158_v15, %v6157_v17  ;;  %v6160_v29 = vld [vmem:[#allocation11 + $0x1ee8] sm:$0xff]  ;;  %v6143_v22 = vld [vmem:[#allocation11 + $0x1e60] sm:$0xff]  ;;  %v6145_v3 = vld [vmem:[#allocation11 + $0x1e70] sm:$0xff] }
 0x549   :  { %v9735_v26 = vpack.c.bf16 %v6142_v5, %v6141_v58  ;;  %v9737_v48 = vpack.c.bf16 %v6160_v29, %v6159_v52  ;;  %v6146_v31 = vld [vmem:[#allocation11 + $0x1e78] sm:$0xff]  ;;  %v6219_v15 = vld [vmem:[#allocation11 + $0x20c0] sm:$0xff]  ;;  %v6204_v5 = vld [vmem:[#allocation11 + $0x2048] sm:$0xff] }
 0x54a   :  { %v11659_v53 = vadd.f32 %v4186_v25, %v11642_v30  ;;  %9676 = vmatpush3.bf16.msra.mxu1 %v9675_v11  ;;  %v6152_v30 = vld [vmem:[#allocation11 + $0x1ea8] sm:$0xff]  ;;  %v6202_v17 = vld [vmem:[#allocation11 + $0x2038] sm:$0xff]  ;;  %v6203_v58 = vld [vmem:[#allocation11 + $0x2040] sm:$0xff] }
 0x54b   :  { %9678 = vmatprep.subr.bf16.mxu1 %v9677_v4  ;;  %v9721_v34 = vpack.c.bf16 %v6152_v30, %v6151_v50  ;;  %v6144_v11 = vld [vmem:[#allocation11 + $0x1e68] sm:$0xff]  ;;  %v9743_v50 = vpack.c.bf16 %v6146_v31, %v6145_v3  ;;  %v6221_v52 = vld [vmem:[#allocation11 + $0x20d0] sm:$0xff]  ;;  %v6222_v29 = vld [vmem:[#allocation11 + $0x20d8] sm:$0xff] }
 0x54e   :  { %9680 = vmatpush3.bf16.msra.mxu1 %v9679_v23 }
 0x54f   :  { %9714 = vmatprep.subr.bf16.mxu1 %v9713_v61  ;;  %v9739_v61 = vpack.c.bf16 %v6144_v11, %v6143_v22  ;;  %v6205_v22 = vld [vmem:[#allocation11 + $0x2050] sm:$0xff]  ;;  %v6206_v11 = vld [vmem:[#allocation11 + $0x2058] sm:$0xff] }
 0x550   :  { %v9799_v54 = vpack.c.bf16 %v6206_v11, %v6205_v22 }
 0x551   :  { %6034 = vmatmul.mubr.f32.vlgmr.msra.gmra.mrb[36].mxu1 %v5891_v0  ;;  %v6211_v0 = vld [vmem:[#allocation11 + $0x2080] sm:$0xff] }
 0x552   :  { %9716 = vmatpush3.bf16.msra.mxu1 %v9715_v9  ;;  %6347 = vmatprep.mubr.f32.mxu1 %v11534_v33  ;;  %v6139_v33 = vld [vmem:[#allocation11 + $0x1e40] sm:$0xff] }
 0x553   :  { %9718 = vmatprep.subr.bf16.mxu1 %v9717_v44  ;;  %v9731_v13 = vpack.c.bf16 %v6140_v18, %v6139_v33  ;;  %v6212_v44 = vld [vmem:[#allocation11 + $0x2088] sm:$0xff]  ;;  %v6201_v18 = vld [vmem:[#allocation11 + $0x2030] sm:$0xff] }
 0x554   :  { %v9777_v30 = vpack.c.bf16 %v6212_v44, %v6211_v0 }
 0x556   :  { %9720 = vmatpush3.bf16.msra.mxu1 %v9719_v7  ;;  %v6195_v7 = vld [vmem:[#allocation11 + $0x2000] sm:$0xff] }
 0x557   :  { %9722 = vmatprep.subr.bf16.mxu1 %v9721_v34  ;;  %v6196_v34 = vld [vmem:[#allocation11 + $0x2008] sm:$0xff] }
 0x558   :  { %v9779_v46 = vpack.c.bf16 %v6196_v34, %v6195_v7  ;;  %v6210_v7 = vld [vmem:[#allocation11 + $0x2078] sm:$0xff] }
 0x55a   :  { %9724 = vmatpush3.bf16.msra.mxu1 %v9723_v37  ;;  %v6215_v37 = vld [vmem:[#allocation11 + $0x20a0] sm:$0xff] }
 0x55b   :  { %9726 = vmatprep.subr.bf16.mxu1 %v9725_v21  ;;  %v6216_v21 = vld [vmem:[#allocation11 + $0x20a8] sm:$0xff] }
 0x55c   :  { %v9785_v42 = vpack.c.bf16 %v6216_v21, %v6215_v37  ;;  %v6260_v21 = vrot.slane %v11671_v20, %v11099_v60 }
 0x55e   :  { %9728 = vmatpush3.bf16.msra.mxu1 %v9727_v24  ;;  %v6218_v24 = vld [vmem:[#allocation11 + $0x20b8] sm:$0xff] }
 0x55f   :  { %9730 = vmatprep.subr.bf16.mxu1 %v9729_v19  ;;  %v9789_v33 = vpack.c.bf16 %v6218_v24, %v6217_v12  ;;  %v6568_v12 = vld [vmem:[#allocation11 + $0x22a8] sm:$0xff] }
 0x562   :  { %9732 = vmatpush3.bf16.msra.mxu1 %v9731_v13  ;;  %v6220_v13 = vld [vmem:[#allocation11 + $0x20c8] sm:$0xff] }
 0x563   :  { %9734 = vmatprep.subr.bf16.mxu1 %v9733_v59  ;;  %v9791_v59 = vpack.c.bf16 %v6202_v17, %v6201_v18  ;;  %v6552_v18 = vld [vmem:[#allocation11 + $0x2228] sm:$0xff]  ;;  %v6569_v17 = vld [vmem:[#allocation11 + $0x22b0] sm:$0xff] }
 0x564   :  { %v7827_v4 = vpop.f32.mrb[24].mxu1 }
 0x565   :  { %v7828_v32 = vpop.f32.mrb[25].mxu1 }
 0x566   :  { %v8422_v25 = vpop.f32.mrb[168].mxu0  ;;  %v7829_v28 = vadd.f32 %v7828_v32, %v7827_v4  ;;  %9736 = vmatpush3.bf16.msra.mxu1 %v9735_v26  ;;  %v9795_v26 = vpack.c.bf16 %v6204_v5, %v6203_v58  ;;  %v6223_v4 = vld [vmem:[#allocation11 + $0x20e0] sm:$0xff] }
 0x567   :  { %v8423_v23 = vpop.f32.mrb[169].mxu0  ;;  %9738 = vmatprep.subr.bf16.mxu1 %v9737_v48  ;;  %v9797_v48 = vpack.c.bf16 %v6222_v29, %v6221_v52  ;;  %v6207_v32 = vld [vmem:[#allocation11 + $0x2060] sm:$0xff]  ;;  %v6556_v29 = vld [vmem:[#allocation11 + $0x2248] sm:$0xff] }
 0x568   :  { %v11664_v27 = vadd.f32 %v8423_v23, %v8422_v25  ;;  %v4500_v9 = vadd.f32 %v7829_v28, %v11518_v63  ;;  %v6213_v63 = vld [vmem:[#allocation11 + $0x2090] sm:$0xff]  ;;  %v9801_v25 = vpack.c.bf16 %v6224_v1, %v6223_v4  ;;  %v6208_v28 = vld [vmem:[#allocation11 + $0x2068] sm:$0xff]  ;;  %v6555_v52 = vld [vmem:[#allocation11 + $0x2240] sm:$0xff] }
 0x569   :  { %v9781_v35 = vpack.c.bf16 %v6214_v39, %v6213_v63  ;;  %v9803_v44 = vpack.c.bf16 %v6208_v28, %v6207_v32  ;;  %v6564_v63 = vld [vmem:[#allocation11 + $0x2288] sm:$0xff]  ;;  %v9859_v22 = vpack.c.bf16 %v6556_v29, %v6555_v52  ;;  %v6557_v4 = vld [vmem:[#allocation11 + $0x2250] sm:$0xff]  ;;  %v6558_v1 = vld [vmem:[#allocation11 + $0x2258] sm:$0xff] }
 0x56a   :  { %v4570_v51 = vadd.f32 %v11550_v43, %v4500_v9  ;;  %9740 = vmatpush3.bf16.msra.mxu1 %v9739_v61  ;;  %v6198_v43 = vld [vmem:[#allocation11 + $0x2018] sm:$0xff]  ;;  %v6225_v61 = vld [vmem:[#allocation11 + $0x20f0] sm:$0xff]  ;;  %v9863_v32 = vpack.c.bf16 %v6558_v1, %v6557_v4  ;;  %v7080_v1 = vld [vmem:[#allocation4] ss:$0 sm:$0xff] }
 0x56b   :  { %9742 = vmatprep.subr.bf16.mxu1 %v9741_v55  ;;  %v9783_v10 = vpack.c.bf16 %v6198_v43, %v6197_v36  ;;  %v6226_v55 = vld [vmem:[#allocation11 + $0x20f8] sm:$0xff]  ;;  %v6548_v36 = vld [vmem:[#allocation11 + $0x2208] sm:$0xff]  ;;  %v6565_v43 = vld [vmem:[#allocation11 + $0x2290] sm:$0xff] }
 0x56c   :  { %v11677_v47 = vadd.f32 %v4570_v51, %v11659_v53  ;;  %v6200_v53 = vld [vmem:[#allocation11 + $0x2028] sm:$0xff] }
 0x56d   :  { %v9787_v19 = vpack.c.bf16 %v6200_v53, %v6199_v57  ;;  %v6660_v57 = vcombine.high %v11571_v40, %v11571_v40  ;;  %v6567_v53 = vld [vmem:[#allocation11 + $0x22a0] sm:$0xff]  ;;  %v6572_v40 = vld [vmem:[#allocation11 + $0x22c8] sm:$0xff] }
 0x56e   :  { %9744 = vmatpush3.bf16.msra.mxu1 %v9743_v50  ;;  %v9805_v50 = vpack.c.bf16 %v6226_v55, %v6225_v61  ;;  %v6560_v61 = vld [vmem:[#allocation11 + $0x2268] sm:$0xff] }
 0x56f   :  { %9778 = vmatprep.subr.bf16.mxu1 %v9777_v30  ;;  %v6209_v30 = vld [vmem:[#allocation11 + $0x2070] sm:$0xff] }
 0x570   :  { %v9807_v39 = vpack.c.bf16 %v6210_v7, %v6209_v30  ;;  %v6561_v30 = vld [vmem:[#allocation11 + $0x2270] sm:$0xff]  ;;  %v6562_v7 = vld [vmem:[#allocation11 + $0x2278] sm:$0xff] }
 0x571   :  { %6348 = vmatmul.mubr.f32.vlgmr.msra.gmra.mrb[38].mxu1 %v11560_v16  ;;  %v9793_v16 = vpack.c.bf16 %v6220_v13, %v6219_v15  ;;  %v6570_v15 = vld [vmem:[#allocation11 + $0x22b8] sm:$0xff]  ;;  %v6553_v13 = vld [vmem:[#allocation11 + $0x2230] sm:$0xff] }
 0x572   :  { %9780 = vmatpush3.bf16.msra.mxu1 %v9779_v46  ;;  %6487 = vmatprep.mubr.f32.mxu1 %v6274_v6  ;;  %v9841_v46 = vpack.c.bf16 %v6564_v63, %v6563_v2  ;;  %v6566_v6 = vld [vmem:[#allocation11 + $0x2298] sm:$0xff]  ;;  %v9853_v20 = vpack.c.bf16 %v6570_v15, %v6569_v17 }
 0x573   :  { %9782 = vmatprep.subr.bf16.mxu1 %v9781_v35  ;;  %v6547_v35 = vld [vmem:[#allocation11 + $0x2200] sm:$0xff] }
 0x574   :  { %v9843_v37 = vpack.c.bf16 %v6548_v36, %v6547_v35 }
 0x576   :  { %9784 = vmatpush3.bf16.msra.mxu1 %v9783_v10  ;;  %v9845_v10 = vpack.c.bf16 %v6566_v6, %v6565_v43 }
 0x577   :  { %9786 = vmatprep.subr.bf16.mxu1 %v9785_v42  ;;  %v6549_v42 = vld [vmem:[#allocation11 + $0x2210] sm:$0xff] }
 0x57a   :  { %9788 = vmatpush3.bf16.msra.mxu1 %v9787_v19  ;;  %v9849_v19 = vpack.c.bf16 %v6568_v12, %v6567_v53 }
 0x57b   :  { %9790 = vmatprep.subr.bf16.mxu1 %v9789_v33  ;;  %v6551_v33 = vld [vmem:[#allocation11 + $0x2220] sm:$0xff] }
 0x57c   :  { %v9851_v60 = vpack.c.bf16 %v6552_v18, %v6551_v33 }
 0x57e   :  { %9792 = vmatpush3.bf16.msra.mxu1 %v9791_v59  ;;  %v6554_v59 = vld [vmem:[#allocation11 + $0x2238] sm:$0xff] }
 0x57f   :  { %9794 = vmatprep.subr.bf16.mxu1 %v9793_v16  ;;  %v6571_v16 = vld [vmem:[#allocation11 + $0x22c0] sm:$0xff]  ;;  %v9855_v58 = vpack.c.bf16 %v6554_v59, %v6553_v13 }
 0x580   :  { %v9857_v5 = vpack.c.bf16 %v6572_v40, %v6571_v16 }
 0x582   :  { %9796 = vmatpush3.bf16.msra.mxu1 %v9795_v26  ;;  %v6573_v26 = vld [vmem:[#allocation11 + $0x22d0] sm:$0xff] }
 0x583   :  { %9798 = vmatprep.subr.bf16.mxu1 %v9797_v48  ;;  %v6574_v48 = vld [vmem:[#allocation11 + $0x22d8] sm:$0xff] }
 0x584   :  { %v7897_v23 = vpop.f32.mrb[26].mxu1  ;;  %v9861_v11 = vpack.c.bf16 %v6574_v48, %v6573_v26  ;;  %v7078_v26 = vld [vmem:[#allocation13] ss:$0 sm:$0xff] }
 0x585   :  { %v7898_v31 = vpop.f32.mrb[27].mxu1 }
 0x586   :  { %v8492_v3 = vpop.f32.mrb[170].mxu0  ;;  %v7899_v9 = vadd.f32 %v7898_v31, %v7897_v23  ;;  %9800 = vmatpush3.bf16.msra.mxu1 %v9799_v54  ;;  %v6575_v54 = vld [vmem:[#allocation11 + $0x22e0] sm:$0xff]  ;;  %v6578_v31 = vld [vmem:[#allocation11 + $0x22f8] sm:$0xff] }
 0x587   :  { %v8493_v0 = vpop.f32.mrb[171].mxu0  ;;  %9802 = vmatprep.subr.bf16.mxu1 %v9801_v25  ;;  %v6576_v25 = vld [vmem:[#allocation11 + $0x22e8] sm:$0xff]  ;;  %v6559_v23 = vld [vmem:[#allocation11 + $0x2260] sm:$0xff] }
 0x588   :  { %v11681_v51 = vadd.f32 %v8493_v0, %v8492_v3  ;;  %v11684_v34 = vadd.f32 %v11576_v62, %v7899_v9  ;;  %v6550_v62 = vld [vmem:[#allocation11 + $0x2218] sm:$0xff]  ;;  %v9865_v28 = vpack.c.bf16 %v6576_v25, %v6575_v54  ;;  %v6577_v3 = vld [vmem:[#allocation11 + $0x22f0] sm:$0xff] }
 0x589   :  { %v9847_v24 = vpack.c.bf16 %v6550_v62, %v6549_v42 }
 0x58a   :  { %9804 = vmatpush3.bf16.msra.mxu1 %v9803_v44  ;;  %v9867_v44 = vpack.c.bf16 %v6560_v61, %v6559_v23 }
 0x58b   :  { %9806 = vmatprep.subr.bf16.mxu1 %v9805_v50  ;;  %v9869_v50 = vpack.c.bf16 %v6578_v31, %v6577_v3 }
 0x58e   :  { %9808 = vmatpush3.bf16.msra.mxu1 %v9807_v39  ;;  %v9871_v39 = vpack.c.bf16 %v6562_v7, %v6561_v30 }
 0x58f   :  { %9842 = vmatprep.subr.bf16.mxu1 %v9841_v46  ;;  %v6659_v46 = vcombine.high %v11590_v38, %v11590_v38 }
 0x591   :  { %6488 = vmatmul.mubr.f32.vlgmr.msra.gmra.mrb[40].mxu1 %v6260_v21 }
 0x592   :  { %9844 = vmatpush3.bf16.msra.mxu1 %v9843_v37  ;;  %6801 = vmatprep.mubr.f32.mxu1 %v6660_v57 }
 0x593   :  { %9846 = vmatprep.subr.bf16.mxu1 %v9845_v10 }
 0x596   :  { %9848 = vmatpush3.bf16.msra.mxu1 %v9847_v24 }
 0x597   :  { %9850 = vmatprep.subr.bf16.mxu1 %v9849_v19 }
 0x59a   :  { %9852 = vmatpush3.bf16.msra.mxu1 %v9851_v60 }
 0x59b   :  { %9854 = vmatprep.subr.bf16.mxu1 %v9853_v20 }
 0x59e   :  { %9856 = vmatpush3.bf16.msra.mxu1 %v9855_v58 }
 0x59f   :  { %9858 = vmatprep.subr.bf16.mxu1 %v9857_v5 }
 0x5a2   :  { %9860 = vmatpush3.bf16.msra.mxu1 %v9859_v22  ;;  %v7079_v22 = vld [vmem:[#allocation14] ss:$0 sm:$0xff] }
 0x5a3   :  { %9862 = vmatprep.subr.bf16.mxu1 %v9861_v11 }
 0x5a4   :  { %v7967_v55 = vpop.f32.mrb[28].mxu1 }
 0x5a5   :  { %v7968_v9 = vpop.f32.mrb[29].mxu1 }
 0x5a6   :  { %v7969_v0 = vadd.f32 %v7968_v9, %v7967_v55  ;;  %9864 = vmatpush3.bf16.msra.mxu1 %v9863_v32 }
 0x5a7   :  { %9866 = vmatprep.subr.bf16.mxu1 %v9865_v28 }
 0x5a8   :  { %v4954_v2 = vadd.f32 %v7969_v0, %v11684_v34 }
 0x5aa   :  { %v4957_v63 = vadd.f32 %v4954_v2, %v11677_v47  ;;  %9868 = vmatpush3.bf16.msra.mxu1 %v9867_v44 }
 0x5ab   :  { %9870 = vmatprep.subr.bf16.mxu1 %v9869_v50 }
 0x5ae   :  { %9872 = vmatpush3.bf16.msra.mxu1 %v9871_v39 }
 0x5b1   :  { %6802 = vmatmul.mubr.f32.vlgmr.msra.gmra.mrb[42].mxu1 %v6659_v46 }
 0x5c4   :  { %v8037_v35 = vpop.f32.mrb[30].mxu1 }
 0x5c5   :  { %v8038_v36 = vpop.f32.mrb[31].mxu1 }
 0x5c6   :  { %v8039_v43 = vadd.f32 %v8038_v36, %v8037_v35 }
 0x5c8   :  { %v5268_v6 = vadd.f32 %v8039_v43, %v11597_v41 }
 0x5ca   :  { %v5338_v37 = vadd.f32 %v11611_v45, %v5268_v6 }
 0x5cc   :  { %v5341_v21 = vadd.f32 %v5338_v37, %v4957_v63 }
 0x5e4   :  { %v8107_v10 = vpop.f32.mrb[32].mxu1 }
 0x5e5   :  { %v8108_v34 = vpop.f32.mrb[33].mxu1 }
 0x5e6   :  { %v8109_v42 = vadd.f32 %v8108_v34, %v8107_v10 }
 0x5e8   :  { %v5652_v47 = vadd.f32 %v11620_v56, %v8109_v42 }
 0x604   :  { %v8177_v62 = vpop.f32.mrb[34].mxu1 }
 0x605   :  { %v8178_v57 = vpop.f32.mrb[35].mxu1 }
 0x606   :  { %v8179_v53 = vadd.f32 %v8178_v57, %v8177_v62 }
 0x608   :  { %v5722_v12 = vadd.f32 %v8179_v53, %v5652_v47 }
 0x60a   :  { %v5725_v24 = vadd.f32 %v5722_v12, %v5341_v21 }
 0x624   :  { %v8247_v38 = vpop.f32.mrb[36].mxu1 }
 0x625   :  { %v8248_v19 = vpop.f32.mrb[37].mxu1 }
 0x626   :  { %v8249_v33 = vadd.f32 %v8248_v19, %v8247_v38 }
 0x628   :  { %v6036_v18 = vadd.f32 %v8249_v33, %v11629_v14 }
 0x62a   :  { %v6106_v41 = vadd.f32 %v11646_v8, %v6036_v18 }
 0x62c   :  { %v6109_v17 = vadd.f32 %v6106_v41, %v5725_v24 }
 0x644   :  { %v8317_v45 = vpop.f32.mrb[38].mxu1 }
 0x645   :  { %v8318_v15 = vpop.f32.mrb[39].mxu1 }
 0x646   :  { %v8319_v60 = vadd.f32 %v8318_v15, %v8317_v45 }
 0x648   :  { %v6420_v20 = vadd.f32 %v11655_v49, %v8319_v60 }
 0x664   :  { %v8387_v13 = vpop.f32.mrb[40].mxu1 }
 0x665   :  { %v8388_v56 = vpop.f32.mrb[41].mxu1 }
 0x666   :  { %v8389_v59 = vadd.f32 %v8388_v56, %v8387_v13 }
 0x668   :  { %v6490_v16 = vadd.f32 %v8389_v59, %v6420_v20 }
 0x66a   :  { %v6493_v40 = vadd.f32 %v6490_v16, %v6109_v17 }
 0x684   :  { %v8457_v58 = vpop.f32.mrb[42].mxu1 }
 0x685   :  { %v8458_v5 = vpop.f32.mrb[43].mxu1 }
 0x686   :  { %v8459_v52 = vadd.f32 %v8458_v5, %v8457_v58 }
 0x688   :  { %v6804_v29 = vadd.f32 %v8459_v52, %v11664_v27 }
 0x68a   :  { %v6874_v14 = vadd.f32 %v11681_v51, %v6804_v29 }
 0x68c   :  { %v6877_v8 = vadd.f32 %v6874_v14, %v6493_v40 }
 0x68e   :  { %v6885_v48 = vadd.f32 %v7078_v26, %v6877_v8 }
 0x690   :  { %v6886_v11 = vmax.f32 %v6885_v48, 0.0 }
 0x692   :  { %v6894_v4 = vmul.f32 %v7079_v22, %v6886_v11 }
 0x694   :  { %v6896_v49 = vsel %vm6895_vm6, %v6894_v4, 0.0 }
 0x695   :  { %6897 = vadd.xlane.f32.xlu0 %v6896_v49 }
 0x722   :  { %v6898_v54 = vpop.xlane.xlu0 %6897 }
 0x723   :  { %v6906_v25 = vadd.f32 %v7080_v1, %v6898_v54 }
 0x725   :  { %v6907_v32 = vsub.f32 0.0, %v6906_v25 }
 0x727   :  { %v6908_v28 = vmul.f32 1.442695, %v6907_v32 }
 0x729   :  { %9917 = vpow2.f32 %v6908_v28 }
 0x733   :  { %v9918_v23 = vpop.eup %9917 }
 0x734   :  { %v6910_v61 = vadd.f32 1.0, %v9918_v23 }
 0x736   :  { %9919 = vrcp.f32 %v6910_v61 }
 0x740   :  { %v9920_v27 = vpop.eup %9919 }
 0x741   :  { %6913 = vst.msk [vmem:[#allocation16] sm:$0x3] %vm6912_vm7, %v9920_v27 }
 0x742   :  { %10065 = shalt.err (!%p10062_p10)
}
 0x743   :  { %s10066_s27 = scalar_lea.hbm %s11721_s7, 32 }
 0x744   :  { %p10067_p11 = scmp.ne.s32.totalorder %s11721_s7, %s10066_s27  ;;  %p10070_p12 = scmp.lt.u32.totalorder %s10066_s27, %s11721_s7 }
 0x746   :  { %p10072_p13 = pnand %p10070_p12, %p10067_p11 }
 0x748   :  { %10075 = shalt.err (!%p10072_p13)
}
 0x749   :  { %6923 = dma.vmem_to_hbm [thread:$0]  %s6921_s0, 32, %s11721_s7, [#allocation7]  }
 0x74a   :  { %10084 = dma.done.wait [#allocation7], 32  }
 0x74b   :  { %10085 = vsyncadd [#allocation7], 4294967264 }
 0x74c   :  { %6927 = vsyncpa [#allocation6], 1 }
 0x74d   :  { %6928 = vsyncpa [#allocation9], 1 }
 0x74e   :  { %6929 = vsyncpa [#allocation12], 1 }
 0x74f   :  { %6930 = vsyncpa [#allocation15], 1 }
 0x750   :  { %6931 = vsyncpa [#allocation7], 1 }

</bundles_post_ra>
